<compile_context>
chip_gen: v5e
topology: v5e:2x2
jax: 0.10.0
libtpu: 0.0.40
codegen_flags: <defaults>
</compile_context>

<pallas_src>
import jax
import jax.numpy as jnp
from jax.experimental import pallas as pl
from jax.experimental.pallas import tpu as pltpu

LEAKY_SLOPE = 0.01   # nn.LeakyReLU() default negative_slope
HID = 512            # encoder output width
OUT_PAD = 128        # final layer padded from 10 -> 128 lanes
TILE_B_MAX = 256     # batch tile (MXU-friendly on v6e/v7x; capped by padded batch)


def _round_up(n, m):
    return ((n + m - 1) // m) * m


def _vmem_limit_bytes():
    # Per-generation budget: ~48 MiB on v7x (64 MiB physical VMEM),
    # up to 96 MiB on v5e/v6e (128 MiB physical VMEM).
    try:
        cap = int(pltpu.get_tpu_info().vmem_capacity_bytes)
    except Exception:
        cap = 64 * 1024 * 1024
    return max(32 * 1024 * 1024, min(cap - 16 * 1024 * 1024, 96 * 1024 * 1024))


# ---------------------------------------------------------------------------
# Fused kernel (per batch tile): encoder(x), encoder(x_next), layer-1 on the
# lane-concat [z1|z2|e], LeakyReLU MLP head.  Weights are VMEM-resident.
# ---------------------------------------------------------------------------
def _classifier_fused_kernel(
    x_ref,        # (tile_b, inp)   bf16
    xn_ref,       # (tile_b, inp)   bf16
    emb_ref,      # (tile_b, 512)   bf16  offset embeddings (gathered in glue)
    enc_w_ref,    # (inp, 512)      bf16
    enc_b_ref,    # (1, 512)        f32
    w1_ref,       # (1536, 1024)    bf16
    b1_ref,       # (1, 1024)       f32
    w2_ref,       # (1024, 1024)    bf16
    b2_ref,       # (1, 1024)       f32
    w3_ref,       # (1024, 128)     bf16  (zero-padded from 10 cols)
    b3_ref,       # (1, 128)        f32
    z1_ref,       # out: (tile_b, 512) f32
    z2_ref,       # out: (tile_b, 512) f32
    out_ref,      # out: (tile_b, 128) f32
):
    # Encoder: bf16 MXU matmuls, f32 accumulation + f32 bias.
    z1 = jnp.dot(x_ref[...], enc_w_ref[...], preferred_element_type=jnp.float32) + enc_b_ref[...]
    z2 = jnp.dot(xn_ref[...], enc_w_ref[...], preferred_element_type=jnp.float32) + enc_b_ref[...]
    z1_ref[...] = z1
    z2_ref[...] = z2

    # Layer 1: single K=1536 matmul on the lane-concatenated [z1 | z2 | e]
    # (one w1 DMA, accumulation stays inside the MXU).
    zcat = jnp.concatenate(
        [z1.astype(jnp.bfloat16), z2.astype(jnp.bfloat16), emb_ref[...]], axis=-1)
    h = jnp.dot(zcat, w1_ref[...], preferred_element_type=jnp.float32) + b1_ref[...]
    h = jnp.maximum(h, LEAKY_SLOPE * h)

    h = jnp.dot(h.astype(jnp.bfloat16), w2_ref[...], preferred_element_type=jnp.float32) + b2_ref[...]
    h = jnp.maximum(h, LEAKY_SLOPE * h)

    out_ref[...] = (
        jnp.dot(h.astype(jnp.bfloat16), w3_ref[...], preferred_element_type=jnp.float32)
        + b3_ref[...]
    )


def classifier_fused_pallas(x_p, xn_p, emb_p, params, tile_b):
    """x_p/xn_p: (Bp, inp) bf16, emb_p: (Bp, 512) bf16 -> (z1, z2 f32, out_pad f32)."""
    bp, inp = x_p.shape
    grid = (bp // tile_b,)

    def act_spec(width):
        return pl.BlockSpec((tile_b, width), lambda i: (i, 0))

    def resident_spec(shape):
        # Constant block index -> weight stays resident in VMEM across grid steps.
        return pl.BlockSpec(shape, lambda i: tuple(0 for _ in shape))

    weights = (
        params["enc_w"], params["enc_b"],
        params["w1"], params["b1"],
        params["w2"], params["b2"],
        params["w3p"], params["b3p"],
    )
    in_specs = [act_spec(inp), act_spec(inp), act_spec(HID)] + [
        resident_spec(w.shape) for w in weights
    ]
    out_specs = (act_spec(HID), act_spec(HID), act_spec(OUT_PAD))

    flops = 2 * bp * (2 * inp * HID + 3 * HID * 1024 + 1024 * 1024 + 1024 * OUT_PAD)
    weight_bytes = sum(int(w.size) * w.dtype.itemsize for w in weights)
    bytes_accessed = (
        2 * bp * inp * 2 + bp * HID * 2           # bf16 activation inputs
        + weight_bytes                            # resident weights (read once)
        + 2 * bp * HID * 4 + bp * OUT_PAD * 4     # f32 outputs
    )

    return pl.pallas_call(
        _classifier_fused_kernel,
        out_shape=(
            jax.ShapeDtypeStruct((bp, HID), jnp.float32),
            jax.ShapeDtypeStruct((bp, HID), jnp.float32),
            jax.ShapeDtypeStruct((bp, OUT_PAD), jnp.float32),
        ),
        grid=grid,
        in_specs=in_specs,
        out_specs=out_specs,
        compiler_params=pltpu.CompilerParams(
            dimension_semantics=("parallel",),
            vmem_limit_bytes=_vmem_limit_bytes(),
        ),
        cost_estimate=pl.CostEstimate(
            flops=flops, transcendentals=0, bytes_accessed=bytes_accessed),
    )(x_p, xn_p, emb_p, *weights)


# ---------------------------------------------------------------------------
# Parameter construction (deterministic, PyTorch-style uniform init; bf16 weights)
# ---------------------------------------------------------------------------
def _init_linear(key, fan_in, fan_out):
    kw, kb = jax.random.split(key)
    bound = 1.0 / float(fan_in) ** 0.5
    # PyTorch stores Linear weight as (out, in); transpose to (in, out) for x @ W.
    w = jax.random.uniform(kw, (fan_out, fan_in), jnp.float32, -bound, bound).T
    b = jax.random.uniform(kb, (1, fan_out), jnp.float32, -bound, bound)
    return w.astype(jnp.bfloat16), b  # bf16 weights (HBM traffic), f32 bias


def make_params(key, inp_size, maxk):
    keys = jax.random.split(key, 6)
    params = {}
    # TODO(synk): the Encoder / Quantize class definitions are not in the provided
    # source; stood in with a single Linear(inp_size -> 512) producing z (el = 0, ind = 0).
    params["enc_w"], params["enc_b"] = _init_linear(keys[0], inp_size, HID)

    # self.out = Linear(512*3,1024) -> LeakyReLU -> Linear(1024,1024) -> LeakyReLU -> Linear(1024,10)
    params["w1"], params["b1"] = _init_linear(keys[1], HID * 3, 1024)
    params["w2"], params["b2"] = _init_linear(keys[2], 1024, 1024)
    w3, b3 = _init_linear(keys[3], 1024, 10)
    # Pad the 10-wide output to 128 lanes (lane-dense store); slice back in glue.
    params["w3p"] = jnp.pad(w3, ((0, 0), (0, OUT_PAD - 10)))
    params["b3p"] = jnp.pad(b3, ((0, 0), (0, OUT_PAD - 10)))

    # self.offset_embedding = nn.Embedding(maxk + 5, 512)
    params["offset_emb"] = jax.random.normal(keys[4], (maxk + 5, HID), jnp.float32)
    return params


# ---------------------------------------------------------------------------
# Classifier forward (use_ae == 'false' path)
# ---------------------------------------------------------------------------
def classifier_forward(params, x, x_next, k_offset):
    B = x.shape[0]
    x_flat = x.reshape(B, -1)
    xn_flat = x_next.reshape(B, -1)

    # Batch tile: multiple of 16 (bf16 sublane packing); up to 256 rows per tile.
    tile_b = min(TILE_B_MAX, _round_up(B, 16))
    Bp = _round_up(B, tile_b)
    pad = Bp - B

    x_p = jnp.pad(x_flat, ((0, pad), (0, 0))).astype(jnp.bfloat16)
    xn_p = jnp.pad(xn_flat, ((0, pad), (0, 0))).astype(jnp.bfloat16)

    # offset_embed = self.offset_embedding(k_offset)
    # TODO(synk): this gather could move in-kernel via PrefetchScalarGridSpec +
    # pl.Element row gather once batch tiles dominate; kept in glue for robustness.
    k_off_p = jnp.pad(k_offset, (0, pad))
    emb_p = jnp.take(params["offset_emb"], k_off_p, axis=0).astype(jnp.bfloat16)  # (Bp, 512)

    # One fused, batch-tiled Pallas kernel: encoder(x) + encoder(x_next) + 3-layer head.
    z1_p, z2_p, out_p = classifier_fused_pallas(x_p, xn_p, emb_p, params, tile_b)

    z1 = z1_p[:B]
    z2 = z2_p[:B]
    out = out_p[:B, :10]

    # Quantizer stand-in -> el_1 = el_2 = 0, ae_loss = 0 (use_ae == 'false').
    el_1 = jnp.float32(0.0)
    el_2 = jnp.float32(0.0)
    ae_loss = jnp.float32(0.0)
    ind_1 = jnp.zeros((B,), jnp.int32)  # TODO(synk): Quantize indices unavailable
    ind_2 = jnp.zeros((B,), jnp.int32)

    loss = el_1 + el_2 + ae_loss
    return out, loss, ind_1, ind_2, z1, z2


# ---------------------------------------------------------------------------
if __name__ == "__main__":
    key = jax.random.PRNGKey(0)
    k_params, k_x, k_xn, k_off = jax.random.split(key, 4)

    # Small synthetic shapes consistent with the module (NCHW image input).
    B, C, H, W = 2, 3, 8, 16
    inp_size = C * H * W  # 384
    maxk = 10

    params = make_params(k_params, inp_size, maxk)
    x = jax.random.normal(k_x, (B, C, H, W), jnp.float32)
    x_next = jax.random.normal(k_xn, (B, C, H, W), jnp.float32)
    k_offset = jax.random.randint(k_off, (B,), 0, maxk + 5, jnp.int32)

    out, loss, ind_1, ind_2, z1, z2 = classifier_forward(params, x, x_next, k_offset)
    jax.block_until_ready(out)

    assert out.shape == (B, 10) and z1.shape == (B, 512) and z2.shape == (B, 512)
    print("KERNEL_OK")
</pallas_src>

<mosaic_0001>
module attributes {stable_mosaic.version = 11 : i64} {
  func.func @_classifier_fused_kernel(%arg0: i32, %arg1: memref<16x384xbf16, #tpu.memory_space<vmem>>, %arg2: memref<16x384xbf16, #tpu.memory_space<vmem>>, %arg3: memref<16x512xbf16, #tpu.memory_space<vmem>>, %arg4: memref<384x512xbf16, #tpu.memory_space<vmem>>, %arg5: memref<1x512xf32, #tpu.memory_space<vmem>>, %arg6: memref<1536x1024xbf16, #tpu.memory_space<vmem>>, %arg7: memref<1x1024xf32, #tpu.memory_space<vmem>>, %arg8: memref<1024x1024xbf16, #tpu.memory_space<vmem>>, %arg9: memref<1x1024xf32, #tpu.memory_space<vmem>>, %arg10: memref<1024x128xbf16, #tpu.memory_space<vmem>>, %arg11: memref<1x128xf32, #tpu.memory_space<vmem>>, %arg12: memref<16x512xf32, #tpu.memory_space<vmem>>, %arg13: memref<16x512xf32, #tpu.memory_space<vmem>>, %arg14: memref<16x128xf32, #tpu.memory_space<vmem>>) attributes {dimension_semantics = [#tpu.dimension_semantics<parallel>], iteration_bounds = array<i64: 1>, scalar_prefetch = 0 : i64, scratch_operands = 0 : i64, tpu.core_type = #tpu.core_type<tc>, window_params = [{transform_indices = @transform_0, window_bounds = array<i64: 16, 384>}, {transform_indices = @transform_1, window_bounds = array<i64: 16, 384>}, {transform_indices = @transform_2, window_bounds = array<i64: 16, 512>}, {pipeline_mode = #tpu.pipeline_mode<synchronous>, transform_indices = @transform_3, window_bounds = array<i64: 384, 512>}, {pipeline_mode = #tpu.pipeline_mode<synchronous>, transform_indices = @transform_4, window_bounds = array<i64: 1, 512>}, {pipeline_mode = #tpu.pipeline_mode<synchronous>, transform_indices = @transform_5, window_bounds = array<i64: 1536, 1024>}, {pipeline_mode = #tpu.pipeline_mode<synchronous>, transform_indices = @transform_6, window_bounds = array<i64: 1, 1024>}, {pipeline_mode = #tpu.pipeline_mode<synchronous>, transform_indices = @transform_7, window_bounds = array<i64: 1024, 1024>}, {pipeline_mode = #tpu.pipeline_mode<synchronous>, transform_indices = @transform_8, window_bounds = array<i64: 1, 1024>}, {pipeline_mode = #tpu.pipeline_mode<synchronous>, transform_indices = @transform_9, window_bounds = array<i64: 1024, 128>}, {pipeline_mode = #tpu.pipeline_mode<synchronous>, transform_indices = @transform_10, window_bounds = array<i64: 1, 128>}, {transform_indices = @transform_11, window_bounds = array<i64: 16, 512>}, {transform_indices = @transform_12, window_bounds = array<i64: 16, 512>}, {transform_indices = @transform_13, window_bounds = array<i64: 16, 128>}]} {
    %c0 = arith.constant 0 : index
    %c0_0 = arith.constant 0 : index
    %0 = vector.load %arg1[%c0, %c0_0] : memref<16x384xbf16, #tpu.memory_space<vmem>>, vector<16x384xbf16>
    %c0_1 = arith.constant 0 : index
    %c0_2 = arith.constant 0 : index
    %1 = vector.load %arg4[%c0_1, %c0_2] : memref<384x512xbf16, #tpu.memory_space<vmem>>, vector<384x512xbf16>
    %cst = arith.constant dense<0.000000e+00> : vector<16x512xf32>
    %2 = tpu.matmul %0, %1, %cst {dimension_numbers = #tpu.dot_dimension_numbers<[1], [0], [0], [1], [0, 0, 1, 1], [], []>} : vector<16x384xbf16>, vector<384x512xbf16>, vector<16x512xf32> -> vector<16x512xf32>
    %c0_3 = arith.constant 0 : index
    %c0_4 = arith.constant 0 : index
    %3 = vector.load %arg5[%c0_3, %c0_4] : memref<1x512xf32, #tpu.memory_space<vmem>>, vector<1x512xf32>
    %4 = vector.broadcast %3 : vector<1x512xf32> to vector<16x512xf32>
    %5 = arith.addf %2, %4 : vector<16x512xf32>
    %c0_5 = arith.constant 0 : index
    %c0_6 = arith.constant 0 : index
    %6 = vector.load %arg2[%c0_5, %c0_6] : memref<16x384xbf16, #tpu.memory_space<vmem>>, vector<16x384xbf16>
    %c0_7 = arith.constant 0 : index
    %c0_8 = arith.constant 0 : index
    %7 = vector.load %arg4[%c0_7, %c0_8] : memref<384x512xbf16, #tpu.memory_space<vmem>>, vector<384x512xbf16>
    %cst_9 = arith.constant dense<0.000000e+00> : vector<16x512xf32>
    %8 = tpu.matmul %6, %7, %cst_9 {dimension_numbers = #tpu.dot_dimension_numbers<[1], [0], [0], [1], [0, 0, 1, 1], [], []>} : vector<16x384xbf16>, vector<384x512xbf16>, vector<16x512xf32> -> vector<16x512xf32>
    %c0_10 = arith.constant 0 : index
    %c0_11 = arith.constant 0 : index
    %9 = vector.load %arg5[%c0_10, %c0_11] : memref<1x512xf32, #tpu.memory_space<vmem>>, vector<1x512xf32>
    %10 = vector.broadcast %9 : vector<1x512xf32> to vector<16x512xf32>
    %11 = arith.addf %8, %10 : vector<16x512xf32>
    %c0_12 = arith.constant 0 : index
    %c0_13 = arith.constant 0 : index
    %12 = vector.load %arg12[%c0_12, %c0_13] : memref<16x512xf32, #tpu.memory_space<vmem>>, vector<16x512xf32>
    tpu.vector_store %arg12[%c0_12, %c0_13], %5 {strides = array<i32>} : memref<16x512xf32, #tpu.memory_space<vmem>>, vector<16x512xf32>,
    %c0_14 = arith.constant 0 : index
    %c0_15 = arith.constant 0 : index
    %13 = vector.load %arg13[%c0_14, %c0_15] : memref<16x512xf32, #tpu.memory_space<vmem>>, vector<16x512xf32>
    tpu.vector_store %arg13[%c0_14, %c0_15], %11 {strides = array<i32>} : memref<16x512xf32, #tpu.memory_space<vmem>>, vector<16x512xf32>,
    %14 = arith.truncf %5 : vector<16x512xf32> to vector<16x512xbf16>
    %15 = arith.truncf %11 : vector<16x512xf32> to vector<16x512xbf16>
    %c0_16 = arith.constant 0 : index
    %c0_17 = arith.constant 0 : index
    %16 = vector.load %arg3[%c0_16, %c0_17] : memref<16x512xbf16, #tpu.memory_space<vmem>>, vector<16x512xbf16>
    %17 = tpu.concatenate %14, %15, %16 in 1 : vector<16x512xbf16>, vector<16x512xbf16>, vector<16x512xbf16> -> vector<16x1536xbf16>
    %c0_18 = arith.constant 0 : index
    %c0_19 = arith.constant 0 : index
    %18 = vector.load %arg6[%c0_18, %c0_19] : memref<1536x1024xbf16, #tpu.memory_space<vmem>>, vector<1536x1024xbf16>
    %cst_20 = arith.constant dense<0.000000e+00> : vector<16x1024xf32>
    %19 = tpu.matmul %17, %18, %cst_20 {dimension_numbers = #tpu.dot_dimension_numbers<[1], [0], [0], [1], [0, 0, 1, 1], [], []>} : vector<16x1536xbf16>, vector<1536x1024xbf16>, vector<16x1024xf32> -> vector<16x1024xf32>
    %c0_21 = arith.constant 0 : index
    %c0_22 = arith.constant 0 : index
    %20 = vector.load %arg7[%c0_21, %c0_22] : memref<1x1024xf32, #tpu.memory_space<vmem>>, vector<1x1024xf32>
    %21 = vector.broadcast %20 : vector<1x1024xf32> to vector<16x1024xf32>
    %22 = arith.addf %19, %21 : vector<16x1024xf32>
    %cst_23 = arith.constant 0.00999999977 : f32
    %23 = vector.broadcast %cst_23 : f32 to vector<16x1024xf32>
    %24 = arith.mulf %23, %22 : vector<16x1024xf32>
    %25 = arith.maximumf %22, %24 : vector<16x1024xf32>
    %26 = arith.truncf %25 : vector<16x1024xf32> to vector<16x1024xbf16>
    %c0_24 = arith.constant 0 : index
    %c0_25 = arith.constant 0 : index
    %27 = vector.load %arg8[%c0_24, %c0_25] : memref<1024x1024xbf16, #tpu.memory_space<vmem>>, vector<1024x1024xbf16>
    %cst_26 = arith.constant dense<0.000000e+00> : vector<16x1024xf32>
    %28 = tpu.matmul %26, %27, %cst_26 {dimension_numbers = #tpu.dot_dimension_numbers<[1], [0], [0], [1], [0, 0, 1, 1], [], []>} : vector<16x1024xbf16>, vector<1024x1024xbf16>, vector<16x1024xf32> -> vector<16x1024xf32>
    %c0_27 = arith.constant 0 : index
    %c0_28 = arith.constant 0 : index
    %29 = vector.load %arg9[%c0_27, %c0_28] : memref<1x1024xf32, #tpu.memory_space<vmem>>, vector<1x1024xf32>
    %30 = vector.broadcast %29 : vector<1x1024xf32> to vector<16x1024xf32>
    %31 = arith.addf %28, %30 : vector<16x1024xf32>
    %cst_29 = arith.constant 0.00999999977 : f32
    %32 = vector.broadcast %cst_29 : f32 to vector<16x1024xf32>
    %33 = arith.mulf %32, %31 : vector<16x1024xf32>
    %34 = arith.maximumf %31, %33 : vector<16x1024xf32>
    %35 = arith.truncf %34 : vector<16x1024xf32> to vector<16x1024xbf16>
    %c0_30 = arith.constant 0 : index
    %c0_31 = arith.constant 0 : index
    %36 = vector.load %arg10[%c0_30, %c0_31] : memref<1024x128xbf16, #tpu.memory_space<vmem>>, vector<1024x128xbf16>
    %cst_32 = arith.constant dense<0.000000e+00> : vector<16x128xf32>
    %37 = tpu.matmul %35, %36, %cst_32 {dimension_numbers = #tpu.dot_dimension_numbers<[1], [0], [0], [1], [0, 0, 1, 1], [], []>} : vector<16x1024xbf16>, vector<1024x128xbf16>, vector<16x128xf32> -> vector<16x128xf32>
    %c0_33 = arith.constant 0 : index
    %c0_34 = arith.constant 0 : index
    %38 = vector.load %arg11[%c0_33, %c0_34] : memref<1x128xf32, #tpu.memory_space<vmem>>, vector<1x128xf32>
    %39 = vector.broadcast %38 : vector<1x128xf32> to vector<16x128xf32>
    %40 = arith.addf %37, %39 : vector<16x128xf32>
    %c0_35 = arith.constant 0 : index
    %c0_36 = arith.constant 0 : index
    %41 = vector.load %arg14[%c0_35, %c0_36] : memref<16x128xf32, #tpu.memory_space<vmem>>, vector<16x128xf32>
    tpu.vector_store %arg14[%c0_35, %c0_36], %40 {strides = array<i32>} : memref<16x128xf32, #tpu.memory_space<vmem>>, vector<16x128xf32>,
    return
  }
  func.func @transform_0(%arg0: i32) -> (i32, i32) {
    %c0_i32 = arith.constant 0 : i32
    %c0_i32_0 = arith.constant 0 : i32
    return %arg0, %c0_i32 : i32, i32
  }
  func.func @transform_1(%arg0: i32) -> (i32, i32) {
    %c0_i32 = arith.constant 0 : i32
    %c0_i32_0 = arith.constant 0 : i32
    return %arg0, %c0_i32 : i32, i32
  }
  func.func @transform_2(%arg0: i32) -> (i32, i32) {
    %c0_i32 = arith.constant 0 : i32
    %c0_i32_0 = arith.constant 0 : i32
    return %arg0, %c0_i32 : i32, i32
  }
  func.func @transform_3(%arg0: i32) -> (i32, i32) {
    %c0_i32 = arith.constant 0 : i32
    %c0_i32_0 = arith.constant 0 : i32
    %c0_i32_1 = arith.constant 0 : i32
    return %c0_i32, %c0_i32_0 : i32, i32
  }
  func.func @transform_4(%arg0: i32) -> (i32, i32) {
    %c0_i32 = arith.constant 0 : i32
    %c0_i32_0 = arith.constant 0 : i32
    %c0_i32_1 = arith.constant 0 : i32
    return %c0_i32, %c0_i32_0 : i32, i32
  }
  func.func @transform_5(%arg0: i32) -> (i32, i32) {
    %c0_i32 = arith.constant 0 : i32
    %c0_i32_0 = arith.constant 0 : i32
    %c0_i32_1 = arith.constant 0 : i32
    return %c0_i32, %c0_i32_0 : i32, i32
  }
  func.func @transform_6(%arg0: i32) -> (i32, i32) {
    %c0_i32 = arith.constant 0 : i32
    %c0_i32_0 = arith.constant 0 : i32
    %c0_i32_1 = arith.constant 0 : i32
    return %c0_i32, %c0_i32_0 : i32, i32
  }
  func.func @transform_7(%arg0: i32) -> (i32, i32) {
    %c0_i32 = arith.constant 0 : i32
    %c0_i32_0 = arith.constant 0 : i32
    %c0_i32_1 = arith.constant 0 : i32
    return %c0_i32, %c0_i32_0 : i32, i32
  }
  func.func @transform_8(%arg0: i32) -> (i32, i32) {
    %c0_i32 = arith.constant 0 : i32
    %c0_i32_0 = arith.constant 0 : i32
    %c0_i32_1 = arith.constant 0 : i32
    return %c0_i32, %c0_i32_0 : i32, i32
  }
  func.func @transform_9(%arg0: i32) -> (i32, i32) {
    %c0_i32 = arith.constant 0 : i32
    %c0_i32_0 = arith.constant 0 : i32
    %c0_i32_1 = arith.constant 0 : i32
    return %c0_i32, %c0_i32_0 : i32, i32
  }
  func.func @transform_10(%arg0: i32) -> (i32, i32) {
    %c0_i32 = arith.constant 0 : i32
    %c0_i32_0 = arith.constant 0 : i32
    %c0_i32_1 = arith.constant 0 : i32
    return %c0_i32, %c0_i32_0 : i32, i32
  }
  func.func @transform_11(%arg0: i32) -> (i32, i32) {
    %c0_i32 = arith.constant 0 : i32
    %c0_i32_0 = arith.constant 0 : i32
    return %arg0, %c0_i32 : i32, i32
  }
  func.func @transform_12(%arg0: i32) -> (i32, i32) {
    %c0_i32 = arith.constant 0 : i32
    %c0_i32_0 = arith.constant 0 : i32
    return %arg0, %c0_i32 : i32, i32
  }
  func.func @transform_13(%arg0: i32) -> (i32, i32) {
    %c0_i32 = arith.constant 0 : i32
    %c0_i32_0 = arith.constant 0 : i32
    return %arg0, %c0_i32 : i32, i32
  }
}

</mosaic_0001>

<bundles_post_ra>
// kernel: tpu_custom_call.1
= control target key start
LH: loop header
LB: loop body
LE: loop exit
PB: predicated region body
PF: predicated region fallthrough
CT: control target
= control target key end

     0   :  { %19 = vsyncpa [#allocation3], 0  ;;  %s21079_s0 = inlined_call_operand.hbm [shape: bf16[16,384], index: 0, kind: input, shape index: {}]   ;;  %s21080_s1 = inlined_call_operand.hbm [shape: bf16[16,384], index: 1, kind: input, shape index: {}]   ;;  %s21081_s2 = inlined_call_operand.hbm [shape: bf16[16,512], index: 2, kind: input, shape index: {}]   ;;  %s21082_s3 = inlined_call_operand.hbm [shape: bf16[384,512], index: 3, kind: input, shape index: {}]   ;;  %s21083_s4 = inlined_call_operand.hbm [shape: f32[1,512], index: 4, kind: input, shape index: {}]   ;;  %s21084_s5 = inlined_call_operand.hbm [shape: bf16[1536,1024], index: 5, kind: input, shape index: {}]   ;;  %s21085_s6 = inlined_call_operand.hbm [shape: f32[1,1024], index: 6, kind: input, shape index: {}]   ;;  %s21086_s7 = inlined_call_operand.hbm [shape: bf16[1024,1024], index: 7, kind: input, shape index: {}]   ;;  %s21087_s8 = inlined_call_operand.hbm [shape: f32[1,1024], index: 8, kind: input, shape index: {}]   ;;  %s21088_s9 = inlined_call_operand.hbm [shape: bf16[1024,128], index: 9, kind: input, shape index: {}]   ;;  %s21089_s10 = inlined_call_operand.hbm [shape: f32[1,128], index: 10, kind: input, shape index: {}]   ;;  %s21090_s11 = inlined_call_operand.hbm [shape: f32[16,512], index: 11, kind: output, shape index: {0}]   ;;  %s21091_s12 = inlined_call_operand.hbm [shape: f32[16,512], index: 12, kind: output, shape index: {1}]   ;;  %s21092_s13 = inlined_call_operand.hbm [shape: f32[16,128], index: 13, kind: output, shape index: {2}]  }
   0x1   :  { %20 = vsyncpa [#allocation6], 0 }
   0x2   :  { %21 = vsyncpa [#allocation9], 0 }
   0x3   :  { %22 = vsyncpa [#allocation12], 0 }
   0x4   :  { %23 = vsyncpa [#allocation15], 0 }
   0x5   :  { %24 = vsyncpa [#allocation18], 0 }
   0x6   :  { %25 = vsyncpa [#allocation4], 0 }
   0x7   :  { %26 = vsyncpa [#allocation22], 0  ;;  %s44_s27 = sshll.u32 %s21080_s1, 4  ;;  %s19614_s28 = smov [#allocation5]   ;;  %s45_s27 = int_to_ptr.hbm [resolvable:$true] %s44_s27 }
   0x8   :  { %s46_s29 = sshll.u32 %s19614_s28, 4  ;;  %s19615_s30 = smov 192   ;;  %s47_s29 = int_to_ptr.vmem [resolvable:$true] %s46_s29 }
   0x9   :  { %s19616_s14 = smov 12   ;;  %s70_s17 = sshll.u32 %s21082_s3, 4  ;;  %s71_s17 = int_to_ptr.hbm [resolvable:$true] %s70_s17 }
   0xa   :  { %52 = dma.hbm_to_vmem [thread:$0]  %s45_s27, 384, %s47_s29, [#allocation6], %s19615_s30, %s19615_s30, %s19616_s14  }
   0xb   :  { %s19617_s18 = smov [#allocation8]   ;;  %s94_s1 = sshll.u32 %s21084_s5, 4  ;;  %s95_s1 = int_to_ptr.hbm [resolvable:$true] %s94_s1 }
   0xc   :  { %s72_s19 = sshll.u32 %s19617_s18, 4  ;;  %s19618_s22 = smov 256   ;;  %s73_s19 = int_to_ptr.vmem [resolvable:$true] %s72_s19 }
   0xd   :  { %s19619_s23 = smov 16   ;;  %s19620_s24 = smov [#allocation11]  }
   0xe   :  { %78 = dma.hbm_to_vmem [thread:$0]  %s71_s17, 12288, %s73_s19, [#allocation9], %s19618_s22, %s19618_s22, %s19619_s23  }
   0xf   :  { %s96_s25 = sshll.u32 %s19620_s24, 4  ;;  %s118_s27 = sshll.u32 %s21086_s7, 4  ;;  %s97_s25 = int_to_ptr.vmem [resolvable:$true] %s96_s25  ;;  %s119_s27 = int_to_ptr.hbm [resolvable:$true] %s118_s27 }
  0x10   :  { %s19621_s28 = smov 512   ;;  %s19622_s29 = smov 32  }
  0x11   :  { %102 = dma.hbm_to_vmem [thread:$0]  %s95_s1, 98304, %s97_s25, [#allocation12], %s19621_s28, %s19621_s28, %s19622_s29  }
  0x12   :  { %s19623_s5 = smov [#allocation14]   ;;  %s142_s17 = sshll.u32 %s21088_s9, 4  ;;  %s143_s17 = int_to_ptr.hbm [resolvable:$true] %s142_s17 }
  0x13   :  { %s120_s15 = sshll.u32 %s19623_s5, 4  ;;  %s19624_s7 = smov [#allocation17]   ;;  %s121_s15 = int_to_ptr.vmem [resolvable:$true] %s120_s15 }
  0x14   :  { %126 = dma.hbm_to_vmem [thread:$0]  %s119_s27, 65536, %s121_s15, [#allocation15], %s19621_s28, %s19621_s28, %s19622_s29  }
  0x15   :  { %s144_s19 = sshll.u32 %s19624_s7, 4  ;;  %s31_s1 = sshll.u32 %s21079_s0, 4  ;;  %s145_s19 = int_to_ptr.vmem [resolvable:$true] %s144_s19  ;;  %s32_s1 = int_to_ptr.hbm [resolvable:$true] %s31_s1 }
  0x16   :  { %s19625_s24 = smov 64   ;;  %s19626_s25 = smov 4  }
  0x17   :  { %150 = dma.hbm_to_vmem [thread:$0]  %s143_s17, 8192, %s145_s19, [#allocation18], %s19625_s24, %s19625_s24, %s19626_s25  }
  0x18   :  { %s19627_s26 = smov [#allocation2]   ;;  %s57_s16 = sshll.u32 %s21081_s2, 4  ;;  %s58_s16 = int_to_ptr.hbm [resolvable:$true] %s57_s16 }
  0x19   :  { %s33_s3 = sshll.u32 %s19627_s26, 4  ;;  %s84_s0 = sshll.u32 %s21083_s4, 4  ;;  %s34_s3 = int_to_ptr.vmem [resolvable:$true] %s33_s3  ;;  %s85_s0 = int_to_ptr.hbm [resolvable:$true] %s84_s0 }
  0x1a   :  { %39 = dma.hbm_to_vmem [thread:$0]  %s32_s1, 384, %s34_s3, [#allocation3], %s19615_s30, %s19615_s30, %s19616_s14  }
  0x1b   :  { %s19628_s18 = smov [#allocation7]   ;;  %s19629_s17 = smov [#allocation10]  }
  0x1c   :  { %s59_s7 = sshll.u32 %s19628_s18, 4  ;;  %s86_s2 = sshll.u32 %s19629_s17, 4  ;;  %s60_s7 = int_to_ptr.vmem [resolvable:$true] %s59_s7  ;;  %s87_s2 = int_to_ptr.vmem [resolvable:$true] %s86_s2 }
  0x1d   :  { %65 = dma.hbm_to_vmem [thread:$0]  %s58_s16, 512, %s60_s7, [#allocation6], %s19618_s22, %s19618_s22, %s19619_s23  }
  0x1e   :  { %s108_s21 = sshll.u32 %s21085_s6, 4  ;;  %s132_s4 = sshll.u32 %s21087_s8, 4  ;;  %s109_s21 = int_to_ptr.hbm [resolvable:$true] %s108_s21  ;;  %s133_s4 = int_to_ptr.hbm [resolvable:$true] %s132_s4 }
  0x1f   :  { %89 = dma.hbm_to_vmem [thread:$0]  %s85_s0, 64, %s87_s2, [#allocation9]  }
  0x20   :  { %s19630_s1 = smov [#allocation13]   ;;  %s19631_s25 = smov [#allocation16]  }
  0x21   :  { %s110_s24 = sshll.u32 %s19630_s1, 4  ;;  %s134_s22 = sshll.u32 %s19631_s25, 4  ;;  %s111_s24 = int_to_ptr.vmem [resolvable:$true] %s110_s24  ;;  %s135_s22 = int_to_ptr.vmem [resolvable:$true] %s134_s22 }
  0x22   :  { %113 = dma.hbm_to_vmem [thread:$0]  %s109_s21, 128, %s111_s24, [#allocation12]  }
  0x23   :  { %s156_s3 = sshll.u32 %s21089_s10, 4  ;;  %s19632_s6 = smov [#allocation19]   ;;  %s157_s3 = int_to_ptr.hbm [resolvable:$true] %s156_s3 }
  0x24   :  { %137 = dma.hbm_to_vmem [thread:$0]  %s133_s4, 128, %s135_s22, [#allocation15]  }
  0x25   :  { %s158_s9 = sshll.u32 %s19632_s6, 4  ;;  %s159_s9 = int_to_ptr.vmem [resolvable:$true] %s158_s9 }
  0x26   :  { %161 = dma.hbm_to_vmem [thread:$0]  %s157_s3, 16, %s159_s9, [#allocation18]  }
  0x27   :  { %19598 = dma.done.wait [#allocation3], 384  }
  0x28   :  { %19599 = vsyncadd [#allocation3], 4294966912 }
  0x29   :  { %19600 = dma.done.wait [#allocation6], 896  }
  0x2a   :  { %19601 = vsyncadd [#allocation6], 4294966400 }
  0x2b   :  { %19602 = dma.done.wait [#allocation9], 12352  }
  0x2c   :  { %19603 = vsyncadd [#allocation9], 4294954944 }
  0x2d   :  { %19604 = dma.done.wait [#allocation12], 98432  }
  0x2e   :  { %19605 = vsyncadd [#allocation12], 4294868864 }
  0x2f   :  { %19606 = dma.done.wait [#allocation15], 65664  }
  0x30   :  { %19607 = vsyncadd [#allocation15], 4294901632 }
  0x31   :  { %19608 = dma.done.wait [#allocation18], 8208  }
  0x32   :  { %19609 = vsyncadd [#allocation18], 4294959088  ;;  %v12107_v0 = vld [vmem:[#allocation8 + $0xe0] sm:$0xf]  ;;  %v17814_v1 = vld [vmem:[#allocation8 + $0xec] sm:$0xf0] }
  0x33   :  { %v12235_v2 = vld [vmem:[#allocation8 + $0x1e0] sm:$0xf]  ;;  %v19759_v3 = vor.u32 %v17814_v1, %v12107_v0  ;;  %v17846_v4 = vld [vmem:[#allocation8 + $0x1ec] sm:$0xf0]  ;;  %v17812_v9 = vld [vmem:[#allocation8 + $0xe4] sm:$0xf] }
  0x34   :  { %v12363_v5 = vld [vmem:[#allocation8 + $0x2e0] sm:$0xf]  ;;  %v17878_v6 = vld [vmem:[#allocation8 + $0x2ec] sm:$0xf0]  ;;  %v19761_v7 = vor.u32 %v17846_v4, %v12235_v2  ;;  %v12109_v10 = vld [vmem:[#allocation8 + $0xf0] sm:$0xf0] }
  0x35   :  { %v19763_v8 = vor.u32 %v17878_v6, %v12363_v5  ;;  %v12091_v11 = vld [vmem:[#allocation8 + $0xc0] sm:$0xf]  ;;  %812 = vmatpush.bf16.msra.mxu0 %v19759_v3  ;;  %v19766_v12 = vor.u32 %v17812_v9, %v12109_v10  ;;  %v17810_v13 = vld [vmem:[#allocation8 + $0xcc] sm:$0xf0]  ;;  %v17808_v20 = vld [vmem:[#allocation8 + $0xc4] sm:$0xf] }
  0x36   :  { %v12219_v14 = vld [vmem:[#allocation8 + $0x1c0] sm:$0xf]  ;;  %v17842_v15 = vld [vmem:[#allocation8 + $0x1cc] sm:$0xf0]  ;;  %826 = vmatpush.bf16.msra.mxu1 %v19761_v7  ;;  %v19770_v16 = vor.u32 %v17810_v13, %v12091_v11  ;;  %v12093_v22 = vld [vmem:[#allocation8 + $0xd0] sm:$0xf0] }
  0x37   :  { %840 = vmatpush.bf16.msra.mxu2 %v19763_v8  ;;  %v19772_v17 = vor.u32 %v17842_v15, %v12219_v14  ;;  %v12347_v18 = vld [vmem:[#allocation8 + $0x2c0] sm:$0xf]  ;;  %v17874_v19 = vld [vmem:[#allocation8 + $0x2cc] sm:$0xf0]  ;;  %854 = vmatpush.bf16.msra.mxu3 %v19766_v12  ;;  %v19777_v25 = vor.u32 %v17808_v20, %v12093_v22  ;;  %v17804_v31 = vld [vmem:[#allocation8 + $0xa4] sm:$0xf] }
  0x38   :  { %v19775_v21 = vor.u32 %v17874_v19, %v12347_v18  ;;  %v12075_v23 = vld [vmem:[#allocation8 + $0xa0] sm:$0xf]  ;;  %v17806_v24 = vld [vmem:[#allocation8 + $0xac] sm:$0xf0]  ;;  %v12077_v32 = vld [vmem:[#allocation8 + $0xb0] sm:$0xf0] }
  0x39   :  { %v12203_v26 = vld [vmem:[#allocation8 + $0x1a0] sm:$0xf]  ;;  %v17838_v27 = vld [vmem:[#allocation8 + $0x1ac] sm:$0xf0]  ;;  %813 = vmatpush.bf16.msra.mxu0 %v19770_v16  ;;  %v19780_v29 = vor.u32 %v17806_v24, %v12075_v23  ;;  %v19789_v38 = vor.u32 %v17804_v31, %v12077_v32  ;;  %v17800_v42 = vld [vmem:[#allocation8 + $0x84] sm:$0xf] }
  0x3a   :  { %v12331_v28 = vld [vmem:[#allocation8 + $0x2a0] sm:$0xf]  ;;  %v17870_v30 = vld [vmem:[#allocation8 + $0x2ac] sm:$0xf0]  ;;  %827 = vmatpush.bf16.msra.mxu1 %v19772_v17  ;;  %v19784_v33 = vor.u32 %v17838_v27, %v12203_v26  ;;  %v12061_v43 = vld [vmem:[#allocation8 + $0x90] sm:$0xf0] }
  0x3b   :  { %841 = vmatpush.bf16.msra.mxu2 %v19775_v21  ;;  %v19786_v34 = vor.u32 %v17870_v30, %v12331_v28  ;;  %v12059_v35 = vld [vmem:[#allocation8 + $0x80] sm:$0xf]  ;;  %v17802_v36 = vld [vmem:[#allocation8 + $0x8c] sm:$0xf0]  ;;  %855 = vmatpush.bf16.msra.mxu3 %v19777_v25  ;;  %v19801_v50 = vor.u32 %v17800_v42, %v12061_v43  ;;  %v17796_v54 = vld [vmem:[#allocation8 + $0x64] sm:$0xf] }
  0x3c   :  { %v12187_v37 = vld [vmem:[#allocation8 + $0x180] sm:$0xf]  ;;  %v17834_v39 = vld [vmem:[#allocation8 + $0x18c] sm:$0xf0]  ;;  %v19792_v44 = vor.u32 %v17802_v36, %v12059_v35  ;;  %v12045_v55 = vld [vmem:[#allocation8 + $0x70] sm:$0xf0] }
  0x3d   :  { %v12315_v40 = vld [vmem:[#allocation8 + $0x280] sm:$0xf]  ;;  %v17866_v41 = vld [vmem:[#allocation8 + $0x28c] sm:$0xf0]  ;;  %814 = vmatpush.bf16.msra.mxu0 %v19780_v29  ;;  %v19796_v45 = vor.u32 %v17834_v39, %v12187_v37  ;;  %v19813_v62 = vor.u32 %v17796_v54, %v12045_v55  ;;  %v17792_v2 = vld [vmem:[#allocation8 + $0x44] sm:$0xf] }
  0x3e   :  { %828 = vmatpush.bf16.msra.mxu1 %v19784_v33  ;;  %v19798_v46 = vor.u32 %v17866_v41, %v12315_v40  ;;  %v12043_v47 = vld [vmem:[#allocation8 + $0x60] sm:$0xf]  ;;  %v17798_v48 = vld [vmem:[#allocation8 + $0x6c] sm:$0xf0]  ;;  %v12029_v4 = vld [vmem:[#allocation8 + $0x50] sm:$0xf0] }
  0x3f   :  { %842 = vmatpush.bf16.msra.mxu2 %v19786_v34  ;;  %v12171_v49 = vld [vmem:[#allocation8 + $0x160] sm:$0xf]  ;;  %856 = vmatpush.bf16.msra.mxu3 %v19789_v38  ;;  %v17830_v51 = vld [vmem:[#allocation8 + $0x16c] sm:$0xf0]  ;;  %v19804_v56 = vor.u32 %v17798_v48, %v12043_v47  ;;  %v19825_v14 = vor.u32 %v17792_v2, %v12029_v4  ;;  %v17788_v20 = vld [vmem:[#allocation8 + $0x24] sm:$0xf] }
  0x40   :  { %v12299_v52 = vld [vmem:[#allocation8 + $0x260] sm:$0xf]  ;;  %v17862_v53 = vld [vmem:[#allocation8 + $0x26c] sm:$0xf0]  ;;  %v19808_v57 = vor.u32 %v17830_v51, %v12171_v49  ;;  %v12013_v22 = vld [vmem:[#allocation8 + $0x30] sm:$0xf0] }
  0x41   :  { %815 = vmatpush.bf16.msra.mxu0 %v19792_v44  ;;  %v19810_v58 = vor.u32 %v17862_v53, %v12299_v52  ;;  %v12027_v59 = vld [vmem:[#allocation8 + $0x40] sm:$0xf]  ;;  %v17794_v60 = vld [vmem:[#allocation8 + $0x4c] sm:$0xf0]  ;;  %v19837_v35 = vor.u32 %v17788_v20, %v12013_v22  ;;  %v17784_v37 = vld [vmem:[#allocation8 + $0x4] sm:$0xf] }
  0x42   :  { %829 = vmatpush.bf16.msra.mxu1 %v19796_v45  ;;  %v12155_v61 = vld [vmem:[#allocation8 + $0x140] sm:$0xf]  ;;  %v17826_v63 = vld [vmem:[#allocation8 + $0x14c] sm:$0xf0]  ;;  %v19816_v5 = vor.u32 %v17794_v60, %v12027_v59  ;;  %v11997_v39 = vld [vmem:[#allocation8 + $0x10] sm:$0xf0] }
  0x43   :  { %843 = vmatpush.bf16.msra.mxu2 %v19798_v46  ;;  %857 = vmatpush.bf16.msra.mxu3 %v19801_v50  ;;  %v12283_v0 = vld [vmem:[#allocation8 + $0x240] sm:$0xf]  ;;  %v17858_v1 = vld [vmem:[#allocation8 + $0x24c] sm:$0xf0]  ;;  %v19820_v6 = vor.u32 %v17826_v63, %v12155_v61  ;;  %v17844_v40 = vld [vmem:[#allocation8 + $0x1e4] sm:$0xf]  ;;  %v19849_v55 = vor.u32 %v17784_v37, %v11997_v39 }
  0x44   :  { %v19822_v9 = vor.u32 %v17858_v1, %v12283_v0  ;;  %v12011_v10 = vld [vmem:[#allocation8 + $0x20] sm:$0xf]  ;;  %v17790_v11 = vld [vmem:[#allocation8 + $0x2c] sm:$0xf0]  ;;  %v12237_v41 = vld [vmem:[#allocation8 + $0x1f0] sm:$0xf0] }
  0x45   :  { %816 = vmatpush.bf16.msra.mxu0 %v19804_v56  ;;  %v12139_v13 = vld [vmem:[#allocation8 + $0x120] sm:$0xf]  ;;  %v17822_v15 = vld [vmem:[#allocation8 + $0x12c] sm:$0xf0]  ;;  %v19828_v23 = vor.u32 %v17790_v11, %v12011_v10  ;;  %v17876_v42 = vld [vmem:[#allocation8 + $0x2e4] sm:$0xf]  ;;  %v19851_v59 = vor.u32 %v17844_v40, %v12237_v41 }
  0x46   :  { %830 = vmatpush.bf16.msra.mxu1 %v19808_v57  ;;  %v12267_v18 = vld [vmem:[#allocation8 + $0x220] sm:$0xf]  ;;  %v17854_v19 = vld [vmem:[#allocation8 + $0x22c] sm:$0xf0]  ;;  %v19832_v27 = vor.u32 %v17822_v15, %v12139_v13  ;;  %v12365_v47 = vld [vmem:[#allocation8 + $0x2f0] sm:$0xf0] }
  0x47   :  { %844 = vmatpush.bf16.msra.mxu2 %v19810_v58  ;;  %858 = vmatpush.bf16.msra.mxu3 %v19813_v62  ;;  %v11995_v24 = vld [vmem:[#allocation8] sm:$0xf]  ;;  %v17786_v26 = vld [vmem:[#allocation8 + $0xc] sm:$0xf0]  ;;  %v19834_v28 = vor.u32 %v17854_v19, %v12267_v18  ;;  %v12115_v48 = vld [vmem:[#allocation8 + $0xe8] sm:$0xf]  ;;  %v19853_v61 = vor.u32 %v17876_v42, %v12365_v47 }
  0x48   :  { %v12123_v30 = vld [vmem:[#allocation8 + $0x100] sm:$0xf]  ;;  %v17818_v31 = vld [vmem:[#allocation8 + $0x10c] sm:$0xf0]  ;;  %v19840_v43 = vor.u32 %v17786_v26, %v11995_v24  ;;  %v17815_v49 = vld [vmem:[#allocation8 + $0xf4] sm:$0xf0] }
  0x49   :  { %817 = vmatpush.bf16.msra.mxu0 %v19816_v5  ;;  %v12251_v32 = vld [vmem:[#allocation8 + $0x200] sm:$0xf]  ;;  %v17850_v36 = vld [vmem:[#allocation8 + $0x20c] sm:$0xf0]  ;;  %v19844_v51 = vor.u32 %v17818_v31, %v12123_v30  ;;  %v12243_v53 = vld [vmem:[#allocation8 + $0x1e8] sm:$0xf]  ;;  %v19855_v63 = vor.u32 %v17815_v49, %v12115_v48 }
  0x4a   :  { %831 = vmatpush.bf16.msra.mxu1 %v19820_v6  ;;  %v19846_v52 = vor.u32 %v17850_v36, %v12251_v32  ;;  %v17847_v54 = vld [vmem:[#allocation8 + $0x1f4] sm:$0xf0]  ;;  %v17840_v60 = vld [vmem:[#allocation8 + $0x1c4] sm:$0xf]  ;;  %v12221_v0 = vld [vmem:[#allocation8 + $0x1d0] sm:$0xf0] }
  0x4b   :  { %845 = vmatpush.bf16.msra.mxu2 %v19822_v9  ;;  %859 = vmatpush.bf16.msra.mxu3 %v19825_v14  ;;  %v17872_v1 = vld [vmem:[#allocation8 + $0x2c4] sm:$0xf]  ;;  %v12349_v2 = vld [vmem:[#allocation8 + $0x2d0] sm:$0xf0]  ;;  %v19858_v4 = vor.u32 %v17847_v54, %v12243_v53  ;;  %v12099_v10 = vld [vmem:[#allocation8 + $0xc8] sm:$0xf]  ;;  %v19864_v20 = vor.u32 %v17840_v60, %v12221_v0 }
  0x4c   :  { %v17811_v11 = vld [vmem:[#allocation8 + $0xd4] sm:$0xf0]  ;;  %v12227_v13 = vld [vmem:[#allocation8 + $0x1c8] sm:$0xf]  ;;  %v11983_v18 = vld [vmem:[#allocation2] sm:$0xf]  ;;  %v19870_v30 = vor.u32 %v17872_v1, %v12349_v2 }
  0x4d   :  { %818 = vmatpush.bf16.msra.mxu0 %v19828_v23  ;;  %21152 = vst [vmem:[#allocation32_spill] sm:$0xff] %v19858_v4  ;;  %v17843_v15 = vld [vmem:[#allocation8 + $0x1d4] sm:$0xf0]  ;;  %v17782_v19 = vld [vmem:[#allocation2 + $0x8] sm:$0xf0]  ;;  %v19872_v31 = vor.u32 %v17811_v11, %v12099_v10  ;;  %s19633_s8 = smov [#allocation21]  }
  0x4e   :  { %832 = vmatpush.bf16.msra.mxu1 %v19832_v27  ;;  %21153 = vst [vmem:[#allocation33_spill] sm:$0xff] %v19864_v20  ;;  %v17836_v22 = vld [vmem:[#allocation8 + $0x1a4] sm:$0xf]  ;;  %v12205_v24 = vld [vmem:[#allocation8 + $0x1b0] sm:$0xf0]  ;;  %v19866_v26 = vor.u32 %v17782_v19, %v11983_v18  ;;  %v19875_v39 = vor.u32 %v17843_v15, %v12227_v13  ;;  %s11939_s10 = sshll.u32 %s19633_s8, 4  ;;  %s11940_s10 = int_to_ptr.vmem [resolvable:$true] %s11939_s10 }
  0x4f   :  { %846 = vmatpush.bf16.msra.mxu2 %v19834_v28  ;;  %860 = vmatpush.bf16.msra.mxu3 %v19837_v35  ;;  %21154 = vst [vmem:[#allocation34_spill] sm:$0xff] %v19870_v30  ;;  %v17868_v32 = vld [vmem:[#allocation8 + $0x2a4] sm:$0xf]  ;;  %v12333_v36 = vld [vmem:[#allocation8 + $0x2b0] sm:$0xf0]  ;;  %v19882_v53 = vor.u32 %v17836_v22, %v12205_v24  ;;  %s11941_s27 = sshll.u32 %s21091_s12, 4  ;;  %s11942_s27 = int_to_ptr.hbm [resolvable:$true] %s11941_s27 }
  0x50   :  { %21155 = vst [vmem:[#allocation35_spill] sm:$0xff] %v19872_v31  ;;  %v12083_v37 = vld [vmem:[#allocation8 + $0xa8] sm:$0xf]  ;;  %v17807_v40 = vld [vmem:[#allocation8 + $0xb4] sm:$0xf0]  ;;  %v19886_v0 = vor.u32 %v17868_v32, %v12333_v36  ;;  %s11928_s18 = sshll.u32 %s21090_s11, 4  ;;  %s11929_s18 = int_to_ptr.hbm [resolvable:$true] %s11928_s18 }
  0x51   :  { %819 = vmatpush.bf16.msra.mxu0 %v19840_v43  ;;  %21156 = vst [vmem:[#allocation36_spill] sm:$0xff] %v19875_v39  ;;  %v17781_v41 = vld [vmem:[#allocation2 + $0x4] sm:$0xf]  ;;  %v11985_v42 = vld [vmem:[#allocation2 + $0xc] sm:$0xf0]  ;;  %v19888_v1 = vor.u32 %v17807_v40, %v12083_v37  ;;  %s19634_s7 = smov [#allocation20]  }
  0x52   :  { %833 = vmatpush.bf16.msra.mxu1 %v19844_v51  ;;  %v12211_v47 = vld [vmem:[#allocation8 + $0x1a8] sm:$0xf]  ;;  %v17839_v48 = vld [vmem:[#allocation8 + $0x1b4] sm:$0xf0]  ;;  %v19878_v49 = vor.u32 %v17781_v41, %v11985_v42  ;;  %21157 = vst [vmem:[#allocation37_spill] sm:$0xff] %v19882_v53  ;;  %s11926_s17 = sshll.u32 %s19634_s7, 4  ;;  %s11927_s17 = int_to_ptr.vmem [resolvable:$true] %s11926_s17 }
  0x53   :  { %847 = vmatpush.bf16.msra.mxu2 %v19846_v52  ;;  %861 = vmatpush.bf16.msra.mxu3 %v19849_v55  ;;  %v17832_v54 = vld [vmem:[#allocation8 + $0x184] sm:$0xf]  ;;  %v12189_v60 = vld [vmem:[#allocation8 + $0x190] sm:$0xf0]  ;;  %21158 = vst [vmem:[#allocation38_spill] sm:$0xff] %v19886_v0  ;;  %v19891_v13 = vor.u32 %v17839_v48, %v12211_v47  ;;  %s19635_s11 = smov [#allocation23]  }
  0x54   :  { %820 = vmatmul.bf16.vlgmr.msra.gmra.mxu0 %v19866_v26  ;;  %21159 = vst [vmem:[#allocation39_spill] sm:$0xff] %v19888_v1  ;;  %v17864_v2 = vld [vmem:[#allocation8 + $0x284] sm:$0xf]  ;;  %v12317_v10 = vld [vmem:[#allocation8 + $0x290] sm:$0xf0]  ;;  %v19897_v32 = vor.u32 %v17832_v54, %v12189_v60  ;;  %s11952_s12 = sshll.u32 %s19635_s11, 4  ;;  %s11953_s12 = int_to_ptr.vmem [resolvable:$true] %s11952_s12 }
  0x55   :  { %868 = vmatpush.bf16.msrb.mxu0 %v19851_v59  ;;  %v11991_v11 = vld [vmem:[#allocation2 + $0x8] sm:$0xf]  ;;  %21160 = vst [vmem:[#allocation40_spill] sm:$0xff] %v19891_v13  ;;  %v12067_v15 = vld [vmem:[#allocation8 + $0x88] sm:$0xf]  ;;  %834 = vmatmul.bf16.vlgmr.msra.gmra.mxu1 %v19878_v49  ;;  %v19901_v36 = vor.u32 %v17864_v2, %v12317_v10  ;;  %s11954_s2 = sshll.u32 %s21092_s13, 4  ;;  %s11955_s2 = int_to_ptr.hbm [resolvable:$true] %s11954_s2 }
  0x56   :  { %882 = vmatpush.bf16.msrb.mxu1 %v19853_v61  ;;  %862 = vmatmul.bf16.vlgmr.msra.gmra.mxu3 %v19866_v26  ;;  %v17803_v18 = vld [vmem:[#allocation8 + $0x94] sm:$0xf0]  ;;  %v17783_v19 = vld [vmem:[#allocation2 + $0x10] sm:$0xf0]  ;;  %v12195_v22 = vld [vmem:[#allocation8 + $0x188] sm:$0xf] }
  0x57   :  { %896 = vmatpush.bf16.msrb.mxu2 %v19855_v63  ;;  %910 = vmatpush.bf16.msrb.mxu3 %v19858_v4  ;;  %v17835_v24 = vld [vmem:[#allocation8 + $0x194] sm:$0xf0]  ;;  %v19894_v41 = vor.u32 %v17783_v19, %v11991_v11  ;;  %21161 = vst [vmem:[#allocation41_spill] sm:$0xff] %v19897_v32  ;;  %v19903_v37 = vor.u32 %v17803_v18, %v12067_v15  ;;  %v17828_v40 = vld [vmem:[#allocation8 + $0x164] sm:$0xf]  ;;  %s19636_s19 = smov 128  }
  0x58   :  { %21162 = vst [vmem:[#allocation42_spill] sm:$0xff] %v19901_v36  ;;  %v12173_v42 = vld [vmem:[#allocation8 + $0x170] sm:$0xf0]  ;;  %v17860_v47 = vld [vmem:[#allocation8 + $0x264] sm:$0xf]  ;;  %v19906_v48 = vor.u32 %v17835_v24, %v12195_v22  ;;  %s19637_s20 = smov 8  }
  0x59   :  { %869 = vmatpush.bf16.msrb.mxu0 %v19864_v20  ;;  %21163 = vst [vmem:[#allocation43_spill] sm:$0xff] %v19903_v37  ;;  %v12301_v11 = vld [vmem:[#allocation8 + $0x270] sm:$0xf0]  ;;  %v12051_v19 = vld [vmem:[#allocation8 + $0x68] sm:$0xf]  ;;  %848 = vmatmul.bf16.vlgmr.msra.gmra.mxu2 %v19894_v41  ;;  %v19910_v2 = vor.u32 %v17828_v40, %v12173_v42 }
  0x5a   :  { %883 = vmatpush.bf16.msrb.mxu1 %v19870_v30  ;;  %21164 = vst [vmem:[#allocation44_spill] sm:$0xff] %v19906_v48  ;;  %v12179_v54 = vld [vmem:[#allocation8 + $0x168] sm:$0xf]  ;;  %v17831_v60 = vld [vmem:[#allocation8 + $0x174] sm:$0xf0]  ;;  %v19914_v10 = vor.u32 %v17860_v47, %v12301_v11 }
  0x5b   :  { %897 = vmatpush.bf16.msrb.mxu2 %v19872_v31  ;;  %911 = vmatpush.bf16.msrb.mxu3 %v19875_v39  ;;  %21165 = vst [vmem:[#allocation45_spill] sm:$0xff] %v19910_v2  ;;  %v17824_v18 = vld [vmem:[#allocation8 + $0x144] sm:$0xf]  ;;  %v12157_v22 = vld [vmem:[#allocation8 + $0x150] sm:$0xf0] }
  0x5c   :  { %21166 = vst [vmem:[#allocation46_spill] sm:$0xff] %v19914_v10  ;;  %v17856_v24 = vld [vmem:[#allocation8 + $0x244] sm:$0xf]  ;;  %v12163_v40 = vld [vmem:[#allocation8 + $0x148] sm:$0xf] }
  0x5d   :  { %870 = vmatpush.bf16.msrb.mxu0 %v19882_v53  ;;  %v17799_v53 = vld [vmem:[#allocation8 + $0x74] sm:$0xf0]  ;;  %v17820_v11 = vld [vmem:[#allocation8 + $0x124] sm:$0xf]  ;;  %v12371_v39 = vld [vmem:[#allocation8 + $0x2e8] sm:$0xf] }
  0x5e   :  { %884 = vmatpush.bf16.msrb.mxu1 %v19886_v0  ;;  %v19916_v15 = vor.u32 %v17799_v53, %v12051_v19  ;;  %v12035_v0 = vld [vmem:[#allocation8 + $0x48] sm:$0xf]  ;;  %v17827_v42 = vld [vmem:[#allocation8 + $0x154] sm:$0xf0]  ;;  %v12141_v19 = vld [vmem:[#allocation8 + $0x130] sm:$0xf0] }
  0x5f   :  { %898 = vmatpush.bf16.msrb.mxu2 %v19888_v1  ;;  %912 = vmatpush.bf16.msrb.mxu3 %v19891_v13  ;;  %v19919_v13 = vor.u32 %v17831_v60, %v12179_v54  ;;  %v12285_v1 = vld [vmem:[#allocation8 + $0x250] sm:$0xf0]  ;;  %v17852_v54 = vld [vmem:[#allocation8 + $0x224] sm:$0xf]  ;;  %v19931_v60 = vor.u32 %v17827_v42, %v12163_v40  ;;  %v17879_v31 = vld [vmem:[#allocation8 + $0x2f4] sm:$0xf0] }
  0x60   :  { %21167 = vst [vmem:[#allocation47_spill] sm:$0xff] %v19916_v15  ;;  %v19926_v53 = vor.u32 %v17856_v24, %v12285_v1  ;;  %v17816_v1 = vld [vmem:[#allocation8 + $0x104] sm:$0xf]  ;;  %v12125_v24 = vld [vmem:[#allocation8 + $0x110] sm:$0xf0] }
  0x61   :  { %871 = vmatpush.bf16.msrb.mxu0 %v19897_v32  ;;  %21168 = vst [vmem:[#allocation48_spill] sm:$0xff] %v19919_v13  ;;  %v17795_v32 = vld [vmem:[#allocation8 + $0x54] sm:$0xf0]  ;;  %v17848_v40 = vld [vmem:[#allocation8 + $0x204] sm:$0xf] }
  0x62   :  { %885 = vmatpush.bf16.msrb.mxu1 %v19901_v36  ;;  %v19922_v36 = vor.u32 %v17824_v18, %v12157_v22  ;;  %21170 = vst [vmem:[#allocation50_spill] sm:$0xff] %v19926_v53  ;;  %v19928_v47 = vor.u32 %v17795_v32, %v12035_v0  ;;  %v12147_v18 = vld [vmem:[#allocation8 + $0x128] sm:$0xf]  ;;  %v17823_v22 = vld [vmem:[#allocation8 + $0x134] sm:$0xf0] }
  0x63   :  { %899 = vmatpush.bf16.msrb.mxu2 %v19903_v37  ;;  %913 = vmatpush.bf16.msrb.mxu3 %v19906_v48  ;;  %21172 = vst [vmem:[#allocation52_spill] sm:$0xff] %v19931_v60  ;;  %v12269_v48 = vld [vmem:[#allocation8 + $0x230] sm:$0xf0]  ;;  %v12019_v37 = vld [vmem:[#allocation8 + $0x28] sm:$0xf] }
  0x64   :  { %21169 = vst [vmem:[#allocation49_spill] sm:$0xff] %v19922_v36  ;;  %v19938_v0 = vor.u32 %v17852_v54, %v12269_v48  ;;  %v12253_v42 = vld [vmem:[#allocation8 + $0x210] sm:$0xf0]  ;;  %v17813_v30 = vld [vmem:[#allocation8 + $0xec] sm:$0xf] }
  0x65   :  { %872 = vmatpush.bf16.msrb.mxu0 %v19910_v2  ;;  %21171 = vst [vmem:[#allocation51_spill] sm:$0xff] %v19928_v47  ;;  %v17791_v2 = vld [vmem:[#allocation8 + $0x34] sm:$0xf0]  ;;  %v12117_v48 = vld [vmem:[#allocation8 + $0xf8] sm:$0xf0]  ;;  %v19950_v54 = vor.u32 %v17848_v40, %v12253_v42 }
  0x66   :  { %886 = vmatpush.bf16.msrb.mxu1 %v19914_v10  ;;  %v19934_v10 = vor.u32 %v17820_v11, %v12141_v19  ;;  %21174 = vst [vmem:[#allocation54_spill] sm:$0xff] %v19938_v0  ;;  %v19940_v32 = vor.u32 %v17791_v2, %v12019_v37  ;;  %v12131_v11 = vld [vmem:[#allocation8 + $0x108] sm:$0xf]  ;;  %v17819_v19 = vld [vmem:[#allocation8 + $0x114] sm:$0xf0] }
  0x67   :  { %900 = vmatpush.bf16.msrb.mxu2 %v19916_v15  ;;  %914 = vmatpush.bf16.msrb.mxu3 %v19919_v13  ;;  %v12003_v13 = vld [vmem:[#allocation8 + $0x8] sm:$0xf]  ;;  %v19943_v15 = vor.u32 %v17823_v22, %v12147_v18  ;;  %v17845_v37 = vld [vmem:[#allocation8 + $0x1ec] sm:$0xf]  ;;  %v12245_v2 = vld [vmem:[#allocation8 + $0x1f8] sm:$0xf0] }
  0x68   :  { %21173 = vst [vmem:[#allocation53_spill] sm:$0xff] %v19934_v10  ;;  %v17877_v22 = vld [vmem:[#allocation8 + $0x2ec] sm:$0xf]  ;;  %v12355_v20 = vld [vmem:[#allocation8 + $0x2c8] sm:$0xf] }
  0x69   :  { %873 = vmatpush.bf16.msrb.mxu0 %v19922_v36  ;;  %v17787_v36 = vld [vmem:[#allocation8 + $0x14] sm:$0xf0]  ;;  %v17809_v4 = vld [vmem:[#allocation8 + $0xcc] sm:$0xf]  ;;  %v12229_v42 = vld [vmem:[#allocation8 + $0x1d8] sm:$0xf0] }
  0x6a   :  { %887 = vmatpush.bf16.msrb.mxu1 %v19926_v53  ;;  %v19952_v18 = vor.u32 %v17787_v36, %v12003_v13  ;;  %v19955_v53 = vor.u32 %v17819_v19, %v12131_v11  ;;  %v12101_v13 = vld [vmem:[#allocation8 + $0xd8] sm:$0xf0]  ;;  %v17841_v36 = vld [vmem:[#allocation8 + $0x1cc] sm:$0xf]  ;;  %v12339_v19 = vld [vmem:[#allocation8 + $0x2a8] sm:$0xf] }
  0x6b   :  { %901 = vmatpush.bf16.msrb.mxu2 %v19928_v47  ;;  %915 = vmatpush.bf16.msrb.mxu3 %v19931_v60  ;;  %v19946_v47 = vor.u32 %v17816_v1, %v12125_v24  ;;  %v12373_v60 = vld [vmem:[#allocation8 + $0x2f8] sm:$0xf0]  ;;  %v19959_v1 = vor.u32 %v17813_v30, %v12117_v48  ;;  %v19961_v24 = vor.u32 %v17845_v37, %v12245_v2  ;;  %v17871_v48 = vld [vmem:[#allocation8 + $0x2b4] sm:$0xf0]  ;;  %v17805_v37 = vld [vmem:[#allocation8 + $0xac] sm:$0xf] }
  0x6c   :  { %21175 = vst [vmem:[#allocation55_spill] sm:$0xff] %v19955_v53  ;;  %v19964_v40 = vor.u32 %v17877_v22, %v12373_v60  ;;  %v19974_v60 = vor.u32 %v17809_v4, %v12101_v13  ;;  %v19976_v11 = vor.u32 %v17841_v36, %v12229_v42  ;;  %v12085_v22 = vld [vmem:[#allocation8 + $0xb8] sm:$0xf0]  ;;  %v19985_v4 = vor.u32 %v17871_v48, %v12339_v19  ;;  %v12323_v42 = vld [vmem:[#allocation8 + $0x288] sm:$0xf] }
  0x6d   :  { %874 = vmatpush.bf16.msrb.mxu0 %v19934_v10  ;;  %v19957_v10 = vor.u32 %v17879_v31, %v12371_v39  ;;  %21177 = vst [vmem:[#allocation57_spill] sm:$0xff] %v19959_v1  ;;  %v17873_v31 = vld [vmem:[#allocation8 + $0x2cc] sm:$0xf]  ;;  %v12357_v39 = vld [vmem:[#allocation8 + $0x2d8] sm:$0xf0]  ;;  %v19990_v13 = vor.u32 %v17805_v37, %v12085_v22 }
  0x6e   :  { %888 = vmatpush.bf16.msrb.mxu1 %v19938_v0  ;;  %21178 = vst [vmem:[#allocation58_spill] sm:$0xff] %v19961_v24  ;;  %v17875_v0 = vld [vmem:[#allocation8 + $0x2d4] sm:$0xf0]  ;;  %v19980_v2 = vor.u32 %v17873_v31, %v12357_v39  ;;  %v17801_v39 = vld [vmem:[#allocation8 + $0x8c] sm:$0xf] }
  0x6f   :  { %902 = vmatpush.bf16.msrb.mxu2 %v19940_v32  ;;  %916 = vmatpush.bf16.msrb.mxu3 %v19943_v15  ;;  %21176 = vst [vmem:[#allocation56_spill] sm:$0xff] %v19957_v10  ;;  %v19970_v30 = vor.u32 %v17875_v0, %v12355_v20  ;;  %v17837_v20 = vld [vmem:[#allocation8 + $0x1ac] sm:$0xf]  ;;  %v12213_v0 = vld [vmem:[#allocation8 + $0x1b8] sm:$0xf0] }
  0x70   :  { %21179 = vst [vmem:[#allocation59_spill] sm:$0xff] %v19964_v40  ;;  %v19992_v36 = vor.u32 %v17837_v20, %v12213_v0  ;;  %v17867_v31 = vld [vmem:[#allocation8 + $0x294] sm:$0xf0]  ;;  %v17833_v19 = vld [vmem:[#allocation8 + $0x18c] sm:$0xf] }
  0x71   :  { %875 = vmatpush.bf16.msrb.mxu0 %v19946_v47  ;;  %21180 = vst [vmem:[#allocation60_spill] sm:$0xff] %v19970_v30  ;;  %v12197_v48 = vld [vmem:[#allocation8 + $0x198] sm:$0xf0]  ;;  %v12307_v20 = vld [vmem:[#allocation8 + $0x268] sm:$0xf] }
  0x72   :  { %889 = vmatpush.bf16.msrb.mxu1 %v19950_v54  ;;  %21181 = vst [vmem:[#allocation61_spill] sm:$0xff] %v19974_v60  ;;  %v20004_v22 = vor.u32 %v17833_v19, %v12197_v48  ;;  %v12291_v19 = vld [vmem:[#allocation8 + $0x248] sm:$0xf] }
  0x73   :  { %903 = vmatpush.bf16.msrb.mxu2 %v19952_v18  ;;  %917 = vmatpush.bf16.msrb.mxu3 %v19955_v53  ;;  %21182 = vst [vmem:[#allocation62_spill] sm:$0xff] %v19976_v11  ;;  %v12325_v53 = vld [vmem:[#allocation8 + $0x298] sm:$0xf0] }
  0x74   :  { %876 = vmatmul.bf16.vlgmr.msrb.gmra.mxu0 %v19878_v49  ;;  %21183 = vst [vmem:[#allocation63_spill] sm:$0xff] %v19980_v2 }
  0x75   :  { %924 = vmatpush.bf16.msra.mxu0 %v19957_v10  ;;  %890 = vmatmul.bf16.vlgmr.msrb.gmra.mxu1 %v19894_v41  ;;  %21184 = vst [vmem:[#allocation64_spill] sm:$0xff] %v19985_v4  ;;  %v17865_v10 = vld [vmem:[#allocation8 + $0x28c] sm:$0xf] }
  0x76   :  { %938 = vmatpush.bf16.msra.mxu1 %v19959_v1  ;;  %v17869_v1 = vld [vmem:[#allocation8 + $0x2ac] sm:$0xf]  ;;  %904 = vmatmul.bf16.vlgmr.msrb.gmra.mxu2 %v19866_v26  ;;  %21185 = vst [vmem:[#allocation65_spill] sm:$0xff] %v19990_v13  ;;  %v20007_v0 = vor.u32 %v17865_v10, %v12325_v53  ;;  %v17859_v10 = vld [vmem:[#allocation8 + $0x254] sm:$0xf0] }
  0x77   :  { %952 = vmatpush.bf16.msra.mxu2 %v19961_v24  ;;  %966 = vmatpush.bf16.msra.mxu3 %v19964_v40  ;;  %v12341_v24 = vld [vmem:[#allocation8 + $0x2b8] sm:$0xf0]  ;;  %21186 = vst [vmem:[#allocation66_spill] sm:$0xff] %v19992_v36  ;;  %v17793_v53 = vld [vmem:[#allocation8 + $0x4c] sm:$0xf] }
  0x78   :  { %918 = vmatmul.bf16.vlgmr.msrb.gmra.mxu3 %v19878_v49  ;;  %v19995_v40 = vor.u32 %v17869_v1, %v12341_v24  ;;  %21190 = vst [vmem:[#allocation70_spill] sm:$0xff] %v20004_v22  ;;  %v17863_v1 = vld [vmem:[#allocation8 + $0x274] sm:$0xf0]  ;;  %v17797_v24 = vld [vmem:[#allocation8 + $0x6c] sm:$0xf] }
  0x79   :  { %925 = vmatpush.bf16.msra.mxu0 %v19970_v30  ;;  %v12069_v30 = vld [vmem:[#allocation8 + $0x98] sm:$0xf0]  ;;  %21191 = vst [vmem:[#allocation71_spill] sm:$0xff] %v20007_v0 }
  0x7a   :  { %939 = vmatpush.bf16.msra.mxu1 %v19974_v60  ;;  %21187 = vst [vmem:[#allocation67_spill] sm:$0xff] %v19995_v40  ;;  %v19998_v60 = vor.u32 %v17867_v31, %v12323_v42  ;;  %v20002_v37 = vor.u32 %v17801_v39, %v12069_v30  ;;  %v17861_v42 = vld [vmem:[#allocation8 + $0x26c] sm:$0xf]  ;;  %v12309_v31 = vld [vmem:[#allocation8 + $0x278] sm:$0xf0] }
  0x7b   :  { %953 = vmatpush.bf16.msra.mxu2 %v19976_v11  ;;  %967 = vmatpush.bf16.msra.mxu3 %v19980_v2  ;;  %v12053_v2 = vld [vmem:[#allocation8 + $0x78] sm:$0xf0]  ;;  %v17829_v11 = vld [vmem:[#allocation8 + $0x16c] sm:$0xf]  ;;  %v20019_v48 = vor.u32 %v17861_v42, %v12309_v31 }
  0x7c   :  { %21188 = vst [vmem:[#allocation68_spill] sm:$0xff] %v19998_v60  ;;  %v20014_v30 = vor.u32 %v17797_v24, %v12053_v2  ;;  %v17855_v24 = vld [vmem:[#allocation8 + $0x234] sm:$0xf0]  ;;  %v17789_v42 = vld [vmem:[#allocation8 + $0x2c] sm:$0xf] }
  0x7d   :  { %926 = vmatpush.bf16.msra.mxu0 %v19985_v4  ;;  %21189 = vst [vmem:[#allocation69_spill] sm:$0xff] %v20002_v37  ;;  %v12181_v4 = vld [vmem:[#allocation8 + $0x178] sm:$0xf0] }
  0x7e   :  { %940 = vmatpush.bf16.msra.mxu1 %v19990_v13  ;;  %v20010_v13 = vor.u32 %v17863_v1, %v12307_v20  ;;  %21193 = vst [vmem:[#allocation73_spill] sm:$0xff] %v20014_v30  ;;  %v20016_v39 = vor.u32 %v17829_v11, %v12181_v4  ;;  %v17857_v20 = vld [vmem:[#allocation8 + $0x24c] sm:$0xf]  ;;  %v12293_v1 = vld [vmem:[#allocation8 + $0x258] sm:$0xf0] }
  0x7f   :  { %954 = vmatpush.bf16.msra.mxu2 %v19992_v36  ;;  %968 = vmatpush.bf16.msra.mxu3 %v19995_v40  ;;  %21195 = vst [vmem:[#allocation75_spill] sm:$0xff] %v20019_v48  ;;  %v12037_v40 = vld [vmem:[#allocation8 + $0x58] sm:$0xf0]  ;;  %v17825_v36 = vld [vmem:[#allocation8 + $0x14c] sm:$0xf]  ;;  %v20031_v31 = vor.u32 %v17857_v20, %v12293_v1 }
  0x80   :  { %21192 = vst [vmem:[#allocation72_spill] sm:$0xff] %v20010_v13  ;;  %v20026_v11 = vor.u32 %v17793_v53, %v12037_v40  ;;  %v12275_v4 = vld [vmem:[#allocation8 + $0x228] sm:$0xf]  ;;  %v17851_v53 = vld [vmem:[#allocation8 + $0x214] sm:$0xf0] }
  0x81   :  { %927 = vmatpush.bf16.msra.mxu0 %v19998_v60  ;;  %21194 = vst [vmem:[#allocation74_spill] sm:$0xff] %v20016_v39  ;;  %v12165_v60 = vld [vmem:[#allocation8 + $0x158] sm:$0xf0]  ;;  %v17785_v20 = vld [vmem:[#allocation8 + $0xc] sm:$0xf] }
  0x82   :  { %941 = vmatpush.bf16.msra.mxu1 %v20002_v37  ;;  %v20022_v37 = vor.u32 %v17859_v10, %v12291_v19  ;;  %21197 = vst [vmem:[#allocation77_spill] sm:$0xff] %v20026_v11  ;;  %v20028_v2 = vor.u32 %v17825_v36, %v12165_v60  ;;  %v17853_v19 = vld [vmem:[#allocation8 + $0x22c] sm:$0xf]  ;;  %v12277_v10 = vld [vmem:[#allocation8 + $0x238] sm:$0xf0] }
  0x83   :  { %955 = vmatpush.bf16.msra.mxu2 %v20004_v22  ;;  %969 = vmatpush.bf16.msra.mxu3 %v20007_v0  ;;  %v12021_v0 = vld [vmem:[#allocation8 + $0x38] sm:$0xf0]  ;;  %v17821_v22 = vld [vmem:[#allocation8 + $0x12c] sm:$0xf]  ;;  %v12259_v36 = vld [vmem:[#allocation8 + $0x208] sm:$0xf]  ;;  %v20043_v1 = vor.u32 %v17853_v19, %v12277_v10 }
  0x84   :  { %21196 = vst [vmem:[#allocation76_spill] sm:$0xff] %v20022_v37  ;;  %v20038_v40 = vor.u32 %v17789_v42, %v12021_v0  ;;  %v21234_v10 = vld [vmem:[#allocation68_spill] sm:$0xff] }
  0x85   :  { %928 = vmatpush.bf16.msra.mxu0 %v20010_v13  ;;  %v12149_v13 = vld [vmem:[#allocation8 + $0x138] sm:$0xf0] }
  0x86   :  { %942 = vmatpush.bf16.msra.mxu1 %v20014_v30  ;;  %v20034_v30 = vor.u32 %v17855_v24, %v12275_v4  ;;  %v20040_v60 = vor.u32 %v17821_v22, %v12149_v13  ;;  %v17849_v4 = vld [vmem:[#allocation8 + $0x20c] sm:$0xf]  ;;  %v12261_v24 = vld [vmem:[#allocation8 + $0x218] sm:$0xf0] }
  0x87   :  { %956 = vmatpush.bf16.msra.mxu2 %v20016_v39  ;;  %970 = vmatpush.bf16.msra.mxu3 %v20019_v48  ;;  %v12005_v48 = vld [vmem:[#allocation8 + $0x18] sm:$0xf0]  ;;  %v17817_v39 = vld [vmem:[#allocation8 + $0x10c] sm:$0xf]  ;;  %v20055_v0 = vor.u32 %v17849_v4, %v12261_v24 }
  0x88   :  { %v20050_v13 = vor.u32 %v17785_v20, %v12005_v48  ;;  %v21233_v48 = vld [vmem:[#allocation67_spill] sm:$0xff] }
  0x89   :  { %929 = vmatpush.bf16.msra.mxu0 %v20022_v37  ;;  %v12133_v37 = vld [vmem:[#allocation8 + $0x118] sm:$0xf0] }
  0x8a   :  { %943 = vmatpush.bf16.msra.mxu1 %v20026_v11  ;;  %v20046_v11 = vor.u32 %v17851_v53, %v12259_v36  ;;  %v20052_v22 = vor.u32 %v17817_v39, %v12133_v37  ;;  %v21231_v37 = vld [vmem:[#allocation65_spill] sm:$0xff]  ;;  %v21232_v39 = vld [vmem:[#allocation66_spill] sm:$0xff]  ;;  %v21237_v20 = vld [vmem:[#allocation71_spill] sm:$0xff] }
  0x8b   :  { %957 = vmatpush.bf16.msra.mxu2 %v20028_v2  ;;  %971 = vmatpush.bf16.msra.mxu3 %v20031_v31  ;;  %v21235_v36 = vld [vmem:[#allocation69_spill] sm:$0xff]  ;;  %v21236_v53 = vld [vmem:[#allocation70_spill] sm:$0xff] }
  0x8d   :  { %930 = vmatpush.bf16.msra.mxu0 %v20034_v30 }
  0x8e   :  { %944 = vmatpush.bf16.msra.mxu1 %v20038_v40 }
  0x8f   :  { %958 = vmatpush.bf16.msra.mxu2 %v20040_v60  ;;  %972 = vmatpush.bf16.msra.mxu3 %v20043_v1 }
  0x91   :  { %931 = vmatpush.bf16.msra.mxu0 %v20046_v11 }
  0x92   :  { %945 = vmatpush.bf16.msra.mxu1 %v20050_v13 }
  0x93   :  { %959 = vmatpush.bf16.msra.mxu2 %v20052_v22  ;;  %973 = vmatpush.bf16.msra.mxu3 %v20055_v0 }
  0x94   :  { %932 = vmatmul.bf16.vlgmr.msra.gmra.mxu0 %v19894_v41 }
  0x95   :  { %1000 = vmatpush.bf16.msrb.mxu0 %v19759_v3  ;;  %946 = vmatmul.bf16.vlgmr.msra.gmra.mxu1 %v19866_v26  ;;  %v12379_v3 = vld [vmem:[#allocation5] sm:$0xf]  ;;  %v21224_v26 = vld [vmem:[#allocation58_spill] sm:$0xff] }
  0x96   :  { %1014 = vmatpush.bf16.msrb.mxu1 %v19761_v7  ;;  %960 = vmatmul.bf16.vlgmr.msra.gmra.mxu2 %v19878_v49  ;;  %v17881_v7 = vld [vmem:[#allocation5 + $0x8] sm:$0xf0]  ;;  %v21225_v49 = vld [vmem:[#allocation59_spill] sm:$0xff] }
  0x97   :  { %1028 = vmatpush.bf16.msrb.mxu2 %v19763_v8  ;;  %1042 = vmatpush.bf16.msrb.mxu3 %v19766_v12  ;;  %v17880_v8 = vld [vmem:[#allocation5 + $0x4] sm:$0xf]  ;;  %v12381_v12 = vld [vmem:[#allocation5 + $0xc] sm:$0xf0] }
  0x98   :  { %974 = vmatmul.bf16.vlgmr.msra.gmra.mxu3 %v19894_v41  ;;  %v21226_v41 = vld [vmem:[#allocation60_spill] sm:$0xff] }
  0x99   :  { %1001 = vmatpush.bf16.msrb.mxu0 %v19770_v16  ;;  %v12387_v16 = vld [vmem:[#allocation5 + $0x8] sm:$0xf] }
  0x9a   :  { %1015 = vmatpush.bf16.msrb.mxu1 %v19772_v17  ;;  %v17882_v17 = vld [vmem:[#allocation5 + $0x10] sm:$0xf0] }
  0x9b   :  { %1029 = vmatpush.bf16.msrb.mxu2 %v19775_v21  ;;  %1043 = vmatpush.bf16.msrb.mxu3 %v19777_v25  ;;  %v20094_v21 = vor.u32 %v17881_v7, %v12379_v3  ;;  %v20098_v25 = vor.u32 %v17880_v8, %v12381_v12  ;;  %v21238_v3 = vld [vmem:[#allocation72_spill] sm:$0xff]  ;;  %v21239_v7 = vld [vmem:[#allocation73_spill] sm:$0xff]  ;;  %v21240_v8 = vld [vmem:[#allocation74_spill] sm:$0xff] }
  0x9c   :  { %v21241_v12 = vld [vmem:[#allocation75_spill] sm:$0xff] }
  0x9d   :  { %1002 = vmatpush.bf16.msrb.mxu0 %v19780_v29  ;;  %v20100_v29 = vor.u32 %v17882_v17, %v12387_v16  ;;  %v21242_v17 = vld [vmem:[#allocation76_spill] sm:$0xff] }
  0x9e   :  { %1016 = vmatpush.bf16.msrb.mxu1 %v19784_v33  ;;  %v21198_v33 = vld [vmem:[#allocation32_spill] sm:$0xff] }
  0x9f   :  { %1030 = vmatpush.bf16.msrb.mxu2 %v19786_v34  ;;  %1044 = vmatpush.bf16.msrb.mxu3 %v19789_v38  ;;  %v21199_v34 = vld [vmem:[#allocation33_spill] sm:$0xff]  ;;  %v21200_v38 = vld [vmem:[#allocation34_spill] sm:$0xff] }
  0xa1   :  { %1003 = vmatpush.bf16.msrb.mxu0 %v19792_v44  ;;  %v21201_v44 = vld [vmem:[#allocation35_spill] sm:$0xff] }
  0xa2   :  { %1017 = vmatpush.bf16.msrb.mxu1 %v19796_v45  ;;  %v21202_v45 = vld [vmem:[#allocation36_spill] sm:$0xff] }
  0xa3   :  { %1031 = vmatpush.bf16.msrb.mxu2 %v19798_v46  ;;  %1045 = vmatpush.bf16.msrb.mxu3 %v19801_v50  ;;  %v21203_v46 = vld [vmem:[#allocation37_spill] sm:$0xff]  ;;  %v21204_v50 = vld [vmem:[#allocation38_spill] sm:$0xff] }
  0xa5   :  { %1004 = vmatpush.bf16.msrb.mxu0 %v19804_v56  ;;  %v21205_v56 = vld [vmem:[#allocation39_spill] sm:$0xff] }
  0xa6   :  { %1018 = vmatpush.bf16.msrb.mxu1 %v19808_v57  ;;  %v21206_v57 = vld [vmem:[#allocation40_spill] sm:$0xff] }
  0xa7   :  { %1032 = vmatpush.bf16.msrb.mxu2 %v19810_v58  ;;  %1046 = vmatpush.bf16.msrb.mxu3 %v19813_v62  ;;  %v21207_v58 = vld [vmem:[#allocation41_spill] sm:$0xff]  ;;  %v21208_v62 = vld [vmem:[#allocation42_spill] sm:$0xff] }
  0xa9   :  { %1005 = vmatpush.bf16.msrb.mxu0 %v19816_v5  ;;  %v21209_v5 = vld [vmem:[#allocation43_spill] sm:$0xff] }
  0xaa   :  { %1019 = vmatpush.bf16.msrb.mxu1 %v19820_v6  ;;  %v21210_v6 = vld [vmem:[#allocation44_spill] sm:$0xff] }
  0xab   :  { %1033 = vmatpush.bf16.msrb.mxu2 %v19822_v9  ;;  %1047 = vmatpush.bf16.msrb.mxu3 %v19825_v14  ;;  %v21211_v9 = vld [vmem:[#allocation45_spill] sm:$0xff]  ;;  %v21212_v14 = vld [vmem:[#allocation46_spill] sm:$0xff] }
  0xad   :  { %1006 = vmatpush.bf16.msrb.mxu0 %v19828_v23  ;;  %v21213_v23 = vld [vmem:[#allocation47_spill] sm:$0xff] }
  0xae   :  { %1020 = vmatpush.bf16.msrb.mxu1 %v19832_v27  ;;  %v21214_v27 = vld [vmem:[#allocation48_spill] sm:$0xff] }
  0xaf   :  { %1034 = vmatpush.bf16.msrb.mxu2 %v19834_v28  ;;  %1048 = vmatpush.bf16.msrb.mxu3 %v19837_v35  ;;  %v21215_v28 = vld [vmem:[#allocation49_spill] sm:$0xff]  ;;  %v21216_v35 = vld [vmem:[#allocation50_spill] sm:$0xff] }
  0xb1   :  { %1007 = vmatpush.bf16.msrb.mxu0 %v19840_v43  ;;  %v21217_v43 = vld [vmem:[#allocation51_spill] sm:$0xff] }
  0xb2   :  { %1021 = vmatpush.bf16.msrb.mxu1 %v19844_v51  ;;  %v21218_v51 = vld [vmem:[#allocation52_spill] sm:$0xff] }
  0xb3   :  { %1035 = vmatpush.bf16.msrb.mxu2 %v19846_v52  ;;  %1049 = vmatpush.bf16.msrb.mxu3 %v19849_v55  ;;  %v21219_v52 = vld [vmem:[#allocation53_spill] sm:$0xff]  ;;  %v21220_v55 = vld [vmem:[#allocation54_spill] sm:$0xff] }
  0xb4   :  { %1008 = vmatmul.bf16.vlgmr.msrb.gmra.mxu0 %v20094_v21 }
  0xb5   :  { %1056 = vmatpush.bf16.msra.mxu0 %v19851_v59  ;;  %1022 = vmatmul.bf16.vlgmr.msrb.gmra.mxu1 %v20098_v25  ;;  %v21221_v59 = vld [vmem:[#allocation55_spill] sm:$0xff] }
  0xb6   :  { %1070 = vmatpush.bf16.msra.mxu1 %v19853_v61  ;;  %1036 = vmatmul.bf16.vlgmr.msrb.gmra.mxu2 %v20100_v29  ;;  %v21222_v61 = vld [vmem:[#allocation56_spill] sm:$0xff] }
  0xb7   :  { %1084 = vmatpush.bf16.msra.mxu2 %v19855_v63  ;;  %1098 = vmatpush.bf16.msra.mxu3 %v21198_v33  ;;  %v21223_v63 = vld [vmem:[#allocation57_spill] sm:$0xff] }
  0xb8   :  { %1050 = vmatmul.bf16.vlgmr.msrb.gmra.mxu3 %v20094_v21  ;;  %v21243_v33 = vld [vmem:[#allocation77_spill] sm:$0xff] }
  0xb9   :  { %1057 = vmatpush.bf16.msra.mxu0 %v21199_v34 }
  0xba   :  { %1071 = vmatpush.bf16.msra.mxu1 %v21200_v38 }
  0xbb   :  { %1085 = vmatpush.bf16.msra.mxu2 %v21201_v44  ;;  %1099 = vmatpush.bf16.msra.mxu3 %v21202_v45 }
  0xbd   :  { %1058 = vmatpush.bf16.msra.mxu0 %v21203_v46  ;;  %v12631_v46 = vld [vmem:[#allocation11 + $0x1c0] sm:$0xf] }
  0xbe   :  { %1072 = vmatpush.bf16.msra.mxu1 %v21204_v50  ;;  %v17947_v50 = vld [vmem:[#allocation11 + $0x1dc] sm:$0xf0] }
  0xbf   :  { %1086 = vmatpush.bf16.msra.mxu2 %v21205_v56  ;;  %1100 = vmatpush.bf16.msra.mxu3 %v21206_v57  ;;  %v12887_v56 = vld [vmem:[#allocation11 + $0x3c0] sm:$0xf] }
  0xc0   :  { %v18011_v57 = vld [vmem:[#allocation11 + $0x3dc] sm:$0xf0] }
  0xc1   :  { %1059 = vmatpush.bf16.msra.mxu0 %v21207_v58 }
  0xc2   :  { %1073 = vmatpush.bf16.msra.mxu1 %v21208_v62  ;;  %v12888_v62 = vor.u32 %v18011_v57, %v12887_v56  ;;  %v17907_v57 = vld [vmem:[#allocation11 + $0x9c] sm:$0xf0] }
  0xc3   :  { %1087 = vmatpush.bf16.msra.mxu2 %v21209_v5  ;;  %1101 = vmatpush.bf16.msra.mxu3 %v21210_v6  ;;  %v12599_v5 = vld [vmem:[#allocation11 + $0x180] sm:$0xf] }
  0xc4   :  { %v17939_v6 = vld [vmem:[#allocation11 + $0x19c] sm:$0xf0] }
  0xc5   :  { %1060 = vmatpush.bf16.msra.mxu0 %v21211_v9  ;;  %v12855_v9 = vld [vmem:[#allocation11 + $0x380] sm:$0xf] }
  0xc6   :  { %1074 = vmatpush.bf16.msra.mxu1 %v21212_v14  ;;  %v12567_v14 = vld [vmem:[#allocation11 + $0x140] sm:$0xf] }
  0xc7   :  { %1088 = vmatpush.bf16.msra.mxu2 %v21213_v23  ;;  %1102 = vmatpush.bf16.msra.mxu3 %v21214_v27  ;;  %v12600_v27 = vor.u32 %v17939_v6, %v12599_v5  ;;  %v17971_v5 = vld [vmem:[#allocation11 + $0x29c] sm:$0xf0] }
  0xc9   :  { %1061 = vmatpush.bf16.msra.mxu0 %v21215_v28  ;;  %v12823_v28 = vld [vmem:[#allocation11 + $0x340] sm:$0xf] }
  0xca   :  { %1075 = vmatpush.bf16.msra.mxu1 %v21216_v35  ;;  %v17995_v35 = vld [vmem:[#allocation11 + $0x35c] sm:$0xf0] }
  0xcb   :  { %1089 = vmatpush.bf16.msra.mxu2 %v21217_v43  ;;  %1103 = vmatpush.bf16.msra.mxu3 %v21218_v51  ;;  %v13143_v43 = vld [vmem:[#allocation11 + $0x5c0] sm:$0xf] }
  0xcc   :  { %v18075_v51 = vld [vmem:[#allocation11 + $0x5dc] sm:$0xf0] }
  0xcd   :  { %1062 = vmatpush.bf16.msra.mxu0 %v21219_v52  ;;  %v13144_v52 = vor.u32 %v18075_v51, %v13143_v43  ;;  %v17899_v43 = vld [vmem:[#allocation11 + $0x5c] sm:$0xf0] }
  0xce   :  { %1076 = vmatpush.bf16.msra.mxu1 %v21220_v55  ;;  %v18139_v55 = vld [vmem:[#allocation11 + $0x7dc] sm:$0xf0] }
  0xcf   :  { %1090 = vmatpush.bf16.msra.mxu2 %v19940_v32  ;;  %1104 = vmatpush.bf16.msra.mxu3 %v19943_v15  ;;  %v21227_v15 = vld [vmem:[#allocation61_spill] sm:$0xff]  ;;  %v21229_v32 = vld [vmem:[#allocation63_spill] sm:$0xff] }
  0xd1   :  { %1063 = vmatpush.bf16.msra.mxu0 %v19946_v47  ;;  %v21228_v47 = vld [vmem:[#allocation62_spill] sm:$0xff]  ;;  %v821_v19 = vpop.f32.mrf.mxu0 }
  0xd2   :  { %1077 = vmatpush.bf16.msra.mxu1 %v19950_v54  ;;  %v20151_v54 = vld [vmem:[#allocation10] sm:$0xf]  ;;  %v835_v24 = vpop.f32.mrf.mxu1 }
  0xd3   :  { %1091 = vmatpush.bf16.msra.mxu2 %v19952_v18  ;;  %1105 = vmatpush.bf16.msra.mxu3 %v21221_v59  ;;  %v21230_v18 = vld [vmem:[#allocation64_spill] sm:$0xff]  ;;  %v20158_v42 = vperm.slane %v20151_v54, 0 }
  0xd4   :  { %1064 = vmatmul.bf16.vlgmr.msra.gmra.mxu0 %v20098_v25  ;;  %v13111_v59 = vld [vmem:[#allocation11 + $0x580] sm:$0xf] }
  0xd5   :  { %1112 = vmatpush.bf16.msrb.mxu0 %v21222_v61  ;;  %1078 = vmatmul.bf16.vlgmr.msra.gmra.mxu1 %v20100_v29  ;;  %v822_v4 = vadd.f32 %v821_v19, %v20158_v42  ;;  %v18067_v61 = vld [vmem:[#allocation11 + $0x59c] sm:$0xf0] }
  0xd6   :  { %1126 = vmatpush.bf16.msrb.mxu1 %v21223_v63  ;;  %1092 = vmatmul.bf16.vlgmr.msra.gmra.mxu2 %v20094_v21  ;;  %v13367_v63 = vld [vmem:[#allocation11 + $0x780] sm:$0xf] }
  0xd7   :  { %1140 = vmatpush.bf16.msrb.mxu2 %v21224_v26  ;;  %1154 = vmatpush.bf16.msrb.mxu3 %v21225_v49  ;;  %v836_v16 = vadd.f32 %v835_v24, %v822_v4  ;;  %v18131_v26 = vld [vmem:[#allocation11 + $0x79c] sm:$0xf0]  ;;  %v13112_v49 = vor.u32 %v18067_v61, %v13111_v59 }
  0xd8   :  { %1106 = vmatmul.bf16.vlgmr.msra.gmra.mxu3 %v20098_v25  ;;  %v12503_v4 = vld [vmem:[#allocation11 + $0xc0] sm:$0xf] }
  0xd9   :  { %1113 = vmatpush.bf16.msrb.mxu0 %v21226_v41  ;;  %v823_v34 = vpop.f32.mrf.mxu0  ;;  %v863_v23 = vpop.f32.mrf.mxu3  ;;  %v17915_v24 = vld [vmem:[#allocation11 + $0xdc] sm:$0xf0] }
  0xda   :  { %1127 = vmatpush.bf16.msrb.mxu1 %v21227_v15  ;;  %v824_v44 = vadd.f32 %v823_v34, %v20158_v42  ;;  %v12471_v34 = vld [vmem:[#allocation11 + $0x80] sm:$0xf] }
  0xdb   :  { %1141 = vmatpush.bf16.msrb.mxu2 %v21228_v47  ;;  %1155 = vmatpush.bf16.msrb.mxu3 %v21229_v32  ;;  %v13368_v47 = vor.u32 %v18131_v26, %v13367_v63  ;;  %v12824_v32 = vor.u32 %v17995_v35, %v12823_v28  ;;  %v12439_v35 = vld [vmem:[#allocation11 + $0x40] sm:$0xf] }
  0xdc   :  { %v849_v38 = vpop.f32.mrf.mxu2  ;;  %v12407_v61 = vld [vmem:[#allocation11] sm:$0xf]  ;;  %v12440_v63 = vor.u32 %v17899_v43, %v12439_v35 }
  0xdd   :  { %1114 = vmatpush.bf16.msrb.mxu0 %v21230_v18  ;;  %v20174_v45 = vadd.f32 %v849_v38, %v836_v16  ;;  %v17923_v18 = vld [vmem:[#allocation11 + $0x11c] sm:$0xf0]  ;;  %v12504_v38 = vor.u32 %v17915_v24, %v12503_v4 }
  0xde   :  { %1128 = vmatpush.bf16.msrb.mxu1 %v21231_v37  ;;  %v17987_v37 = vld [vmem:[#allocation11 + $0x31c] sm:$0xf0] }
  0xdf   :  { %1142 = vmatpush.bf16.msrb.mxu2 %v21232_v39  ;;  %1156 = vmatpush.bf16.msrb.mxu3 %v21233_v48  ;;  %1168 = vst [vmem:[#allocation20] sm:$0xff] %v20174_v45  ;;  %v12759_v16 = vld [vmem:[#allocation11 + $0x2c0] sm:$0xf] }
  0xe0   :  { %v12983_v26 = vld [vmem:[#allocation11 + $0x480] sm:$0xf] }
  0xe1   :  { %1115 = vmatpush.bf16.msrb.mxu0 %v21234_v10  ;;  %v13079_v10 = vld [vmem:[#allocation11 + $0x540] sm:$0xf] }
  0xe2   :  { %1129 = vmatpush.bf16.msrb.mxu1 %v21235_v36  ;;  %v18059_v36 = vld [vmem:[#allocation11 + $0x55c] sm:$0xf0] }
  0xe3   :  { %1143 = vmatpush.bf16.msrb.mxu2 %v21236_v53  ;;  %1157 = vmatpush.bf16.msrb.mxu3 %v21237_v20  ;;  %v13335_v53 = vld [vmem:[#allocation11 + $0x740] sm:$0xf] }
  0xe4   :  { %v18251_v35 = vld [vmem:[#allocation11 + $0xb5c] sm:$0xf0] }
  0xe5   :  { %1116 = vmatpush.bf16.msrb.mxu0 %v21238_v3  ;;  %v865_v3 = vpop.f32.mrf.mxu3 }
  0xe6   :  { %1130 = vmatpush.bf16.msrb.mxu1 %v21239_v7  ;;  %v13080_v7 = vor.u32 %v18059_v36, %v13079_v10  ;;  %v12951_v36 = vld [vmem:[#allocation11 + $0x440] sm:$0xf] }
  0xe7   :  { %1144 = vmatpush.bf16.msrb.mxu2 %v21240_v8  ;;  %1158 = vmatpush.bf16.msrb.mxu3 %v21241_v12  ;;  %v18123_v8 = vld [vmem:[#allocation11 + $0x75c] sm:$0xf0] }
  0xe9   :  { %1117 = vmatpush.bf16.msrb.mxu0 %v21242_v17  ;;  %v17979_v17 = vld [vmem:[#allocation11 + $0x2dc] sm:$0xf0] }
  0xea   :  { %1131 = vmatpush.bf16.msrb.mxu1 %v21243_v33  ;;  %v13336_v33 = vor.u32 %v18123_v8, %v13335_v53  ;;  %v12760_v56 = vor.u32 %v17979_v17, %v12759_v16  ;;  %v18027_v53 = vld [vmem:[#allocation11 + $0x45c] sm:$0xf0]  ;;  %v20200_v16 = vperm.slane %v20151_v54, 2 }
  0xeb   :  { %1145 = vmatpush.bf16.msrb.mxu2 %v20028_v2  ;;  %1159 = vmatpush.bf16.msrb.mxu3 %v20031_v31  ;;  %v837_v2 = vpop.f32.mrf.mxu1  ;;  %v12632_v31 = vor.u32 %v17947_v50, %v12631_v46  ;;  %v13047_v46 = vld [vmem:[#allocation11 + $0x500] sm:$0xf]  ;;  %v12952_v24 = vor.u32 %v18027_v53, %v12951_v36 }
  0xec   :  { %v838_v58 = vadd.f32 %v837_v2, %v824_v44  ;;  %v18051_v50 = vld [vmem:[#allocation11 + $0x51c] sm:$0xf0] }
  0xed   :  { %1118 = vmatpush.bf16.msrb.mxu0 %v20034_v30  ;;  %v18003_v30 = vld [vmem:[#allocation11 + $0x39c] sm:$0xf0]  ;;  %v13048_v2 = vor.u32 %v18051_v50, %v13047_v46 }
  0xee   :  { %1132 = vmatpush.bf16.msrb.mxu1 %v20038_v40  ;;  %v17931_v40 = vld [vmem:[#allocation11 + $0x15c] sm:$0xf0] }
  0xef   :  { %1146 = vmatpush.bf16.msrb.mxu2 %v20040_v60  ;;  %1160 = vmatpush.bf16.msrb.mxu3 %v20043_v1  ;;  %v20185_v60 = vperm.slane %v20151_v54, 1  ;;  %v851_v1 = vpop.f32.mrf.mxu2  ;;  %v12568_v41 = vor.u32 %v17931_v40, %v12567_v14  ;;  %v12472_v14 = vor.u32 %v17907_v57, %v12471_v34  ;;  %v18203_v8 = vld [vmem:[#allocation11 + $0x9dc] sm:$0xf0] }
  0xf0   :  { %v13911_v34 = vld [vmem:[#allocation11 + $0xbc0] sm:$0xf] }
  0xf1   :  { %1119 = vmatpush.bf16.msrb.mxu0 %v20046_v11  ;;  %v20188_v11 = vadd.f32 %v851_v1, %v838_v58  ;;  %v864_v15 = vadd.f32 %v863_v23, %v20185_v60  ;;  %v877_v39 = vpop.f32.mrf.mxu0  ;;  %v866_v44 = vadd.f32 %v865_v3, %v20185_v60  ;;  %v18115_v58 = vld [vmem:[#allocation11 + $0x71c] sm:$0xf0] }
  0xf2   :  { %1133 = vmatpush.bf16.msrb.mxu1 %v20050_v13  ;;  %v13399_v13 = vld [vmem:[#allocation11 + $0x7c0] sm:$0xf] }
  0xf3   :  { %1147 = vmatpush.bf16.msrb.mxu2 %v20052_v22  ;;  %1161 = vmatpush.bf16.msrb.mxu3 %v20055_v0  ;;  %v12856_v22 = vor.u32 %v18003_v30, %v12855_v9  ;;  %1172 = vst [vmem:[#allocation20 + $0x20] sm:$0xff] %v20188_v11  ;;  %v13400_v0 = vor.u32 %v18139_v55, %v13399_v13  ;;  %v13015_v23 = vld [vmem:[#allocation11 + $0x4c0] sm:$0xf] }
  0xf4   :  { %1120 = vmatmul.bf16.vlgmr.msrb.gmra.mxu0 %v20100_v29  ;;  %v878_v48 = vadd.f32 %v877_v39, %v864_v15  ;;  %v18043_v1 = vld [vmem:[#allocation11 + $0x4dc] sm:$0xf0] }
  0xf5   :  { %5882 = vmatpush.bf16.msra.mxu0 %v12632_v31  ;;  %1134 = vmatmul.bf16.vlgmr.msrb.gmra.mxu1 %v20094_v21  ;;  %v12535_v21 = vld [vmem:[#allocation11 + $0x100] sm:$0xf]  ;;  %v13016_v51 = vor.u32 %v18043_v1, %v13015_v23 }
  0xf6   :  { %5896 = vmatpush.bf16.msra.mxu1 %v12888_v62  ;;  %1148 = vmatmul.bf16.vlgmr.msrb.gmra.mxu2 %v20098_v25  ;;  %v12791_v25 = vld [vmem:[#allocation11 + $0x300] sm:$0xf]  ;;  %v12536_v19 = vor.u32 %v17923_v18, %v12535_v21 }
  0xf7   :  { %1162 = vmatmul.bf16.vlgmr.msrb.gmra.mxu3 %v20100_v29  ;;  %5910 = vmatpush.bf16.msra.mxu2 %v13144_v52  ;;  %v891_v29 = vpop.f32.mrf.mxu1  ;;  %v12792_v20 = vor.u32 %v17987_v37, %v12791_v25  ;;  %v13303_v31 = vld [vmem:[#allocation11 + $0x700] sm:$0xf] }
  0xf8   :  { %5924 = vmatpush.bf16.msra.mxu3 %v13400_v0  ;;  %v892_v12 = vadd.f32 %v891_v29, %v878_v48  ;;  %v12727_v62 = vld [vmem:[#allocation11 + $0x280] sm:$0xf]  ;;  %v13304_v6 = vor.u32 %v18115_v58, %v13303_v31 }
  0xf9   :  { %5883 = vmatpush.bf16.msra.mxu0 %v12600_v27  ;;  %v879_v9 = vpop.f32.mrf.mxu0  ;;  %v13271_v27 = vld [vmem:[#allocation11 + $0x6c0] sm:$0xf]  ;;  %v12728_v28 = vor.u32 %v17971_v5, %v12727_v62  ;;  %v905_v29 = vpop.f32.mrf.mxu2 }
  0xfa   :  { %5897 = vmatpush.bf16.msra.mxu1 %v12856_v22  ;;  %1169 = vst [vmem:[#allocation20 + $0x8] sm:$0xff] %v892_v12  ;;  %v880_v30 = vadd.f32 %v879_v9, %v866_v44  ;;  %v18107_v13 = vld [vmem:[#allocation11 + $0x6dc] sm:$0xf0] }
  0xfb   :  { %5911 = vmatpush.bf16.msra.mxu2 %v13112_v49  ;;  %v12695_v52 = vld [vmem:[#allocation11 + $0x240] sm:$0xf]  ;;  %v13272_v59 = vor.u32 %v18107_v13, %v13271_v27  ;;  %v919_v10 = vpop.f32.mrf.mxu3 }
  0xfc   :  { %5925 = vmatpush.bf16.msra.mxu3 %v13368_v47  ;;  %v17963_v55 = vld [vmem:[#allocation11 + $0x25c] sm:$0xf0] }
  0xfd   :  { %5884 = vmatpush.bf16.msra.mxu0 %v12568_v41  ;;  %v18035_v49 = vld [vmem:[#allocation11 + $0x49c] sm:$0xf0]  ;;  %v1184_v41 = vpack.c.bf16 %v892_v12, %v20174_v45  ;;  %v12696_v15 = vor.u32 %v17963_v55, %v12695_v52 }
  0xfe   :  { %5898 = vmatpush.bf16.msra.mxu1 %v12824_v32  ;;  %v17891_v47 = vld [vmem:[#allocation11 + $0x1c] sm:$0xf0]  ;;  %v12984_v32 = vor.u32 %v18035_v49, %v12983_v26  ;;  %v20210_v26 = vperm.slane %v20151_v54, 3 }
  0xff   :  { %5912 = vmatpush.bf16.msra.mxu2 %v13080_v7  ;;  %v893_v40 = vpop.f32.mrf.mxu1  ;;  %v13239_v21 = vld [vmem:[#allocation11 + $0x680] sm:$0xf]  ;;  %v1201_v12 = vunpack.c.h.b16 %v1184_v41 }
 0x100   :  { %5926 = vmatpush.bf16.msra.mxu3 %v13336_v33  ;;  %v894_v22 = vadd.f32 %v893_v40, %v880_v30  ;;  %v18099_v18 = vld [vmem:[#allocation11 + $0x69c] sm:$0xf0] }
 0x101   :  { %5885 = vmatpush.bf16.msra.mxu0 %v12536_v19  ;;  %v12663_v25 = vld [vmem:[#allocation11 + $0x200] sm:$0xf]  ;;  %v13240_v39 = vor.u32 %v18099_v18, %v13239_v21  ;;  %v907_v13 = vpop.f32.mrf.mxu2 }
 0x102   :  { %5899 = vmatpush.bf16.msra.mxu1 %v12792_v20  ;;  %1173 = vst [vmem:[#allocation20 + $0x28] sm:$0xff] %v894_v22  ;;  %v1186_v0 = vpack.c.bf16 %v894_v22, %v20188_v11  ;;  %v17955_v37 = vld [vmem:[#allocation11 + $0x21c] sm:$0xf0]  ;;  %v12408_v11 = vor.u32 %v17891_v47, %v12407_v61  ;;  %v1200_v20 = vunpack.c.l.b16 %v1184_v41  ;;  %v908_v41 = vadd.f32 %v907_v13, %v20200_v16 }
 0x103   :  { %5913 = vmatpush.bf16.msra.mxu2 %v13048_v2  ;;  %v13207_v45 = vld [vmem:[#allocation11 + $0x640] sm:$0xf]  ;;  %v12664_v4 = vor.u32 %v17955_v37, %v12663_v25  ;;  %v921_v22 = vpop.f32.mrf.mxu3 }
 0x104   :  { %5927 = vmatpush.bf16.msra.mxu3 %v13304_v6  ;;  %v1204_v48 = vunpack.c.l.b16 %v1186_v0  ;;  %v1205_v19 = vunpack.c.h.b16 %v1186_v0  ;;  %v18091_v3 = vld [vmem:[#allocation11 + $0x65c] sm:$0xf0]  ;;  %v906_v6 = vadd.f32 %v905_v29, %v20200_v16 }
 0x105   :  { %5886 = vmatpush.bf16.msra.mxu0 %v12504_v38  ;;  %v13655_v7 = vld [vmem:[#allocation11 + $0x9c0] sm:$0xf]  ;;  %v13208_v17 = vor.u32 %v18091_v3, %v13207_v45 }
 0x106   :  { %5900 = vmatpush.bf16.msra.mxu1 %v12760_v56  ;;  %v13656_v33 = vor.u32 %v18203_v8, %v13655_v7  ;;  %v18267_v38 = vld [vmem:[#allocation11 + $0xbdc] sm:$0xf0]  ;;  %v20202_v44 = vpack.c.b16 %v1204_v48, %v1200_v20  ;;  %v20204_v50 = vpack.c.b16 %v1205_v19, %v1201_v12  ;;  %v922_v48 = vadd.f32 %v921_v22, %v908_v41 }
 0x107   :  { %5914 = vmatpush.bf16.msra.mxu2 %v13016_v51  ;;  %v13912_v46 = vor.u32 %v18267_v38, %v13911_v34  ;;  %v12919_v56 = vld [vmem:[#allocation11 + $0x400] sm:$0xf]  ;;  %v920_v51 = vadd.f32 %v919_v10, %v906_v6 }
 0x108   :  { %5928 = vmatpush.bf16.msra.mxu3 %v13272_v59  ;;  %v18019_v57 = vld [vmem:[#allocation11 + $0x41c] sm:$0xf0] }
 0x109   :  { %5887 = vmatpush.bf16.msra.mxu0 %v12472_v14  ;;  %v13175_v2 = vld [vmem:[#allocation11 + $0x600] sm:$0xf]  ;;  %v12920_v31 = vor.u32 %v18019_v57, %v12919_v56 }
 0x10a   :  { %5901 = vmatpush.bf16.msra.mxu1 %v12728_v28  ;;  %v18083_v58 = vld [vmem:[#allocation11 + $0x61c] sm:$0xf0] }
 0x10b   :  { %5915 = vmatpush.bf16.msra.mxu2 %v12984_v32  ;;  %v13623_v62 = vld [vmem:[#allocation11 + $0x980] sm:$0xf]  ;;  %v13176_v9 = vor.u32 %v18083_v58, %v13175_v2 }
 0x10c   :  { %5929 = vmatpush.bf16.msra.mxu3 %v13240_v39  ;;  %v18195_v5 = vld [vmem:[#allocation11 + $0x99c] sm:$0xf0] }
 0x10d   :  { %5888 = vmatpush.bf16.msra.mxu0 %v12440_v63  ;;  %v13624_v30 = vor.u32 %v18195_v5, %v13623_v62  ;;  %v13879_v14 = vld [vmem:[#allocation11 + $0xb80] sm:$0xf] }
 0x10e   :  { %5902 = vmatpush.bf16.msra.mxu1 %v12696_v15  ;;  %v18259_v40 = vld [vmem:[#allocation11 + $0xb9c] sm:$0xf0] }
 0x10f   :  { %5916 = vmatpush.bf16.msra.mxu2 %v12952_v24  ;;  %v13880_v23 = vor.u32 %v18259_v40, %v13879_v14  ;;  %v13591_v1 = vld [vmem:[#allocation11 + $0x940] sm:$0xf] }
 0x110   :  { %5930 = vmatpush.bf16.msra.mxu3 %v13208_v17  ;;  %v18187_v27 = vld [vmem:[#allocation11 + $0x95c] sm:$0xf0] }
 0x111   :  { %5889 = vmatpush.bf16.msra.mxu0 %v12408_v11  ;;  %v13847_v28 = vld [vmem:[#allocation11 + $0xb40] sm:$0xf]  ;;  %v13592_v43 = vor.u32 %v18187_v27, %v13591_v1  ;;  %v933_v63 = vpop.f32.mrf.mxu0 }
 0x112   :  { %5903 = vmatpush.bf16.msra.mxu1 %v12664_v4  ;;  %v13848_v52 = vor.u32 %v18251_v35, %v13847_v28  ;;  %v13559_v55 = vld [vmem:[#allocation11 + $0x900] sm:$0xf]  ;;  %v20213_v15 = vadd.f32 %v933_v63, %v920_v51  ;;  %v947_v18 = vpop.f32.mrf.mxu1 }
 0x113   :  { %5917 = vmatpush.bf16.msra.mxu2 %v12920_v31  ;;  %v18179_v59 = vld [vmem:[#allocation11 + $0x91c] sm:$0xf0]  ;;  %v948_v39 = vadd.f32 %v947_v18, %v20210_v26 }
 0x114   :  { %5890 = vmatmul.bf16.vlgmr.msra.gmra.mxu0 %v20202_v44  ;;  %5931 = vmatpush.bf16.msra.mxu3 %v13176_v9  ;;  %v13815_v61 = vld [vmem:[#allocation11 + $0xb00] sm:$0xf]  ;;  %v13560_v49 = vor.u32 %v18179_v59, %v13559_v55  ;;  %1170 = vst [vmem:[#allocation20 + $0x10] sm:$0xff] %v20213_v15 }
 0x115   :  { %5938 = vmatpush.bf16.msrb.mxu0 %v13656_v33  ;;  %5904 = vmatmul.bf16.vlgmr.msra.gmra.mxu1 %v20204_v50  ;;  %v18243_v0 = vld [vmem:[#allocation11 + $0xb1c] sm:$0xf0] }
 0x116   :  { %5952 = vmatpush.bf16.msrb.mxu1 %v13912_v46  ;;  %v13816_v47 = vor.u32 %v18243_v0, %v13815_v61  ;;  %v13527_v32 = vld [vmem:[#allocation11 + $0x8c0] sm:$0xf] }
 0x117   :  { %v18171_v21 = vld [vmem:[#allocation11 + $0x8dc] sm:$0xf0] }
 0x118   :  { %v13783_v25 = vld [vmem:[#allocation11 + $0xac0] sm:$0xf]  ;;  %v13528_v54 = vor.u32 %v18171_v21, %v13527_v32 }
 0x119   :  { %5939 = vmatpush.bf16.msrb.mxu0 %v13624_v30  ;;  %v18235_v37 = vld [vmem:[#allocation11 + $0xadc] sm:$0xf0]  ;;  %v961_v53 = vpop.f32.mrf.mxu2  ;;  %v935_v4 = vpop.f32.mrf.mxu0 }
 0x11a   :  { %5953 = vmatpush.bf16.msrb.mxu1 %v13880_v23  ;;  %v13784_v19 = vor.u32 %v18235_v37, %v13783_v25  ;;  %v13495_v11 = vld [vmem:[#allocation11 + $0x880] sm:$0xf]  ;;  %v962_v20 = vadd.f32 %v961_v53, %v948_v39  ;;  %v936_v3 = vadd.f32 %v935_v4, %v922_v48  ;;  %v949_v34 = vpop.f32.mrf.mxu1 }
 0x11b   :  { %v18163_v29 = vld [vmem:[#allocation11 + $0x89c] sm:$0xf0]  ;;  %v975_v45 = vpop.f32.mrf.mxu3  ;;  %v950_v58 = vadd.f32 %v949_v34, %v20210_v26 }
 0x11c   :  { %v13751_v10 = vld [vmem:[#allocation11 + $0xa80] sm:$0xf]  ;;  %v13496_v24 = vor.u32 %v18163_v29, %v13495_v11  ;;  %v976_v33 = vadd.f32 %v975_v45, %v962_v20  ;;  %1174 = vst [vmem:[#allocation20 + $0x30] sm:$0xff] %v936_v3 }
 0x11d   :  { %5940 = vmatpush.bf16.msrb.mxu0 %v13592_v43  ;;  %v18227_v36 = vld [vmem:[#allocation11 + $0xa9c] sm:$0xf0] }
 0x11e   :  { %5954 = vmatpush.bf16.msrb.mxu1 %v13848_v52  ;;  %v13752_v7 = vor.u32 %v18227_v36, %v13751_v10  ;;  %v13463_v8 = vld [vmem:[#allocation11 + $0x840] sm:$0xf]  ;;  %1171 = vst [vmem:[#allocation20 + $0x18] sm:$0xff] %v976_v33  ;;  %v1185_v55 = vpack.c.bf16 %v976_v33, %v20213_v15 }
 0x11f   :  { %v18155_v12 = vld [vmem:[#allocation11 + $0x85c] sm:$0xf0] }
 0x120   :  { %v13719_v17 = vld [vmem:[#allocation11 + $0xa40] sm:$0xf]  ;;  %v13464_v62 = vor.u32 %v18155_v12, %v13463_v8  ;;  %v1202_v21 = vunpack.c.l.b16 %v1185_v55  ;;  %v1203_v18 = vunpack.c.h.b16 %v1185_v55 }
 0x121   :  { %5941 = vmatpush.bf16.msrb.mxu0 %v13560_v49  ;;  %v18219_v38 = vld [vmem:[#allocation11 + $0xa5c] sm:$0xf0]  ;;  %v963_v27 = vpop.f32.mrf.mxu2 }
 0x122   :  { %5955 = vmatpush.bf16.msrb.mxu1 %v13816_v47  ;;  %v14167_v46 = vld [vmem:[#allocation11 + $0xdc0] sm:$0xf]  ;;  %v13720_v6 = vor.u32 %v18219_v38, %v13719_v17  ;;  %v964_v51 = vadd.f32 %v963_v27, %v950_v58 }
 0x123   :  { %v18331_v56 = vld [vmem:[#allocation11 + $0xddc] sm:$0xf0]  ;;  %v977_v28 = vpop.f32.mrf.mxu3 }
 0x124   :  { %v14168_v57 = vor.u32 %v18331_v56, %v14167_v46  ;;  %v14423_v2 = vld [vmem:[#allocation11 + $0xfc0] sm:$0xf]  ;;  %v978_v59 = vadd.f32 %v977_v28, %v964_v51 }
 0x125   :  { %5942 = vmatpush.bf16.msrb.mxu0 %v13528_v54  ;;  %v18395_v31 = vld [vmem:[#allocation11 + $0xfdc] sm:$0xf0] }
 0x126   :  { %5956 = vmatpush.bf16.msrb.mxu1 %v13784_v19  ;;  %v14424_v5 = vor.u32 %v18395_v31, %v14423_v2  ;;  %v13431_v9 = vld [vmem:[#allocation11 + $0x800] sm:$0xf]  ;;  %5966 = vmatpush.bf16.msrb.mxu2 %v14168_v57  ;;  %1175 = vst [vmem:[#allocation20 + $0x38] sm:$0xff] %v978_v59  ;;  %v1187_v49 = vpack.c.bf16 %v978_v59, %v936_v3 }
 0x127   :  { %v18147_v30 = vld [vmem:[#allocation11 + $0x81c] sm:$0xf0]  ;;  %11934 = dma.vmem_to_hbm [thread:$0]  %s11927_s17, 1024, %s11929_s18, [#allocation4], %s19621_s28, %s19621_s28, %s19622_s29  }
 0x128   :  { %v13687_v14 = vld [vmem:[#allocation11 + $0xa00] sm:$0xf]  ;;  %5980 = vmatpush.bf16.msrb.mxu3 %v14424_v5  ;;  %v13432_v13 = vor.u32 %v18147_v30, %v13431_v9  ;;  %v1206_v25 = vunpack.c.l.b16 %v1187_v49  ;;  %v1207_v37 = vunpack.c.h.b16 %v1187_v49 }
 0x129   :  { %5943 = vmatpush.bf16.msrb.mxu0 %v13496_v24  ;;  %v18211_v40 = vld [vmem:[#allocation11 + $0xa1c] sm:$0xf0] }
 0x12a   :  { %5957 = vmatpush.bf16.msrb.mxu1 %v13752_v7  ;;  %v14679_v23 = vld [vmem:[#allocation11 + $0x11c0] sm:$0xf]  ;;  %v13688_v22 = vor.u32 %v18211_v40, %v13687_v14  ;;  %v20219_v48 = vpack.c.b16 %v1206_v25, %v1202_v21  ;;  %v20221_v19 = vpack.c.b16 %v1207_v37, %v1203_v18 }
 0x12b   :  { %v18459_v1 = vld [vmem:[#allocation11 + $0x11dc] sm:$0xf0] }
 0x12c   :  { %v14935_v35 = vld [vmem:[#allocation11 + $0x13c0] sm:$0xf]  ;;  %v14680_v52 = vor.u32 %v18459_v1, %v14679_v23  ;;  %5918 = vmatmul.bf16.vlgmr.msra.gmra.mxu2 %v20219_v48  ;;  %5932 = vmatmul.bf16.vlgmr.msra.gmra.mxu3 %v20221_v19 }
 0x12d   :  { %v18523_v43 = vld [vmem:[#allocation11 + $0x13dc] sm:$0xf0]  ;;  %5944 = vmatpush.bf16.msrb.mxu0 %v13464_v62 }
 0x12e   :  { %5958 = vmatpush.bf16.msrb.mxu1 %v13720_v6  ;;  %v14936_v61 = vor.u32 %v18523_v43, %v14935_v35  ;;  %v14647_v0 = vld [vmem:[#allocation11 + $0x1180] sm:$0xf] }
 0x12f   :  { %v18451_v63 = vld [vmem:[#allocation11 + $0x119c] sm:$0xf0] }
 0x130   :  { %v14903_v41 = vld [vmem:[#allocation11 + $0x1380] sm:$0xf]  ;;  %v14648_v32 = vor.u32 %v18451_v63, %v14647_v0 }
 0x131   :  { %5945 = vmatpush.bf16.msrb.mxu0 %v13432_v13  ;;  %v18515_v47 = vld [vmem:[#allocation11 + $0x139c] sm:$0xf0]  ;;  %v1009_v17 = vpop.f32.mrf.mxu0 }
 0x132   :  { %5959 = vmatpush.bf16.msrb.mxu1 %v13688_v22  ;;  %v14615_v39 = vld [vmem:[#allocation11 + $0x1140] sm:$0xf]  ;;  %v14904_v15 = vor.u32 %v18515_v47, %v14903_v41  ;;  %v1010_v38 = vadd.f32 %v1009_v17, %v20158_v42  ;;  %v1023_v46 = vpop.f32.mrf.mxu1 }
 0x133   :  { %v18443_v54 = vld [vmem:[#allocation11 + $0x115c] sm:$0xf0] }
 0x134   :  { %v14871_v11 = vld [vmem:[#allocation11 + $0x1340] sm:$0xf]  ;;  %v14616_v10 = vor.u32 %v18443_v54, %v14615_v39  ;;  %v1024_v14 = vadd.f32 %v1023_v46, %v1010_v38 }
 0x135   :  { %5994 = vmatpush.bf16.msra.mxu0 %v14680_v52  ;;  %v18507_v29 = vld [vmem:[#allocation11 + $0x135c] sm:$0xf0] }
 0x136   :  { %6008 = vmatpush.bf16.msra.mxu1 %v14936_v61  ;;  %v14872_v36 = vor.u32 %v18507_v29, %v14871_v11  ;;  %v14135_v53 = vld [vmem:[#allocation11 + $0xd80] sm:$0xf] }
 0x137   :  { %v18323_v45 = vld [vmem:[#allocation11 + $0xd9c] sm:$0xf0] }
 0x138   :  { %v14391_v20 = vld [vmem:[#allocation11 + $0xf80] sm:$0xf]  ;;  %v14136_v4 = vor.u32 %v18323_v45, %v14135_v53 }
 0x139   :  { %5995 = vmatpush.bf16.msra.mxu0 %v14648_v32  ;;  %v18387_v24 = vld [vmem:[#allocation11 + $0xf9c] sm:$0xf0]  ;;  %v1037_v13 = vpop.f32.mrf.mxu2  ;;  %v1011_v61 = vpop.f32.mrf.mxu0 }
 0x13a   :  { %6009 = vmatpush.bf16.msra.mxu1 %v14904_v15  ;;  %v14392_v3 = vor.u32 %v18387_v24, %v14391_v20  ;;  %v14583_v7 = vld [vmem:[#allocation11 + $0x1100] sm:$0xf]  ;;  %5967 = vmatpush.bf16.msrb.mxu2 %v14136_v4  ;;  %v20226_v0 = vadd.f32 %v1037_v13, %v1024_v14  ;;  %v1012_v41 = vadd.f32 %v1011_v61, %v20158_v42  ;;  %v1025_v39 = vpop.f32.mrf.mxu1 }
 0x13b   :  { %v18435_v8 = vld [vmem:[#allocation11 + $0x111c] sm:$0xf0]  ;;  %v1051_v14 = vpop.f32.mrf.mxu3 }
 0x13c   :  { %v14839_v12 = vld [vmem:[#allocation11 + $0x1300] sm:$0xf]  ;;  %v14584_v33 = vor.u32 %v18435_v8, %v14583_v7  ;;  %5981 = vmatpush.bf16.msrb.mxu3 %v14392_v3  ;;  %1176 = vst [vmem:[#allocation21] sm:$0xff] %v20226_v0 }
 0x13d   :  { %5996 = vmatpush.bf16.msra.mxu0 %v14616_v10  ;;  %v18499_v34 = vld [vmem:[#allocation11 + $0x131c] sm:$0xf0]  ;;  %v1026_v10 = vadd.f32 %v1025_v39, %v1012_v41 }
 0x13e   :  { %6010 = vmatpush.bf16.msra.mxu1 %v14872_v36  ;;  %v14840_v56 = vor.u32 %v18499_v34, %v14839_v12  ;;  %v14103_v57 = vld [vmem:[#allocation11 + $0xd40] sm:$0xf] }
 0x13f   :  { %v18315_v2 = vld [vmem:[#allocation11 + $0xd5c] sm:$0xf0] }
 0x140   :  { %v14359_v31 = vld [vmem:[#allocation11 + $0xf40] sm:$0xf]  ;;  %v14104_v58 = vor.u32 %v18315_v2, %v14103_v57 }
 0x141   :  { %v18379_v62 = vld [vmem:[#allocation11 + $0xf5c] sm:$0xf0]  ;;  %5997 = vmatpush.bf16.msra.mxu0 %v14584_v33  ;;  %v1039_v7 = vpop.f32.mrf.mxu2 }
 0x142   :  { %v14360_v5 = vor.u32 %v18379_v62, %v14359_v31  ;;  %v14551_v6 = vld [vmem:[#allocation11 + $0x10c0] sm:$0xf]  ;;  %5968 = vmatpush.bf16.msrb.mxu2 %v14104_v58  ;;  %6011 = vmatpush.bf16.msra.mxu1 %v14840_v56  ;;  %v20230_v34 = vadd.f32 %v1039_v7, %v1026_v10 }
 0x143   :  { %v18427_v9 = vld [vmem:[#allocation11 + $0x10dc] sm:$0xf0] }
 0x144   :  { %v14807_v30 = vld [vmem:[#allocation11 + $0x12c0] sm:$0xf]  ;;  %v14552_v40 = vor.u32 %v18427_v9, %v14551_v6  ;;  %5982 = vmatpush.bf16.msrb.mxu3 %v14360_v5  ;;  %1180 = vst [vmem:[#allocation21 + $0x20] sm:$0xff] %v20230_v34 }
 0x145   :  { %v18491_v23 = vld [vmem:[#allocation11 + $0x12dc] sm:$0xf0] }
 0x146   :  { %v14808_v1 = vor.u32 %v18491_v23, %v14807_v30  ;;  %v14071_v27 = vld [vmem:[#allocation11 + $0xd00] sm:$0xf]  ;;  %5998 = vmatpush.bf16.msra.mxu0 %v14552_v40 }
 0x147   :  { %v18307_v28 = vld [vmem:[#allocation11 + $0xd1c] sm:$0xf0] }
 0x148   :  { %v14327_v35 = vld [vmem:[#allocation11 + $0xf00] sm:$0xf]  ;;  %v14072_v43 = vor.u32 %v18307_v28, %v14071_v27  ;;  %6012 = vmatpush.bf16.msra.mxu1 %v14808_v1 }
 0x149   :  { %v18371_v51 = vld [vmem:[#allocation11 + $0xf1c] sm:$0xf0] }
 0x14a   :  { %v14328_v22 = vor.u32 %v18371_v51, %v14327_v35  ;;  %v14519_v52 = vld [vmem:[#allocation11 + $0x1080] sm:$0xf]  ;;  %5969 = vmatpush.bf16.msrb.mxu2 %v14072_v43 }
 0x14b   :  { %v18419_v55 = vld [vmem:[#allocation11 + $0x109c] sm:$0xf0] }
 0x14c   :  { %v14775_v59 = vld [vmem:[#allocation11 + $0x1280] sm:$0xf]  ;;  %v14520_v63 = vor.u32 %v18419_v55, %v14519_v52  ;;  %5983 = vmatpush.bf16.msrb.mxu3 %v14328_v22 }
 0x14d   :  { %v18483_v49 = vld [vmem:[#allocation11 + $0x129c] sm:$0xf0] }
 0x14e   :  { %v14776_v47 = vor.u32 %v18483_v49, %v14775_v59  ;;  %v14039_v32 = vld [vmem:[#allocation11 + $0xcc0] sm:$0xf]  ;;  %5999 = vmatpush.bf16.msra.mxu0 %v14520_v63  ;;  %v1052_v59 = vadd.f32 %v1051_v14, %v20185_v60 }
 0x14f   :  { %v18299_v21 = vld [vmem:[#allocation11 + $0xcdc] sm:$0xf0] }
 0x150   :  { %v14295_v18 = vld [vmem:[#allocation11 + $0xec0] sm:$0xf]  ;;  %v14040_v25 = vor.u32 %v18299_v21, %v14039_v32  ;;  %6013 = vmatpush.bf16.msra.mxu1 %v14776_v47 }
 0x151   :  { %v18363_v37 = vld [vmem:[#allocation11 + $0xedc] sm:$0xf0]  ;;  %v1065_v41 = vpop.f32.mrf.mxu0 }
 0x152   :  { %v14296_v54 = vor.u32 %v18363_v37, %v14295_v18  ;;  %v14487_v15 = vld [vmem:[#allocation11 + $0x1040] sm:$0xf]  ;;  %5970 = vmatpush.bf16.msrb.mxu2 %v14040_v25  ;;  %v1066_v18 = vadd.f32 %v1065_v41, %v1052_v59  ;;  %v1079_v25 = vpop.f32.mrf.mxu1 }
 0x153   :  { %v18411_v11 = vld [vmem:[#allocation11 + $0x105c] sm:$0xf0] }
 0x154   :  { %v14743_v29 = vld [vmem:[#allocation11 + $0x1240] sm:$0xf]  ;;  %v14488_v36 = vor.u32 %v18411_v11, %v14487_v15  ;;  %5984 = vmatpush.bf16.msrb.mxu3 %v14296_v54  ;;  %v1053_v54 = vpop.f32.mrf.mxu3  ;;  %v1080_v11 = vadd.f32 %v1079_v25, %v1066_v18 }
 0x155   :  { %v18475_v42 = vld [vmem:[#allocation11 + $0x125c] sm:$0xf0]  ;;  %v1054_v10 = vadd.f32 %v1053_v54, %v20185_v60 }
 0x156   :  { %v14744_v53 = vor.u32 %v18475_v42, %v14743_v29  ;;  %v14007_v45 = vld [vmem:[#allocation11 + $0xc80] sm:$0xf]  ;;  %6000 = vmatpush.bf16.msra.mxu0 %v14488_v36  ;;  %1177 = vst [vmem:[#allocation21 + $0x8] sm:$0xff] %v1080_v11 }
 0x157   :  { %v18291_v20 = vld [vmem:[#allocation11 + $0xc9c] sm:$0xf0] }
 0x158   :  { %v14263_v4 = vld [vmem:[#allocation11 + $0xe80] sm:$0xf]  ;;  %v14008_v24 = vor.u32 %v18291_v20, %v14007_v45  ;;  %6014 = vmatpush.bf16.msra.mxu1 %v14744_v53 }
 0x159   :  { %v18355_v3 = vld [vmem:[#allocation11 + $0xe9c] sm:$0xf0] }
 0x15a   :  { %v14264_v8 = vor.u32 %v18355_v3, %v14263_v4  ;;  %v14455_v12 = vld [vmem:[#allocation11 + $0x1000] sm:$0xf]  ;;  %5971 = vmatpush.bf16.msrb.mxu2 %v14008_v24  ;;  %v1067_v4 = vpop.f32.mrf.mxu0 }
 0x15b   :  { %v18403_v17 = vld [vmem:[#allocation11 + $0x101c] sm:$0xf0] }
 0x15c   :  { %v14711_v33 = vld [vmem:[#allocation11 + $0x1200] sm:$0xf]  ;;  %v14456_v38 = vor.u32 %v18403_v17, %v14455_v12  ;;  %5985 = vmatpush.bf16.msrb.mxu3 %v14264_v8  ;;  %v1068_v8 = vadd.f32 %v1067_v4, %v1054_v10  ;;  %v1081_v12 = vpop.f32.mrf.mxu1  ;;  %v12537_v4 = vld [vmem:[#allocation11 + $0x120] sm:$0xf0] }
 0x15d   :  { %v18467_v46 = vld [vmem:[#allocation11 + $0x121c] sm:$0xf0] }
 0x15e   :  { %v14712_v56 = vor.u32 %v18467_v46, %v14711_v33  ;;  %v13975_v57 = vld [vmem:[#allocation11 + $0xc40] sm:$0xf]  ;;  %6001 = vmatpush.bf16.msra.mxu0 %v14456_v38  ;;  %v1188_v46 = vpack.c.bf16 %v1080_v11, %v20226_v0  ;;  %v1082_v60 = vadd.f32 %v1081_v12, %v1068_v8  ;;  %v17885_v8 = vld [vmem:[#allocation7 + $0xc] sm:$0xf0] }
 0x15f   :  { %v18283_v2 = vld [vmem:[#allocation11 + $0xc5c] sm:$0xf0] }
 0x160   :  { %v14231_v31 = vld [vmem:[#allocation11 + $0xe40] sm:$0xf]  ;;  %v13976_v58 = vor.u32 %v18283_v2, %v13975_v57  ;;  %6015 = vmatpush.bf16.msra.mxu1 %v14712_v56  ;;  %v17943_v56 = vld [vmem:[#allocation11 + $0x1c4] sm:$0xf]  ;;  %1181 = vst [vmem:[#allocation21 + $0x28] sm:$0xff] %v1082_v60 }
 0x161   :  { %v18347_v62 = vld [vmem:[#allocation11 + $0xe5c] sm:$0xf0]  ;;  %v12633_v57 = vld [vmem:[#allocation11 + $0x1e0] sm:$0xf0] }
 0x162   :  { %v14232_v5 = vor.u32 %v18347_v62, %v14231_v31  ;;  %5972 = vmatpush.bf16.msrb.mxu2 %v13976_v58  ;;  %v13943_v6 = vld [vmem:[#allocation11 + $0xc00] sm:$0xf]  ;;  %v18007_v2 = vld [vmem:[#allocation11 + $0x3c4] sm:$0xf] }
 0x163   :  { %v18275_v9 = vld [vmem:[#allocation11 + $0xc1c] sm:$0xf0] }
 0x164   :  { %v14199_v30 = vld [vmem:[#allocation11 + $0xe00] sm:$0xf]  ;;  %5986 = vmatpush.bf16.msrb.mxu3 %v14232_v5  ;;  %v13944_v40 = vor.u32 %v18275_v9, %v13943_v6  ;;  %v1190_v5 = vpack.c.bf16 %v1082_v60, %v20230_v34  ;;  %v12889_v6 = vld [vmem:[#allocation11 + $0x3e0] sm:$0xf0]  ;;  %v12393_v60 = vld [vmem:[#allocation7 + $0x10] sm:$0xf0] }
 0x165   :  { %v18339_v23 = vld [vmem:[#allocation11 + $0xe1c] sm:$0xf0] }
 0x166   :  { %v15191_v1 = vld [vmem:[#allocation11 + $0x15c0] sm:$0xf]  ;;  %v14200_v28 = vor.u32 %v18339_v23, %v14199_v30  ;;  %5973 = vmatpush.bf16.msrb.mxu2 %v13944_v40  ;;  %v1220_v40 = vunpack.c.l.b16 %v1188_v46  ;;  %v1221_v23 = vunpack.c.h.b16 %v1188_v46  ;;  %v1225_v0 = vunpack.c.h.b16 %v1190_v5 }
 0x167   :  { %v18587_v27 = vld [vmem:[#allocation11 + $0x15dc] sm:$0xf0] }
 0x168   :  { %v15192_v35 = vor.u32 %v18587_v27, %v15191_v1  ;;  %v15447_v43 = vld [vmem:[#allocation11 + $0x17c0] sm:$0xf]  ;;  %5987 = vmatpush.bf16.msrb.mxu3 %v14200_v28  ;;  %v1224_v1 = vunpack.c.l.b16 %v1190_v5  ;;  %v17935_v27 = vld [vmem:[#allocation11 + $0x184] sm:$0xf]  ;;  %v20239_v34 = vpack.c.b16 %v1225_v0, %v1221_v23 }
 0x169   :  { %v18651_v51 = vld [vmem:[#allocation11 + $0x17dc] sm:$0xf0]  ;;  %v12601_v28 = vld [vmem:[#allocation11 + $0x1a0] sm:$0xf0] }
 0x16a   :  { %v15448_v13 = vor.u32 %v18651_v51, %v15447_v43  ;;  %6022 = vmatpush.bf16.msra.mxu2 %v15192_v35  ;;  %v15159_v22 = vld [vmem:[#allocation11 + $0x1580] sm:$0xf]  ;;  %v12636_v35 = vor.u32 %v17943_v56, %v12633_v57  ;;  %v12892_v43 = vor.u32 %v18007_v2, %v12889_v6  ;;  %v17999_v51 = vld [vmem:[#allocation11 + $0x384] sm:$0xf]  ;;  %5960 = vmatmul.bf16.vlgmr.msrb.gmra.mxu1 %v20239_v34 }
 0x16b   :  { %v18579_v52 = vld [vmem:[#allocation11 + $0x159c] sm:$0xf0]  ;;  %v12604_v18 = vor.u32 %v17935_v27, %v12601_v28  ;;  %v17911_v56 = vld [vmem:[#allocation11 + $0xc4] sm:$0xf] }
 0x16c   :  { %v15415_v55 = vld [vmem:[#allocation11 + $0x1780] sm:$0xf]  ;;  %6036 = vmatpush.bf16.msra.mxu3 %v15448_v13  ;;  %v15160_v61 = vor.u32 %v18579_v52, %v15159_v22  ;;  %v12857_v13 = vld [vmem:[#allocation11 + $0x3a0] sm:$0xf0]  ;;  %v20237_v52 = vpack.c.b16 %v1224_v1, %v1220_v40  ;;  %6064 = vmatpush.bf16.msrb.mxu1 %v12892_v43 }
 0x16d   :  { %v18643_v63 = vld [vmem:[#allocation11 + $0x179c] sm:$0xf0]  ;;  %v12860_v25 = vor.u32 %v17999_v51, %v12857_v13  ;;  %v17903_v1 = vld [vmem:[#allocation11 + $0x84] sm:$0xf] }
 0x16e   :  { %v15416_v49 = vor.u32 %v18643_v63, %v15415_v55  ;;  %6023 = vmatpush.bf16.msra.mxu2 %v15160_v61  ;;  %v15127_v47 = vld [vmem:[#allocation11 + $0x1540] sm:$0xf]  ;;  %v1093_v63 = vpop.f32.mrf.mxu2  ;;  %5946 = vmatmul.bf16.vlgmr.msrb.gmra.mxu0 %v20237_v52  ;;  %v12473_v27 = vld [vmem:[#allocation11 + $0xa0] sm:$0xf0] }
 0x16f   :  { %v18571_v32 = vld [vmem:[#allocation11 + $0x155c] sm:$0xf0]  ;;  %6050 = vmatpush.bf16.msrb.mxu0 %v12636_v35  ;;  %v17967_v28 = vld [vmem:[#allocation11 + $0x284] sm:$0xf] }
 0x170   :  { %v15383_v21 = vld [vmem:[#allocation11 + $0x1740] sm:$0xf]  ;;  %6037 = vmatpush.bf16.msra.mxu3 %v15416_v49  ;;  %v15128_v37 = vor.u32 %v18571_v32, %v15127_v47  ;;  %v1107_v47 = vpop.f32.mrf.mxu3  ;;  %v17927_v32 = vld [vmem:[#allocation11 + $0x144] sm:$0xf]  ;;  %6065 = vmatpush.bf16.msrb.mxu1 %v12860_v25 }
 0x171   :  { %v18635_v39 = vld [vmem:[#allocation11 + $0x175c] sm:$0xf0]  ;;  %v1121_v2 = vpop.f32.mrf.mxu0  ;;  %v12729_v35 = vld [vmem:[#allocation11 + $0x2a0] sm:$0xf0] }
 0x172   :  { %v15384_v15 = vor.u32 %v18635_v39, %v15383_v21  ;;  %6024 = vmatpush.bf16.msra.mxu2 %v15128_v37  ;;  %v15095_v29 = vld [vmem:[#allocation11 + $0x1500] sm:$0xf]  ;;  %v12569_v21 = vld [vmem:[#allocation11 + $0x160] sm:$0xf0]  ;;  %v1135_v6 = vpop.f32.mrf.mxu1  ;;  %v12732_v13 = vor.u32 %v17967_v28, %v12729_v35 }
 0x173   :  { %v18563_v36 = vld [vmem:[#allocation11 + $0x151c] sm:$0xf0]  ;;  %v17991_v37 = vld [vmem:[#allocation11 + $0x344] sm:$0xf]  ;;  %6051 = vmatpush.bf16.msrb.mxu0 %v12604_v18  ;;  %v1136_v0 = vadd.f32 %v1135_v6, %v20210_v26 }
 0x174   :  { %6038 = vmatpush.bf16.msra.mxu3 %v15384_v15  ;;  %v15351_v42 = vld [vmem:[#allocation11 + $0x1700] sm:$0xf]  ;;  %v15096_v53 = vor.u32 %v18563_v36, %v15095_v29  ;;  %v12825_v15 = vld [vmem:[#allocation11 + $0x360] sm:$0xf0] }
 0x175   :  { %v18627_v45 = vld [vmem:[#allocation11 + $0x171c] sm:$0xf0]  ;;  %v13593_v6 = vld [vmem:[#allocation11 + $0x960] sm:$0xf0] }
 0x176   :  { %v15352_v20 = vor.u32 %v18627_v45, %v15351_v42  ;;  %6025 = vmatpush.bf16.msra.mxu2 %v15096_v53  ;;  %v15063_v24 = vld [vmem:[#allocation11 + $0x14c0] sm:$0xf]  ;;  %v1094_v42 = vadd.f32 %v1093_v63, %v20200_v16  ;;  %v12572_v53 = vor.u32 %v17927_v32, %v12569_v21  ;;  %v12828_v45 = vor.u32 %v17991_v37, %v12825_v15  ;;  %v12441_v63 = vld [vmem:[#allocation11 + $0x60] sm:$0xf0] }
 0x177   :  { %v18555_v3 = vld [vmem:[#allocation11 + $0x14dc] sm:$0xf0]  ;;  %v17887_v21 = vld [vmem:[#allocation11 + $0x4] sm:$0xf] }
 0x178   :  { %v15319_v7 = vld [vmem:[#allocation11 + $0x16c0] sm:$0xf]  ;;  %6039 = vmatpush.bf16.msra.mxu3 %v15352_v20  ;;  %v15064_v17 = vor.u32 %v18555_v3, %v15063_v24  ;;  %v17919_v20 = vld [vmem:[#allocation11 + $0x104] sm:$0xf]  ;;  %v1108_v12 = vadd.f32 %v1107_v47, %v1094_v42  ;;  %6052 = vmatpush.bf16.msrb.mxu0 %v12572_v53  ;;  %v1109_v57 = vpop.f32.mrf.mxu3 }
 0x179   :  { %v18619_v33 = vld [vmem:[#allocation11 + $0x16dc] sm:$0xf0]  ;;  %v17983_v24 = vld [vmem:[#allocation11 + $0x304] sm:$0xf]  ;;  %6066 = vmatpush.bf16.msrb.mxu1 %v12828_v45 }
 0x17a   :  { %v15320_v38 = vor.u32 %v18619_v33, %v15319_v7  ;;  %6026 = vmatpush.bf16.msra.mxu2 %v15064_v17  ;;  %v15031_v31 = vld [vmem:[#allocation11 + $0x1480] sm:$0xf]  ;;  %v12793_v3 = vld [vmem:[#allocation11 + $0x320] sm:$0xf0]  ;;  %v12391_v7 = vld [vmem:[#allocation7] sm:$0xf]  ;;  %v1095_v17 = vpop.f32.mrf.mxu2  ;;  %v12540_v33 = vor.u32 %v17919_v20, %v12537_v4  ;;  %v1122_v5 = vadd.f32 %v1121_v2, %v1108_v12  ;;  %v1137_v18 = vpop.f32.mrf.mxu1 }
 0x17b   :  { %v18547_v58 = vld [vmem:[#allocation11 + $0x149c] sm:$0xf0]  ;;  %v12665_v15 = vld [vmem:[#allocation11 + $0x220] sm:$0xf0]  ;;  %v1138_v42 = vadd.f32 %v1137_v18, %v20210_v26 }
 0x17c   :  { %v15287_v62 = vld [vmem:[#allocation11 + $0x1680] sm:$0xf]  ;;  %6040 = vmatpush.bf16.msra.mxu3 %v15320_v38  ;;  %v15032_v9 = vor.u32 %v18547_v58, %v15031_v31  ;;  %v12796_v38 = vor.u32 %v17983_v24, %v12793_v3  ;;  %v12505_v31 = vld [vmem:[#allocation11 + $0xe0] sm:$0xf0]  ;;  %1178 = vst [vmem:[#allocation21 + $0x10] sm:$0xff] %v1122_v5  ;;  %6053 = vmatpush.bf16.msrb.mxu0 %v12540_v33 }
 0x17d   :  { %v18611_v30 = vld [vmem:[#allocation11 + $0x169c] sm:$0xf0]  ;;  %v17975_v58 = vld [vmem:[#allocation11 + $0x2c4] sm:$0xf]  ;;  %v12508_v40 = vor.u32 %v17911_v56, %v12505_v31 }
 0x17e   :  { %v15288_v14 = vor.u32 %v18611_v30, %v15287_v62  ;;  %6027 = vmatpush.bf16.msra.mxu2 %v15032_v9  ;;  %v14999_v22 = vld [vmem:[#allocation11 + $0x1440] sm:$0xf]  ;;  %v12761_v62 = vld [vmem:[#allocation11 + $0x2e0] sm:$0xf0]  ;;  %v20244_v9 = vor.u32 %v17885_v8, %v12391_v7  ;;  %6067 = vmatpush.bf16.msrb.mxu1 %v12796_v38 }
 0x17f   :  { %v18539_v55 = vld [vmem:[#allocation11 + $0x145c] sm:$0xf0]  ;;  %v12764_v23 = vor.u32 %v17975_v58, %v12761_v62  ;;  %v18191_v7 = vld [vmem:[#allocation11 + $0x984] sm:$0xf] }
 0x180   :  { %6041 = vmatpush.bf16.msra.mxu3 %v15288_v14  ;;  %v15255_v59 = vld [vmem:[#allocation11 + $0x1640] sm:$0xf]  ;;  %v15000_v49 = vor.u32 %v18539_v55, %v14999_v22  ;;  %v1096_v14 = vadd.f32 %v1095_v17, %v20200_v16  ;;  %6002 = vmatmul.bf16.vlgmr.msra.gmra.mxu0 %v20244_v9  ;;  %v12476_v16 = vor.u32 %v17903_v1, %v12473_v27  ;;  %v17895_v22 = vld [vmem:[#allocation11 + $0x44] sm:$0xf] }
 0x181   :  { %v18603_v61 = vld [vmem:[#allocation11 + $0x165c] sm:$0xf0]  ;;  %6054 = vmatpush.bf16.msrb.mxu0 %v12508_v40  ;;  %v12444_v25 = vor.u32 %v17895_v22, %v12441_v63  ;;  %v13625_v12 = vld [vmem:[#allocation11 + $0x9a0] sm:$0xf0] }
 0x182   :  { %v15256_v41 = vor.u32 %v18603_v61, %v15255_v59  ;;  %v14967_v39 = vld [vmem:[#allocation11 + $0x1400] sm:$0xf]  ;;  %6028 = vmatpush.bf16.msra.mxu2 %v15000_v49  ;;  %v1110_v43 = vadd.f32 %v1109_v57, %v1096_v14  ;;  %v1149_v51 = vpop.f32.mrf.mxu2  ;;  %6068 = vmatpush.bf16.msrb.mxu1 %v12764_v23  ;;  %v1163_v59 = vpop.f32.mrf.mxu3  ;;  %v17959_v49 = vld [vmem:[#allocation11 + $0x244] sm:$0xf]  ;;  %v13628_v31 = vor.u32 %v18191_v7, %v13625_v12 }
 0x183   :  { %v18531_v54 = vld [vmem:[#allocation11 + $0x141c] sm:$0xf0]  ;;  %v1150_v55 = vadd.f32 %v1149_v51, %v1136_v0  ;;  %v1123_v61 = vpop.f32.mrf.mxu0  ;;  %v18255_v17 = vld [vmem:[#allocation11 + $0xb84] sm:$0xf] }
 0x184   :  { %6042 = vmatpush.bf16.msra.mxu3 %v15256_v41  ;;  %v14968_v11 = vor.u32 %v18531_v54, %v14967_v39  ;;  %v15223_v29 = vld [vmem:[#allocation11 + $0x1600] sm:$0xf]  ;;  %v12697_v41 = vld [vmem:[#allocation11 + $0x260] sm:$0xf0]  ;;  %v1124_v47 = vadd.f32 %v1123_v61, %v1110_v43 }
 0x185   :  { %v18595_v10 = vld [vmem:[#allocation11 + $0x161c] sm:$0xf0]  ;;  %v1164_v32 = vadd.f32 %v1163_v59, %v1150_v55  ;;  %6055 = vmatpush.bf16.msrb.mxu0 %v12476_v16  ;;  %v12700_v37 = vor.u32 %v17959_v49, %v12697_v41  ;;  %v12409_v39 = vld [vmem:[#allocation11 + $0x20] sm:$0xf0] }
 0x186   :  { %v15224_v36 = vor.u32 %v18595_v10, %v15223_v29  ;;  %6029 = vmatpush.bf16.msra.mxu2 %v14968_v11  ;;  %v17883_v46 = vld [vmem:[#allocation7 + $0x4] sm:$0xf]  ;;  %1182 = vst [vmem:[#allocation21 + $0x30] sm:$0xff] %v1124_v47  ;;  %6069 = vmatpush.bf16.msrb.mxu1 %v12732_v13  ;;  %v17951_v54 = vld [vmem:[#allocation11 + $0x204] sm:$0xf]  ;;  %v12412_v45 = vor.u32 %v17887_v21, %v12409_v39 }
 0x187   :  { %v20246_v30 = vor.u32 %v17883_v46, %v12393_v60  ;;  %1179 = vst [vmem:[#allocation21 + $0x18] sm:$0xff] %v1164_v32  ;;  %v18199_v11 = vld [vmem:[#allocation11 + $0x9c4] sm:$0xf]  ;;  %v12668_v20 = vor.u32 %v17951_v54, %v12665_v15  ;;  %v1189_v38 = vpack.c.bf16 %v1164_v32, %v1122_v5 }
 0x188   :  { %6043 = vmatpush.bf16.msra.mxu3 %v15224_v36  ;;  %v13657_v29 = vld [vmem:[#allocation11 + $0x9e0] sm:$0xf0] }
 0x189   :  { %6016 = vmatmul.bf16.vlgmr.msra.gmra.mxu1 %v20246_v30  ;;  %v18263_v10 = vld [vmem:[#allocation11 + $0xbc4] sm:$0xf]  ;;  %6056 = vmatpush.bf16.msrb.mxu0 %v12444_v25  ;;  %v13660_v24 = vor.u32 %v18199_v11, %v13657_v29  ;;  %v1222_v23 = vunpack.c.l.b16 %v1189_v38  ;;  %v1223_v1 = vunpack.c.h.b16 %v1189_v38 }
 0x18a   :  { %v13913_v36 = vld [vmem:[#allocation11 + $0xbe0] sm:$0xf0]  ;;  %v1151_v53 = vpop.f32.mrf.mxu2  ;;  %6070 = vmatpush.bf16.msrb.mxu1 %v12700_v37  ;;  %v1165_v8 = vpop.f32.mrf.mxu3 }
 0x18b   :  { %v1152_v4 = vadd.f32 %v1151_v53, %v1138_v42  ;;  %v13916_v3 = vor.u32 %v18263_v10, %v13913_v36  ;;  %v13881_v33 = vld [vmem:[#allocation11 + $0xba0] sm:$0xf0] }
 0x18c   :  { %v18071_v60 = vld [vmem:[#allocation11 + $0x5c4] sm:$0xf]  ;;  %v13884_v58 = vor.u32 %v18255_v17, %v13881_v33 }
 0x18d   :  { %v1166_v46 = vadd.f32 %v1165_v8, %v1152_v4  ;;  %6057 = vmatpush.bf16.msrb.mxu0 %v12412_v45  ;;  %v13145_v56 = vld [vmem:[#allocation11 + $0x5e0] sm:$0xf0] }
 0x18e   :  { %6071 = vmatpush.bf16.msrb.mxu1 %v12668_v20  ;;  %v18135_v26 = vld [vmem:[#allocation11 + $0x7c4] sm:$0xf]  ;;  %v13148_v27 = vor.u32 %v18071_v60, %v13145_v56 }
 0x18f   :  { %v13401_v57 = vld [vmem:[#allocation11 + $0x7e0] sm:$0xf0]  ;;  %1183 = vst [vmem:[#allocation21 + $0x38] sm:$0xff] %v1166_v46  ;;  %v1191_v2 = vpack.c.bf16 %v1166_v46, %v1124_v47 }
 0x190   :  { %v18183_v62 = vld [vmem:[#allocation11 + $0x944] sm:$0xf]  ;;  %6058 = vmatmul.bf16.vlgmr.msrb.gmra.mxu0 %v20202_v44  ;;  %v13404_v28 = vor.u32 %v18135_v26, %v13401_v57  ;;  %11947 = dma.vmem_to_hbm [thread:$0]  %s11940_s10, 1024, %s11942_s27, [#allocation22], %s19621_s28, %s19621_s28, %s19622_s29  }
 0x191   :  { %6106 = vmatpush.bf16.msra.mxu0 %v13660_v24  ;;  %v18247_v14 = vld [vmem:[#allocation11 + $0xb44] sm:$0xf]  ;;  %v1226_v5 = vunpack.c.l.b16 %v1191_v2  ;;  %v1227_v0 = vunpack.c.h.b16 %v1191_v2  ;;  %v13596_v35 = vor.u32 %v18183_v62, %v13593_v6  ;;  %v5891_v53 = vpop.f32.mrf.mxu0  ;;  %v17886_v2 = vld [vmem:[#allocation7 + $0x14] sm:$0xf0]  ;;  %v12401_v6 = vld [vmem:[#allocation7 + $0x18] sm:$0xf0] }
 0x192   :  { %6120 = vmatpush.bf16.msra.mxu1 %v13916_v3  ;;  %v13849_v40 = vld [vmem:[#allocation11 + $0xb60] sm:$0xf0]  ;;  %v5905_v7 = vpop.f32.mrf.mxu1 }
 0x193   :  { %v20255_v43 = vld [vmem:[#allocation13] sm:$0xff]  ;;  %v20257_v13 = vpack.c.b16 %v1226_v5, %v1222_v23  ;;  %v20259_v22 = vpack.c.b16 %v1227_v0, %v1223_v1  ;;  %v13852_v55 = vor.u32 %v18247_v14, %v13849_v40 }
 0x194   :  { %v18063_v51 = vld [vmem:[#allocation11 + $0x584] sm:$0xf]  ;;  %v21140_v32 = vperm.slane %v20255_v43, 0 }
 0x195   :  { %v13113_v16 = vld [vmem:[#allocation11 + $0x5a0] sm:$0xf0]  ;;  %6107 = vmatpush.bf16.msra.mxu0 %v13628_v31  ;;  %5974 = vmatmul.bf16.vlgmr.msrb.gmra.mxu2 %v20257_v13  ;;  %v17884_v31 = vld [vmem:[#allocation7 + $0xc] sm:$0xf] }
 0x196   :  { %6121 = vmatpush.bf16.msra.mxu1 %v13884_v58  ;;  %v18127_v59 = vld [vmem:[#allocation11 + $0x784] sm:$0xf]  ;;  %5988 = vmatmul.bf16.vlgmr.msrb.gmra.mxu3 %v20259_v22  ;;  %v13116_v21 = vor.u32 %v18063_v51, %v13113_v16  ;;  %v5892_v45 = vadd.f32 %v5891_v53, %v21140_v32 }
 0x197   :  { %v13369_v61 = vld [vmem:[#allocation11 + $0x7a0] sm:$0xf0]  ;;  %6078 = vmatpush.bf16.msrb.mxu2 %v13148_v27  ;;  %6092 = vmatpush.bf16.msrb.mxu3 %v13404_v28 }
 0x198   :  { %v18175_v63 = vld [vmem:[#allocation11 + $0x904] sm:$0xf]  ;;  %v13372_v18 = vor.u32 %v18127_v59, %v13369_v61  ;;  %v20266_v46 = vadd.f32 %v5905_v7, %v5892_v45 }
 0x199   :  { %6072 = vmatmul.bf16.vlgmr.msrb.gmra.mxu1 %v20204_v50  ;;  %v13561_v49 = vld [vmem:[#allocation11 + $0x920] sm:$0xf0]  ;;  %6108 = vmatpush.bf16.msra.mxu0 %v13596_v35 }
 0x19a   :  { %v18239_v41 = vld [vmem:[#allocation11 + $0xb04] sm:$0xf]  ;;  %6122 = vmatpush.bf16.msra.mxu1 %v13852_v55  ;;  %v13564_v39 = vor.u32 %v18175_v63, %v13561_v49  ;;  %v20270_v55 = vor.u32 %v17884_v31, %v12401_v6 }
 0x19b   :  { %v13817_v47 = vld [vmem:[#allocation11 + $0xb20] sm:$0xf0]  ;;  %6079 = vmatpush.bf16.msrb.mxu2 %v13116_v21  ;;  %6093 = vmatpush.bf16.msrb.mxu3 %v13372_v18 }
 0x19c   :  { %v18055_v25 = vld [vmem:[#allocation11 + $0x544] sm:$0xf]  ;;  %v13820_v54 = vor.u32 %v18239_v41, %v13817_v47 }
 0x19d   :  { %v13081_v37 = vld [vmem:[#allocation11 + $0x560] sm:$0xf0]  ;;  %6109 = vmatpush.bf16.msra.mxu0 %v13564_v39 }
 0x19e   :  { %v18119_v15 = vld [vmem:[#allocation11 + $0x744] sm:$0xf]  ;;  %v13084_v20 = vor.u32 %v18055_v25, %v13081_v37  ;;  %6123 = vmatpush.bf16.msra.mxu1 %v13820_v54 }
 0x19f   :  { %v13337_v11 = vld [vmem:[#allocation11 + $0x760] sm:$0xf0] }
 0x1a0   :  { %v18167_v29 = vld [vmem:[#allocation11 + $0x8c4] sm:$0xf]  ;;  %v13340_v4 = vor.u32 %v18119_v15, %v13337_v11  ;;  %6080 = vmatpush.bf16.msrb.mxu2 %v13084_v20 }
 0x1a1   :  { %v13529_v10 = vld [vmem:[#allocation11 + $0x8e0] sm:$0xf0] }
 0x1a2   :  { %v18231_v36 = vld [vmem:[#allocation11 + $0xac4] sm:$0xf]  ;;  %v13532_v8 = vor.u32 %v18167_v29, %v13529_v10  ;;  %6094 = vmatpush.bf16.msrb.mxu3 %v13340_v4 }
 0x1a3   :  { %v13785_v42 = vld [vmem:[#allocation11 + $0xae0] sm:$0xf0] }
 0x1a4   :  { %v18047_v24 = vld [vmem:[#allocation11 + $0x504] sm:$0xf]  ;;  %v13788_v12 = vor.u32 %v18231_v36, %v13785_v42  ;;  %6110 = vmatpush.bf16.msra.mxu0 %v13532_v8 }
 0x1a5   :  { %v13049_v3 = vld [vmem:[#allocation11 + $0x520] sm:$0xf0] }
 0x1a6   :  { %v18111_v17 = vld [vmem:[#allocation11 + $0x704] sm:$0xf]  ;;  %v13052_v58 = vor.u32 %v18047_v24, %v13049_v3  ;;  %6124 = vmatpush.bf16.msra.mxu1 %v13788_v12  ;;  %6044 = vmatmul.bf16.vlgmr.msra.gmra.mxu3 %v20270_v55 }
 0x1a7   :  { %v13305_v33 = vld [vmem:[#allocation11 + $0x720] sm:$0xf0] }
 0x1a8   :  { %v18159_v38 = vld [vmem:[#allocation11 + $0x884] sm:$0xf]  ;;  %v13308_v62 = vor.u32 %v18111_v17, %v13305_v33  ;;  %6081 = vmatpush.bf16.msrb.mxu2 %v13052_v58 }
 0x1a9   :  { %v13497_v60 = vld [vmem:[#allocation11 + $0x8a0] sm:$0xf0] }
 0x1aa   :  { %v18223_v56 = vld [vmem:[#allocation11 + $0xa84] sm:$0xf]  ;;  %v13500_v23 = vor.u32 %v18159_v38, %v13497_v60  ;;  %6095 = vmatpush.bf16.msrb.mxu3 %v13308_v62 }
 0x1ab   :  { %v13753_v26 = vld [vmem:[#allocation11 + $0xaa0] sm:$0xf0] }
 0x1ac   :  { %v12399_v57 = vld [vmem:[#allocation7 + $0x8] sm:$0xf]  ;;  %v13756_v1 = vor.u32 %v18223_v56, %v13753_v26  ;;  %6111 = vmatpush.bf16.msra.mxu0 %v13500_v23 }
 0x1ad   :  { %v18039_v14 = vld [vmem:[#allocation11 + $0x4c4] sm:$0xf]  ;;  %v20268_v16 = vor.u32 %v17886_v2, %v12399_v57 }
 0x1ae   :  { %v13017_v40 = vld [vmem:[#allocation11 + $0x4e0] sm:$0xf0]  ;;  %6125 = vmatpush.bf16.msra.mxu1 %v13756_v1 }
 0x1af   :  { %v18103_v5 = vld [vmem:[#allocation11 + $0x6c4] sm:$0xf]  ;;  %v13020_v59 = vor.u32 %v18039_v14, %v13017_v40  ;;  %6030 = vmatmul.bf16.vlgmr.msra.gmra.mxu2 %v20268_v16 }
 0x1b0   :  { %v13273_v0 = vld [vmem:[#allocation11 + $0x6e0] sm:$0xf0] }
 0x1b1   :  { %v18151_v27 = vld [vmem:[#allocation11 + $0x844] sm:$0xf]  ;;  %v13276_v61 = vor.u32 %v18103_v5, %v13273_v0  ;;  %6082 = vmatpush.bf16.msrb.mxu2 %v13020_v59 }
 0x1b2   :  { %v13465_v28 = vld [vmem:[#allocation11 + $0x860] sm:$0xf0] }
 0x1b3   :  { %v18215_v35 = vld [vmem:[#allocation11 + $0xa44] sm:$0xf]  ;;  %v13468_v47 = vor.u32 %v18151_v27, %v13465_v28  ;;  %6096 = vmatpush.bf16.msrb.mxu3 %v13276_v61 }
 0x1b4   :  { %v13721_v51 = vld [vmem:[#allocation11 + $0xa60] sm:$0xf0] }
 0x1b5   :  { %v18031_v63 = vld [vmem:[#allocation11 + $0x484] sm:$0xf]  ;;  %v13724_v21 = vor.u32 %v18215_v35, %v13721_v51  ;;  %6112 = vmatpush.bf16.msra.mxu0 %v13468_v47 }
 0x1b6   :  { %v12985_v49 = vld [vmem:[#allocation11 + $0x4a0] sm:$0xf0] }
 0x1b7   :  { %v18095_v41 = vld [vmem:[#allocation11 + $0x684] sm:$0xf]  ;;  %v12988_v36 = vor.u32 %v18031_v63, %v12985_v49  ;;  %6126 = vmatpush.bf16.msra.mxu1 %v13724_v21 }
 0x1b8   :  { %v13241_v18 = vld [vmem:[#allocation11 + $0x6a0] sm:$0xf0] }
 0x1b9   :  { %v18143_v25 = vld [vmem:[#allocation11 + $0x804] sm:$0xf]  ;;  %v13244_v42 = vor.u32 %v18095_v41, %v13241_v18  ;;  %6083 = vmatpush.bf16.msrb.mxu2 %v12988_v36 }
 0x1ba   :  { %v13433_v37 = vld [vmem:[#allocation11 + $0x820] sm:$0xf0] }
 0x1bb   :  { %v18207_v39 = vld [vmem:[#allocation11 + $0xa04] sm:$0xf]  ;;  %v13436_v45 = vor.u32 %v18143_v25, %v13433_v37  ;;  %6097 = vmatpush.bf16.msrb.mxu3 %v13244_v42 }
 0x1bc   :  { %v13689_v54 = vld [vmem:[#allocation11 + $0xa20] sm:$0xf0] }
 0x1bd   :  { %v18455_v15 = vld [vmem:[#allocation11 + $0x11c4] sm:$0xf]  ;;  %v13692_v20 = vor.u32 %v18207_v39, %v13689_v54  ;;  %6113 = vmatpush.bf16.msra.mxu0 %v13436_v45 }
 0x1be   :  { %v14681_v11 = vld [vmem:[#allocation11 + $0x11e0] sm:$0xf0] }
 0x1bf   :  { %v18519_v29 = vld [vmem:[#allocation11 + $0x13c4] sm:$0xf]  ;;  %v14684_v7 = vor.u32 %v18455_v15, %v14681_v11  ;;  %6127 = vmatpush.bf16.msra.mxu1 %v13692_v20 }
 0x1c0   :  { %v14937_v10 = vld [vmem:[#allocation11 + $0x13e0] sm:$0xf0]  ;;  %6114 = vmatmul.bf16.vlgmr.msra.gmra.mxu0 %v20237_v52 }
 0x1c1   :  { %v18023_v53 = vld [vmem:[#allocation11 + $0x444] sm:$0xf]  ;;  %v14940_v8 = vor.u32 %v18519_v29, %v14937_v10  ;;  %6162 = vmatpush.bf16.msrb.mxu0 %v14684_v7 }
 0x1c2   :  { %v12953_v4 = vld [vmem:[#allocation11 + $0x460] sm:$0xf0]  ;;  %6128 = vmatmul.bf16.vlgmr.msra.gmra.mxu1 %v20239_v34 }
 0x1c3   :  { %v18087_v24 = vld [vmem:[#allocation11 + $0x644] sm:$0xf]  ;;  %v12956_v60 = vor.u32 %v18023_v53, %v12953_v4  ;;  %6176 = vmatpush.bf16.msrb.mxu1 %v14940_v8 }
 0x1c4   :  { %v13209_v3 = vld [vmem:[#allocation11 + $0x660] sm:$0xf0] }
 0x1c5   :  { %v18447_v12 = vld [vmem:[#allocation11 + $0x1184] sm:$0xf]  ;;  %v13212_v56 = vor.u32 %v18087_v24, %v13209_v3  ;;  %6084 = vmatpush.bf16.msrb.mxu2 %v12956_v60 }
 0x1c6   :  { %v14649_v17 = vld [vmem:[#allocation11 + $0x11a0] sm:$0xf0] }
 0x1c7   :  { %v18511_v33 = vld [vmem:[#allocation11 + $0x1384] sm:$0xf]  ;;  %v14652_v6 = vor.u32 %v18447_v12, %v14649_v17  ;;  %6098 = vmatpush.bf16.msrb.mxu3 %v13212_v56 }
 0x1c8   :  { %v14905_v38 = vld [vmem:[#allocation11 + $0x13a0] sm:$0xf0] }
 0x1c9   :  { %v18015_v26 = vld [vmem:[#allocation11 + $0x404] sm:$0xf]  ;;  %v14908_v14 = vor.u32 %v18511_v33, %v14905_v38  ;;  %6163 = vmatpush.bf16.msrb.mxu0 %v14652_v6 }
 0x1ca   :  { %v12921_v57 = vld [vmem:[#allocation11 + $0x420] sm:$0xf0] }
 0x1cb   :  { %v18079_v2 = vld [vmem:[#allocation11 + $0x604] sm:$0xf]  ;;  %v12924_v28 = vor.u32 %v18015_v26, %v12921_v57  ;;  %6177 = vmatpush.bf16.msrb.mxu1 %v14908_v14 }
 0x1cc   :  { %v13177_v31 = vld [vmem:[#allocation11 + $0x620] sm:$0xf0] }
 0x1cd   :  { %v18327_v58 = vld [vmem:[#allocation11 + $0xdc4] sm:$0xf]  ;;  %v13180_v35 = vor.u32 %v18079_v2, %v13177_v31  ;;  %6085 = vmatpush.bf16.msrb.mxu2 %v12924_v28 }
 0x1ce   :  { %v14169_v62 = vld [vmem:[#allocation11 + $0xde0] sm:$0xf0] }
 0x1cf   :  { %v18391_v40 = vld [vmem:[#allocation11 + $0xfc4] sm:$0xf]  ;;  %v14172_v51 = vor.u32 %v18327_v58, %v14169_v62  ;;  %6099 = vmatpush.bf16.msrb.mxu3 %v13180_v35  ;;  %v5919_v35 = vpop.f32.mrf.mxu2 }
 0x1d0   :  { %v14425_v23 = vld [vmem:[#allocation11 + $0xfe0] sm:$0xf0]  ;;  %6086 = vmatmul.bf16.vlgmr.msrb.gmra.mxu2 %v20219_v48 }
 0x1d1   :  { %v18439_v1 = vld [vmem:[#allocation11 + $0x1144] sm:$0xf]  ;;  %v14428_v59 = vor.u32 %v18391_v40, %v14425_v23  ;;  %6134 = vmatpush.bf16.msra.mxu2 %v14172_v51 }
 0x1d2   :  { %v14617_v5 = vld [vmem:[#allocation11 + $0x1160] sm:$0xf0]  ;;  %6100 = vmatmul.bf16.vlgmr.msrb.gmra.mxu3 %v20221_v19 }
 0x1d3   :  { %v18503_v0 = vld [vmem:[#allocation11 + $0x1344] sm:$0xf]  ;;  %v14620_v49 = vor.u32 %v18439_v1, %v14617_v5  ;;  %6148 = vmatpush.bf16.msra.mxu3 %v14428_v59 }
 0x1d4   :  { %v14873_v27 = vld [vmem:[#allocation11 + $0x1360] sm:$0xf0] }
 0x1d5   :  { %v18319_v61 = vld [vmem:[#allocation11 + $0xd84] sm:$0xf]  ;;  %v14876_v41 = vor.u32 %v18503_v0, %v14873_v27  ;;  %6164 = vmatpush.bf16.msrb.mxu0 %v14620_v49 }
 0x1d6   :  { %v14137_v63 = vld [vmem:[#allocation11 + $0xda0] sm:$0xf0] }
 0x1d7   :  { %v18383_v47 = vld [vmem:[#allocation11 + $0xf84] sm:$0xf]  ;;  %v14140_v54 = vor.u32 %v18319_v61, %v14137_v63  ;;  %6178 = vmatpush.bf16.msrb.mxu1 %v14876_v41  ;;  %v5920_v41 = vadd.f32 %v5919_v35, %v20266_v46 }
 0x1d8   :  { %v14393_v21 = vld [vmem:[#allocation11 + $0xfa0] sm:$0xf0] }
 0x1d9   :  { %v18431_v18 = vld [vmem:[#allocation11 + $0x1104] sm:$0xf]  ;;  %v14396_v15 = vor.u32 %v18383_v47, %v14393_v21  ;;  %6135 = vmatpush.bf16.msra.mxu2 %v14140_v54 }
 0x1da   :  { %v14585_v25 = vld [vmem:[#allocation11 + $0x1120] sm:$0xf0] }
 0x1db   :  { %v18495_v37 = vld [vmem:[#allocation11 + $0x1304] sm:$0xf]  ;;  %v14588_v10 = vor.u32 %v18431_v18, %v14585_v25  ;;  %6149 = vmatpush.bf16.msra.mxu3 %v14396_v15 }
 0x1dc   :  { %v14841_v39 = vld [vmem:[#allocation11 + $0x1320] sm:$0xf0] }
 0x1dd   :  { %v18311_v11 = vld [vmem:[#allocation11 + $0xd44] sm:$0xf]  ;;  %v14844_v36 = vor.u32 %v18495_v37, %v14841_v39  ;;  %6165 = vmatpush.bf16.msrb.mxu0 %v14588_v10  ;;  %v5933_v39 = vpop.f32.mrf.mxu3  ;;  %v17948_v10 = vld [vmem:[#allocation11 + $0x1e4] sm:$0xf0] }
 0x1de   :  { %v14105_v29 = vld [vmem:[#allocation11 + $0xd60] sm:$0xf0] }
 0x1df   :  { %v18375_v42 = vld [vmem:[#allocation11 + $0xf44] sm:$0xf]  ;;  %v14108_v3 = vor.u32 %v18311_v11, %v14105_v29  ;;  %6179 = vmatpush.bf16.msrb.mxu1 %v14844_v36  ;;  %v12639_v11 = vld [vmem:[#allocation11 + $0x1c8] sm:$0xf]  ;;  %v20279_v29 = vadd.f32 %v5933_v39, %v5920_v41 }
 0x1e0   :  { %v14361_v53 = vld [vmem:[#allocation11 + $0xf60] sm:$0xf0]  ;;  %v12895_v36 = vld [vmem:[#allocation11 + $0x3c8] sm:$0xf] }
 0x1e1   :  { %v18423_v45 = vld [vmem:[#allocation11 + $0x10c4] sm:$0xf]  ;;  %v14364_v7 = vor.u32 %v18375_v42, %v14361_v53  ;;  %6136 = vmatpush.bf16.msra.mxu2 %v14108_v3  ;;  %v18012_v42 = vld [vmem:[#allocation11 + $0x3e4] sm:$0xf0] }
 0x1e2   :  { %v14553_v20 = vld [vmem:[#allocation11 + $0x10e0] sm:$0xf0]  ;;  %v12799_v39 = vld [vmem:[#allocation11 + $0x308] sm:$0xf] }
 0x1e3   :  { %v18487_v4 = vld [vmem:[#allocation11 + $0x12c4] sm:$0xf]  ;;  %v14556_v17 = vor.u32 %v18423_v45, %v14553_v20  ;;  %6150 = vmatpush.bf16.msra.mxu3 %v14364_v7 }
 0x1e4   :  { %v14809_v24 = vld [vmem:[#allocation11 + $0x12e0] sm:$0xf0] }
 0x1e5   :  { %v18303_v8 = vld [vmem:[#allocation11 + $0xd04] sm:$0xf]  ;;  %v14812_v33 = vor.u32 %v18487_v4, %v14809_v24  ;;  %6166 = vmatpush.bf16.msrb.mxu0 %v14556_v17  ;;  %v12607_v17 = vld [vmem:[#allocation11 + $0x188] sm:$0xf] }
 0x1e6   :  { %v14073_v12 = vld [vmem:[#allocation11 + $0xd20] sm:$0xf0] }
 0x1e7   :  { %v18367_v38 = vld [vmem:[#allocation11 + $0xf04] sm:$0xf]  ;;  %v14076_v31 = vor.u32 %v18303_v8, %v14073_v12  ;;  %6180 = vmatpush.bf16.msrb.mxu1 %v14812_v33  ;;  %v12640_v8 = vor.u32 %v17948_v10, %v12639_v11  ;;  %v12896_v12 = vor.u32 %v18012_v42, %v12895_v36  ;;  %v17940_v33 = vld [vmem:[#allocation11 + $0x1a4] sm:$0xf0] }
 0x1e8   :  { %v14329_v60 = vld [vmem:[#allocation11 + $0xf20] sm:$0xf0] }
 0x1e9   :  { %v18415_v56 = vld [vmem:[#allocation11 + $0x1084] sm:$0xf]  ;;  %v14332_v58 = vor.u32 %v18367_v38, %v14329_v60  ;;  %6137 = vmatpush.bf16.msra.mxu2 %v14076_v31  ;;  %v12863_v38 = vld [vmem:[#allocation11 + $0x388] sm:$0xf] }
 0x1ea   :  { %v14521_v26 = vld [vmem:[#allocation11 + $0x10a0] sm:$0xf0]  ;;  %v18004_v60 = vld [vmem:[#allocation11 + $0x3a4] sm:$0xf0] }
 0x1eb   :  { %v18479_v57 = vld [vmem:[#allocation11 + $0x1284] sm:$0xf]  ;;  %v14524_v14 = vor.u32 %v18415_v56, %v14521_v26  ;;  %6151 = vmatpush.bf16.msra.mxu3 %v14332_v58 }
 0x1ec   :  { %v14777_v2 = vld [vmem:[#allocation11 + $0x12a0] sm:$0xf0] }
 0x1ed   :  { %v18295_v62 = vld [vmem:[#allocation11 + $0xcc4] sm:$0xf]  ;;  %v14780_v40 = vor.u32 %v18479_v57, %v14777_v2  ;;  %6167 = vmatpush.bf16.msrb.mxu0 %v14524_v14  ;;  %v12608_v14 = vor.u32 %v17940_v33, %v12607_v17 }
 0x1ee   :  { %v14041_v6 = vld [vmem:[#allocation11 + $0xce0] sm:$0xf0] }
 0x1ef   :  { %v18359_v23 = vld [vmem:[#allocation11 + $0xec4] sm:$0xf]  ;;  %v14044_v51 = vor.u32 %v18295_v62, %v14041_v6  ;;  %6181 = vmatpush.bf16.msrb.mxu1 %v14780_v40  ;;  %v12864_v40 = vor.u32 %v18004_v60, %v12863_v38 }
 0x1f0   :  { %v14297_v1 = vld [vmem:[#allocation11 + $0xee0] sm:$0xf0] }
 0x1f1   :  { %v18407_v5 = vld [vmem:[#allocation11 + $0x1044] sm:$0xf]  ;;  %v14300_v59 = vor.u32 %v18359_v23, %v14297_v1  ;;  %6138 = vmatpush.bf16.msra.mxu2 %v14044_v51 }
 0x1f2   :  { %v14489_v0 = vld [vmem:[#allocation11 + $0x1060] sm:$0xf0] }
 0x1f3   :  { %v18471_v27 = vld [vmem:[#allocation11 + $0x1244] sm:$0xf]  ;;  %v14492_v47 = vor.u32 %v18407_v5, %v14489_v0  ;;  %6152 = vmatpush.bf16.msra.mxu3 %v14300_v59  ;;  %v12575_v5 = vld [vmem:[#allocation11 + $0x148] sm:$0xf] }
 0x1f4   :  { %v14745_v28 = vld [vmem:[#allocation11 + $0x1260] sm:$0xf0]  ;;  %v17932_v0 = vld [vmem:[#allocation11 + $0x164] sm:$0xf0] }
 0x1f5   :  { %v18287_v61 = vld [vmem:[#allocation11 + $0xc84] sm:$0xf]  ;;  %v14748_v21 = vor.u32 %v18471_v27, %v14745_v28  ;;  %6168 = vmatpush.bf16.msrb.mxu0 %v14492_v47  ;;  %v12831_v27 = vld [vmem:[#allocation11 + $0x348] sm:$0xf]  ;;  %v12576_v41 = vor.u32 %v17932_v0, %v12575_v5 }
 0x1f6   :  { %v14009_v63 = vld [vmem:[#allocation11 + $0xca0] sm:$0xf0]  ;;  %v17996_v28 = vld [vmem:[#allocation11 + $0x364] sm:$0xf0] }
 0x1f7   :  { %v18351_v49 = vld [vmem:[#allocation11 + $0xe84] sm:$0xf]  ;;  %v14012_v53 = vor.u32 %v18287_v61, %v14009_v63  ;;  %6182 = vmatpush.bf16.msrb.mxu1 %v14748_v21  ;;  %v12832_v47 = vor.u32 %v17996_v28, %v12831_v27  ;;  %v12447_v0 = vld [vmem:[#allocation11 + $0x48] sm:$0xf] }
 0x1f8   :  { %v14265_v18 = vld [vmem:[#allocation11 + $0xea0] sm:$0xf0]  ;;  %v17900_v27 = vld [vmem:[#allocation11 + $0x64] sm:$0xf0] }
 0x1f9   :  { %v18399_v25 = vld [vmem:[#allocation11 + $0x1004] sm:$0xf]  ;;  %v14268_v45 = vor.u32 %v18351_v49, %v14265_v18  ;;  %6139 = vmatpush.bf16.msra.mxu2 %v14012_v53  ;;  %v12703_v28 = vld [vmem:[#allocation11 + $0x248] sm:$0xf] }
 0x1fa   :  { %v14457_v37 = vld [vmem:[#allocation11 + $0x1020] sm:$0xf0] }
 0x1fb   :  { %v18463_v54 = vld [vmem:[#allocation11 + $0x1204] sm:$0xf]  ;;  %v14460_v46 = vor.u32 %v18399_v25, %v14457_v37  ;;  %6153 = vmatpush.bf16.msra.mxu3 %v14268_v45  ;;  %v12543_v25 = vld [vmem:[#allocation11 + $0x108] sm:$0xf] }
 0x1fc   :  { %v14713_v15 = vld [vmem:[#allocation11 + $0x1220] sm:$0xf0]  ;;  %v17924_v37 = vld [vmem:[#allocation11 + $0x124] sm:$0xf0] }
 0x1fd   :  { %v18279_v20 = vld [vmem:[#allocation11 + $0xc44] sm:$0xf]  ;;  %v14716_v4 = vor.u32 %v18463_v54, %v14713_v15  ;;  %6169 = vmatpush.bf16.msrb.mxu0 %v14460_v46  ;;  %v17988_v54 = vld [vmem:[#allocation11 + $0x324] sm:$0xf0]  ;;  %v12544_v42 = vor.u32 %v17924_v37, %v12543_v25 }
 0x1fe   :  { %v13977_v24 = vld [vmem:[#allocation11 + $0xc60] sm:$0xf0]  ;;  %v12800_v53 = vor.u32 %v17988_v54, %v12799_v39  ;;  %v12511_v46 = vld [vmem:[#allocation11 + $0xc8] sm:$0xf] }
 0x1ff   :  { %v18343_v3 = vld [vmem:[#allocation11 + $0xe44] sm:$0xf]  ;;  %v13980_v56 = vor.u32 %v18279_v20, %v13977_v24  ;;  %6183 = vmatpush.bf16.msrb.mxu1 %v14716_v4  ;;  %v17916_v4 = vld [vmem:[#allocation11 + $0xe4] sm:$0xf0] }
 0x200   :  { %v14233_v7 = vld [vmem:[#allocation11 + $0xe60] sm:$0xf0]  ;;  %6170 = vmatmul.bf16.vlgmr.msrb.gmra.mxu0 %v20244_v9  ;;  %v12767_v24 = vld [vmem:[#allocation11 + $0x2c8] sm:$0xf]  ;;  %v12512_v33 = vor.u32 %v17916_v4, %v12511_v46 }
 0x201   :  { %v14236_v26 = vor.u32 %v18343_v3, %v14233_v7  ;;  %v18271_v57 = vld [vmem:[#allocation11 + $0xc04] sm:$0xf]  ;;  %6218 = vmatpush.bf16.msra.mxu0 %v12640_v8  ;;  %6140 = vmatpush.bf16.msra.mxu2 %v13980_v56  ;;  %v17980_v3 = vld [vmem:[#allocation11 + $0x2e4] sm:$0xf0] }
 0x202   :  { %v13945_v2 = vld [vmem:[#allocation11 + $0xc20] sm:$0xf0]  ;;  %6184 = vmatmul.bf16.vlgmr.msrb.gmra.mxu1 %v20246_v30  ;;  %v12768_v38 = vor.u32 %v17980_v3, %v12767_v24  ;;  %v17892_v25 = vld [vmem:[#allocation11 + $0x24] sm:$0xf0] }
 0x203   :  { %v18335_v31 = vld [vmem:[#allocation11 + $0xe04] sm:$0xf]  ;;  %6232 = vmatpush.bf16.msra.mxu1 %v12896_v12  ;;  %6154 = vmatpush.bf16.msra.mxu3 %v14236_v26  ;;  %v13948_v35 = vor.u32 %v18271_v57, %v13945_v2  ;;  %v12479_v26 = vld [vmem:[#allocation11 + $0x88] sm:$0xf] }
 0x204   :  { %v14201_v58 = vld [vmem:[#allocation11 + $0xe20] sm:$0xf0]  ;;  %v17908_v57 = vld [vmem:[#allocation11 + $0xa4] sm:$0xf0] }
 0x205   :  { %v18583_v62 = vld [vmem:[#allocation11 + $0x15c4] sm:$0xf]  ;;  %v14204_v51 = vor.u32 %v18335_v31, %v14201_v58  ;;  %6219 = vmatpush.bf16.msra.mxu0 %v12608_v14  ;;  %6141 = vmatpush.bf16.msra.mxu2 %v13948_v35  ;;  %v12735_v2 = vld [vmem:[#allocation11 + $0x288] sm:$0xf] }
 0x206   :  { %v15193_v6 = vld [vmem:[#allocation11 + $0x15e0] sm:$0xf0]  ;;  %v17972_v31 = vld [vmem:[#allocation11 + $0x2a4] sm:$0xf0] }
 0x207   :  { %v18647_v23 = vld [vmem:[#allocation11 + $0x17c4] sm:$0xf]  ;;  %v15196_v59 = vor.u32 %v18583_v62, %v15193_v6  ;;  %6233 = vmatpush.bf16.msra.mxu1 %v12864_v40  ;;  %6155 = vmatpush.bf16.msra.mxu3 %v14204_v51  ;;  %v12480_v40 = vor.u32 %v17908_v57, %v12479_v26  ;;  %v17964_v35 = vld [vmem:[#allocation11 + $0x264] sm:$0xf0] }
 0x208   :  { %v15449_v1 = vld [vmem:[#allocation11 + $0x17e0] sm:$0xf0]  ;;  %6142 = vmatmul.bf16.vlgmr.msra.gmra.mxu2 %v20257_v13  ;;  %v12671_v37 = vld [vmem:[#allocation11 + $0x208] sm:$0xf] }
 0x209   :  { %v15452_v61 = vor.u32 %v18647_v23, %v15449_v1  ;;  %v18575_v63 = vld [vmem:[#allocation11 + $0x1584] sm:$0xf]  ;;  %6190 = vmatpush.bf16.msrb.mxu2 %v15196_v59  ;;  %6220 = vmatpush.bf16.msra.mxu0 %v12576_v41  ;;  %v12736_v23 = vor.u32 %v17972_v31, %v12735_v2  ;;  %v12448_v41 = vor.u32 %v17900_v27, %v12447_v0  ;;  %v17956_v39 = vld [vmem:[#allocation11 + $0x224] sm:$0xf0] }
 0x20a   :  { %v15161_v49 = vld [vmem:[#allocation11 + $0x15a0] sm:$0xf0]  ;;  %6156 = vmatmul.bf16.vlgmr.msra.gmra.mxu3 %v20259_v22  ;;  %v13663_v54 = vld [vmem:[#allocation11 + $0x9c8] sm:$0xf] }
 0x20b   :  { %v18639_v21 = vld [vmem:[#allocation11 + $0x1784] sm:$0xf]  ;;  %6204 = vmatpush.bf16.msrb.mxu3 %v15452_v61  ;;  %v15164_v15 = vor.u32 %v18575_v63, %v15161_v49  ;;  %6234 = vmatpush.bf16.msra.mxu1 %v12832_v47  ;;  %v12704_v47 = vor.u32 %v17964_v35, %v12703_v28  ;;  %v13151_v31 = vld [vmem:[#allocation11 + $0x5c8] sm:$0xf] }
 0x20c   :  { %v15417_v18 = vld [vmem:[#allocation11 + $0x17a0] sm:$0xf0]  ;;  %v18188_v0 = vld [vmem:[#allocation11 + $0x964] sm:$0xf0] }
 0x20d   :  { %v15420_v11 = vor.u32 %v18639_v21, %v15417_v18  ;;  %v18567_v10 = vld [vmem:[#allocation11 + $0x1544] sm:$0xf]  ;;  %6191 = vmatpush.bf16.msrb.mxu2 %v15164_v15  ;;  %6221 = vmatpush.bf16.msra.mxu0 %v12544_v42  ;;  %v12415_v18 = vld [vmem:[#allocation11 + $0x8] sm:$0xf] }
 0x20e   :  { %v15129_v36 = vld [vmem:[#allocation11 + $0x1560] sm:$0xf0]  ;;  %v18204_v15 = vld [vmem:[#allocation11 + $0x9e4] sm:$0xf0] }
 0x20f   :  { %v18631_v45 = vld [vmem:[#allocation11 + $0x1744] sm:$0xf]  ;;  %6205 = vmatpush.bf16.msrb.mxu3 %v15420_v11  ;;  %v15132_v7 = vor.u32 %v18567_v10, %v15129_v36  ;;  %6235 = vmatpush.bf16.msra.mxu1 %v12800_v53  ;;  %v13919_v11 = vld [vmem:[#allocation11 + $0xbc8] sm:$0xf]  ;;  %v13664_v3 = vor.u32 %v18204_v15, %v13663_v54 }
 0x210   :  { %v15385_v20 = vld [vmem:[#allocation11 + $0x1760] sm:$0xf0]  ;;  %v18268_v10 = vld [vmem:[#allocation11 + $0xbe4] sm:$0xf0] }
 0x211   :  { %v15388_v8 = vor.u32 %v18631_v45, %v15385_v20  ;;  %v18559_v12 = vld [vmem:[#allocation11 + $0x1504] sm:$0xf]  ;;  %6192 = vmatpush.bf16.msrb.mxu2 %v15132_v7  ;;  %6222 = vmatpush.bf16.msra.mxu0 %v12512_v33  ;;  %v12416_v45 = vor.u32 %v17892_v25, %v12415_v18  ;;  %v12672_v20 = vor.u32 %v17956_v39, %v12671_v37  ;;  %v18260_v33 = vld [vmem:[#allocation11 + $0xba4] sm:$0xf0] }
 0x212   :  { %v15097_v17 = vld [vmem:[#allocation11 + $0x1520] sm:$0xf0]  ;;  %v13920_v7 = vor.u32 %v18268_v10, %v13919_v11  ;;  %v13855_v27 = vld [vmem:[#allocation11 + $0xb48] sm:$0xf] }
 0x213   :  { %v18623_v60 = vld [vmem:[#allocation11 + $0x1704] sm:$0xf]  ;;  %6206 = vmatpush.bf16.msrb.mxu3 %v15388_v8  ;;  %v15100_v58 = vor.u32 %v18559_v12, %v15097_v17  ;;  %6236 = vmatpush.bf16.msra.mxu1 %v12768_v38  ;;  %v13631_v8 = vld [vmem:[#allocation11 + $0x988] sm:$0xf] }
 0x214   :  { %v15353_v56 = vld [vmem:[#allocation11 + $0x1720] sm:$0xf0]  ;;  %v18196_v12 = vld [vmem:[#allocation11 + $0x9a4] sm:$0xf0] }
 0x215   :  { %v15356_v62 = vor.u32 %v18623_v60, %v15353_v56  ;;  %v18551_v6 = vld [vmem:[#allocation11 + $0x14c4] sm:$0xf]  ;;  %6193 = vmatpush.bf16.msrb.mxu2 %v15100_v58  ;;  %6223 = vmatpush.bf16.msra.mxu0 %v12480_v40  ;;  %v13887_v17 = vld [vmem:[#allocation11 + $0xb88] sm:$0xf] }
 0x216   :  { %v15065_v14 = vld [vmem:[#allocation11 + $0x14e0] sm:$0xf0]  ;;  %v18076_v58 = vld [vmem:[#allocation11 + $0x5e4] sm:$0xf0]  ;;  %v13888_v40 = vor.u32 %v18260_v33, %v13887_v17 }
 0x217   :  { %v18615_v1 = vld [vmem:[#allocation11 + $0x16c4] sm:$0xf]  ;;  %6207 = vmatpush.bf16.msrb.mxu3 %v15356_v62  ;;  %v15068_v51 = vor.u32 %v18551_v6, %v15065_v14  ;;  %6237 = vmatpush.bf16.msra.mxu1 %v12736_v23  ;;  %v20285_v62 = vpop.f32.mrf.mxu0  ;;  %v20287_v6 = vpop.f32.mrf.mxu1  ;;  %v13632_v14 = vor.u32 %v18196_v12, %v13631_v8  ;;  %v13407_v23 = vld [vmem:[#allocation11 + $0x7c8] sm:$0xf] }
 0x218   :  { %v15321_v5 = vld [vmem:[#allocation11 + $0x16e0] sm:$0xf0]  ;;  %v18252_v28 = vld [vmem:[#allocation11 + $0xb64] sm:$0xf0] }
 0x219   :  { %v15324_v59 = vor.u32 %v18615_v1, %v15321_v5  ;;  %v18543_v61 = vld [vmem:[#allocation11 + $0x1484] sm:$0xf]  ;;  %6194 = vmatpush.bf16.msrb.mxu2 %v15068_v51  ;;  %6224 = vmatpush.bf16.msra.mxu0 %v12448_v41  ;;  %v18140_v1 = vld [vmem:[#allocation11 + $0x7e4] sm:$0xf0] }
 0x21a   :  { %v15033_v63 = vld [vmem:[#allocation11 + $0x14a0] sm:$0xf0]  ;;  %v13599_v5 = vld [vmem:[#allocation11 + $0x948] sm:$0xf] }
 0x21b   :  { %v18607_v49 = vld [vmem:[#allocation11 + $0x1684] sm:$0xf]  ;;  %6208 = vmatpush.bf16.msrb.mxu3 %v15324_v59  ;;  %v15036_v36 = vor.u32 %v18543_v61, %v15033_v63  ;;  %6238 = vmatpush.bf16.msra.mxu1 %v12704_v47  ;;  %v13152_v59 = vor.u32 %v18076_v58, %v13151_v31  ;;  %v13408_v61 = vor.u32 %v18140_v1, %v13407_v23  ;;  %v13119_v63 = vld [vmem:[#allocation11 + $0x588] sm:$0xf] }
 0x21c   :  { %v15289_v21 = vld [vmem:[#allocation11 + $0x16a0] sm:$0xf0]  ;;  %v13600_v41 = vor.u32 %v18188_v0, %v13599_v5  ;;  %v13856_v47 = vor.u32 %v18252_v28, %v13855_v27  ;;  %v18132_v18 = vld [vmem:[#allocation11 + $0x7a4] sm:$0xf0] }
 0x21d   :  { %v15292_v42 = vor.u32 %v18607_v49, %v15289_v21  ;;  %v18535_v53 = vld [vmem:[#allocation11 + $0x1444] sm:$0xf]  ;;  %6195 = vmatpush.bf16.msrb.mxu2 %v15036_v36  ;;  %6225 = vmatpush.bf16.msra.mxu0 %v12416_v45  ;;  %v18068_v49 = vld [vmem:[#allocation11 + $0x5a4] sm:$0xf0] }
 0x21e   :  { %v15001_v46 = vld [vmem:[#allocation11 + $0x1460] sm:$0xf0]  ;;  %v13375_v21 = vld [vmem:[#allocation11 + $0x788] sm:$0xf]  ;;  %v13120_v15 = vor.u32 %v18068_v49, %v13119_v63 }
 0x21f   :  { %v18599_v4 = vld [vmem:[#allocation11 + $0x1644] sm:$0xf]  ;;  %6209 = vmatpush.bf16.msrb.mxu3 %v15292_v42  ;;  %v15004_v38 = vor.u32 %v18535_v53, %v15001_v46  ;;  %6239 = vmatpush.bf16.msra.mxu1 %v12672_v20  ;;  %v13567_v25 = vld [vmem:[#allocation11 + $0x908] sm:$0xf]  ;;  %v13376_v11 = vor.u32 %v18132_v18, %v13375_v21  ;;  %v5947_v42 = vpop.f32.mrf.mxu0  ;;  %v5961_v53 = vpop.f32.mrf.mxu1 }
 0x220   :  { %v15257_v24 = vld [vmem:[#allocation11 + $0x1660] sm:$0xf0]  ;;  %6226 = vmatmul.bf16.vlgmr.msra.gmra.mxu0 %v20202_v44  ;;  %v18180_v37 = vld [vmem:[#allocation11 + $0x924] sm:$0xf0] }
 0x221   :  { %v15260_v60 = vor.u32 %v18599_v4, %v15257_v24  ;;  %v18527_v56 = vld [vmem:[#allocation11 + $0x1404] sm:$0xf]  ;;  %6274 = vmatpush.bf16.msrb.mxu0 %v13664_v3  ;;  %6196 = vmatpush.bf16.msrb.mxu2 %v15004_v38  ;;  %v13823_v39 = vld [vmem:[#allocation11 + $0xb08] sm:$0xf]  ;;  %v13568_v45 = vor.u32 %v18180_v37, %v13567_v25  ;;  %v5948_v3 = vadd.f32 %v5947_v42, %v20279_v29 }
 0x222   :  { %v14969_v26 = vld [vmem:[#allocation11 + $0x1420] sm:$0xf0]  ;;  %6240 = vmatmul.bf16.vlgmr.msra.gmra.mxu1 %v20204_v50  ;;  %v18244_v54 = vld [vmem:[#allocation11 + $0xb24] sm:$0xf0] }
 0x223   :  { %v18591_v57 = vld [vmem:[#allocation11 + $0x1604] sm:$0xf]  ;;  %6288 = vmatpush.bf16.msrb.mxu1 %v13920_v7  ;;  %6210 = vmatpush.bf16.msrb.mxu3 %v15260_v60  ;;  %v14972_v35 = vor.u32 %v18527_v56, %v14969_v26  ;;  %v13087_v10 = vld [vmem:[#allocation11 + $0x548] sm:$0xf]  ;;  %v13824_v20 = vor.u32 %v18244_v54, %v13823_v39  ;;  %v20294_v17 = vadd.f32 %v5961_v53, %v5948_v3 }
 0x224   :  { %v15225_v2 = vld [vmem:[#allocation11 + $0x1620] sm:$0xf0]  ;;  %v18060_v36 = vld [vmem:[#allocation11 + $0x564] sm:$0xf0] }
 0x225   :  { %v15228_v51 = vor.u32 %v18591_v57, %v15225_v2  ;;  %6275 = vmatpush.bf16.msrb.mxu0 %v13632_v14  ;;  %6197 = vmatpush.bf16.msrb.mxu2 %v14972_v35  ;;  %v13343_v46 = vld [vmem:[#allocation11 + $0x748] sm:$0xf]  ;;  %v13088_v33 = vor.u32 %v18060_v36, %v13087_v10 }
 0x226   :  { %v18124_v4 = vld [vmem:[#allocation11 + $0x764] sm:$0xf0] }
 0x227   :  { %6289 = vmatpush.bf16.msrb.mxu1 %v13888_v40  ;;  %6211 = vmatpush.bf16.msrb.mxu3 %v15228_v51  ;;  %v13535_v24 = vld [vmem:[#allocation11 + $0x8c8] sm:$0xf]  ;;  %v13344_v38 = vor.u32 %v18124_v4, %v13343_v46  ;;  %v20296_v27 = vpop.f32.mrf.mxu0  ;;  %v20298_v28 = vpop.f32.mrf.mxu1 }
 0x228   :  { %6198 = vmatmul.bf16.vlgmr.msrb.gmra.mxu2 %v20268_v16  ;;  %v18172_v7 = vld [vmem:[#allocation11 + $0x8e4] sm:$0xf0] }
 0x229   :  { %6246 = vmatpush.bf16.msra.mxu2 %v13152_v59  ;;  %6276 = vmatpush.bf16.msrb.mxu0 %v13600_v41  ;;  %v13791_v8 = vld [vmem:[#allocation11 + $0xac8] sm:$0xf]  ;;  %v13536_v26 = vor.u32 %v18172_v7, %v13535_v24 }
 0x22a   :  { %6212 = vmatmul.bf16.vlgmr.msrb.gmra.mxu3 %v20270_v55  ;;  %v18236_v12 = vld [vmem:[#allocation11 + $0xae4] sm:$0xf0] }
 0x22b   :  { %6260 = vmatpush.bf16.msra.mxu3 %v13408_v61  ;;  %6290 = vmatpush.bf16.msrb.mxu1 %v13856_v47  ;;  %v13055_v60 = vld [vmem:[#allocation11 + $0x508] sm:$0xf]  ;;  %v13792_v57 = vor.u32 %v18236_v12, %v13791_v8 }
 0x22c   :  { %v18052_v56 = vld [vmem:[#allocation11 + $0x524] sm:$0xf0] }
 0x22d   :  { %6247 = vmatpush.bf16.msra.mxu2 %v13120_v15  ;;  %6277 = vmatpush.bf16.msrb.mxu0 %v13568_v45  ;;  %v13311_v2 = vld [vmem:[#allocation11 + $0x708] sm:$0xf]  ;;  %v13056_v23 = vor.u32 %v18052_v56, %v13055_v60 }
 0x22e   :  { %v18116_v31 = vld [vmem:[#allocation11 + $0x724] sm:$0xf0] }
 0x22f   :  { %6261 = vmatpush.bf16.msra.mxu3 %v13376_v11  ;;  %6291 = vmatpush.bf16.msrb.mxu1 %v13824_v20  ;;  %v13503_v29 = vld [vmem:[#allocation11 + $0x888] sm:$0xf]  ;;  %v13312_v1 = vor.u32 %v18116_v31, %v13311_v2  ;;  %v20300_v8 = vpop.f32.mrf.mxu0  ;;  %v20302_v12 = vpop.f32.mrf.mxu1 }
 0x230   :  { %v18164_v58 = vld [vmem:[#allocation11 + $0x8a4] sm:$0xf0] }
 0x231   :  { %v13759_v14 = vld [vmem:[#allocation11 + $0xa88] sm:$0xf]  ;;  %6248 = vmatpush.bf16.msra.mxu2 %v13088_v33  ;;  %6278 = vmatpush.bf16.msrb.mxu0 %v13536_v26  ;;  %v13504_v35 = vor.u32 %v18164_v58, %v13503_v29 }
 0x232   :  { %v18228_v40 = vld [vmem:[#allocation11 + $0xaa4] sm:$0xf0] }
 0x233   :  { %6262 = vmatpush.bf16.msra.mxu3 %v13344_v38  ;;  %v13023_v5 = vld [vmem:[#allocation11 + $0x4c8] sm:$0xf]  ;;  %6292 = vmatpush.bf16.msrb.mxu1 %v13792_v57  ;;  %v13760_v51 = vor.u32 %v18228_v40, %v13759_v14 }
 0x234   :  { %v18044_v0 = vld [vmem:[#allocation11 + $0x4e4] sm:$0xf0] }
 0x235   :  { %v13279_v59 = vld [vmem:[#allocation11 + $0x6c8] sm:$0xf]  ;;  %6249 = vmatpush.bf16.msra.mxu2 %v13056_v23  ;;  %v13024_v21 = vor.u32 %v18044_v0, %v13023_v5  ;;  %6279 = vmatpush.bf16.msrb.mxu0 %v13504_v35 }
 0x236   :  { %v18108_v61 = vld [vmem:[#allocation11 + $0x6e4] sm:$0xf0] }
 0x237   :  { %v13471_v63 = vld [vmem:[#allocation11 + $0x848] sm:$0xf]  ;;  %6263 = vmatpush.bf16.msra.mxu3 %v13312_v1  ;;  %v13280_v18 = vor.u32 %v18108_v61, %v13279_v59  ;;  %6293 = vmatpush.bf16.msrb.mxu1 %v13760_v51 }
 0x238   :  { %v18156_v49 = vld [vmem:[#allocation11 + $0x864] sm:$0xf0] }
 0x239   :  { %v13727_v41 = vld [vmem:[#allocation11 + $0xa48] sm:$0xf]  ;;  %v13472_v54 = vor.u32 %v18156_v49, %v13471_v63  ;;  %6250 = vmatpush.bf16.msra.mxu2 %v13024_v21 }
 0x23a   :  { %v18220_v47 = vld [vmem:[#allocation11 + $0xa64] sm:$0xf0] }
 0x23b   :  { %v12991_v25 = vld [vmem:[#allocation11 + $0x488] sm:$0xf]  ;;  %v13728_v15 = vor.u32 %v18220_v47, %v13727_v41  ;;  %6264 = vmatpush.bf16.msra.mxu3 %v13280_v18  ;;  %6280 = vmatpush.bf16.msrb.mxu0 %v13472_v54  ;;  %v20306_v54 = vpop.f32.mrf.mxu0 }
 0x23c   :  { %v18036_v37 = vld [vmem:[#allocation11 + $0x4a4] sm:$0xf0] }
 0x23d   :  { %v13247_v39 = vld [vmem:[#allocation11 + $0x688] sm:$0xf]  ;;  %v12992_v24 = vor.u32 %v18036_v37, %v12991_v25  ;;  %6294 = vmatpush.bf16.msrb.mxu1 %v13728_v15  ;;  %v20308_v15 = vpop.f32.mrf.mxu1 }
 0x23e   :  { %v18100_v11 = vld [vmem:[#allocation11 + $0x6a4] sm:$0xf0]  ;;  %21244 = vst [vmem:[#allocation32_spill] sm:$0xff] %v20308_v15  ;;  %v18517_v15 = vld [vmem:[#allocation11 + $0x13ac] sm:$0xf0] }
 0x23f   :  { %v13439_v10 = vld [vmem:[#allocation11 + $0x808] sm:$0xf]  ;;  %v13248_v3 = vor.u32 %v18100_v11, %v13247_v39  ;;  %6251 = vmatpush.bf16.msra.mxu2 %v12992_v24 }
 0x240   :  { %v18148_v36 = vld [vmem:[#allocation11 + $0x824] sm:$0xf0] }
 0x241   :  { %v13695_v42 = vld [vmem:[#allocation11 + $0xa08] sm:$0xf]  ;;  %v13440_v33 = vor.u32 %v18148_v36, %v13439_v10  ;;  %6265 = vmatpush.bf16.msra.mxu3 %v13248_v3 }
 0x242   :  { %v18212_v53 = vld [vmem:[#allocation11 + $0xa24] sm:$0xf0] }
 0x243   :  { %v14687_v45 = vld [vmem:[#allocation11 + $0x11c8] sm:$0xf]  ;;  %v13696_v38 = vor.u32 %v18212_v53, %v13695_v42  ;;  %6281 = vmatpush.bf16.msrb.mxu0 %v13440_v33 }
 0x244   :  { %v18460_v20 = vld [vmem:[#allocation11 + $0x11e4] sm:$0xf0] }
 0x245   :  { %v14943_v46 = vld [vmem:[#allocation11 + $0x13c8] sm:$0xf]  ;;  %v14688_v57 = vor.u32 %v18460_v20, %v14687_v45  ;;  %6295 = vmatpush.bf16.msrb.mxu1 %v13696_v38 }
 0x246   :  { %v18524_v4 = vld [vmem:[#allocation11 + $0x13e4] sm:$0xf0]  ;;  %6282 = vmatmul.bf16.vlgmr.msrb.gmra.mxu0 %v20237_v52 }
 0x247   :  { %v12959_v7 = vld [vmem:[#allocation11 + $0x448] sm:$0xf]  ;;  %v14944_v2 = vor.u32 %v18524_v4, %v14943_v46  ;;  %6330 = vmatpush.bf16.msra.mxu0 %v14688_v57 }
 0x248   :  { %v18028_v60 = vld [vmem:[#allocation11 + $0x464] sm:$0xf0]  ;;  %6296 = vmatmul.bf16.vlgmr.msrb.gmra.mxu1 %v20239_v34 }
 0x249   :  { %v13215_v56 = vld [vmem:[#allocation11 + $0x648] sm:$0xf]  ;;  %v12960_v40 = vor.u32 %v18028_v60, %v12959_v7  ;;  %6344 = vmatpush.bf16.msra.mxu1 %v14944_v2  ;;  %v20310_v60 = vld [vmem:[#allocation13] sm:$0xff] }
 0x24a   :  { %v18092_v26 = vld [vmem:[#allocation11 + $0x664] sm:$0xf0] }
 0x24b   :  { %v14655_v31 = vld [vmem:[#allocation11 + $0x1188] sm:$0xf]  ;;  %v13216_v23 = vor.u32 %v18092_v26, %v13215_v56  ;;  %6252 = vmatpush.bf16.msra.mxu2 %v12960_v40  ;;  %v21139_v56 = vperm.slane %v20310_v60, 1 }
 0x24c   :  { %v18452_v29 = vld [vmem:[#allocation11 + $0x11a4] sm:$0xf0] }
 0x24d   :  { %v14911_v58 = vld [vmem:[#allocation11 + $0x1388] sm:$0xf]  ;;  %v14656_v61 = vor.u32 %v18452_v29, %v14655_v31  ;;  %6266 = vmatpush.bf16.msra.mxu3 %v13216_v23 }
 0x24e   :  { %v18516_v14 = vld [vmem:[#allocation11 + $0x13a4] sm:$0xf0] }
 0x24f   :  { %v12927_v1 = vld [vmem:[#allocation11 + $0x408] sm:$0xf]  ;;  %v14912_v63 = vor.u32 %v18516_v14, %v14911_v58  ;;  %6331 = vmatpush.bf16.msra.mxu0 %v14656_v61  ;;  %v20315_v61 = vpop.f32.mrf.mxu2 }
 0x250   :  { %v18020_v5 = vld [vmem:[#allocation11 + $0x424] sm:$0xf0] }
 0x251   :  { %v13183_v0 = vld [vmem:[#allocation11 + $0x608] sm:$0xf]  ;;  %v12928_v37 = vor.u32 %v18020_v5, %v12927_v1  ;;  %6345 = vmatpush.bf16.msra.mxu1 %v14912_v63  ;;  %v6059_v5 = vpop.f32.mrf.mxu0 }
 0x252   :  { %v18084_v35 = vld [vmem:[#allocation11 + $0x624] sm:$0xf0]  ;;  %v6060_v63 = vadd.f32 %v6059_v5, %v21139_v56 }
 0x253   :  { %v14175_v51 = vld [vmem:[#allocation11 + $0xdc8] sm:$0xf]  ;;  %v13184_v39 = vor.u32 %v18084_v35, %v13183_v0  ;;  %6253 = vmatpush.bf16.msra.mxu2 %v12928_v37  ;;  %v6073_v37 = vpop.f32.mrf.mxu1 }
 0x254   :  { %v18332_v59 = vld [vmem:[#allocation11 + $0xde4] sm:$0xf0] }
 0x255   :  { %v14431_v49 = vld [vmem:[#allocation11 + $0xfc8] sm:$0xf]  ;;  %v14176_v11 = vor.u32 %v18332_v59, %v14175_v51  ;;  %6267 = vmatpush.bf16.msra.mxu3 %v13184_v39 }
 0x256   :  { %v18396_v41 = vld [vmem:[#allocation11 + $0xfe4] sm:$0xf0]  ;;  %6254 = vmatmul.bf16.vlgmr.msra.gmra.mxu2 %v20219_v48 }
 0x257   :  { %v14623_v47 = vld [vmem:[#allocation11 + $0x1148] sm:$0xf]  ;;  %v14432_v10 = vor.u32 %v18396_v41, %v14431_v49  ;;  %6302 = vmatpush.bf16.msrb.mxu2 %v14176_v11 }
 0x258   :  { %v18444_v21 = vld [vmem:[#allocation11 + $0x1164] sm:$0xf0]  ;;  %6268 = vmatmul.bf16.vlgmr.msra.gmra.mxu3 %v20221_v19 }
 0x259   :  { %v14879_v18 = vld [vmem:[#allocation11 + $0x1348] sm:$0xf]  ;;  %v14624_v53 = vor.u32 %v18444_v21, %v14623_v47  ;;  %6316 = vmatpush.bf16.msrb.mxu3 %v14432_v10 }
 0x25a   :  { %v18508_v25 = vld [vmem:[#allocation11 + $0x1364] sm:$0xf0] }
 0x25b   :  { %v14143_v36 = vld [vmem:[#allocation11 + $0xd88] sm:$0xf]  ;;  %v14880_v45 = vor.u32 %v18508_v25, %v14879_v18  ;;  %6332 = vmatpush.bf16.msra.mxu0 %v14624_v53  ;;  %v20319_v25 = vpop.f32.mrf.mxu3 }
 0x25c   :  { %v18324_v42 = vld [vmem:[#allocation11 + $0xda4] sm:$0xf0] }
 0x25d   :  { %v14399_v20 = vld [vmem:[#allocation11 + $0xf88] sm:$0xf]  ;;  %v14144_v33 = vor.u32 %v18324_v42, %v14143_v36  ;;  %6346 = vmatpush.bf16.msra.mxu1 %v14880_v45  ;;  %v20321_v36 = vadd.f32 %v6073_v37, %v6060_v63  ;;  %v17944_v63 = vld [vmem:[#allocation11 + $0x1cc] sm:$0xf] }
 0x25e   :  { %v18388_v46 = vld [vmem:[#allocation11 + $0xfa4] sm:$0xf0] }
 0x25f   :  { %v14591_v4 = vld [vmem:[#allocation11 + $0x1108] sm:$0xf]  ;;  %v14400_v38 = vor.u32 %v18388_v46, %v14399_v20  ;;  %6303 = vmatpush.bf16.msrb.mxu2 %v14144_v33 }
 0x260   :  { %v18436_v24 = vld [vmem:[#allocation11 + $0x1124] sm:$0xf0] }
 0x261   :  { %v14847_v3 = vld [vmem:[#allocation11 + $0x1308] sm:$0xf]  ;;  %v14592_v2 = vor.u32 %v18436_v24, %v14591_v4  ;;  %6317 = vmatpush.bf16.msrb.mxu3 %v14400_v38 }
 0x262   :  { %v18500_v7 = vld [vmem:[#allocation11 + $0x1324] sm:$0xf0] }
 0x263   :  { %v14111_v26 = vld [vmem:[#allocation11 + $0xd48] sm:$0xf]  ;;  %v14848_v31 = vor.u32 %v18500_v7, %v14847_v3  ;;  %6333 = vmatpush.bf16.msra.mxu0 %v14592_v2 }
 0x264   :  { %v18316_v57 = vld [vmem:[#allocation11 + $0xd64] sm:$0xf0] }
 0x265   :  { %v14367_v29 = vld [vmem:[#allocation11 + $0xf48] sm:$0xf]  ;;  %v14112_v0 = vor.u32 %v18316_v57, %v14111_v26  ;;  %6347 = vmatpush.bf16.msra.mxu1 %v14848_v31 }
 0x266   :  { %v18380_v58 = vld [vmem:[#allocation11 + $0xf64] sm:$0xf0] }
 0x267   :  { %v14559_v14 = vld [vmem:[#allocation11 + $0x10c8] sm:$0xf]  ;;  %v14368_v35 = vor.u32 %v18380_v58, %v14367_v29  ;;  %6304 = vmatpush.bf16.msrb.mxu2 %v14112_v0  ;;  %v5975_v0 = vpop.f32.mrf.mxu2 }
 0x268   :  { %v18428_v40 = vld [vmem:[#allocation11 + $0x10e4] sm:$0xf0] }
 0x269   :  { %v14815_v23 = vld [vmem:[#allocation11 + $0x12c8] sm:$0xf]  ;;  %v14560_v49 = vor.u32 %v18428_v40, %v14559_v14  ;;  %6318 = vmatpush.bf16.msrb.mxu3 %v14368_v35  ;;  %v5989_v35 = vpop.f32.mrf.mxu3 }
 0x26a   :  { %v18492_v1 = vld [vmem:[#allocation11 + $0x12e4] sm:$0xf0] }
 0x26b   :  { %v14079_v51 = vld [vmem:[#allocation11 + $0xd08] sm:$0xf]  ;;  %v14816_v41 = vor.u32 %v18492_v1, %v14815_v23  ;;  %6334 = vmatpush.bf16.msra.mxu0 %v14560_v49  ;;  %v5976_v49 = vadd.f32 %v5975_v0, %v20294_v17 }
 0x26c   :  { %v18308_v59 = vld [vmem:[#allocation11 + $0xd24] sm:$0xf0] }
 0x26d   :  { %v14335_v47 = vld [vmem:[#allocation11 + $0xf08] sm:$0xf]  ;;  %v14080_v42 = vor.u32 %v18308_v59, %v14079_v51  ;;  %6348 = vmatpush.bf16.msra.mxu1 %v14816_v41  ;;  %v12641_v41 = vld [vmem:[#allocation11 + $0x1e8] sm:$0xf0] }
 0x26e   :  { %v18372_v21 = vld [vmem:[#allocation11 + $0xf24] sm:$0xf0] }
 0x26f   :  { %v14527_v18 = vld [vmem:[#allocation11 + $0x1088] sm:$0xf]  ;;  %v14336_v53 = vor.u32 %v18372_v21, %v14335_v47  ;;  %6305 = vmatpush.bf16.msrb.mxu2 %v14080_v42  ;;  %v18008_v47 = vld [vmem:[#allocation11 + $0x3cc] sm:$0xf] }
 0x270   :  { %v18420_v39 = vld [vmem:[#allocation11 + $0x10a4] sm:$0xf0]  ;;  %v12897_v21 = vld [vmem:[#allocation11 + $0x3e8] sm:$0xf0] }
 0x271   :  { %v14783_v11 = vld [vmem:[#allocation11 + $0x1288] sm:$0xf]  ;;  %v14528_v46 = vor.u32 %v18420_v39, %v14527_v18  ;;  %6319 = vmatpush.bf16.msrb.mxu3 %v14336_v53 }
 0x272   :  { %v18484_v10 = vld [vmem:[#allocation11 + $0x12a4] sm:$0xf0] }
 0x273   :  { %v14047_v45 = vld [vmem:[#allocation11 + $0xcc8] sm:$0xf]  ;;  %v14784_v4 = vor.u32 %v18484_v10, %v14783_v11  ;;  %6335 = vmatpush.bf16.msra.mxu0 %v14528_v46  ;;  %v5990_v11 = vadd.f32 %v5989_v35, %v5976_v49  ;;  %v12644_v46 = vor.u32 %v17944_v63, %v12641_v41  ;;  %v17992_v63 = vld [vmem:[#allocation11 + $0x34c] sm:$0xf] }
 0x274   :  { %v18300_v20 = vld [vmem:[#allocation11 + $0xce4] sm:$0xf0]  ;;  %v12833_v49 = vld [vmem:[#allocation11 + $0x368] sm:$0xf0] }
 0x275   :  { %v14303_v24 = vld [vmem:[#allocation11 + $0xec8] sm:$0xf]  ;;  %v14048_v57 = vor.u32 %v18300_v20, %v14047_v45  ;;  %6349 = vmatpush.bf16.msra.mxu1 %v14784_v4  ;;  %v12900_v4 = vor.u32 %v18008_v47, %v12897_v21  ;;  %v6004_v17 = vadd.f32 %v20300_v8, %v5990_v11  ;;  %v20328_v8 = vpop.f32.mrf.mxu3  ;;  %v12836_v11 = vor.u32 %v17992_v63, %v12833_v49 }
 0x276   :  { %v18364_v3 = vld [vmem:[#allocation11 + $0xee4] sm:$0xf0] }
 0x277   :  { %v14495_v7 = vld [vmem:[#allocation11 + $0x1048] sm:$0xf]  ;;  %v14304_v2 = vor.u32 %v18364_v3, %v14303_v24  ;;  %6306 = vmatpush.bf16.msrb.mxu2 %v14048_v57  ;;  %v17936_v24 = vld [vmem:[#allocation11 + $0x18c] sm:$0xf] }
 0x278   :  { %v18412_v33 = vld [vmem:[#allocation11 + $0x1064] sm:$0xf0]  ;;  %v12609_v3 = vld [vmem:[#allocation11 + $0x1a8] sm:$0xf0] }
 0x279   :  { %v14751_v38 = vld [vmem:[#allocation11 + $0x1248] sm:$0xf]  ;;  %v14496_v14 = vor.u32 %v18412_v33, %v14495_v7  ;;  %6320 = vmatpush.bf16.msrb.mxu3 %v14304_v2  ;;  %v18000_v7 = vld [vmem:[#allocation11 + $0x38c] sm:$0xf] }
 0x27a   :  { %v18476_v26 = vld [vmem:[#allocation11 + $0x1264] sm:$0xf0]  ;;  %v12865_v33 = vld [vmem:[#allocation11 + $0x3a8] sm:$0xf0] }
 0x27b   :  { %v14015_v31 = vld [vmem:[#allocation11 + $0xc88] sm:$0xf]  ;;  %v14752_v40 = vor.u32 %v18476_v26, %v14751_v38  ;;  %6336 = vmatpush.bf16.msra.mxu0 %v14496_v14 }
 0x27c   :  { %v18292_v29 = vld [vmem:[#allocation11 + $0xca4] sm:$0xf0] }
 0x27d   :  { %v14271_v58 = vld [vmem:[#allocation11 + $0xe88] sm:$0xf]  ;;  %v14016_v18 = vor.u32 %v18292_v29, %v14015_v31  ;;  %6350 = vmatpush.bf16.msra.mxu1 %v14752_v40  ;;  %v6018_v40 = vadd.f32 %v20302_v12, %v6004_v17 }
 0x27e   :  { %v18356_v23 = vld [vmem:[#allocation11 + $0xea4] sm:$0xf0] }
 0x27f   :  { %v14463_v1 = vld [vmem:[#allocation11 + $0x1008] sm:$0xf]  ;;  %v14272_v37 = vor.u32 %v18356_v23, %v14271_v58  ;;  %6307 = vmatpush.bf16.msrb.mxu2 %v14016_v18  ;;  %v20326_v23 = vpop.f32.mrf.mxu2 }
 0x280   :  { %v18404_v5 = vld [vmem:[#allocation11 + $0x1024] sm:$0xf0] }
 0x281   :  { %v14719_v51 = vld [vmem:[#allocation11 + $0x1208] sm:$0xf]  ;;  %v14464_v10 = vor.u32 %v18404_v5, %v14463_v1  ;;  %6321 = vmatpush.bf16.msrb.mxu3 %v14272_v37  ;;  %v12612_v1 = vor.u32 %v17936_v24, %v12609_v3  ;;  %v12868_v5 = vor.u32 %v18000_v7, %v12865_v33  ;;  %v6045_v33 = vpop.f32.mrf.mxu3 }
 0x282   :  { %v18468_v59 = vld [vmem:[#allocation11 + $0x1224] sm:$0xf0] }
 0x283   :  { %v13983_v39 = vld [vmem:[#allocation11 + $0xc48] sm:$0xf]  ;;  %v14720_v42 = vor.u32 %v18468_v59, %v14719_v51  ;;  %6337 = vmatpush.bf16.msra.mxu0 %v14464_v10  ;;  %v17928_v51 = vld [vmem:[#allocation11 + $0x14c] sm:$0xf] }
 0x284   :  { %v18284_v53 = vld [vmem:[#allocation11 + $0xc64] sm:$0xf0]  ;;  %v12577_v59 = vld [vmem:[#allocation11 + $0x168] sm:$0xf0] }
 0x285   :  { %v14239_v45 = vld [vmem:[#allocation11 + $0xe48] sm:$0xf]  ;;  %v13984_v38 = vor.u32 %v18284_v53, %v13983_v39  ;;  %6351 = vmatpush.bf16.msra.mxu1 %v14720_v42  ;;  %v12580_v39 = vor.u32 %v17928_v51, %v12577_v59  ;;  %v17920_v53 = vld [vmem:[#allocation11 + $0x10c] sm:$0xf] }
 0x286   :  { %v18348_v20 = vld [vmem:[#allocation11 + $0xe64] sm:$0xf0]  ;;  %6338 = vmatmul.bf16.vlgmr.msra.gmra.mxu0 %v20244_v9 }
 0x287   :  { %v14240_v26 = vor.u32 %v18348_v20, %v14239_v45  ;;  %v13951_v57 = vld [vmem:[#allocation11 + $0xc08] sm:$0xf]  ;;  %6386 = vmatpush.bf16.msrb.mxu0 %v12644_v46  ;;  %6308 = vmatpush.bf16.msrb.mxu2 %v13984_v38  ;;  %v12545_v45 = vld [vmem:[#allocation11 + $0x128] sm:$0xf0]  ;;  %v6031_v7 = vpop.f32.mrf.mxu2 }
 0x288   :  { %v18276_v2 = vld [vmem:[#allocation11 + $0xc24] sm:$0xf0]  ;;  %6352 = vmatmul.bf16.vlgmr.msra.gmra.mxu1 %v20246_v30  ;;  %v17984_v20 = vld [vmem:[#allocation11 + $0x30c] sm:$0xf]  ;;  %v12548_v38 = vor.u32 %v17920_v53, %v12545_v45 }
 0x289   :  { %v14207_v31 = vld [vmem:[#allocation11 + $0xe08] sm:$0xf]  ;;  %6400 = vmatpush.bf16.msrb.mxu1 %v12900_v4  ;;  %6322 = vmatpush.bf16.msrb.mxu3 %v14240_v26  ;;  %v13952_v41 = vor.u32 %v18276_v2, %v13951_v57  ;;  %v12801_v46 = vld [vmem:[#allocation11 + $0x328] sm:$0xf0]  ;;  %v20338_v53 = vpop.f32.mrf.mxu3 }
 0x28a   :  { %v18340_v29 = vld [vmem:[#allocation11 + $0xe24] sm:$0xf0]  ;;  %v12804_v26 = vor.u32 %v17984_v20, %v12801_v46  ;;  %21247 = vst [vmem:[#allocation35_spill] sm:$0xff] %v20338_v53 }
 0x28b   :  { %v15199_v58 = vld [vmem:[#allocation11 + $0x15c8] sm:$0xf]  ;;  %v14208_v47 = vor.u32 %v18340_v29, %v14207_v31  ;;  %6387 = vmatpush.bf16.msrb.mxu0 %v12612_v1  ;;  %6309 = vmatpush.bf16.msrb.mxu2 %v13952_v41  ;;  %v17912_v31 = vld [vmem:[#allocation11 + $0xcc] sm:$0xf]  ;;  %v6032_v29 = vadd.f32 %v6031_v7, %v6018_v40 }
 0x28c   :  { %v18588_v14 = vld [vmem:[#allocation11 + $0x15e4] sm:$0xf0]  ;;  %v12769_v1 = vld [vmem:[#allocation11 + $0x2e8] sm:$0xf0] }
 0x28d   :  { %v15455_v0 = vld [vmem:[#allocation11 + $0x17c8] sm:$0xf]  ;;  %v15200_v21 = vor.u32 %v18588_v14, %v15199_v58  ;;  %6401 = vmatpush.bf16.msrb.mxu1 %v12868_v5  ;;  %6323 = vmatpush.bf16.msrb.mxu3 %v14208_v47  ;;  %v12513_v58 = vld [vmem:[#allocation11 + $0xe8] sm:$0xf0]  ;;  %v20334_v5 = vadd.f32 %v6045_v33, %v6032_v29 }
 0x28e   :  { %v18652_v35 = vld [vmem:[#allocation11 + $0x17e4] sm:$0xf0]  ;;  %6310 = vmatmul.bf16.vlgmr.msrb.gmra.mxu2 %v20257_v13  ;;  %v17976_v14 = vld [vmem:[#allocation11 + $0x2cc] sm:$0xf]  ;;  %v12516_v63 = vor.u32 %v17912_v31, %v12513_v58  ;;  %v20340_v31 = vpop.f32.mrf.mxu0 }
 0x28f   :  { %v15456_v12 = vor.u32 %v18652_v35, %v15455_v0  ;;  %v15167_v18 = vld [vmem:[#allocation11 + $0x1588] sm:$0xf]  ;;  %6358 = vmatpush.bf16.msra.mxu2 %v15200_v21  ;;  %6388 = vmatpush.bf16.msrb.mxu0 %v12580_v39  ;;  %21245 = vst [vmem:[#allocation33_spill] sm:$0xff] %v20334_v5  ;;  %v12772_v49 = vor.u32 %v17976_v14, %v12769_v1  ;;  %v17904_v47 = vld [vmem:[#allocation11 + $0x8c] sm:$0xf] }
 0x290   :  { %v18580_v37 = vld [vmem:[#allocation11 + $0x15a4] sm:$0xf0]  ;;  %6324 = vmatmul.bf16.vlgmr.msrb.gmra.mxu3 %v20259_v22  ;;  %v12481_v21 = vld [vmem:[#allocation11 + $0xa8] sm:$0xf0] }
 0x291   :  { %v15423_v10 = vld [vmem:[#allocation11 + $0x1788] sm:$0xf]  ;;  %6372 = vmatpush.bf16.msra.mxu3 %v15456_v12  ;;  %v15168_v4 = vor.u32 %v18580_v37, %v15167_v18  ;;  %6402 = vmatpush.bf16.msrb.mxu1 %v12836_v11  ;;  %v17968_v12 = vld [vmem:[#allocation11 + $0x28c] sm:$0xf]  ;;  %v12484_v45 = vor.u32 %v17904_v47, %v12481_v21 }
 0x292   :  { %v18644_v42 = vld [vmem:[#allocation11 + $0x17a4] sm:$0xf0]  ;;  %v12737_v18 = vld [vmem:[#allocation11 + $0x2a8] sm:$0xf0] }
 0x293   :  { %v15424_v24 = vor.u32 %v18644_v42, %v15423_v10  ;;  %v15135_v17 = vld [vmem:[#allocation11 + $0x1548] sm:$0xf]  ;;  %6359 = vmatpush.bf16.msra.mxu2 %v15168_v4  ;;  %6389 = vmatpush.bf16.msrb.mxu0 %v12548_v38  ;;  %v20336_v42 = vpop.f32.mrf.mxu2  ;;  %v12740_v20 = vor.u32 %v17968_v12, %v12737_v18  ;;  %v12705_v7 = vld [vmem:[#allocation11 + $0x268] sm:$0xf0] }
 0x294   :  { %v18572_v3 = vld [vmem:[#allocation11 + $0x1564] sm:$0xf0]  ;;  %21246 = vst [vmem:[#allocation34_spill] sm:$0xff] %v20336_v42  ;;  %v17888_v1 = vld [vmem:[#allocation11 + $0xc] sm:$0xf] }
 0x295   :  { %v15391_v57 = vld [vmem:[#allocation11 + $0x1748] sm:$0xf]  ;;  %6373 = vmatpush.bf16.msra.mxu3 %v15424_v24  ;;  %v15136_v0 = vor.u32 %v18572_v3, %v15135_v17  ;;  %6403 = vmatpush.bf16.msrb.mxu1 %v12804_v26  ;;  %v17896_v24 = vld [vmem:[#allocation11 + $0x4c] sm:$0xf] }
 0x296   :  { %v18636_v2 = vld [vmem:[#allocation11 + $0x1764] sm:$0xf0]  ;;  %v12449_v17 = vld [vmem:[#allocation11 + $0x68] sm:$0xf0] }
 0x297   :  { %v15392_v35 = vor.u32 %v18636_v2, %v15391_v57  ;;  %v15103_v51 = vld [vmem:[#allocation11 + $0x1508] sm:$0xf]  ;;  %6360 = vmatpush.bf16.msra.mxu2 %v15136_v0  ;;  %6390 = vmatpush.bf16.msrb.mxu0 %v12516_v63  ;;  %v17960_v3 = vld [vmem:[#allocation11 + $0x24c] sm:$0xf]  ;;  %v12452_v29 = vor.u32 %v17896_v24, %v12449_v17  ;;  %v20342_v63 = vpop.f32.mrf.mxu1  ;;  %v6101_v17 = vpop.f32.mrf.mxu3 }
 0x298   :  { %v18564_v59 = vld [vmem:[#allocation11 + $0x1524] sm:$0xf0]  ;;  %v12708_v58 = vor.u32 %v17960_v3, %v12705_v7  ;;  %v12417_v0 = vld [vmem:[#allocation11 + $0x28] sm:$0xf0] }
 0x299   :  { %v15359_v40 = vld [vmem:[#allocation11 + $0x1708] sm:$0xf]  ;;  %6374 = vmatpush.bf16.msra.mxu3 %v15392_v35  ;;  %v15104_v37 = vor.u32 %v18564_v59, %v15103_v51  ;;  %6404 = vmatpush.bf16.msrb.mxu1 %v12772_v49  ;;  %v17952_v35 = vld [vmem:[#allocation11 + $0x20c] sm:$0xf] }
 0x29a   :  { %v18628_v41 = vld [vmem:[#allocation11 + $0x1724] sm:$0xf0]  ;;  %v12673_v51 = vld [vmem:[#allocation11 + $0x228] sm:$0xf0] }
 0x29b   :  { %v15360_v39 = vor.u32 %v18628_v41, %v15359_v40  ;;  %v15071_v11 = vld [vmem:[#allocation11 + $0x14c8] sm:$0xf]  ;;  %6361 = vmatpush.bf16.msra.mxu2 %v15104_v37  ;;  %6391 = vmatpush.bf16.msrb.mxu0 %v12484_v45  ;;  %v18200_v59 = vld [vmem:[#allocation11 + $0x9cc] sm:$0xf]  ;;  %v6087_v18 = vpop.f32.mrf.mxu2  ;;  %v12420_v37 = vor.u32 %v17888_v1, %v12417_v0 }
 0x29c   :  { %v18556_v10 = vld [vmem:[#allocation11 + $0x14e4] sm:$0xf0]  ;;  %v13665_v49 = vld [vmem:[#allocation11 + $0x9e8] sm:$0xf0] }
 0x29d   :  { %v15327_v46 = vld [vmem:[#allocation11 + $0x16c8] sm:$0xf]  ;;  %6375 = vmatpush.bf16.msra.mxu3 %v15360_v39  ;;  %v15072_v33 = vor.u32 %v18556_v10, %v15071_v11  ;;  %6405 = vmatpush.bf16.msrb.mxu1 %v12740_v20  ;;  %v18264_v40 = vld [vmem:[#allocation11 + $0xbcc] sm:$0xf]  ;;  %v12676_v39 = vor.u32 %v17952_v35, %v12673_v51  ;;  %v6088_v20 = vadd.f32 %v6087_v18, %v20321_v36 }
 0x29e   :  { %v18620_v4 = vld [vmem:[#allocation11 + $0x16e4] sm:$0xf0]  ;;  %v13921_v41 = vld [vmem:[#allocation11 + $0xbe8] sm:$0xf0] }
 0x29f   :  { %v15328_v38 = vor.u32 %v18620_v4, %v15327_v46  ;;  %v15039_v26 = vld [vmem:[#allocation11 + $0x1488] sm:$0xf]  ;;  %6362 = vmatpush.bf16.msra.mxu2 %v15072_v33  ;;  %6392 = vmatpush.bf16.msrb.mxu0 %v12452_v29  ;;  %v13668_v46 = vor.u32 %v18200_v59, %v13665_v49  ;;  %v13924_v4 = vor.u32 %v18264_v40, %v13921_v41  ;;  %v18192_v24 = vld [vmem:[#allocation11 + $0x98c] sm:$0xf] }
 0x2a0   :  { %v18548_v57 = vld [vmem:[#allocation11 + $0x14a4] sm:$0xf0]  ;;  %v13633_v3 = vld [vmem:[#allocation11 + $0x9a8] sm:$0xf0] }
 0x2a1   :  { %v15295_v2 = vld [vmem:[#allocation11 + $0x1688] sm:$0xf]  ;;  %6376 = vmatpush.bf16.msra.mxu3 %v15328_v38  ;;  %v15040_v47 = vor.u32 %v18548_v57, %v15039_v26  ;;  %6406 = vmatpush.bf16.msrb.mxu1 %v12708_v58  ;;  %v18256_v7 = vld [vmem:[#allocation11 + $0xb8c] sm:$0xf]  ;;  %v6102_v38 = vadd.f32 %v6101_v17, %v6088_v20  ;;  %v13636_v51 = vor.u32 %v18192_v24, %v13633_v3 }
 0x2a2   :  { %v18612_v14 = vld [vmem:[#allocation11 + $0x16a4] sm:$0xf0]  ;;  %v13889_v33 = vld [vmem:[#allocation11 + $0xba8] sm:$0xf0] }
 0x2a3   :  { %v15296_v21 = vor.u32 %v18612_v14, %v15295_v2  ;;  %v15007_v12 = vld [vmem:[#allocation11 + $0x1448] sm:$0xf]  ;;  %6363 = vmatpush.bf16.msra.mxu2 %v15040_v47  ;;  %v6115_v14 = vpop.f32.mrf.mxu0  ;;  %6393 = vmatpush.bf16.msrb.mxu0 %v12420_v37  ;;  %v18072_v36 = vld [vmem:[#allocation11 + $0x5cc] sm:$0xf]  ;;  %v13892_v59 = vor.u32 %v18256_v7, %v13889_v33  ;;  %v6129_v47 = vpop.f32.mrf.mxu1 }
 0x2a4   :  { %v18540_v11 = vld [vmem:[#allocation11 + $0x1464] sm:$0xf0]  ;;  %v13153_v0 = vld [vmem:[#allocation11 + $0x5e8] sm:$0xf0]  ;;  %v6116_v35 = vadd.f32 %v6115_v14, %v6102_v38 }
 0x2a5   :  { %v15263_v10 = vld [vmem:[#allocation11 + $0x1648] sm:$0xf]  ;;  %6377 = vmatpush.bf16.msra.mxu3 %v15296_v21  ;;  %v15008_v26 = vor.u32 %v18540_v11, %v15007_v12  ;;  %6407 = vmatpush.bf16.msrb.mxu1 %v12676_v39  ;;  %v18136_v49 = vld [vmem:[#allocation11 + $0x7cc] sm:$0xf] }
 0x2a6   :  { %v18604_v45 = vld [vmem:[#allocation11 + $0x1664] sm:$0xf0]  ;;  %v13409_v40 = vld [vmem:[#allocation11 + $0x7e8] sm:$0xf0]  ;;  %v20345_v39 = vadd.f32 %v6129_v47, %v6116_v35  ;;  %6394 = vmatmul.bf16.vlgmr.msrb.gmra.mxu0 %v20202_v44 }
 0x2a7   :  { %v15264_v57 = vor.u32 %v18604_v45, %v15263_v10  ;;  %v14975_v2 = vld [vmem:[#allocation11 + $0x1408] sm:$0xf]  ;;  %6442 = vmatpush.bf16.msra.mxu0 %v13668_v46  ;;  %v18184_v41 = vld [vmem:[#allocation11 + $0x94c] sm:$0xf]  ;;  %6364 = vmatpush.bf16.msra.mxu2 %v15008_v26  ;;  %v13156_v10 = vor.u32 %v18072_v36, %v13153_v0  ;;  %v13412_v45 = vor.u32 %v18136_v49, %v13409_v40 }
 0x2a8   :  { %v18532_v29 = vld [vmem:[#allocation11 + $0x1424] sm:$0xf0]  ;;  %v13601_v21 = vld [vmem:[#allocation11 + $0x968] sm:$0xf0]  ;;  %6408 = vmatmul.bf16.vlgmr.msrb.gmra.mxu1 %v20204_v50 }
 0x2a9   :  { %v15231_v58 = vld [vmem:[#allocation11 + $0x1608] sm:$0xf]  ;;  %6456 = vmatpush.bf16.msra.mxu1 %v13924_v4  ;;  %v18248_v12 = vld [vmem:[#allocation11 + $0xb4c] sm:$0xf]  ;;  %6378 = vmatpush.bf16.msra.mxu3 %v15264_v57  ;;  %v14976_v11 = vor.u32 %v18532_v29, %v14975_v2  ;;  %v13604_v4 = vor.u32 %v18184_v41, %v13601_v21 }
 0x2aa   :  { %v18596_v1 = vld [vmem:[#allocation11 + $0x1624] sm:$0xf0]  ;;  %v13857_v18 = vld [vmem:[#allocation11 + $0xb68] sm:$0xf0] }
 0x2ab   :  { %v15232_v37 = vor.u32 %v18596_v1, %v15231_v58  ;;  %v18064_v20 = vld [vmem:[#allocation11 + $0x58c] sm:$0xf]  ;;  %6443 = vmatpush.bf16.msra.mxu0 %v13636_v51  ;;  %v13860_v24 = vor.u32 %v18248_v12, %v13857_v18  ;;  %6365 = vmatpush.bf16.msra.mxu2 %v14976_v11 }
 0x2ac   :  { %v13121_v46 = vld [vmem:[#allocation11 + $0x5a8] sm:$0xf0] }
 0x2ad   :  { %6457 = vmatpush.bf16.msra.mxu1 %v13892_v59  ;;  %v18128_v17 = vld [vmem:[#allocation11 + $0x78c] sm:$0xf]  ;;  %6379 = vmatpush.bf16.msra.mxu3 %v15232_v37  ;;  %v13124_v57 = vor.u32 %v18064_v20, %v13121_v46 }
 0x2ae   :  { %v13377_v3 = vld [vmem:[#allocation11 + $0x7a8] sm:$0xf0]  ;;  %6366 = vmatmul.bf16.vlgmr.msra.gmra.mxu2 %v20268_v16 }
 0x2af   :  { %v18176_v7 = vld [vmem:[#allocation11 + $0x90c] sm:$0xf]  ;;  %6414 = vmatpush.bf16.msrb.mxu2 %v13156_v10  ;;  %v13380_v2 = vor.u32 %v18128_v17, %v13377_v3  ;;  %6444 = vmatpush.bf16.msra.mxu0 %v13604_v4 }
 0x2b0   :  { %v13569_v33 = vld [vmem:[#allocation11 + $0x928] sm:$0xf0]  ;;  %6380 = vmatmul.bf16.vlgmr.msra.gmra.mxu3 %v20270_v55 }
 0x2b1   :  { %v18240_v38 = vld [vmem:[#allocation11 + $0xb0c] sm:$0xf]  ;;  %6428 = vmatpush.bf16.msrb.mxu3 %v13412_v45  ;;  %6458 = vmatpush.bf16.msra.mxu1 %v13860_v24  ;;  %v13572_v14 = vor.u32 %v18176_v7, %v13569_v33  ;;  %v20351_v45 = vpop.f32.mrf.mxu0  ;;  %v20353_v24 = vpop.f32.mrf.mxu1 }
 0x2b2   :  { %v13825_v26 = vld [vmem:[#allocation11 + $0xb28] sm:$0xf0] }
 0x2b3   :  { %v18056_v29 = vld [vmem:[#allocation11 + $0x54c] sm:$0xf]  ;;  %v13828_v1 = vor.u32 %v18240_v38, %v13825_v26  ;;  %6415 = vmatpush.bf16.msrb.mxu2 %v13124_v57  ;;  %6445 = vmatpush.bf16.msra.mxu0 %v13572_v14  ;;  %v20355_v38 = vpop.f32.mrf.mxu2 }
 0x2b4   :  { %v13089_v58 = vld [vmem:[#allocation11 + $0x568] sm:$0xf0] }
 0x2b5   :  { %v18120_v36 = vld [vmem:[#allocation11 + $0x74c] sm:$0xf]  ;;  %6429 = vmatpush.bf16.msrb.mxu3 %v13380_v2  ;;  %v13092_v40 = vor.u32 %v18056_v29, %v13089_v58  ;;  %6459 = vmatpush.bf16.msra.mxu1 %v13828_v1 }
 0x2b6   :  { %v13345_v0 = vld [vmem:[#allocation11 + $0x768] sm:$0xf0] }
 0x2b7   :  { %v18168_v35 = vld [vmem:[#allocation11 + $0x8cc] sm:$0xf]  ;;  %v13348_v41 = vor.u32 %v18120_v36, %v13345_v0  ;;  %6416 = vmatpush.bf16.msrb.mxu2 %v13092_v40  ;;  %v20357_v0 = vpop.f32.mrf.mxu3 }
 0x2b8   :  { %v13537_v51 = vld [vmem:[#allocation11 + $0x8e8] sm:$0xf0] }
 0x2b9   :  { %v18232_v59 = vld [vmem:[#allocation11 + $0xacc] sm:$0xf]  ;;  %v13540_v12 = vor.u32 %v18168_v35, %v13537_v51  ;;  %6430 = vmatpush.bf16.msrb.mxu3 %v13348_v41 }
 0x2ba   :  { %v13793_v49 = vld [vmem:[#allocation11 + $0xae8] sm:$0xf0] }
 0x2bb   :  { %v18048_v47 = vld [vmem:[#allocation11 + $0x50c] sm:$0xf]  ;;  %v13796_v18 = vor.u32 %v18232_v59, %v13793_v49  ;;  %6446 = vmatpush.bf16.msra.mxu0 %v13540_v12 }
 0x2bc   :  { %v13057_v21 = vld [vmem:[#allocation11 + $0x528] sm:$0xf0] }
 0x2bd   :  { %v18112_v11 = vld [vmem:[#allocation11 + $0x70c] sm:$0xf]  ;;  %v13060_v17 = vor.u32 %v18048_v47, %v13057_v21  ;;  %6460 = vmatpush.bf16.msra.mxu1 %v13796_v18 }
 0x2be   :  { %v13313_v37 = vld [vmem:[#allocation11 + $0x728] sm:$0xf0] }
 0x2bf   :  { %v18160_v10 = vld [vmem:[#allocation11 + $0x88c] sm:$0xf]  ;;  %v13316_v3 = vor.u32 %v18112_v11, %v13313_v37  ;;  %6417 = vmatpush.bf16.msrb.mxu2 %v13060_v17  ;;  %v6171_v11 = vpop.f32.mrf.mxu0  ;;  %v6157_v53 = vpop.f32.mrf.mxu3 }
 0x2c0   :  { %v13505_v20 = vld [vmem:[#allocation11 + $0x8a8] sm:$0xf0] }
 0x2c1   :  { %v18224_v46 = vld [vmem:[#allocation11 + $0xa8c] sm:$0xf]  ;;  %v13508_v26 = vor.u32 %v18160_v10, %v13505_v20  ;;  %6431 = vmatpush.bf16.msrb.mxu3 %v13316_v3  ;;  %v6185_v3 = vpop.f32.mrf.mxu1 }
 0x2c2   :  { %v13761_v4 = vld [vmem:[#allocation11 + $0xaa8] sm:$0xf0] }
 0x2c3   :  { %v18040_v7 = vld [vmem:[#allocation11 + $0x4cc] sm:$0xf]  ;;  %v13764_v57 = vor.u32 %v18224_v46, %v13761_v4  ;;  %6447 = vmatpush.bf16.msra.mxu0 %v13508_v26  ;;  %v6143_v26 = vpop.f32.mrf.mxu2 }
 0x2c4   :  { %v13025_v33 = vld [vmem:[#allocation11 + $0x4e8] sm:$0xf0] }
 0x2c5   :  { %v18104_v2 = vld [vmem:[#allocation11 + $0x6cc] sm:$0xf]  ;;  %v13028_v35 = vor.u32 %v18040_v7, %v13025_v33  ;;  %6461 = vmatpush.bf16.msra.mxu1 %v13764_v57 }
 0x2c6   :  { %v13281_v29 = vld [vmem:[#allocation11 + $0x6e8] sm:$0xf0] }
 0x2c7   :  { %v18152_v58 = vld [vmem:[#allocation11 + $0x84c] sm:$0xf]  ;;  %v13284_v51 = vor.u32 %v18104_v2, %v13281_v29  ;;  %6418 = vmatpush.bf16.msrb.mxu2 %v13028_v35 }
 0x2c8   :  { %v13473_v14 = vld [vmem:[#allocation11 + $0x868] sm:$0xf0] }
 0x2c9   :  { %v18216_v1 = vld [vmem:[#allocation11 + $0xa4c] sm:$0xf]  ;;  %v13476_v41 = vor.u32 %v18152_v58, %v13473_v14  ;;  %6432 = vmatpush.bf16.msrb.mxu3 %v13284_v51 }
 0x2ca   :  { %v13729_v36 = vld [vmem:[#allocation11 + $0xa68] sm:$0xf0] }
 0x2cb   :  { %v18032_v59 = vld [vmem:[#allocation11 + $0x48c] sm:$0xf]  ;;  %v13732_v47 = vor.u32 %v18216_v1, %v13729_v36  ;;  %6448 = vmatpush.bf16.msra.mxu0 %v13476_v41  ;;  %v6144_v36 = vadd.f32 %v6143_v26, %v20345_v39  ;;  %v20362_v26 = vpop.f32.mrf.mxu0 }
 0x2cc   :  { %v12993_v49 = vld [vmem:[#allocation11 + $0x4a8] sm:$0xf0]  ;;  %21248 = vst [vmem:[#allocation36_spill] sm:$0xff] %v20362_v26  ;;  %v12615_v26 = vld [vmem:[#allocation11 + $0x190] sm:$0xf] }
 0x2cd   :  { %v18096_v40 = vld [vmem:[#allocation11 + $0x68c] sm:$0xf]  ;;  %v12996_v7 = vor.u32 %v18032_v59, %v12993_v49  ;;  %6462 = vmatpush.bf16.msra.mxu1 %v13732_v47  ;;  %v6158_v59 = vadd.f32 %v6157_v53, %v6144_v36 }
 0x2ce   :  { %v13249_v21 = vld [vmem:[#allocation11 + $0x6a8] sm:$0xf0] }
 0x2cf   :  { %v18144_v12 = vld [vmem:[#allocation11 + $0x80c] sm:$0xf]  ;;  %v13252_v33 = vor.u32 %v18096_v40, %v13249_v21  ;;  %6419 = vmatpush.bf16.msrb.mxu2 %v12996_v7 }
 0x2d0   :  { %v13441_v18 = vld [vmem:[#allocation11 + $0x828] sm:$0xf0] }
 0x2d1   :  { %v18208_v37 = vld [vmem:[#allocation11 + $0xa0c] sm:$0xf]  ;;  %v13444_v57 = vor.u32 %v18144_v12, %v13441_v18  ;;  %6433 = vmatpush.bf16.msrb.mxu3 %v13252_v33 }
 0x2d2   :  { %v13697_v10 = vld [vmem:[#allocation11 + $0xa28] sm:$0xf0] }
 0x2d3   :  { %v18456_v20 = vld [vmem:[#allocation11 + $0x11cc] sm:$0xf]  ;;  %v13700_v29 = vor.u32 %v18208_v37, %v13697_v10  ;;  %6449 = vmatpush.bf16.msra.mxu0 %v13444_v57  ;;  %v6172_v37 = vadd.f32 %v6171_v11, %v6158_v59  ;;  %v20366_v11 = vpop.f32.mrf.mxu1 }
 0x2d4   :  { %v14689_v46 = vld [vmem:[#allocation11 + $0x11e8] sm:$0xf0]  ;;  %21249 = vst [vmem:[#allocation37_spill] sm:$0xff] %v20366_v11 }
 0x2d5   :  { %v18520_v4 = vld [vmem:[#allocation11 + $0x13cc] sm:$0xf]  ;;  %v14692_v56 = vor.u32 %v18456_v20, %v14689_v46  ;;  %6463 = vmatpush.bf16.msra.mxu1 %v13700_v29 }
 0x2d6   :  { %v14945_v17 = vld [vmem:[#allocation11 + $0x13e8] sm:$0xf0]  ;;  %6450 = vmatmul.bf16.vlgmr.msra.gmra.mxu0 %v20237_v52 }
 0x2d7   :  { %v18024_v2 = vld [vmem:[#allocation11 + $0x44c] sm:$0xf]  ;;  %v14948_v32 = vor.u32 %v18520_v4, %v14945_v17  ;;  %6498 = vmatpush.bf16.msrb.mxu0 %v14692_v56 }
 0x2d8   :  { %v12961_v58 = vld [vmem:[#allocation11 + $0x468] sm:$0xf0]  ;;  %6464 = vmatmul.bf16.vlgmr.msra.gmra.mxu1 %v20239_v34 }
 0x2d9   :  { %v18088_v14 = vld [vmem:[#allocation11 + $0x64c] sm:$0xf]  ;;  %v12964_v49 = vor.u32 %v18024_v2, %v12961_v58  ;;  %6512 = vmatpush.bf16.msrb.mxu1 %v14948_v32  ;;  %v20360_v2 = vadd.f32 %v6185_v3, %v6172_v37 }
 0x2da   :  { %v13217_v1 = vld [vmem:[#allocation11 + $0x668] sm:$0xf0] }
 0x2db   :  { %v18448_v5 = vld [vmem:[#allocation11 + $0x118c] sm:$0xf]  ;;  %v13220_v40 = vor.u32 %v18088_v14, %v13217_v1  ;;  %6420 = vmatpush.bf16.msrb.mxu2 %v12964_v49 }
 0x2dc   :  { %v14657_v35 = vld [vmem:[#allocation11 + $0x11a8] sm:$0xf0] }
 0x2dd   :  { %v18512_v51 = vld [vmem:[#allocation11 + $0x138c] sm:$0xf]  ;;  %v14660_v10 = vor.u32 %v18448_v5, %v14657_v35  ;;  %6434 = vmatpush.bf16.msrb.mxu3 %v13220_v40 }
 0x2de   :  { %v14913_v42 = vld [vmem:[#allocation11 + $0x13a8] sm:$0xf0] }
 0x2df   :  { %v18016_v41 = vld [vmem:[#allocation11 + $0x40c] sm:$0xf]  ;;  %v14916_v20 = vor.u32 %v18512_v51, %v14913_v42  ;;  %6499 = vmatpush.bf16.msrb.mxu0 %v14660_v10 }
 0x2e0   :  { %v12929_v47 = vld [vmem:[#allocation11 + $0x428] sm:$0xf0] }
 0x2e1   :  { %v18080_v21 = vld [vmem:[#allocation11 + $0x60c] sm:$0xf]  ;;  %v12932_v57 = vor.u32 %v18016_v41, %v12929_v47  ;;  %6513 = vmatpush.bf16.msrb.mxu1 %v14916_v20  ;;  %v21142_v41 = vperm.slane %v20310_v60, 2 }
 0x2e2   :  { %v13185_v12 = vld [vmem:[#allocation11 + $0x628] sm:$0xf0] }
 0x2e3   :  { %v18328_v18 = vld [vmem:[#allocation11 + $0xdcc] sm:$0xf]  ;;  %v13188_v29 = vor.u32 %v18080_v21, %v13185_v12  ;;  %6421 = vmatpush.bf16.msrb.mxu2 %v12932_v57  ;;  %v6227_v57 = vpop.f32.mrf.mxu0 }
 0x2e4   :  { %v14177_v39 = vld [vmem:[#allocation11 + $0xde8] sm:$0xf0] }
 0x2e5   :  { %v18392_v46 = vld [vmem:[#allocation11 + $0xfcc] sm:$0xf]  ;;  %v14180_v32 = vor.u32 %v18328_v18, %v14177_v39  ;;  %6435 = vmatpush.bf16.msrb.mxu3 %v13188_v29 }
 0x2e6   :  { %v14433_v4 = vld [vmem:[#allocation11 + $0xfe8] sm:$0xf0]  ;;  %6422 = vmatmul.bf16.vlgmr.msrb.gmra.mxu2 %v20219_v48 }
 0x2e7   :  { %v18440_v53 = vld [vmem:[#allocation11 + $0x114c] sm:$0xf]  ;;  %v14436_v56 = vor.u32 %v18392_v46, %v14433_v4  ;;  %6470 = vmatpush.bf16.msra.mxu2 %v14180_v32 }
 0x2e8   :  { %v14625_v17 = vld [vmem:[#allocation11 + $0x1168] sm:$0xf0]  ;;  %6436 = vmatmul.bf16.vlgmr.msrb.gmra.mxu3 %v20221_v19 }
 0x2e9   :  { %v18504_v7 = vld [vmem:[#allocation11 + $0x134c] sm:$0xf]  ;;  %v14628_v3 = vor.u32 %v18440_v53, %v14625_v17  ;;  %6484 = vmatpush.bf16.msra.mxu3 %v14436_v56 }
 0x2ea   :  { %v14881_v33 = vld [vmem:[#allocation11 + $0x1368] sm:$0xf0] }
 0x2eb   :  { %v18320_v5 = vld [vmem:[#allocation11 + $0xd8c] sm:$0xf]  ;;  %v14884_v58 = vor.u32 %v18504_v7, %v14881_v33  ;;  %6500 = vmatpush.bf16.msrb.mxu0 %v14628_v3  ;;  %v6228_v3 = vadd.f32 %v6227_v57, %v21142_v41  ;;  %v18013_v41 = vld [vmem:[#allocation11 + $0x3ec] sm:$0xf0] }
 0x2ec   :  { %v14145_v42 = vld [vmem:[#allocation11 + $0xda8] sm:$0xf0] }
 0x2ed   :  { %v18384_v14 = vld [vmem:[#allocation11 + $0xf8c] sm:$0xf]  ;;  %v14148_v49 = vor.u32 %v18320_v5, %v14145_v42  ;;  %6514 = vmatpush.bf16.msrb.mxu1 %v14884_v58 }
 0x2ee   :  { %v14401_v1 = vld [vmem:[#allocation11 + $0xfa8] sm:$0xf0] }
 0x2ef   :  { %v18432_v36 = vld [vmem:[#allocation11 + $0x110c] sm:$0xf]  ;;  %v14404_v40 = vor.u32 %v18384_v14, %v14401_v1  ;;  %6471 = vmatpush.bf16.msra.mxu2 %v14148_v49 }
 0x2f0   :  { %v14593_v35 = vld [vmem:[#allocation11 + $0x1128] sm:$0xf0] }
 0x2f1   :  { %v18496_v51 = vld [vmem:[#allocation11 + $0x130c] sm:$0xf]  ;;  %v14596_v12 = vor.u32 %v18432_v36, %v14593_v35  ;;  %6485 = vmatpush.bf16.msra.mxu3 %v14404_v40  ;;  %v6241_v36 = vpop.f32.mrf.mxu1 }
 0x2f2   :  { %v14849_v59 = vld [vmem:[#allocation11 + $0x1328] sm:$0xf0]  ;;  %v20373_v35 = vadd.f32 %v6241_v36, %v6228_v3  ;;  %v12903_v36 = vld [vmem:[#allocation11 + $0x3d0] sm:$0xf] }
 0x2f3   :  { %v18312_v47 = vld [vmem:[#allocation11 + $0xd4c] sm:$0xf]  ;;  %v14852_v18 = vor.u32 %v18496_v51, %v14849_v59  ;;  %6501 = vmatpush.bf16.msrb.mxu0 %v14596_v12  ;;  %v12904_v11 = vor.u32 %v18013_v41, %v12903_v36  ;;  %v17933_v36 = vld [vmem:[#allocation11 + $0x16c] sm:$0xf0] }
 0x2f4   :  { %v14113_v21 = vld [vmem:[#allocation11 + $0xd68] sm:$0xf0] }
 0x2f5   :  { %v18376_v39 = vld [vmem:[#allocation11 + $0xf4c] sm:$0xf]  ;;  %v14116_v53 = vor.u32 %v18312_v47, %v14113_v21  ;;  %6515 = vmatpush.bf16.msrb.mxu1 %v14852_v18  ;;  %v20375_v47 = vpop.f32.mrf.mxu2  ;;  %v20377_v21 = vpop.f32.mrf.mxu3 }
 0x2f6   :  { %v14369_v37 = vld [vmem:[#allocation11 + $0xf68] sm:$0xf0]  ;;  %21250 = vst [vmem:[#allocation38_spill] sm:$0xff] %v20375_v47  ;;  %v14921_v47 = vld [vmem:[#allocation11 + $0x13b0] sm:$0xf0] }
 0x2f7   :  { %v18424_v10 = vld [vmem:[#allocation11 + $0x10cc] sm:$0xf]  ;;  %v14372_v17 = vor.u32 %v18376_v39, %v14369_v37  ;;  %6472 = vmatpush.bf16.msra.mxu2 %v14116_v53  ;;  %21251 = vst [vmem:[#allocation39_spill] sm:$0xff] %v20377_v21  ;;  %v17941_v21 = vld [vmem:[#allocation11 + $0x1ac] sm:$0xf0] }
 0x2f8   :  { %v14561_v20 = vld [vmem:[#allocation11 + $0x10e8] sm:$0xf0]  ;;  %v12616_v41 = vor.u32 %v17941_v21, %v12615_v26 }
 0x2f9   :  { %v18488_v46 = vld [vmem:[#allocation11 + $0x12cc] sm:$0xf]  ;;  %v14564_v29 = vor.u32 %v18424_v10, %v14561_v20  ;;  %6486 = vmatpush.bf16.msra.mxu3 %v14372_v17 }
 0x2fa   :  { %v14817_v4 = vld [vmem:[#allocation11 + $0x12e8] sm:$0xf0] }
 0x2fb   :  { %v18304_v7 = vld [vmem:[#allocation11 + $0xd0c] sm:$0xf]  ;;  %v14820_v32 = vor.u32 %v18488_v46, %v14817_v4  ;;  %6502 = vmatpush.bf16.msrb.mxu0 %v14564_v29 }
 0x2fc   :  { %v14081_v33 = vld [vmem:[#allocation11 + $0xd28] sm:$0xf0] }
 0x2fd   :  { %v18368_v56 = vld [vmem:[#allocation11 + $0xf0c] sm:$0xf]  ;;  %v14084_v51 = vor.u32 %v18304_v7, %v14081_v33  ;;  %6516 = vmatpush.bf16.msrb.mxu1 %v14820_v32 }
 0x2fe   :  { %v14337_v5 = vld [vmem:[#allocation11 + $0xf28] sm:$0xf0] }
 0x2ff   :  { %v18416_v42 = vld [vmem:[#allocation11 + $0x108c] sm:$0xf]  ;;  %v14340_v59 = vor.u32 %v18368_v56, %v14337_v5  ;;  %6473 = vmatpush.bf16.msra.mxu2 %v14084_v51 }
 0x300   :  { %v14529_v58 = vld [vmem:[#allocation11 + $0x10a8] sm:$0xf0] }
 0x301   :  { %v18480_v14 = vld [vmem:[#allocation11 + $0x128c] sm:$0xf]  ;;  %v14532_v12 = vor.u32 %v18416_v42, %v14529_v58  ;;  %6487 = vmatpush.bf16.msra.mxu3 %v14340_v59 }
 0x302   :  { %v14785_v1 = vld [vmem:[#allocation11 + $0x12a8] sm:$0xf0] }
 0x303   :  { %v18296_v49 = vld [vmem:[#allocation11 + $0xccc] sm:$0xf]  ;;  %v14788_v18 = vor.u32 %v18480_v14, %v14785_v1  ;;  %6503 = vmatpush.bf16.msrb.mxu0 %v14532_v12  ;;  %v12647_v14 = vld [vmem:[#allocation11 + $0x1d0] sm:$0xf]  ;;  %v6213_v12 = vpop.f32.mrf.mxu3 }
 0x304   :  { %v14049_v40 = vld [vmem:[#allocation11 + $0xce8] sm:$0xf0]  ;;  %v17949_v1 = vld [vmem:[#allocation11 + $0x1ec] sm:$0xf0] }
 0x305   :  { %v18360_v39 = vld [vmem:[#allocation11 + $0xecc] sm:$0xf]  ;;  %v14052_v53 = vor.u32 %v18296_v49, %v14049_v40  ;;  %6517 = vmatpush.bf16.msrb.mxu1 %v14788_v18  ;;  %v6199_v40 = vpop.f32.mrf.mxu2 }
 0x306   :  { %v14305_v37 = vld [vmem:[#allocation11 + $0xee8] sm:$0xf0] }
 0x307   :  { %v18408_v10 = vld [vmem:[#allocation11 + $0x104c] sm:$0xf]  ;;  %v14308_v17 = vor.u32 %v18360_v39, %v14305_v37  ;;  %6474 = vmatpush.bf16.msra.mxu2 %v14052_v53  ;;  %v12871_v53 = vld [vmem:[#allocation11 + $0x390] sm:$0xf] }
 0x308   :  { %v14497_v20 = vld [vmem:[#allocation11 + $0x1068] sm:$0xf0] }
 0x309   :  { %v18472_v46 = vld [vmem:[#allocation11 + $0x124c] sm:$0xf]  ;;  %v14500_v56 = vor.u32 %v18408_v10, %v14497_v20  ;;  %6488 = vmatpush.bf16.msra.mxu3 %v14308_v17  ;;  %v18005_v17 = vld [vmem:[#allocation11 + $0x3ac] sm:$0xf0] }
 0x30a   :  { %v14753_v4 = vld [vmem:[#allocation11 + $0x1268] sm:$0xf0] }
 0x30b   :  { %v18288_v7 = vld [vmem:[#allocation11 + $0xc8c] sm:$0xf]  ;;  %v14756_v29 = vor.u32 %v18472_v46, %v14753_v4  ;;  %6504 = vmatpush.bf16.msrb.mxu0 %v14500_v56  ;;  %v6200_v46 = vadd.f32 %v6199_v40, %v20360_v2  ;;  %v12648_v4 = vor.u32 %v17949_v1, %v12647_v14  ;;  %v12583_v1 = vld [vmem:[#allocation11 + $0x150] sm:$0xf] }
 0x30c   :  { %v14017_v33 = vld [vmem:[#allocation11 + $0xca8] sm:$0xf0]  ;;  %v12584_v26 = vor.u32 %v17933_v36, %v12583_v1 }
 0x30d   :  { %v18352_v57 = vld [vmem:[#allocation11 + $0xe8c] sm:$0xf]  ;;  %v14020_v51 = vor.u32 %v18288_v7, %v14017_v33  ;;  %6518 = vmatpush.bf16.msrb.mxu1 %v14756_v29  ;;  %v20380_v7 = vadd.f32 %v6213_v12, %v6200_v46  ;;  %v17925_v46 = vld [vmem:[#allocation11 + $0x12c] sm:$0xf0] }
 0x30e   :  { %v14273_v32 = vld [vmem:[#allocation11 + $0xea8] sm:$0xf0] }
 0x30f   :  { %v18400_v5 = vld [vmem:[#allocation11 + $0x100c] sm:$0xf]  ;;  %v14276_v59 = vor.u32 %v18352_v57, %v14273_v32  ;;  %21252 = vst [vmem:[#allocation40_spill] sm:$0xff] %v20380_v7  ;;  %6475 = vmatpush.bf16.msra.mxu2 %v14020_v51  ;;  %v12839_v51 = vld [vmem:[#allocation11 + $0x350] sm:$0xf] }
 0x310   :  { %v14465_v42 = vld [vmem:[#allocation11 + $0x1028] sm:$0xf0] }
 0x311   :  { %v18464_v3 = vld [vmem:[#allocation11 + $0x120c] sm:$0xf]  ;;  %v14468_v18 = vor.u32 %v18400_v5, %v14465_v42  ;;  %6489 = vmatpush.bf16.msra.mxu3 %v14276_v59  ;;  %v17997_v59 = vld [vmem:[#allocation11 + $0x36c] sm:$0xf0] }
 0x312   :  { %v14721_v58 = vld [vmem:[#allocation11 + $0x1228] sm:$0xf0] }
 0x313   :  { %v18280_v49 = vld [vmem:[#allocation11 + $0xc4c] sm:$0xf]  ;;  %v14724_v39 = vor.u32 %v18464_v3, %v14721_v58  ;;  %6505 = vmatpush.bf16.msrb.mxu0 %v14468_v18  ;;  %v12872_v3 = vor.u32 %v18005_v17, %v12871_v53  ;;  %v17989_v53 = vld [vmem:[#allocation11 + $0x32c] sm:$0xf0] }
 0x314   :  { %v13985_v37 = vld [vmem:[#allocation11 + $0xc68] sm:$0xf0] }
 0x315   :  { %v18344_v10 = vld [vmem:[#allocation11 + $0xe4c] sm:$0xf]  ;;  %v13988_v33 = vor.u32 %v18280_v49, %v13985_v37  ;;  %6519 = vmatpush.bf16.msrb.mxu1 %v14724_v39 }
 0x316   :  { %v14241_v20 = vld [vmem:[#allocation11 + $0xe68] sm:$0xf0]  ;;  %6506 = vmatmul.bf16.vlgmr.msrb.gmra.mxu0 %v20244_v9 }
 0x317   :  { %v14244_v57 = vor.u32 %v18344_v10, %v14241_v20  ;;  %v18272_v56 = vld [vmem:[#allocation11 + $0xc0c] sm:$0xf]  ;;  %6554 = vmatpush.bf16.msra.mxu0 %v12648_v4  ;;  %6476 = vmatpush.bf16.msra.mxu2 %v13988_v33  ;;  %v12551_v20 = vld [vmem:[#allocation11 + $0x110] sm:$0xf] }
 0x318   :  { %v13953_v29 = vld [vmem:[#allocation11 + $0xc28] sm:$0xf0]  ;;  %6520 = vmatmul.bf16.vlgmr.msrb.gmra.mxu1 %v20246_v30  ;;  %v12807_v4 = vld [vmem:[#allocation11 + $0x310] sm:$0xf] }
 0x319   :  { %v18336_v32 = vld [vmem:[#allocation11 + $0xe0c] sm:$0xf]  ;;  %6568 = vmatpush.bf16.msra.mxu1 %v12904_v11  ;;  %6490 = vmatpush.bf16.msra.mxu3 %v14244_v57  ;;  %v13956_v49 = vor.u32 %v18272_v56, %v13953_v29  ;;  %v12840_v11 = vor.u32 %v17997_v59, %v12839_v51  ;;  %v12552_v29 = vor.u32 %v17925_v46, %v12551_v20  ;;  %v20386_v46 = vpop.f32.mrf.mxu2 }
 0x31a   :  { %v14209_v5 = vld [vmem:[#allocation11 + $0xe28] sm:$0xf0]  ;;  %21253 = vst [vmem:[#allocation41_spill] sm:$0xff] %v20386_v46  ;;  %v18197_v46 = vld [vmem:[#allocation11 + $0x9ac] sm:$0xf0] }
 0x31b   :  { %v18584_v42 = vld [vmem:[#allocation11 + $0x15cc] sm:$0xf]  ;;  %v14212_v40 = vor.u32 %v18336_v32, %v14209_v5  ;;  %6555 = vmatpush.bf16.msra.mxu0 %v12616_v41  ;;  %6477 = vmatpush.bf16.msra.mxu2 %v13956_v49  ;;  %v12808_v32 = vor.u32 %v17989_v53, %v12807_v4  ;;  %v17917_v41 = vld [vmem:[#allocation11 + $0xec] sm:$0xf0] }
 0x31c   :  { %v15201_v2 = vld [vmem:[#allocation11 + $0x15e8] sm:$0xf0] }
 0x31d   :  { %v18648_v58 = vld [vmem:[#allocation11 + $0x17cc] sm:$0xf]  ;;  %v15204_v12 = vor.u32 %v18584_v42, %v15201_v2  ;;  %6569 = vmatpush.bf16.msra.mxu1 %v12872_v3  ;;  %6491 = vmatpush.bf16.msra.mxu3 %v14212_v40  ;;  %v12519_v2 = vld [vmem:[#allocation11 + $0xd0] sm:$0xf] }
 0x31e   :  { %v15457_v14 = vld [vmem:[#allocation11 + $0x17e8] sm:$0xf0]  ;;  %6478 = vmatmul.bf16.vlgmr.msra.gmra.mxu2 %v20257_v13  ;;  %v12775_v3 = vld [vmem:[#allocation11 + $0x2d0] sm:$0xf]  ;;  %v12520_v59 = vor.u32 %v17917_v41, %v12519_v2 }
 0x31f   :  { %v15460_v18 = vor.u32 %v18648_v58, %v15457_v14  ;;  %v18576_v39 = vld [vmem:[#allocation11 + $0x158c] sm:$0xf]  ;;  %6526 = vmatpush.bf16.msrb.mxu2 %v15204_v12  ;;  %6556 = vmatpush.bf16.msra.mxu0 %v12584_v26  ;;  %v17981_v58 = vld [vmem:[#allocation11 + $0x2ec] sm:$0xf0] }
 0x320   :  { %v15169_v37 = vld [vmem:[#allocation11 + $0x15a8] sm:$0xf0]  ;;  %6492 = vmatmul.bf16.vlgmr.msra.gmra.mxu3 %v20259_v22  ;;  %v12776_v49 = vor.u32 %v17981_v58, %v12775_v3  ;;  %v17973_v26 = vld [vmem:[#allocation11 + $0x2ac] sm:$0xf0] }
 0x321   :  { %v18640_v21 = vld [vmem:[#allocation11 + $0x178c] sm:$0xf]  ;;  %6540 = vmatpush.bf16.msrb.mxu3 %v15460_v18  ;;  %v15172_v17 = vor.u32 %v18576_v39, %v15169_v37  ;;  %6570 = vmatpush.bf16.msra.mxu1 %v12840_v11  ;;  %v12487_v18 = vld [vmem:[#allocation11 + $0x90] sm:$0xf] }
 0x322   :  { %v15425_v10 = vld [vmem:[#allocation11 + $0x17a8] sm:$0xf0]  ;;  %v17909_v39 = vld [vmem:[#allocation11 + $0xac] sm:$0xf0] }
 0x323   :  { %v15428_v33 = vor.u32 %v18640_v21, %v15425_v10  ;;  %v18568_v57 = vld [vmem:[#allocation11 + $0x154c] sm:$0xf]  ;;  %6527 = vmatpush.bf16.msrb.mxu2 %v15172_v17  ;;  %6557 = vmatpush.bf16.msra.mxu0 %v12552_v29  ;;  %v12743_v37 = vld [vmem:[#allocation11 + $0x290] sm:$0xf]  ;;  %v12488_v4 = vor.u32 %v17909_v39, %v12487_v18  ;;  %v20392_v39 = vpop.f32.mrf.mxu1 }
 0x324   :  { %v15137_v56 = vld [vmem:[#allocation11 + $0x1568] sm:$0xf0]  ;;  %v12744_v53 = vor.u32 %v17973_v26, %v12743_v37  ;;  %v12711_v29 = vld [vmem:[#allocation11 + $0x250] sm:$0xf]  ;;  %21256 = vst [vmem:[#allocation44_spill] sm:$0xff] %v20392_v39 }
 0x325   :  { %v18632_v5 = vld [vmem:[#allocation11 + $0x174c] sm:$0xf]  ;;  %6541 = vmatpush.bf16.msrb.mxu3 %v15428_v33  ;;  %v15140_v14 = vor.u32 %v18568_v57, %v15137_v56  ;;  %6571 = vmatpush.bf16.msra.mxu1 %v12808_v32  ;;  %v12455_v57 = vld [vmem:[#allocation11 + $0x50] sm:$0xf] }
 0x326   :  { %v15393_v42 = vld [vmem:[#allocation11 + $0x1768] sm:$0xf0]  ;;  %v17901_v56 = vld [vmem:[#allocation11 + $0x6c] sm:$0xf0] }
 0x327   :  { %v15396_v1 = vor.u32 %v18632_v5, %v15393_v42  ;;  %v18560_v36 = vld [vmem:[#allocation11 + $0x150c] sm:$0xf]  ;;  %6528 = vmatpush.bf16.msrb.mxu2 %v15140_v14  ;;  %6558 = vmatpush.bf16.msra.mxu0 %v12520_v59  ;;  %v17965_v32 = vld [vmem:[#allocation11 + $0x26c] sm:$0xf0]  ;;  %v20388_v5 = vpop.f32.mrf.mxu3  ;;  %v20390_v14 = vpop.f32.mrf.mxu0 }
 0x328   :  { %v15105_v51 = vld [vmem:[#allocation11 + $0x1528] sm:$0xf0]  ;;  %21254 = vst [vmem:[#allocation42_spill] sm:$0xff] %v20388_v5  ;;  %v12423_v59 = vld [vmem:[#allocation11 + $0x10] sm:$0xf] }
 0x329   :  { %v18624_v40 = vld [vmem:[#allocation11 + $0x170c] sm:$0xf]  ;;  %6542 = vmatpush.bf16.msrb.mxu3 %v15396_v1  ;;  %v15108_v11 = vor.u32 %v18560_v36, %v15105_v51  ;;  %6572 = vmatpush.bf16.msra.mxu1 %v12776_v49  ;;  %21255 = vst [vmem:[#allocation43_spill] sm:$0xff] %v20390_v14  ;;  %v12456_v1 = vor.u32 %v17901_v56, %v12455_v57  ;;  %v17893_v49 = vld [vmem:[#allocation11 + $0x2c] sm:$0xf0] }
 0x32a   :  { %v15361_v12 = vld [vmem:[#allocation11 + $0x1728] sm:$0xf0]  ;;  %v12712_v36 = vor.u32 %v17965_v32, %v12711_v29  ;;  %v13671_v18 = vld [vmem:[#allocation11 + $0x9d0] sm:$0xf] }
 0x32b   :  { %v15364_v21 = vor.u32 %v18624_v40, %v15361_v12  ;;  %v18552_v10 = vld [vmem:[#allocation11 + $0x14cc] sm:$0xf]  ;;  %6529 = vmatpush.bf16.msrb.mxu2 %v15108_v11  ;;  %6559 = vmatpush.bf16.msra.mxu0 %v12488_v4  ;;  %v12679_v40 = vld [vmem:[#allocation11 + $0x210] sm:$0xf]  ;;  %v6255_v4 = vpop.f32.mrf.mxu2 }
 0x32c   :  { %v15073_v20 = vld [vmem:[#allocation11 + $0x14e8] sm:$0xf0]  ;;  %v17957_v12 = vld [vmem:[#allocation11 + $0x22c] sm:$0xf0]  ;;  %v6256_v29 = vadd.f32 %v6255_v4, %v20373_v35 }
 0x32d   :  { %v18616_v17 = vld [vmem:[#allocation11 + $0x16cc] sm:$0xf]  ;;  %6543 = vmatpush.bf16.msrb.mxu3 %v15364_v21  ;;  %v15076_v42 = vor.u32 %v18552_v10, %v15073_v20  ;;  %6573 = vmatpush.bf16.msra.mxu1 %v12744_v53  ;;  %v18205_v37 = vld [vmem:[#allocation11 + $0x9ec] sm:$0xf0]  ;;  %v12424_v53 = vor.u32 %v17893_v49, %v12423_v59 }
 0x32e   :  { %v15329_v33 = vld [vmem:[#allocation11 + $0x16e8] sm:$0xf0]  ;;  %v13927_v26 = vld [vmem:[#allocation11 + $0xbd0] sm:$0xf]  ;;  %v13672_v32 = vor.u32 %v18205_v37, %v13671_v18 }
 0x32f   :  { %v15332_v2 = vor.u32 %v18616_v17, %v15329_v33  ;;  %v18544_v41 = vld [vmem:[#allocation11 + $0x148c] sm:$0xf]  ;;  %v18269_v11 = vld [vmem:[#allocation11 + $0xbec] sm:$0xf0]  ;;  %6530 = vmatpush.bf16.msrb.mxu2 %v15076_v42  ;;  %6560 = vmatpush.bf16.msra.mxu0 %v12456_v1  ;;  %v12680_v17 = vor.u32 %v17957_v12, %v12679_v40  ;;  %v6269_v39 = vpop.f32.mrf.mxu3  ;;  %v6283_v59 = vpop.f32.mrf.mxu0 }
 0x330   :  { %v15041_v3 = vld [vmem:[#allocation11 + $0x14a8] sm:$0xf0]  ;;  %v13928_v7 = vor.u32 %v18269_v11, %v13927_v26  ;;  %v13639_v5 = vld [vmem:[#allocation11 + $0x990] sm:$0xf] }
 0x331   :  { %v18608_v58 = vld [vmem:[#allocation11 + $0x168c] sm:$0xf]  ;;  %6544 = vmatpush.bf16.msrb.mxu3 %v15332_v2  ;;  %v15044_v21 = vor.u32 %v18544_v41, %v15041_v3  ;;  %6574 = vmatpush.bf16.msra.mxu1 %v12712_v36  ;;  %v13895_v42 = vld [vmem:[#allocation11 + $0xb90] sm:$0xf]  ;;  %v6270_v41 = vadd.f32 %v6269_v39, %v6256_v29  ;;  %v13640_v18 = vor.u32 %v18197_v46, %v13639_v5 }
 0x332   :  { %v15297_v51 = vld [vmem:[#allocation11 + $0x16a8] sm:$0xf0]  ;;  %v18261_v2 = vld [vmem:[#allocation11 + $0xbac] sm:$0xf0] }
 0x333   :  { %v15300_v10 = vor.u32 %v18608_v58, %v15297_v51  ;;  %v18536_v20 = vld [vmem:[#allocation11 + $0x144c] sm:$0xf]  ;;  %6531 = vmatpush.bf16.msrb.mxu2 %v15044_v21  ;;  %6561 = vmatpush.bf16.msra.mxu0 %v12424_v53  ;;  %v13159_v35 = vld [vmem:[#allocation11 + $0x5d0] sm:$0xf]  ;;  %v6284_v12 = vadd.f32 %v6283_v59, %v6270_v41  ;;  %v13896_v37 = vor.u32 %v18261_v2, %v13895_v42  ;;  %v6297_v21 = vpop.f32.mrf.mxu1 }
 0x334   :  { %v15009_v33 = vld [vmem:[#allocation11 + $0x1468] sm:$0xf0]  ;;  %v18077_v40 = vld [vmem:[#allocation11 + $0x5ec] sm:$0xf0] }
 0x335   :  { %v18600_v57 = vld [vmem:[#allocation11 + $0x164c] sm:$0xf]  ;;  %6545 = vmatpush.bf16.msrb.mxu3 %v15300_v10  ;;  %v15012_v3 = vor.u32 %v18536_v20, %v15009_v33  ;;  %6575 = vmatpush.bf16.msra.mxu1 %v12680_v17  ;;  %v13415_v26 = vld [vmem:[#allocation11 + $0x7d0] sm:$0xf]  ;;  %v20395_v17 = vadd.f32 %v6297_v21, %v6284_v12 }
 0x336   :  { %v15265_v56 = vld [vmem:[#allocation11 + $0x1668] sm:$0xf0]  ;;  %v18141_v39 = vld [vmem:[#allocation11 + $0x7ec] sm:$0xf0]  ;;  %6562 = vmatmul.bf16.vlgmr.msra.gmra.mxu0 %v20202_v44 }
 0x337   :  { %v15268_v58 = vor.u32 %v18600_v57, %v15265_v56  ;;  %v18528_v1 = vld [vmem:[#allocation11 + $0x140c] sm:$0xf]  ;;  %6610 = vmatpush.bf16.msrb.mxu0 %v13672_v32  ;;  %v13607_v11 = vld [vmem:[#allocation11 + $0x950] sm:$0xf]  ;;  %6532 = vmatpush.bf16.msrb.mxu2 %v15012_v3  ;;  %v13416_v46 = vor.u32 %v18141_v39, %v13415_v26 }
 0x338   :  { %v14977_v36 = vld [vmem:[#allocation11 + $0x1428] sm:$0xf0]  ;;  %v18189_v10 = vld [vmem:[#allocation11 + $0x96c] sm:$0xf0]  ;;  %6576 = vmatmul.bf16.vlgmr.msra.gmra.mxu1 %v20204_v50 }
 0x339   :  { %v18592_v51 = vld [vmem:[#allocation11 + $0x160c] sm:$0xf]  ;;  %6624 = vmatpush.bf16.msrb.mxu1 %v13928_v7  ;;  %v13863_v20 = vld [vmem:[#allocation11 + $0xb50] sm:$0xf]  ;;  %6546 = vmatpush.bf16.msrb.mxu3 %v15268_v58  ;;  %v14980_v33 = vor.u32 %v18528_v1, %v14977_v36  ;;  %v13160_v7 = vor.u32 %v18077_v40, %v13159_v35  ;;  %v13608_v56 = vor.u32 %v18189_v10, %v13607_v11 }
 0x33a   :  { %v15233_v49 = vld [vmem:[#allocation11 + $0x1628] sm:$0xf0]  ;;  %v18253_v4 = vld [vmem:[#allocation11 + $0xb6c] sm:$0xf0] }
 0x33b   :  { %v15236_v53 = vor.u32 %v18592_v51, %v15233_v49  ;;  %v13127_v5 = vld [vmem:[#allocation11 + $0x590] sm:$0xf]  ;;  %6611 = vmatpush.bf16.msrb.mxu0 %v13640_v18  ;;  %v13864_v29 = vor.u32 %v18253_v4, %v13863_v20  ;;  %6533 = vmatpush.bf16.msrb.mxu2 %v14980_v33 }
 0x33c   :  { %v18069_v57 = vld [vmem:[#allocation11 + $0x5ac] sm:$0xf0] }
 0x33d   :  { %6625 = vmatpush.bf16.msrb.mxu1 %v13896_v37  ;;  %v13383_v32 = vld [vmem:[#allocation11 + $0x790] sm:$0xf]  ;;  %6547 = vmatpush.bf16.msrb.mxu3 %v15236_v53  ;;  %v13128_v1 = vor.u32 %v18069_v57, %v13127_v5  ;;  %v20401_v5 = vpop.f32.mrf.mxu0 }
 0x33e   :  { %v18133_v42 = vld [vmem:[#allocation11 + $0x7ac] sm:$0xf0]  ;;  %6534 = vmatmul.bf16.vlgmr.msrb.gmra.mxu2 %v20268_v16  ;;  %21257 = vst [vmem:[#allocation45_spill] sm:$0xff] %v20401_v5 }
 0x33f   :  { %v13575_v2 = vld [vmem:[#allocation11 + $0x910] sm:$0xf]  ;;  %6582 = vmatpush.bf16.msra.mxu2 %v13160_v7  ;;  %v13384_v36 = vor.u32 %v18133_v42, %v13383_v32  ;;  %6612 = vmatpush.bf16.msrb.mxu0 %v13608_v56  ;;  %v20403_v32 = vpop.f32.mrf.mxu1 }
 0x340   :  { %v18181_v41 = vld [vmem:[#allocation11 + $0x92c] sm:$0xf0]  ;;  %6548 = vmatmul.bf16.vlgmr.msrb.gmra.mxu3 %v20270_v55  ;;  %21258 = vst [vmem:[#allocation46_spill] sm:$0xff] %v20403_v32 }
 0x341   :  { %v13831_v3 = vld [vmem:[#allocation11 + $0xb10] sm:$0xf]  ;;  %6596 = vmatpush.bf16.msra.mxu3 %v13416_v46  ;;  %6626 = vmatpush.bf16.msrb.mxu1 %v13864_v29  ;;  %v13576_v49 = vor.u32 %v18181_v41, %v13575_v2 }
 0x342   :  { %v18245_v58 = vld [vmem:[#allocation11 + $0xb2c] sm:$0xf0] }
 0x343   :  { %v13095_v51 = vld [vmem:[#allocation11 + $0x550] sm:$0xf]  ;;  %v13832_v35 = vor.u32 %v18245_v58, %v13831_v3  ;;  %6583 = vmatpush.bf16.msra.mxu2 %v13128_v1  ;;  %6613 = vmatpush.bf16.msrb.mxu0 %v13576_v49  ;;  %v20405_v58 = vpop.f32.mrf.mxu2 }
 0x344   :  { %v18061_v59 = vld [vmem:[#allocation11 + $0x56c] sm:$0xf0]  ;;  %21259 = vst [vmem:[#allocation47_spill] sm:$0xff] %v20405_v58 }
 0x345   :  { %v13351_v40 = vld [vmem:[#allocation11 + $0x750] sm:$0xf]  ;;  %6597 = vmatpush.bf16.msra.mxu3 %v13384_v36  ;;  %v13096_v11 = vor.u32 %v18061_v59, %v13095_v51  ;;  %6627 = vmatpush.bf16.msrb.mxu1 %v13832_v35 }
 0x346   :  { %v18125_v12 = vld [vmem:[#allocation11 + $0x76c] sm:$0xf0] }
 0x347   :  { %v13543_v18 = vld [vmem:[#allocation11 + $0x8d0] sm:$0xf]  ;;  %v13352_v21 = vor.u32 %v18125_v12, %v13351_v40  ;;  %6584 = vmatpush.bf16.msra.mxu2 %v13096_v11 }
 0x348   :  { %v18173_v37 = vld [vmem:[#allocation11 + $0x8ec] sm:$0xf0] }
 0x349   :  { %v13799_v26 = vld [vmem:[#allocation11 + $0xad0] sm:$0xf]  ;;  %v13544_v4 = vor.u32 %v18173_v37, %v13543_v18  ;;  %6598 = vmatpush.bf16.msra.mxu3 %v13352_v21  ;;  %v20407_v18 = vpop.f32.mrf.mxu3 }
 0x34a   :  { %v18237_v39 = vld [vmem:[#allocation11 + $0xaec] sm:$0xf0]  ;;  %21260 = vst [vmem:[#allocation48_spill] sm:$0xff] %v20407_v18 }
 0x34b   :  { %v13063_v10 = vld [vmem:[#allocation11 + $0x510] sm:$0xf]  ;;  %v13800_v33 = vor.u32 %v18237_v39, %v13799_v26  ;;  %6614 = vmatpush.bf16.msrb.mxu0 %v13544_v4 }
 0x34c   :  { %v18053_v20 = vld [vmem:[#allocation11 + $0x52c] sm:$0xf0] }
 0x34d   :  { %v13319_v53 = vld [vmem:[#allocation11 + $0x710] sm:$0xf]  ;;  %v13064_v42 = vor.u32 %v18053_v20, %v13063_v10  ;;  %6628 = vmatpush.bf16.msrb.mxu1 %v13800_v33 }
 0x34e   :  { %v18117_v7 = vld [vmem:[#allocation11 + $0x72c] sm:$0xf0] }
 0x34f   :  { %v13511_v46 = vld [vmem:[#allocation11 + $0x890] sm:$0xf]  ;;  %v13320_v2 = vor.u32 %v18117_v7, %v13319_v53  ;;  %6585 = vmatpush.bf16.msra.mxu2 %v13064_v42  ;;  %v6339_v7 = vpop.f32.mrf.mxu0 }
 0x350   :  { %v18165_v57 = vld [vmem:[#allocation11 + $0x8ac] sm:$0xf0] }
 0x351   :  { %v13767_v56 = vld [vmem:[#allocation11 + $0xa90] sm:$0xf]  ;;  %v13512_v1 = vor.u32 %v18165_v57, %v13511_v46  ;;  %6599 = vmatpush.bf16.msra.mxu3 %v13320_v2  ;;  %v6353_v2 = vpop.f32.mrf.mxu1  ;;  %v6325_v14 = vpop.f32.mrf.mxu3 }
 0x352   :  { %v18229_v29 = vld [vmem:[#allocation11 + $0xaac] sm:$0xf0] }
 0x353   :  { %v13031_v41 = vld [vmem:[#allocation11 + $0x4d0] sm:$0xf]  ;;  %v13768_v36 = vor.u32 %v18229_v29, %v13767_v56  ;;  %6615 = vmatpush.bf16.msrb.mxu0 %v13512_v1  ;;  %v6311_v1 = vpop.f32.mrf.mxu2 }
 0x354   :  { %v18045_v3 = vld [vmem:[#allocation11 + $0x4ec] sm:$0xf0] }
 0x355   :  { %v13287_v51 = vld [vmem:[#allocation11 + $0x6d0] sm:$0xf]  ;;  %v13032_v37 = vor.u32 %v18045_v3, %v13031_v41  ;;  %6629 = vmatpush.bf16.msrb.mxu1 %v13768_v36 }
 0x356   :  { %v18109_v59 = vld [vmem:[#allocation11 + $0x6ec] sm:$0xf0] }
 0x357   :  { %v13479_v49 = vld [vmem:[#allocation11 + $0x850] sm:$0xf]  ;;  %v13288_v26 = vor.u32 %v18109_v59, %v13287_v51  ;;  %6586 = vmatpush.bf16.msra.mxu2 %v13032_v37 }
 0x358   :  { %v18157_v35 = vld [vmem:[#allocation11 + $0x86c] sm:$0xf0] }
 0x359   :  { %v13735_v40 = vld [vmem:[#allocation11 + $0xa50] sm:$0xf]  ;;  %v13480_v10 = vor.u32 %v18157_v35, %v13479_v49  ;;  %6600 = vmatpush.bf16.msra.mxu3 %v13288_v26 }
 0x35a   :  { %v18221_v12 = vld [vmem:[#allocation11 + $0xa6c] sm:$0xf0] }
 0x35b   :  { %v12999_v39 = vld [vmem:[#allocation11 + $0x490] sm:$0xf]  ;;  %v13736_v20 = vor.u32 %v18221_v12, %v13735_v40  ;;  %6616 = vmatpush.bf16.msrb.mxu0 %v13480_v10  ;;  %v6312_v12 = vadd.f32 %v6311_v1, %v20395_v17  ;;  %v20412_v1 = vpop.f32.mrf.mxu0 }
 0x35c   :  { %v18037_v11 = vld [vmem:[#allocation11 + $0x4ac] sm:$0xf0]  ;;  %21261 = vst [vmem:[#allocation49_spill] sm:$0xff] %v20412_v1 }
 0x35d   :  { %v13255_v21 = vld [vmem:[#allocation11 + $0x690] sm:$0xf]  ;;  %v13000_v41 = vor.u32 %v18037_v11, %v12999_v39  ;;  %6630 = vmatpush.bf16.msrb.mxu1 %v13736_v20  ;;  %v6326_v39 = vadd.f32 %v6325_v14, %v6312_v12 }
 0x35e   :  { %v18101_v4 = vld [vmem:[#allocation11 + $0x6ac] sm:$0xf0] }
 0x35f   :  { %v13447_v33 = vld [vmem:[#allocation11 + $0x810] sm:$0xf]  ;;  %v13256_v3 = vor.u32 %v18101_v4, %v13255_v21  ;;  %6587 = vmatpush.bf16.msra.mxu2 %v13000_v41 }
 0x360   :  { %v18149_v53 = vld [vmem:[#allocation11 + $0x82c] sm:$0xf0] }
 0x361   :  { %v13703_v46 = vld [vmem:[#allocation11 + $0xa10] sm:$0xf]  ;;  %v13448_v36 = vor.u32 %v18149_v53, %v13447_v33  ;;  %6601 = vmatpush.bf16.msra.mxu3 %v13256_v3 }
 0x362   :  { %v18213_v57 = vld [vmem:[#allocation11 + $0xa2c] sm:$0xf0] }
 0x363   :  { %v14695_v56 = vld [vmem:[#allocation11 + $0x11d0] sm:$0xf]  ;;  %v13704_v59 = vor.u32 %v18213_v57, %v13703_v46  ;;  %6617 = vmatpush.bf16.msrb.mxu0 %v13448_v36  ;;  %v6340_v46 = vadd.f32 %v6339_v7, %v6326_v39  ;;  %v20416_v7 = vpop.f32.mrf.mxu1 }
 0x364   :  { %v18461_v29 = vld [vmem:[#allocation11 + $0x11ec] sm:$0xf0]  ;;  %21262 = vst [vmem:[#allocation50_spill] sm:$0xff] %v20416_v7  ;;  %v12905_v7 = vld [vmem:[#allocation11 + $0x3f0] sm:$0xf0] }
 0x365   :  { %v14951_v32 = vld [vmem:[#allocation11 + $0x13d0] sm:$0xf]  ;;  %v14696_v5 = vor.u32 %v18461_v29, %v14695_v56  ;;  %6631 = vmatpush.bf16.msrb.mxu1 %v13704_v59 }
 0x366   :  { %v18525_v42 = vld [vmem:[#allocation11 + $0x13ec] sm:$0xf0]  ;;  %6618 = vmatmul.bf16.vlgmr.msrb.gmra.mxu0 %v20237_v52 }
 0x367   :  { %v12967_v51 = vld [vmem:[#allocation11 + $0x450] sm:$0xf]  ;;  %v14952_v18 = vor.u32 %v18525_v42, %v14951_v32  ;;  %6666 = vmatpush.bf16.msra.mxu0 %v14696_v5 }
 0x368   :  { %v18029_v49 = vld [vmem:[#allocation11 + $0x46c] sm:$0xf0]  ;;  %6632 = vmatmul.bf16.vlgmr.msrb.gmra.mxu1 %v20239_v34 }
 0x369   :  { %v13223_v35 = vld [vmem:[#allocation11 + $0x650] sm:$0xf]  ;;  %v12968_v11 = vor.u32 %v18029_v49, %v12967_v51  ;;  %6680 = vmatpush.bf16.msra.mxu1 %v14952_v18  ;;  %v20410_v51 = vadd.f32 %v6353_v2, %v6340_v46 }
 0x36a   :  { %v18093_v40 = vld [vmem:[#allocation11 + $0x66c] sm:$0xf0] }
 0x36b   :  { %v14663_v58 = vld [vmem:[#allocation11 + $0x1190] sm:$0xf]  ;;  %v13224_v21 = vor.u32 %v18093_v40, %v13223_v35  ;;  %6588 = vmatpush.bf16.msra.mxu2 %v12968_v11 }
 0x36c   :  { %v18453_v37 = vld [vmem:[#allocation11 + $0x11ac] sm:$0xf0] }
 0x36d   :  { %v14919_v26 = vld [vmem:[#allocation11 + $0x1390] sm:$0xf]  ;;  %v14664_v32 = vor.u32 %v18453_v37, %v14663_v58  ;;  %6602 = vmatpush.bf16.msra.mxu3 %v13224_v21 }
 0x36e   :  { %v12935_v10 = vld [vmem:[#allocation11 + $0x410] sm:$0xf]  ;;  %v14920_v57 = vor.u32 %v18517_v15, %v14919_v26 }
 0x36f   :  { %v18021_v20 = vld [vmem:[#allocation11 + $0x42c] sm:$0xf0]  ;;  %6667 = vmatpush.bf16.msra.mxu0 %v14664_v32 }
 0x370   :  { %v13191_v4 = vld [vmem:[#allocation11 + $0x610] sm:$0xf]  ;;  %v12936_v36 = vor.u32 %v18021_v20, %v12935_v10  ;;  %6681 = vmatpush.bf16.msra.mxu1 %v14920_v57  ;;  %v20418_v10 = vld [vmem:[#allocation13] sm:$0xff] }
 0x371   :  { %v18085_v33 = vld [vmem:[#allocation11 + $0x62c] sm:$0xf0]  ;;  %v21144_v20 = vperm.slane %v20418_v10, 3 }
 0x372   :  { %v14183_v53 = vld [vmem:[#allocation11 + $0xdd0] sm:$0xf]  ;;  %v13192_v59 = vor.u32 %v18085_v33, %v13191_v4  ;;  %6589 = vmatpush.bf16.msra.mxu2 %v12936_v36 }
 0x373   :  { %v18333_v17 = vld [vmem:[#allocation11 + $0xdec] sm:$0xf0] }
 0x374   :  { %v14439_v56 = vld [vmem:[#allocation11 + $0xfd0] sm:$0xf]  ;;  %v14184_v5 = vor.u32 %v18333_v17, %v14183_v53  ;;  %6603 = vmatpush.bf16.msra.mxu3 %v13192_v59  ;;  %v6395_v59 = vpop.f32.mrf.mxu0 }
 0x375   :  { %v18397_v29 = vld [vmem:[#allocation11 + $0xfec] sm:$0xf0]  ;;  %6590 = vmatmul.bf16.vlgmr.msra.gmra.mxu2 %v20219_v48 }
 0x376   :  { %v14631_v14 = vld [vmem:[#allocation11 + $0x1150] sm:$0xf]  ;;  %v14440_v15 = vor.u32 %v18397_v29, %v14439_v56  ;;  %6638 = vmatpush.bf16.msrb.mxu2 %v14184_v5 }
 0x377   :  { %v18445_v42 = vld [vmem:[#allocation11 + $0x116c] sm:$0xf0]  ;;  %6604 = vmatmul.bf16.vlgmr.msra.gmra.mxu3 %v20221_v19 }
 0x378   :  { %v14887_v41 = vld [vmem:[#allocation11 + $0x1350] sm:$0xf]  ;;  %v14632_v2 = vor.u32 %v18445_v42, %v14631_v14  ;;  %6652 = vmatpush.bf16.msrb.mxu3 %v14440_v15 }
 0x379   :  { %v18509_v3 = vld [vmem:[#allocation11 + $0x136c] sm:$0xf0] }
 0x37a   :  { %v14151_v58 = vld [vmem:[#allocation11 + $0xd90] sm:$0xf]  ;;  %v14888_v49 = vor.u32 %v18509_v3, %v14887_v41  ;;  %6668 = vmatpush.bf16.msra.mxu0 %v14632_v2 }
 0x37b   :  { %v18325_v18 = vld [vmem:[#allocation11 + $0xdac] sm:$0xf0] }
 0x37c   :  { %v14407_v35 = vld [vmem:[#allocation11 + $0xf90] sm:$0xf]  ;;  %v14152_v11 = vor.u32 %v18325_v18, %v14151_v58  ;;  %6682 = vmatpush.bf16.msra.mxu1 %v14888_v49  ;;  %v6396_v49 = vadd.f32 %v6395_v59, %v21144_v20  ;;  %v18009_v20 = vld [vmem:[#allocation11 + $0x3d4] sm:$0xf] }
 0x37d   :  { %v18389_v40 = vld [vmem:[#allocation11 + $0xfac] sm:$0xf0]  ;;  %v12908_v1 = vor.u32 %v18009_v20, %v12905_v7 }
 0x37e   :  { %v14599_v12 = vld [vmem:[#allocation11 + $0x1110] sm:$0xf]  ;;  %v14408_v21 = vor.u32 %v18389_v40, %v14407_v35  ;;  %6639 = vmatpush.bf16.msrb.mxu2 %v14152_v11 }
 0x37f   :  { %v18437_v37 = vld [vmem:[#allocation11 + $0x112c] sm:$0xf0] }
 0x380   :  { %v14855_v26 = vld [vmem:[#allocation11 + $0x1310] sm:$0xf]  ;;  %v14600_v53 = vor.u32 %v18437_v37, %v14599_v12  ;;  %6653 = vmatpush.bf16.msrb.mxu3 %v14408_v21  ;;  %v6409_v37 = vpop.f32.mrf.mxu1 }
 0x381   :  { %v18501_v39 = vld [vmem:[#allocation11 + $0x132c] sm:$0xf0] }
 0x382   :  { %v14119_v4 = vld [vmem:[#allocation11 + $0xd50] sm:$0xf]  ;;  %v14856_v17 = vor.u32 %v18501_v39, %v14855_v26  ;;  %6669 = vmatpush.bf16.msra.mxu0 %v14600_v53  ;;  %v20425_v26 = vadd.f32 %v6409_v37, %v6396_v49  ;;  %v20429_v53 = vpop.f32.mrf.mxu3  ;;  %v12649_v37 = vld [vmem:[#allocation11 + $0x1f0] sm:$0xf0] }
 0x383   :  { %v18317_v33 = vld [vmem:[#allocation11 + $0xd6c] sm:$0xf0]  ;;  %21264 = vst [vmem:[#allocation52_spill] sm:$0xff] %v20429_v53  ;;  %v17937_v53 = vld [vmem:[#allocation11 + $0x194] sm:$0xf] }
 0x384   :  { %v14375_v46 = vld [vmem:[#allocation11 + $0xf50] sm:$0xf]  ;;  %v14120_v42 = vor.u32 %v18317_v33, %v14119_v4  ;;  %6683 = vmatpush.bf16.msra.mxu1 %v14856_v17  ;;  %v20427_v33 = vpop.f32.mrf.mxu2 }
 0x385   :  { %v18381_v32 = vld [vmem:[#allocation11 + $0xf6c] sm:$0xf0]  ;;  %21263 = vst [vmem:[#allocation51_spill] sm:$0xff] %v20427_v33  ;;  %v12617_v33 = vld [vmem:[#allocation11 + $0x1b0] sm:$0xf0] }
 0x386   :  { %v14567_v57 = vld [vmem:[#allocation11 + $0x10d0] sm:$0xf]  ;;  %v14376_v41 = vor.u32 %v18381_v32, %v14375_v46  ;;  %6640 = vmatpush.bf16.msrb.mxu2 %v14120_v42  ;;  %v12620_v7 = vor.u32 %v17937_v53, %v12617_v33 }
 0x387   :  { %v18429_v56 = vld [vmem:[#allocation11 + $0x10ec] sm:$0xf0] }
 0x388   :  { %v14823_v29 = vld [vmem:[#allocation11 + $0x12d0] sm:$0xf]  ;;  %v14568_v5 = vor.u32 %v18429_v56, %v14567_v57  ;;  %6654 = vmatpush.bf16.msrb.mxu3 %v14376_v41 }
 0x389   :  { %v18493_v14 = vld [vmem:[#allocation11 + $0x12ec] sm:$0xf0] }
 0x38a   :  { %v14087_v3 = vld [vmem:[#allocation11 + $0xd10] sm:$0xf]  ;;  %v14824_v15 = vor.u32 %v18493_v14, %v14823_v29  ;;  %6670 = vmatpush.bf16.msra.mxu0 %v14568_v5 }
 0x38b   :  { %v18309_v36 = vld [vmem:[#allocation11 + $0xd2c] sm:$0xf0] }
 0x38c   :  { %v14343_v58 = vld [vmem:[#allocation11 + $0xf10] sm:$0xf]  ;;  %v14088_v39 = vor.u32 %v18309_v36, %v14087_v3  ;;  %6684 = vmatpush.bf16.msra.mxu1 %v14824_v15 }
 0x38d   :  { %v18373_v18 = vld [vmem:[#allocation11 + $0xf2c] sm:$0xf0] }
 0x38e   :  { %v14535_v2 = vld [vmem:[#allocation11 + $0x1090] sm:$0xf]  ;;  %v14344_v11 = vor.u32 %v18373_v18, %v14343_v58  ;;  %6641 = vmatpush.bf16.msrb.mxu2 %v14088_v39 }
 0x38f   :  { %v18421_v35 = vld [vmem:[#allocation11 + $0x10ac] sm:$0xf0] }
 0x390   :  { %v14791_v40 = vld [vmem:[#allocation11 + $0x1290] sm:$0xf]  ;;  %v14536_v17 = vor.u32 %v18421_v35, %v14535_v2  ;;  %6655 = vmatpush.bf16.msrb.mxu3 %v14344_v11 }
 0x391   :  { %v18485_v12 = vld [vmem:[#allocation11 + $0x12ac] sm:$0xf0] }
 0x392   :  { %v14055_v21 = vld [vmem:[#allocation11 + $0xcd0] sm:$0xf]  ;;  %v14792_v46 = vor.u32 %v18485_v12, %v14791_v40  ;;  %6671 = vmatpush.bf16.msra.mxu0 %v14536_v17  ;;  %v17945_v12 = vld [vmem:[#allocation11 + $0x1d4] sm:$0xf]  ;;  %v6381_v17 = vpop.f32.mrf.mxu3 }
 0x393   :  { %v18301_v4 = vld [vmem:[#allocation11 + $0xcec] sm:$0xf0] }
 0x394   :  { %v14311_v32 = vld [vmem:[#allocation11 + $0xed0] sm:$0xf]  ;;  %v14056_v42 = vor.u32 %v18301_v4, %v14055_v21  ;;  %6685 = vmatpush.bf16.msra.mxu1 %v14792_v46  ;;  %v6367_v4 = vpop.f32.mrf.mxu2 }
 0x395   :  { %v18365_v57 = vld [vmem:[#allocation11 + $0xeec] sm:$0xf0] }
 0x396   :  { %v14503_v56 = vld [vmem:[#allocation11 + $0x1050] sm:$0xf]  ;;  %v14312_v41 = vor.u32 %v18365_v57, %v14311_v32  ;;  %6642 = vmatpush.bf16.msrb.mxu2 %v14056_v42  ;;  %v18001_v42 = vld [vmem:[#allocation11 + $0x394] sm:$0xf] }
 0x397   :  { %v18413_v29 = vld [vmem:[#allocation11 + $0x106c] sm:$0xf0] }
 0x398   :  { %v14759_v14 = vld [vmem:[#allocation11 + $0x1250] sm:$0xf]  ;;  %v14504_v18 = vor.u32 %v18413_v29, %v14503_v56  ;;  %6656 = vmatpush.bf16.msrb.mxu3 %v14312_v41  ;;  %v12873_v41 = vld [vmem:[#allocation11 + $0x3b0] sm:$0xf0] }
 0x399   :  { %v18477_v59 = vld [vmem:[#allocation11 + $0x126c] sm:$0xf0]  ;;  %v12876_v20 = vor.u32 %v18001_v42, %v12873_v41  ;;  %v12809_v42 = vld [vmem:[#allocation11 + $0x330] sm:$0xf0] }
 0x39a   :  { %v14023_v3 = vld [vmem:[#allocation11 + $0xc90] sm:$0xf]  ;;  %v14760_v5 = vor.u32 %v18477_v59, %v14759_v14  ;;  %6672 = vmatpush.bf16.msra.mxu0 %v14504_v18  ;;  %v6368_v14 = vadd.f32 %v6367_v4, %v20410_v51  ;;  %v12652_v59 = vor.u32 %v17945_v12, %v12649_v37  ;;  %v17929_v12 = vld [vmem:[#allocation11 + $0x154] sm:$0xf] }
 0x39b   :  { %v18293_v36 = vld [vmem:[#allocation11 + $0xcac] sm:$0xf0]  ;;  %v12585_v37 = vld [vmem:[#allocation11 + $0x170] sm:$0xf0] }
 0x39c   :  { %v14279_v58 = vld [vmem:[#allocation11 + $0xe90] sm:$0xf]  ;;  %v14024_v39 = vor.u32 %v18293_v36, %v14023_v3  ;;  %6686 = vmatpush.bf16.msra.mxu1 %v14760_v5  ;;  %v20432_v3 = vadd.f32 %v6381_v17, %v6368_v14  ;;  %v12553_v14 = vld [vmem:[#allocation11 + $0x130] sm:$0xf0] }
 0x39d   :  { %v18357_v15 = vld [vmem:[#allocation11 + $0xeac] sm:$0xf0] }
 0x39e   :  { %v14471_v2 = vld [vmem:[#allocation11 + $0x1010] sm:$0xf]  ;;  %v14280_v11 = vor.u32 %v18357_v15, %v14279_v58  ;;  %21265 = vst [vmem:[#allocation53_spill] sm:$0xff] %v20432_v3  ;;  %6643 = vmatpush.bf16.msrb.mxu2 %v14024_v39  ;;  %v17993_v39 = vld [vmem:[#allocation11 + $0x354] sm:$0xf] }
 0x39f   :  { %v18405_v49 = vld [vmem:[#allocation11 + $0x102c] sm:$0xf0] }
 0x3a0   :  { %v14727_v35 = vld [vmem:[#allocation11 + $0x1210] sm:$0xf]  ;;  %v14472_v46 = vor.u32 %v18405_v49, %v14471_v2  ;;  %6657 = vmatpush.bf16.msrb.mxu3 %v14280_v11  ;;  %v12841_v11 = vld [vmem:[#allocation11 + $0x370] sm:$0xf0] }
 0x3a1   :  { %v18469_v40 = vld [vmem:[#allocation11 + $0x122c] sm:$0xf0]  ;;  %v12844_v33 = vor.u32 %v17993_v39, %v12841_v11 }
 0x3a2   :  { %v13991_v21 = vld [vmem:[#allocation11 + $0xc50] sm:$0xf]  ;;  %v14728_v32 = vor.u32 %v18469_v40, %v14727_v35  ;;  %6673 = vmatpush.bf16.msra.mxu0 %v14472_v46 }
 0x3a3   :  { %v18285_v57 = vld [vmem:[#allocation11 + $0xc6c] sm:$0xf0] }
 0x3a4   :  { %v14247_v56 = vld [vmem:[#allocation11 + $0xe50] sm:$0xf]  ;;  %v13992_v36 = vor.u32 %v18285_v57, %v13991_v21  ;;  %6687 = vmatpush.bf16.msra.mxu1 %v14728_v32 }
 0x3a5   :  { %v18349_v29 = vld [vmem:[#allocation11 + $0xe6c] sm:$0xf0]  ;;  %6674 = vmatmul.bf16.vlgmr.msra.gmra.mxu0 %v20244_v9 }
 0x3a6   :  { %v14248_v58 = vor.u32 %v18349_v29, %v14247_v56  ;;  %v13959_v18 = vld [vmem:[#allocation11 + $0xc10] sm:$0xf]  ;;  %6722 = vmatpush.bf16.msrb.mxu0 %v12652_v59  ;;  %6644 = vmatpush.bf16.msrb.mxu2 %v13992_v36  ;;  %v17921_v29 = vld [vmem:[#allocation11 + $0x114] sm:$0xf] }
 0x3a7   :  { %v18277_v5 = vld [vmem:[#allocation11 + $0xc2c] sm:$0xf0]  ;;  %6688 = vmatmul.bf16.vlgmr.msra.gmra.mxu1 %v20246_v30  ;;  %v17985_v59 = vld [vmem:[#allocation11 + $0x314] sm:$0xf] }
 0x3a8   :  { %v14215_v15 = vld [vmem:[#allocation11 + $0xe10] sm:$0xf]  ;;  %6736 = vmatpush.bf16.msrb.mxu1 %v12908_v1  ;;  %6658 = vmatpush.bf16.msrb.mxu3 %v14248_v58  ;;  %v13960_v21 = vor.u32 %v18277_v5, %v13959_v18  ;;  %v12588_v1 = vor.u32 %v17929_v12, %v12585_v37  ;;  %v12556_v5 = vor.u32 %v17921_v29, %v12553_v14  ;;  %v20438_v14 = vpop.f32.mrf.mxu2 }
 0x3a9   :  { %v18341_v2 = vld [vmem:[#allocation11 + $0xe2c] sm:$0xf0]  ;;  %21266 = vst [vmem:[#allocation54_spill] sm:$0xff] %v20438_v14  ;;  %v18193_v14 = vld [vmem:[#allocation11 + $0x994] sm:$0xf] }
 0x3aa   :  { %v15207_v49 = vld [vmem:[#allocation11 + $0x15d0] sm:$0xf]  ;;  %v14216_v4 = vor.u32 %v18341_v2, %v14215_v15  ;;  %6723 = vmatpush.bf16.msrb.mxu0 %v12620_v7  ;;  %6645 = vmatpush.bf16.msrb.mxu2 %v13960_v21  ;;  %v12812_v15 = vor.u32 %v17985_v59, %v12809_v42  ;;  %v12521_v7 = vld [vmem:[#allocation11 + $0xf0] sm:$0xf0] }
 0x3ab   :  { %v18589_v51 = vld [vmem:[#allocation11 + $0x15ec] sm:$0xf0] }
 0x3ac   :  { %v15463_v35 = vld [vmem:[#allocation11 + $0x17d0] sm:$0xf]  ;;  %v15208_v17 = vor.u32 %v18589_v51, %v15207_v49  ;;  %6737 = vmatpush.bf16.msrb.mxu1 %v12876_v20  ;;  %6659 = vmatpush.bf16.msrb.mxu3 %v14216_v4  ;;  %v17913_v51 = vld [vmem:[#allocation11 + $0xd4] sm:$0xf] }
 0x3ad   :  { %v18653_v40 = vld [vmem:[#allocation11 + $0x17ec] sm:$0xf0]  ;;  %6646 = vmatmul.bf16.vlgmr.msrb.gmra.mxu2 %v20257_v13  ;;  %v17977_v20 = vld [vmem:[#allocation11 + $0x2d4] sm:$0xf]  ;;  %v12524_v11 = vor.u32 %v17913_v51, %v12521_v7 }
 0x3ae   :  { %v15464_v46 = vor.u32 %v18653_v40, %v15463_v35  ;;  %v15175_v32 = vld [vmem:[#allocation11 + $0x1590] sm:$0xf]  ;;  %6694 = vmatpush.bf16.msra.mxu2 %v15208_v17  ;;  %6724 = vmatpush.bf16.msrb.mxu0 %v12588_v1  ;;  %v12777_v35 = vld [vmem:[#allocation11 + $0x2f0] sm:$0xf0] }
 0x3af   :  { %v18581_v57 = vld [vmem:[#allocation11 + $0x15ac] sm:$0xf0]  ;;  %6660 = vmatmul.bf16.vlgmr.msrb.gmra.mxu3 %v20259_v22  ;;  %v12780_v21 = vor.u32 %v17977_v20, %v12777_v35  ;;  %v12745_v1 = vld [vmem:[#allocation11 + $0x2b0] sm:$0xf0] }
 0x3b0   :  { %v15431_v53 = vld [vmem:[#allocation11 + $0x1790] sm:$0xf]  ;;  %6708 = vmatpush.bf16.msra.mxu3 %v15464_v46  ;;  %v15176_v41 = vor.u32 %v18581_v57, %v15175_v32  ;;  %6738 = vmatpush.bf16.msrb.mxu1 %v12844_v33  ;;  %v17905_v46 = vld [vmem:[#allocation11 + $0x94] sm:$0xf] }
 0x3b1   :  { %v18645_v56 = vld [vmem:[#allocation11 + $0x17ac] sm:$0xf0]  ;;  %v12489_v32 = vld [vmem:[#allocation11 + $0xb0] sm:$0xf0] }
 0x3b2   :  { %v15432_v36 = vor.u32 %v18645_v56, %v15431_v53  ;;  %v15143_v58 = vld [vmem:[#allocation11 + $0x1550] sm:$0xf]  ;;  %6695 = vmatpush.bf16.msra.mxu2 %v15176_v41  ;;  %6725 = vmatpush.bf16.msrb.mxu0 %v12556_v5  ;;  %v17969_v57 = vld [vmem:[#allocation11 + $0x294] sm:$0xf]  ;;  %v12492_v59 = vor.u32 %v17905_v46, %v12489_v32  ;;  %v20444_v32 = vpop.f32.mrf.mxu1 }
 0x3b3   :  { %v18573_v18 = vld [vmem:[#allocation11 + $0x156c] sm:$0xf0]  ;;  %v12748_v42 = vor.u32 %v17969_v57, %v12745_v1  ;;  %v17961_v5 = vld [vmem:[#allocation11 + $0x254] sm:$0xf]  ;;  %21269 = vst [vmem:[#allocation57_spill] sm:$0xff] %v20444_v32 }
 0x3b4   :  { %v15399_v2 = vld [vmem:[#allocation11 + $0x1750] sm:$0xf]  ;;  %6709 = vmatpush.bf16.msra.mxu3 %v15432_v36  ;;  %v15144_v40 = vor.u32 %v18573_v18, %v15143_v58  ;;  %6739 = vmatpush.bf16.msrb.mxu1 %v12812_v15  ;;  %v17897_v58 = vld [vmem:[#allocation11 + $0x54] sm:$0xf] }
 0x3b5   :  { %v18637_v49 = vld [vmem:[#allocation11 + $0x176c] sm:$0xf0]  ;;  %v12457_v18 = vld [vmem:[#allocation11 + $0x70] sm:$0xf0] }
 0x3b6   :  { %v15400_v12 = vor.u32 %v18637_v49, %v15399_v2  ;;  %v15111_v37 = vld [vmem:[#allocation11 + $0x1510] sm:$0xf]  ;;  %6696 = vmatpush.bf16.msra.mxu2 %v15144_v40  ;;  %6726 = vmatpush.bf16.msrb.mxu0 %v12524_v11  ;;  %v12713_v15 = vld [vmem:[#allocation11 + $0x270] sm:$0xf0]  ;;  %v20440_v2 = vpop.f32.mrf.mxu3  ;;  %v20442_v40 = vpop.f32.mrf.mxu0 }
 0x3b7   :  { %v18565_v39 = vld [vmem:[#allocation11 + $0x152c] sm:$0xf0]  ;;  %21267 = vst [vmem:[#allocation55_spill] sm:$0xff] %v20440_v2  ;;  %v17889_v11 = vld [vmem:[#allocation11 + $0x14] sm:$0xf] }
 0x3b8   :  { %v15367_v4 = vld [vmem:[#allocation11 + $0x1710] sm:$0xf]  ;;  %6710 = vmatpush.bf16.msra.mxu3 %v15400_v12  ;;  %v15112_v33 = vor.u32 %v18565_v39, %v15111_v37  ;;  %6740 = vmatpush.bf16.msrb.mxu1 %v12780_v21  ;;  %21268 = vst [vmem:[#allocation56_spill] sm:$0xff] %v20442_v40  ;;  %v12460_v12 = vor.u32 %v17897_v58, %v12457_v18  ;;  %v12425_v21 = vld [vmem:[#allocation11 + $0x30] sm:$0xf0] }
 0x3b9   :  { %v18629_v17 = vld [vmem:[#allocation11 + $0x172c] sm:$0xf0]  ;;  %v12716_v37 = vor.u32 %v17961_v5, %v12713_v15  ;;  %v18201_v46 = vld [vmem:[#allocation11 + $0x9d4] sm:$0xf] }
 0x3ba   :  { %v15368_v53 = vor.u32 %v18629_v17, %v15367_v4  ;;  %v15079_v56 = vld [vmem:[#allocation11 + $0x14d0] sm:$0xf]  ;;  %6697 = vmatpush.bf16.msra.mxu2 %v15112_v33  ;;  %6727 = vmatpush.bf16.msrb.mxu0 %v12492_v59  ;;  %v17953_v4 = vld [vmem:[#allocation11 + $0x214] sm:$0xf]  ;;  %v6423_v59 = vpop.f32.mrf.mxu2 }
 0x3bb   :  { %v18557_v29 = vld [vmem:[#allocation11 + $0x14ec] sm:$0xf0]  ;;  %v12681_v17 = vld [vmem:[#allocation11 + $0x230] sm:$0xf0]  ;;  %v6424_v5 = vadd.f32 %v6423_v59, %v20425_v26 }
 0x3bc   :  { %v15335_v41 = vld [vmem:[#allocation11 + $0x16d0] sm:$0xf]  ;;  %6711 = vmatpush.bf16.msra.mxu3 %v15368_v53  ;;  %v15080_v49 = vor.u32 %v18557_v29, %v15079_v56  ;;  %6741 = vmatpush.bf16.msrb.mxu1 %v12748_v42  ;;  %v13673_v57 = vld [vmem:[#allocation11 + $0x9f0] sm:$0xf0]  ;;  %v12428_v42 = vor.u32 %v17889_v11, %v12425_v21 }
 0x3bd   :  { %v18621_v36 = vld [vmem:[#allocation11 + $0x16ec] sm:$0xf0]  ;;  %v18265_v1 = vld [vmem:[#allocation11 + $0xbd4] sm:$0xf]  ;;  %v13676_v15 = vor.u32 %v18201_v46, %v13673_v57 }
 0x3be   :  { %v15336_v51 = vor.u32 %v18621_v36, %v15335_v41  ;;  %v15047_v7 = vld [vmem:[#allocation11 + $0x1490] sm:$0xf]  ;;  %v13929_v33 = vld [vmem:[#allocation11 + $0xbf0] sm:$0xf0]  ;;  %6698 = vmatpush.bf16.msra.mxu2 %v15080_v49  ;;  %6728 = vmatpush.bf16.msrb.mxu0 %v12460_v12  ;;  %v12684_v41 = vor.u32 %v17953_v4, %v12681_v17  ;;  %v6437_v3 = vpop.f32.mrf.mxu3  ;;  %v6451_v11 = vpop.f32.mrf.mxu0 }
 0x3bf   :  { %v18549_v20 = vld [vmem:[#allocation11 + $0x14ac] sm:$0xf0]  ;;  %v13932_v2 = vor.u32 %v18265_v1, %v13929_v33  ;;  %v13641_v32 = vld [vmem:[#allocation11 + $0x9b0] sm:$0xf0] }
 0x3c0   :  { %v15303_v35 = vld [vmem:[#allocation11 + $0x1690] sm:$0xf]  ;;  %6712 = vmatpush.bf16.msra.mxu3 %v15336_v51  ;;  %v15048_v53 = vor.u32 %v18549_v20, %v15047_v7  ;;  %6742 = vmatpush.bf16.msrb.mxu1 %v12716_v37  ;;  %v18257_v49 = vld [vmem:[#allocation11 + $0xb94] sm:$0xf]  ;;  %v6438_v7 = vadd.f32 %v6437_v3, %v6424_v5  ;;  %v13644_v46 = vor.u32 %v18193_v14, %v13641_v32 }
 0x3c1   :  { %v18613_v39 = vld [vmem:[#allocation11 + $0x16ac] sm:$0xf0]  ;;  %v13897_v51 = vld [vmem:[#allocation11 + $0xbb0] sm:$0xf0] }
 0x3c2   :  { %v15304_v56 = vor.u32 %v18613_v39, %v15303_v35  ;;  %v15015_v29 = vld [vmem:[#allocation11 + $0x1450] sm:$0xf]  ;;  %6699 = vmatpush.bf16.msra.mxu2 %v15048_v53  ;;  %6729 = vmatpush.bf16.msrb.mxu0 %v12428_v42  ;;  %v18073_v26 = vld [vmem:[#allocation11 + $0x5d4] sm:$0xf]  ;;  %v6452_v17 = vadd.f32 %v6451_v11, %v6438_v7  ;;  %v13900_v57 = vor.u32 %v18257_v49, %v13897_v51  ;;  %v6465_v53 = vpop.f32.mrf.mxu1 }
 0x3c3   :  { %v18541_v36 = vld [vmem:[#allocation11 + $0x146c] sm:$0xf0]  ;;  %v13161_v4 = vld [vmem:[#allocation11 + $0x5f0] sm:$0xf0] }
 0x3c4   :  { %v15271_v58 = vld [vmem:[#allocation11 + $0x1650] sm:$0xf]  ;;  %6713 = vmatpush.bf16.msra.mxu3 %v15304_v56  ;;  %v15016_v20 = vor.u32 %v18541_v36, %v15015_v29  ;;  %6743 = vmatpush.bf16.msrb.mxu1 %v12684_v41  ;;  %v18137_v1 = vld [vmem:[#allocation11 + $0x7d4] sm:$0xf]  ;;  %v20447_v41 = vadd.f32 %v6465_v53, %v6452_v17 }
 0x3c5   :  { %v18605_v18 = vld [vmem:[#allocation11 + $0x166c] sm:$0xf0]  ;;  %v13417_v3 = vld [vmem:[#allocation11 + $0x7f0] sm:$0xf0]  ;;  %6730 = vmatmul.bf16.vlgmr.msrb.gmra.mxu0 %v20202_v44 }
 0x3c6   :  { %v15272_v35 = vor.u32 %v18605_v18, %v15271_v58  ;;  %v14983_v12 = vld [vmem:[#allocation11 + $0x1410] sm:$0xf]  ;;  %6778 = vmatpush.bf16.msra.mxu0 %v13676_v15  ;;  %v18185_v33 = vld [vmem:[#allocation11 + $0x954] sm:$0xf]  ;;  %6700 = vmatpush.bf16.msra.mxu2 %v15016_v20  ;;  %v13420_v14 = vor.u32 %v18137_v1, %v13417_v3 }
 0x3c7   :  { %v18533_v37 = vld [vmem:[#allocation11 + $0x142c] sm:$0xf0]  ;;  %v13609_v56 = vld [vmem:[#allocation11 + $0x970] sm:$0xf0]  ;;  %6744 = vmatmul.bf16.vlgmr.msrb.gmra.mxu1 %v20204_v50 }
 0x3c8   :  { %v15239_v39 = vld [vmem:[#allocation11 + $0x1610] sm:$0xf]  ;;  %6792 = vmatpush.bf16.msra.mxu1 %v13932_v2  ;;  %v18249_v29 = vld [vmem:[#allocation11 + $0xb54] sm:$0xf]  ;;  %6714 = vmatpush.bf16.msra.mxu3 %v15272_v35  ;;  %v14984_v36 = vor.u32 %v18533_v37, %v14983_v12  ;;  %v13164_v2 = vor.u32 %v18073_v26, %v13161_v4  ;;  %v13612_v18 = vor.u32 %v18185_v33, %v13609_v56 }
 0x3c9   :  { %v18597_v21 = vld [vmem:[#allocation11 + $0x162c] sm:$0xf0]  ;;  %v13865_v59 = vld [vmem:[#allocation11 + $0xb70] sm:$0xf0] }
 0x3ca   :  { %v15240_v42 = vor.u32 %v18597_v21, %v15239_v39  ;;  %v18065_v32 = vld [vmem:[#allocation11 + $0x594] sm:$0xf]  ;;  %6779 = vmatpush.bf16.msra.mxu0 %v13644_v46  ;;  %v13868_v5 = vor.u32 %v18249_v29, %v13865_v59  ;;  %6701 = vmatpush.bf16.msra.mxu2 %v14984_v36 }
 0x3cb   :  { %v13129_v58 = vld [vmem:[#allocation11 + $0x5b0] sm:$0xf0] }
 0x3cc   :  { %6793 = vmatpush.bf16.msra.mxu1 %v13900_v57  ;;  %v18129_v15 = vld [vmem:[#allocation11 + $0x794] sm:$0xf]  ;;  %6715 = vmatpush.bf16.msra.mxu3 %v15240_v42  ;;  %v13132_v12 = vor.u32 %v18065_v32, %v13129_v58  ;;  %v20453_v32 = vpop.f32.mrf.mxu0 }
 0x3cd   :  { %v13385_v49 = vld [vmem:[#allocation11 + $0x7b0] sm:$0xf0]  ;;  %6702 = vmatmul.bf16.vlgmr.msra.gmra.mxu2 %v20268_v16  ;;  %21270 = vst [vmem:[#allocation58_spill] sm:$0xff] %v20453_v32 }
 0x3ce   :  { %v18177_v51 = vld [vmem:[#allocation11 + $0x914] sm:$0xf]  ;;  %6750 = vmatpush.bf16.msrb.mxu2 %v13164_v2  ;;  %v13388_v37 = vor.u32 %v18129_v15, %v13385_v49  ;;  %6780 = vmatpush.bf16.msra.mxu0 %v13612_v18  ;;  %v20455_v15 = vpop.f32.mrf.mxu1 }
 0x3cf   :  { %v13577_v7 = vld [vmem:[#allocation11 + $0x930] sm:$0xf0]  ;;  %6716 = vmatmul.bf16.vlgmr.msra.gmra.mxu3 %v20270_v55  ;;  %21271 = vst [vmem:[#allocation59_spill] sm:$0xff] %v20455_v15 }
 0x3d0   :  { %v18241_v20 = vld [vmem:[#allocation11 + $0xb14] sm:$0xf]  ;;  %6764 = vmatpush.bf16.msrb.mxu3 %v13420_v14  ;;  %6794 = vmatpush.bf16.msra.mxu1 %v13868_v5  ;;  %v13580_v21 = vor.u32 %v18177_v51, %v13577_v7 }
 0x3d1   :  { %v13833_v35 = vld [vmem:[#allocation11 + $0xb30] sm:$0xf0] }
 0x3d2   :  { %v18057_v39 = vld [vmem:[#allocation11 + $0x554] sm:$0xf]  ;;  %v13836_v26 = vor.u32 %v18241_v20, %v13833_v35  ;;  %6751 = vmatpush.bf16.msrb.mxu2 %v13132_v12  ;;  %6781 = vmatpush.bf16.msra.mxu0 %v13580_v21  ;;  %v20457_v35 = vpop.f32.mrf.mxu2 }
 0x3d3   :  { %v13097_v11 = vld [vmem:[#allocation11 + $0x570] sm:$0xf0]  ;;  %21272 = vst [vmem:[#allocation60_spill] sm:$0xff] %v20457_v35 }
 0x3d4   :  { %v18121_v4 = vld [vmem:[#allocation11 + $0x754] sm:$0xf]  ;;  %6765 = vmatpush.bf16.msrb.mxu3 %v13388_v37  ;;  %v13100_v33 = vor.u32 %v18057_v39, %v13097_v11  ;;  %6795 = vmatpush.bf16.msra.mxu1 %v13836_v26 }
 0x3d5   :  { %v13353_v17 = vld [vmem:[#allocation11 + $0x770] sm:$0xf0] }
 0x3d6   :  { %v18169_v46 = vld [vmem:[#allocation11 + $0x8d4] sm:$0xf]  ;;  %v13356_v53 = vor.u32 %v18121_v4, %v13353_v17  ;;  %6752 = vmatpush.bf16.msrb.mxu2 %v13100_v33 }
 0x3d7   :  { %v13545_v57 = vld [vmem:[#allocation11 + $0x8f0] sm:$0xf0] }
 0x3d8   :  { %v18233_v1 = vld [vmem:[#allocation11 + $0xad4] sm:$0xf]  ;;  %v13548_v59 = vor.u32 %v18169_v46, %v13545_v57  ;;  %6766 = vmatpush.bf16.msrb.mxu3 %v13356_v53  ;;  %v20459_v46 = vpop.f32.mrf.mxu3 }
 0x3d9   :  { %v13801_v3 = vld [vmem:[#allocation11 + $0xaf0] sm:$0xf0]  ;;  %21273 = vst [vmem:[#allocation61_spill] sm:$0xff] %v20459_v46 }
 0x3da   :  { %v18049_v56 = vld [vmem:[#allocation11 + $0x514] sm:$0xf]  ;;  %v13804_v36 = vor.u32 %v18233_v1, %v13801_v3  ;;  %6782 = vmatpush.bf16.msra.mxu0 %v13548_v59 }
 0x3db   :  { %v13065_v29 = vld [vmem:[#allocation11 + $0x530] sm:$0xf0] }
 0x3dc   :  { %v18113_v42 = vld [vmem:[#allocation11 + $0x714] sm:$0xf]  ;;  %v13068_v49 = vor.u32 %v18049_v56, %v13065_v29  ;;  %6796 = vmatpush.bf16.msra.mxu1 %v13804_v36 }
 0x3dd   :  { %v13321_v2 = vld [vmem:[#allocation11 + $0x730] sm:$0xf0] }
 0x3de   :  { %v18161_v14 = vld [vmem:[#allocation11 + $0x894] sm:$0xf]  ;;  %v13324_v51 = vor.u32 %v18113_v42, %v13321_v2  ;;  %6753 = vmatpush.bf16.msrb.mxu2 %v13068_v49  ;;  %v6507_v2 = vpop.f32.mrf.mxu0 }
 0x3df   :  { %v13513_v58 = vld [vmem:[#allocation11 + $0x8b0] sm:$0xf0] }
 0x3e0   :  { %v18225_v18 = vld [vmem:[#allocation11 + $0xa94] sm:$0xf]  ;;  %v13516_v12 = vor.u32 %v18161_v14, %v13513_v58  ;;  %6767 = vmatpush.bf16.msrb.mxu3 %v13324_v51  ;;  %v6521_v51 = vpop.f32.mrf.mxu1  ;;  %v6493_v40 = vpop.f32.mrf.mxu3 }
 0x3e1   :  { %v13769_v5 = vld [vmem:[#allocation11 + $0xab0] sm:$0xf0] }
 0x3e2   :  { %v18041_v7 = vld [vmem:[#allocation11 + $0x4d4] sm:$0xf]  ;;  %v13772_v37 = vor.u32 %v18225_v18, %v13769_v5  ;;  %6783 = vmatpush.bf16.msra.mxu0 %v13516_v12  ;;  %v6479_v12 = vpop.f32.mrf.mxu2 }
 0x3e3   :  { %v13033_v20 = vld [vmem:[#allocation11 + $0x4f0] sm:$0xf0] }
 0x3e4   :  { %v18105_v39 = vld [vmem:[#allocation11 + $0x6d4] sm:$0xf]  ;;  %v13036_v57 = vor.u32 %v18041_v7, %v13033_v20  ;;  %6797 = vmatpush.bf16.msra.mxu1 %v13772_v37 }
 0x3e5   :  { %v13289_v11 = vld [vmem:[#allocation11 + $0x6f0] sm:$0xf0] }
 0x3e6   :  { %v18153_v21 = vld [vmem:[#allocation11 + $0x854] sm:$0xf]  ;;  %v13292_v1 = vor.u32 %v18105_v39, %v13289_v11  ;;  %6754 = vmatpush.bf16.msrb.mxu2 %v13036_v57 }
 0x3e7   :  { %v13481_v26 = vld [vmem:[#allocation11 + $0x870] sm:$0xf0] }
 0x3e8   :  { %v18217_v4 = vld [vmem:[#allocation11 + $0xa54] sm:$0xf]  ;;  %v13484_v56 = vor.u32 %v18153_v21, %v13481_v26  ;;  %6768 = vmatpush.bf16.msrb.mxu3 %v13292_v1 }
 0x3e9   :  { %v13737_v17 = vld [vmem:[#allocation11 + $0xa70] sm:$0xf0] }
 0x3ea   :  { %v18033_v3 = vld [vmem:[#allocation11 + $0x494] sm:$0xf]  ;;  %v13740_v29 = vor.u32 %v18217_v4, %v13737_v17  ;;  %6784 = vmatpush.bf16.msra.mxu0 %v13484_v56  ;;  %v6480_v17 = vadd.f32 %v6479_v12, %v20447_v41  ;;  %v20464_v12 = vpop.f32.mrf.mxu0 }
 0x3eb   :  { %v13001_v33 = vld [vmem:[#allocation11 + $0x4b0] sm:$0xf0]  ;;  %21274 = vst [vmem:[#allocation62_spill] sm:$0xff] %v20464_v12  ;;  %v12623_v12 = vld [vmem:[#allocation11 + $0x198] sm:$0xf] }
 0x3ec   :  { %v18097_v53 = vld [vmem:[#allocation11 + $0x694] sm:$0xf]  ;;  %v13004_v7 = vor.u32 %v18033_v3, %v13001_v33  ;;  %6798 = vmatpush.bf16.msra.mxu1 %v13740_v29  ;;  %v6494_v3 = vadd.f32 %v6493_v40, %v6480_v17 }
 0x3ed   :  { %v13257_v59 = vld [vmem:[#allocation11 + $0x6b0] sm:$0xf0] }
 0x3ee   :  { %v18145_v36 = vld [vmem:[#allocation11 + $0x814] sm:$0xf]  ;;  %v13260_v20 = vor.u32 %v18097_v53, %v13257_v59  ;;  %6755 = vmatpush.bf16.msrb.mxu2 %v13004_v7 }
 0x3ef   :  { %v13449_v42 = vld [vmem:[#allocation11 + $0x830] sm:$0xf0] }
 0x3f0   :  { %v18209_v14 = vld [vmem:[#allocation11 + $0xa14] sm:$0xf]  ;;  %v13452_v37 = vor.u32 %v18145_v36, %v13449_v42  ;;  %6769 = vmatpush.bf16.msrb.mxu3 %v13260_v20 }
 0x3f1   :  { %v13705_v58 = vld [vmem:[#allocation11 + $0xa30] sm:$0xf0] }
 0x3f2   :  { %v18457_v18 = vld [vmem:[#allocation11 + $0x11d4] sm:$0xf]  ;;  %v13708_v11 = vor.u32 %v18209_v14, %v13705_v58  ;;  %6785 = vmatpush.bf16.msra.mxu0 %v13452_v37  ;;  %v6508_v14 = vadd.f32 %v6507_v2, %v6494_v3  ;;  %v20468_v2 = vpop.f32.mrf.mxu1 }
 0x3f3   :  { %v14697_v5 = vld [vmem:[#allocation11 + $0x11f0] sm:$0xf0]  ;;  %21275 = vst [vmem:[#allocation63_spill] sm:$0xff] %v20468_v2 }
 0x3f4   :  { %v18521_v15 = vld [vmem:[#allocation11 + $0x13d4] sm:$0xf]  ;;  %v14700_v32 = vor.u32 %v18457_v18, %v14697_v5  ;;  %6799 = vmatpush.bf16.msra.mxu1 %v13708_v11 }
 0x3f5   :  { %v14953_v49 = vld [vmem:[#allocation11 + $0x13f0] sm:$0xf0]  ;;  %6786 = vmatmul.bf16.vlgmr.msra.gmra.mxu0 %v20237_v52 }
 0x3f6   :  { %v18025_v39 = vld [vmem:[#allocation11 + $0x454] sm:$0xf]  ;;  %v14956_v46 = vor.u32 %v18521_v15, %v14953_v49  ;;  %6834 = vmatpush.bf16.msrb.mxu0 %v14700_v32 }
 0x3f7   :  { %v12969_v21 = vld [vmem:[#allocation11 + $0x470] sm:$0xf0]  ;;  %6800 = vmatmul.bf16.vlgmr.msra.gmra.mxu1 %v20239_v34 }
 0x3f8   :  { %v18089_v26 = vld [vmem:[#allocation11 + $0x654] sm:$0xf]  ;;  %v12972_v33 = vor.u32 %v18025_v39, %v12969_v21  ;;  %6848 = vmatpush.bf16.msrb.mxu1 %v14956_v46  ;;  %v20462_v39 = vadd.f32 %v6521_v51, %v6508_v14 }
 0x3f9   :  { %v13225_v4 = vld [vmem:[#allocation11 + $0x670] sm:$0xf0] }
 0x3fa   :  { %v18449_v35 = vld [vmem:[#allocation11 + $0x1194] sm:$0xf]  ;;  %v13228_v53 = vor.u32 %v18089_v26, %v13225_v4  ;;  %6756 = vmatpush.bf16.msrb.mxu2 %v12972_v33 }
 0x3fb   :  { %v14665_v57 = vld [vmem:[#allocation11 + $0x11b0] sm:$0xf0] }
 0x3fc   :  { %v18513_v1 = vld [vmem:[#allocation11 + $0x1394] sm:$0xf]  ;;  %v14668_v15 = vor.u32 %v18449_v35, %v14665_v57  ;;  %6770 = vmatpush.bf16.msrb.mxu3 %v13228_v53 }
 0x3fd   :  { %v18017_v56 = vld [vmem:[#allocation11 + $0x414] sm:$0xf]  ;;  %v14924_v58 = vor.u32 %v18513_v1, %v14921_v47 }
 0x3fe   :  { %v12937_v29 = vld [vmem:[#allocation11 + $0x430] sm:$0xf0]  ;;  %6835 = vmatpush.bf16.msrb.mxu0 %v14668_v15 }
 0x3ff   :  { %v18081_v59 = vld [vmem:[#allocation11 + $0x614] sm:$0xf]  ;;  %v12940_v37 = vor.u32 %v18017_v56, %v12937_v29  ;;  %6849 = vmatpush.bf16.msrb.mxu1 %v14924_v58  ;;  %v21146_v56 = vperm.slane %v20418_v10, 4 }
 0x400   :  { %v13193_v36 = vld [vmem:[#allocation11 + $0x630] sm:$0xf0] }
 0x401   :  { %v18329_v42 = vld [vmem:[#allocation11 + $0xdd4] sm:$0xf]  ;;  %v13196_v11 = vor.u32 %v18081_v59, %v13193_v36  ;;  %6757 = vmatpush.bf16.msrb.mxu2 %v12940_v37  ;;  %v6563_v37 = vpop.f32.mrf.mxu0 }
 0x402   :  { %v14185_v41 = vld [vmem:[#allocation11 + $0xdf0] sm:$0xf0] }
 0x403   :  { %v18393_v18 = vld [vmem:[#allocation11 + $0xfd4] sm:$0xf]  ;;  %v14188_v32 = vor.u32 %v18329_v42, %v14185_v41  ;;  %6771 = vmatpush.bf16.msrb.mxu3 %v13196_v11 }
 0x404   :  { %v14441_v5 = vld [vmem:[#allocation11 + $0xff0] sm:$0xf0]  ;;  %6758 = vmatmul.bf16.vlgmr.msrb.gmra.mxu2 %v20219_v48 }
 0x405   :  { %v18441_v40 = vld [vmem:[#allocation11 + $0x1154] sm:$0xf]  ;;  %v14444_v47 = vor.u32 %v18393_v18, %v14441_v5  ;;  %6806 = vmatpush.bf16.msra.mxu2 %v14188_v32 }
 0x406   :  { %v14633_v49 = vld [vmem:[#allocation11 + $0x1170] sm:$0xf0]  ;;  %6772 = vmatmul.bf16.vlgmr.msrb.gmra.mxu3 %v20221_v19 }
 0x407   :  { %v18505_v7 = vld [vmem:[#allocation11 + $0x1354] sm:$0xf]  ;;  %v14636_v51 = vor.u32 %v18441_v40, %v14633_v49  ;;  %6820 = vmatpush.bf16.msra.mxu3 %v14444_v47 }
 0x408   :  { %v14889_v20 = vld [vmem:[#allocation11 + $0x1370] sm:$0xf0] }
 0x409   :  { %v18321_v35 = vld [vmem:[#allocation11 + $0xd94] sm:$0xf]  ;;  %v14892_v21 = vor.u32 %v18505_v7, %v14889_v20  ;;  %6836 = vmatpush.bf16.msrb.mxu0 %v14636_v51  ;;  %v6564_v51 = vadd.f32 %v6563_v37, %v21146_v56  ;;  %v18014_v56 = vld [vmem:[#allocation11 + $0x3f4] sm:$0xf0] }
 0x40a   :  { %v14153_v46 = vld [vmem:[#allocation11 + $0xdb0] sm:$0xf0] }
 0x40b   :  { %v18385_v26 = vld [vmem:[#allocation11 + $0xf94] sm:$0xf]  ;;  %v14156_v33 = vor.u32 %v18321_v35, %v14153_v46  ;;  %6850 = vmatpush.bf16.msrb.mxu1 %v14892_v21 }
 0x40c   :  { %v14409_v4 = vld [vmem:[#allocation11 + $0xfb0] sm:$0xf0] }
 0x40d   :  { %v18433_v17 = vld [vmem:[#allocation11 + $0x1114] sm:$0xf]  ;;  %v14412_v53 = vor.u32 %v18385_v26, %v14409_v4  ;;  %6807 = vmatpush.bf16.msra.mxu2 %v14156_v33 }
 0x40e   :  { %v14601_v57 = vld [vmem:[#allocation11 + $0x1130] sm:$0xf0] }
 0x40f   :  { %v18497_v1 = vld [vmem:[#allocation11 + $0x1314] sm:$0xf]  ;;  %v14604_v36 = vor.u32 %v18433_v17, %v14601_v57  ;;  %6821 = vmatpush.bf16.msra.mxu3 %v14412_v53  ;;  %v6577_v17 = vpop.f32.mrf.mxu1 }
 0x410   :  { %v14857_v3 = vld [vmem:[#allocation11 + $0x1330] sm:$0xf0]  ;;  %v20475_v57 = vadd.f32 %v6577_v17, %v6564_v51  ;;  %v12911_v17 = vld [vmem:[#allocation11 + $0x3d8] sm:$0xf] }
 0x411   :  { %v18313_v29 = vld [vmem:[#allocation11 + $0xd54] sm:$0xf]  ;;  %v14860_v42 = vor.u32 %v18497_v1, %v14857_v3  ;;  %6837 = vmatpush.bf16.msrb.mxu0 %v14604_v36  ;;  %v12912_v2 = vor.u32 %v18014_v56, %v12911_v17  ;;  %v17934_v17 = vld [vmem:[#allocation11 + $0x174] sm:$0xf0] }
 0x412   :  { %v14121_v59 = vld [vmem:[#allocation11 + $0xd70] sm:$0xf0] }
 0x413   :  { %v18377_v41 = vld [vmem:[#allocation11 + $0xf54] sm:$0xf]  ;;  %v14124_v40 = vor.u32 %v18313_v29, %v14121_v59  ;;  %6851 = vmatpush.bf16.msrb.mxu1 %v14860_v42  ;;  %v20477_v29 = vpop.f32.mrf.mxu2  ;;  %v20479_v59 = vpop.f32.mrf.mxu3 }
 0x414   :  { %v14377_v14 = vld [vmem:[#allocation11 + $0xf70] sm:$0xf0]  ;;  %21276 = vst [vmem:[#allocation64_spill] sm:$0xff] %v20477_v29  ;;  %v18198_v29 = vld [vmem:[#allocation11 + $0x9b4] sm:$0xf0] }
 0x415   :  { %v18425_v15 = vld [vmem:[#allocation11 + $0x10d4] sm:$0xf]  ;;  %v14380_v49 = vor.u32 %v18377_v41, %v14377_v14  ;;  %6808 = vmatpush.bf16.msra.mxu2 %v14124_v40  ;;  %21277 = vst [vmem:[#allocation65_spill] sm:$0xff] %v20479_v59  ;;  %v17942_v59 = vld [vmem:[#allocation11 + $0x1b4] sm:$0xf0] }
 0x416   :  { %v14569_v58 = vld [vmem:[#allocation11 + $0x10f0] sm:$0xf0]  ;;  %v12624_v56 = vor.u32 %v17942_v59, %v12623_v12 }
 0x417   :  { %v18489_v18 = vld [vmem:[#allocation11 + $0x12d4] sm:$0xf]  ;;  %v14572_v11 = vor.u32 %v18425_v15, %v14569_v58  ;;  %6822 = vmatpush.bf16.msra.mxu3 %v14380_v49 }
 0x418   :  { %v14825_v5 = vld [vmem:[#allocation11 + $0x12f0] sm:$0xf0] }
 0x419   :  { %v18305_v7 = vld [vmem:[#allocation11 + $0xd14] sm:$0xf]  ;;  %v14828_v32 = vor.u32 %v18489_v18, %v14825_v5  ;;  %6838 = vmatpush.bf16.msrb.mxu0 %v14572_v11 }
 0x41a   :  { %v14089_v20 = vld [vmem:[#allocation11 + $0xd30] sm:$0xf0] }
 0x41b   :  { %v18369_v47 = vld [vmem:[#allocation11 + $0xf14] sm:$0xf]  ;;  %v14092_v1 = vor.u32 %v18305_v7, %v14089_v20  ;;  %6852 = vmatpush.bf16.msrb.mxu1 %v14828_v32 }
 0x41c   :  { %v14345_v35 = vld [vmem:[#allocation11 + $0xf30] sm:$0xf0] }
 0x41d   :  { %v18417_v46 = vld [vmem:[#allocation11 + $0x1094] sm:$0xf]  ;;  %v14348_v3 = vor.u32 %v18369_v47, %v14345_v35  ;;  %6809 = vmatpush.bf16.msra.mxu2 %v14092_v1 }
 0x41e   :  { %v14537_v21 = vld [vmem:[#allocation11 + $0x10b0] sm:$0xf0] }
 0x41f   :  { %v18481_v26 = vld [vmem:[#allocation11 + $0x1294] sm:$0xf]  ;;  %v14540_v36 = vor.u32 %v18417_v46, %v14537_v21  ;;  %6823 = vmatpush.bf16.msra.mxu3 %v14348_v3 }
 0x420   :  { %v14793_v4 = vld [vmem:[#allocation11 + $0x12b0] sm:$0xf0] }
 0x421   :  { %v18297_v33 = vld [vmem:[#allocation11 + $0xcd4] sm:$0xf]  ;;  %v14796_v42 = vor.u32 %v18481_v26, %v14793_v4  ;;  %6839 = vmatpush.bf16.msrb.mxu0 %v14540_v36  ;;  %v12655_v26 = vld [vmem:[#allocation11 + $0x1d8] sm:$0xf]  ;;  %v6549_v36 = vpop.f32.mrf.mxu3 }
 0x422   :  { %v14057_v53 = vld [vmem:[#allocation11 + $0xcf0] sm:$0xf0]  ;;  %v17950_v4 = vld [vmem:[#allocation11 + $0x1f4] sm:$0xf0] }
 0x423   :  { %v18361_v41 = vld [vmem:[#allocation11 + $0xed4] sm:$0xf]  ;;  %v14060_v40 = vor.u32 %v18297_v33, %v14057_v53  ;;  %6853 = vmatpush.bf16.msrb.mxu1 %v14796_v42  ;;  %v6535_v53 = vpop.f32.mrf.mxu2 }
 0x424   :  { %v14313_v14 = vld [vmem:[#allocation11 + $0xef0] sm:$0xf0] }
 0x425   :  { %v18409_v15 = vld [vmem:[#allocation11 + $0x1054] sm:$0xf]  ;;  %v14316_v49 = vor.u32 %v18361_v41, %v14313_v14  ;;  %6810 = vmatpush.bf16.msra.mxu2 %v14060_v40  ;;  %v12879_v40 = vld [vmem:[#allocation11 + $0x398] sm:$0xf] }
 0x426   :  { %v14505_v58 = vld [vmem:[#allocation11 + $0x1070] sm:$0xf0] }
 0x427   :  { %v18473_v18 = vld [vmem:[#allocation11 + $0x1254] sm:$0xf]  ;;  %v14508_v47 = vor.u32 %v18409_v15, %v14505_v58  ;;  %6824 = vmatpush.bf16.msra.mxu3 %v14316_v49  ;;  %v18006_v49 = vld [vmem:[#allocation11 + $0x3b4] sm:$0xf0] }
 0x428   :  { %v14761_v5 = vld [vmem:[#allocation11 + $0x1270] sm:$0xf0] }
 0x429   :  { %v18289_v7 = vld [vmem:[#allocation11 + $0xc94] sm:$0xf]  ;;  %v14764_v11 = vor.u32 %v18473_v18, %v14761_v5  ;;  %6840 = vmatpush.bf16.msrb.mxu0 %v14508_v47  ;;  %v6536_v18 = vadd.f32 %v6535_v53, %v20462_v39  ;;  %v12656_v5 = vor.u32 %v17950_v4, %v12655_v26  ;;  %v12591_v4 = vld [vmem:[#allocation11 + $0x158] sm:$0xf] }
 0x42a   :  { %v14025_v20 = vld [vmem:[#allocation11 + $0xcb0] sm:$0xf0]  ;;  %v12592_v12 = vor.u32 %v17934_v17, %v12591_v4 }
 0x42b   :  { %v18353_v37 = vld [vmem:[#allocation11 + $0xe94] sm:$0xf]  ;;  %v14028_v1 = vor.u32 %v18289_v7, %v14025_v20  ;;  %6854 = vmatpush.bf16.msrb.mxu1 %v14764_v11  ;;  %v20482_v7 = vadd.f32 %v6549_v36, %v6536_v18  ;;  %v17926_v18 = vld [vmem:[#allocation11 + $0x134] sm:$0xf0] }
 0x42c   :  { %v14281_v32 = vld [vmem:[#allocation11 + $0xeb0] sm:$0xf0] }
 0x42d   :  { %v18401_v35 = vld [vmem:[#allocation11 + $0x1014] sm:$0xf]  ;;  %v14284_v3 = vor.u32 %v18353_v37, %v14281_v32  ;;  %21278 = vst [vmem:[#allocation66_spill] sm:$0xff] %v20482_v7  ;;  %6811 = vmatpush.bf16.msra.mxu2 %v14028_v1  ;;  %v12847_v1 = vld [vmem:[#allocation11 + $0x358] sm:$0xf] }
 0x42e   :  { %v14473_v46 = vld [vmem:[#allocation11 + $0x1030] sm:$0xf0] }
 0x42f   :  { %v18465_v51 = vld [vmem:[#allocation11 + $0x1214] sm:$0xf]  ;;  %v14476_v42 = vor.u32 %v18401_v35, %v14473_v46  ;;  %6825 = vmatpush.bf16.msra.mxu3 %v14284_v3  ;;  %v17998_v3 = vld [vmem:[#allocation11 + $0x374] sm:$0xf0] }
 0x430   :  { %v14729_v21 = vld [vmem:[#allocation11 + $0x1230] sm:$0xf0] }
 0x431   :  { %v18281_v33 = vld [vmem:[#allocation11 + $0xc54] sm:$0xf]  ;;  %v14732_v41 = vor.u32 %v18465_v51, %v14729_v21  ;;  %6841 = vmatpush.bf16.msrb.mxu0 %v14476_v42  ;;  %v12880_v51 = vor.u32 %v18006_v49, %v12879_v40  ;;  %v17990_v40 = vld [vmem:[#allocation11 + $0x334] sm:$0xf0] }
 0x432   :  { %v13993_v14 = vld [vmem:[#allocation11 + $0xc70] sm:$0xf0] }
 0x433   :  { %v18345_v15 = vld [vmem:[#allocation11 + $0xe54] sm:$0xf]  ;;  %v13996_v20 = vor.u32 %v18281_v33, %v13993_v14  ;;  %6855 = vmatpush.bf16.msrb.mxu1 %v14732_v41 }
 0x434   :  { %v14249_v58 = vld [vmem:[#allocation11 + $0xe70] sm:$0xf0]  ;;  %6842 = vmatmul.bf16.vlgmr.msrb.gmra.mxu0 %v20244_v9 }
 0x435   :  { %v14252_v37 = vor.u32 %v18345_v15, %v14249_v58  ;;  %v18273_v47 = vld [vmem:[#allocation11 + $0xc14] sm:$0xf]  ;;  %6890 = vmatpush.bf16.msra.mxu0 %v12656_v5  ;;  %6812 = vmatpush.bf16.msra.mxu2 %v13996_v20  ;;  %v12559_v58 = vld [vmem:[#allocation11 + $0x118] sm:$0xf] }
 0x436   :  { %v13961_v11 = vld [vmem:[#allocation11 + $0xc30] sm:$0xf0]  ;;  %6856 = vmatmul.bf16.vlgmr.msrb.gmra.mxu1 %v20246_v30  ;;  %v12815_v5 = vld [vmem:[#allocation11 + $0x318] sm:$0xf] }
 0x437   :  { %v18337_v32 = vld [vmem:[#allocation11 + $0xe14] sm:$0xf]  ;;  %6904 = vmatpush.bf16.msra.mxu1 %v12912_v2  ;;  %6826 = vmatpush.bf16.msra.mxu3 %v14252_v37  ;;  %v13964_v33 = vor.u32 %v18273_v47, %v13961_v11  ;;  %v12848_v2 = vor.u32 %v17998_v3, %v12847_v1  ;;  %v12560_v11 = vor.u32 %v17926_v18, %v12559_v58  ;;  %v20488_v18 = vpop.f32.mrf.mxu2 }
 0x438   :  { %v14217_v35 = vld [vmem:[#allocation11 + $0xe30] sm:$0xf0]  ;;  %21279 = vst [vmem:[#allocation67_spill] sm:$0xff] %v20488_v18 }
 0x439   :  { %v18585_v46 = vld [vmem:[#allocation11 + $0x15d4] sm:$0xf]  ;;  %v14220_v53 = vor.u32 %v18337_v32, %v14217_v35  ;;  %6891 = vmatpush.bf16.msra.mxu0 %v12624_v56  ;;  %6813 = vmatpush.bf16.msra.mxu2 %v13964_v33  ;;  %v12816_v32 = vor.u32 %v17990_v40, %v12815_v5  ;;  %v17918_v56 = vld [vmem:[#allocation11 + $0xf4] sm:$0xf0] }
 0x43a   :  { %v15209_v39 = vld [vmem:[#allocation11 + $0x15f0] sm:$0xf0] }
 0x43b   :  { %v18649_v21 = vld [vmem:[#allocation11 + $0x17d4] sm:$0xf]  ;;  %v15212_v36 = vor.u32 %v18585_v46, %v15209_v39  ;;  %6905 = vmatpush.bf16.msra.mxu1 %v12880_v51  ;;  %6827 = vmatpush.bf16.msra.mxu3 %v14220_v53  ;;  %v12527_v39 = vld [vmem:[#allocation11 + $0xd8] sm:$0xf] }
 0x43c   :  { %v15465_v26 = vld [vmem:[#allocation11 + $0x17f0] sm:$0xf0]  ;;  %6814 = vmatmul.bf16.vlgmr.msra.gmra.mxu2 %v20257_v13  ;;  %v12783_v51 = vld [vmem:[#allocation11 + $0x2d8] sm:$0xf]  ;;  %v12528_v3 = vor.u32 %v17918_v56, %v12527_v39 }
 0x43d   :  { %v15468_v42 = vor.u32 %v18649_v21, %v15465_v26  ;;  %v18577_v41 = vld [vmem:[#allocation11 + $0x1594] sm:$0xf]  ;;  %6862 = vmatpush.bf16.msrb.mxu2 %v15212_v36  ;;  %6892 = vmatpush.bf16.msra.mxu0 %v12592_v12  ;;  %v17982_v21 = vld [vmem:[#allocation11 + $0x2f4] sm:$0xf0] }
 0x43e   :  { %v15177_v14 = vld [vmem:[#allocation11 + $0x15b0] sm:$0xf0]  ;;  %6828 = vmatmul.bf16.vlgmr.msra.gmra.mxu3 %v20259_v22  ;;  %v12784_v33 = vor.u32 %v17982_v21, %v12783_v51  ;;  %v17974_v12 = vld [vmem:[#allocation11 + $0x2b4] sm:$0xf0] }
 0x43f   :  { %v18641_v59 = vld [vmem:[#allocation11 + $0x1794] sm:$0xf]  ;;  %6876 = vmatpush.bf16.msrb.mxu3 %v15468_v42  ;;  %v15180_v49 = vor.u32 %v18577_v41, %v15177_v14  ;;  %6906 = vmatpush.bf16.msra.mxu1 %v12848_v2  ;;  %v12495_v42 = vld [vmem:[#allocation11 + $0x98] sm:$0xf] }
 0x440   :  { %v15433_v15 = vld [vmem:[#allocation11 + $0x17b0] sm:$0xf0]  ;;  %v17910_v41 = vld [vmem:[#allocation11 + $0xb4] sm:$0xf0] }
 0x441   :  { %v15436_v20 = vor.u32 %v18641_v59, %v15433_v15  ;;  %v18569_v37 = vld [vmem:[#allocation11 + $0x1554] sm:$0xf]  ;;  %6863 = vmatpush.bf16.msrb.mxu2 %v15180_v49  ;;  %6893 = vmatpush.bf16.msra.mxu0 %v12560_v11  ;;  %v12751_v14 = vld [vmem:[#allocation11 + $0x298] sm:$0xf]  ;;  %v12496_v5 = vor.u32 %v17910_v41, %v12495_v42  ;;  %v20494_v41 = vpop.f32.mrf.mxu1 }
 0x442   :  { %v15145_v47 = vld [vmem:[#allocation11 + $0x1570] sm:$0xf0]  ;;  %v12752_v40 = vor.u32 %v17974_v12, %v12751_v14  ;;  %v12719_v11 = vld [vmem:[#allocation11 + $0x258] sm:$0xf] }
 0x443   :  { %v18633_v35 = vld [vmem:[#allocation11 + $0x1754] sm:$0xf]  ;;  %6877 = vmatpush.bf16.msrb.mxu3 %v15436_v20  ;;  %v15148_v26 = vor.u32 %v18569_v37, %v15145_v47  ;;  %6907 = vmatpush.bf16.msra.mxu1 %v12816_v32  ;;  %v12463_v37 = vld [vmem:[#allocation11 + $0x58] sm:$0xf] }
 0x444   :  { %v15401_v46 = vld [vmem:[#allocation11 + $0x1770] sm:$0xf0]  ;;  %v17902_v47 = vld [vmem:[#allocation11 + $0x74] sm:$0xf0] }
 0x445   :  { %v15404_v4 = vor.u32 %v18633_v35, %v15401_v46  ;;  %v18561_v17 = vld [vmem:[#allocation11 + $0x1514] sm:$0xf]  ;;  %6864 = vmatpush.bf16.msrb.mxu2 %v15148_v26  ;;  %6894 = vmatpush.bf16.msra.mxu0 %v12528_v3  ;;  %v17966_v32 = vld [vmem:[#allocation11 + $0x274] sm:$0xf0]  ;;  %v20490_v35 = vpop.f32.mrf.mxu3  ;;  %v20492_v26 = vpop.f32.mrf.mxu0 }
 0x446   :  { %v15113_v1 = vld [vmem:[#allocation11 + $0x1530] sm:$0xf0]  ;;  %21280 = vst [vmem:[#allocation68_spill] sm:$0xff] %v20490_v35  ;;  %v12431_v3 = vld [vmem:[#allocation11 + $0x18] sm:$0xf] }
 0x447   :  { %v18625_v53 = vld [vmem:[#allocation11 + $0x1714] sm:$0xf]  ;;  %6878 = vmatpush.bf16.msrb.mxu3 %v15404_v4  ;;  %v15116_v2 = vor.u32 %v18561_v17, %v15113_v1  ;;  %6908 = vmatpush.bf16.msra.mxu1 %v12784_v33  ;;  %v12464_v4 = vor.u32 %v17902_v47, %v12463_v37  ;;  %v12720_v17 = vor.u32 %v17966_v32, %v12719_v11  ;;  %v17894_v33 = vld [vmem:[#allocation11 + $0x34] sm:$0xf0] }
 0x448   :  { %v15369_v36 = vld [vmem:[#allocation11 + $0x1730] sm:$0xf0]  ;;  %v13679_v42 = vld [vmem:[#allocation11 + $0x9d8] sm:$0xf] }
 0x449   :  { %v15372_v59 = vor.u32 %v18625_v53, %v15369_v36  ;;  %v18553_v15 = vld [vmem:[#allocation11 + $0x14d4] sm:$0xf]  ;;  %6865 = vmatpush.bf16.msrb.mxu2 %v15116_v2  ;;  %6895 = vmatpush.bf16.msra.mxu0 %v12496_v5  ;;  %v12687_v53 = vld [vmem:[#allocation11 + $0x218] sm:$0xf]  ;;  %v6591_v5 = vpop.f32.mrf.mxu2 }
 0x44a   :  { %v15081_v58 = vld [vmem:[#allocation11 + $0x14f0] sm:$0xf0]  ;;  %v17958_v36 = vld [vmem:[#allocation11 + $0x234] sm:$0xf0]  ;;  %v6592_v11 = vadd.f32 %v6591_v5, %v20475_v57 }
 0x44b   :  { %v18617_v49 = vld [vmem:[#allocation11 + $0x16d4] sm:$0xf]  ;;  %6879 = vmatpush.bf16.msrb.mxu3 %v15372_v59  ;;  %v15084_v46 = vor.u32 %v18553_v15, %v15081_v58  ;;  %6909 = vmatpush.bf16.msra.mxu1 %v12752_v40  ;;  %v18206_v14 = vld [vmem:[#allocation11 + $0x9f4] sm:$0xf0]  ;;  %v12432_v40 = vor.u32 %v17894_v33, %v12431_v3 }
 0x44c   :  { %v15337_v20 = vld [vmem:[#allocation11 + $0x16f0] sm:$0xf0]  ;;  %v13935_v12 = vld [vmem:[#allocation11 + $0xbd8] sm:$0xf]  ;;  %v13680_v32 = vor.u32 %v18206_v14, %v13679_v42 }
 0x44d   :  { %v15340_v39 = vor.u32 %v18617_v49, %v15337_v20  ;;  %v18545_v56 = vld [vmem:[#allocation11 + $0x1494] sm:$0xf]  ;;  %v18270_v2 = vld [vmem:[#allocation11 + $0xbf4] sm:$0xf0]  ;;  %6866 = vmatpush.bf16.msrb.mxu2 %v15084_v46  ;;  %6896 = vmatpush.bf16.msra.mxu0 %v12464_v4  ;;  %v12688_v49 = vor.u32 %v17958_v36, %v12687_v53  ;;  %v6605_v18 = vpop.f32.mrf.mxu3  ;;  %v6619_v3 = vpop.f32.mrf.mxu0 }
 0x44e   :  { %v15049_v51 = vld [vmem:[#allocation11 + $0x14b0] sm:$0xf0]  ;;  %v13936_v7 = vor.u32 %v18270_v2, %v13935_v12  ;;  %v13647_v35 = vld [vmem:[#allocation11 + $0x998] sm:$0xf] }
 0x44f   :  { %v18609_v21 = vld [vmem:[#allocation11 + $0x1694] sm:$0xf]  ;;  %6880 = vmatpush.bf16.msrb.mxu3 %v15340_v39  ;;  %v15052_v59 = vor.u32 %v18545_v56, %v15049_v51  ;;  %6910 = vmatpush.bf16.msra.mxu1 %v12720_v17  ;;  %v13903_v46 = vld [vmem:[#allocation11 + $0xb98] sm:$0xf]  ;;  %v6606_v56 = vadd.f32 %v6605_v18, %v6592_v11  ;;  %v13648_v42 = vor.u32 %v18198_v29, %v13647_v35 }
 0x450   :  { %v15305_v1 = vld [vmem:[#allocation11 + $0x16b0] sm:$0xf0]  ;;  %v18262_v39 = vld [vmem:[#allocation11 + $0xbb4] sm:$0xf0] }
 0x451   :  { %v15308_v15 = vor.u32 %v18609_v21, %v15305_v1  ;;  %v18537_v58 = vld [vmem:[#allocation11 + $0x1454] sm:$0xf]  ;;  %6867 = vmatpush.bf16.msrb.mxu2 %v15052_v59  ;;  %6897 = vmatpush.bf16.msra.mxu0 %v12432_v40  ;;  %v13167_v57 = vld [vmem:[#allocation11 + $0x5d8] sm:$0xf]  ;;  %v6620_v36 = vadd.f32 %v6619_v3, %v6606_v56  ;;  %v13904_v14 = vor.u32 %v18262_v39, %v13903_v46  ;;  %v6633_v59 = vpop.f32.mrf.mxu1 }
 0x452   :  { %v15017_v20 = vld [vmem:[#allocation11 + $0x1470] sm:$0xf0]  ;;  %v18078_v53 = vld [vmem:[#allocation11 + $0x5f4] sm:$0xf0] }
 0x453   :  { %v18601_v37 = vld [vmem:[#allocation11 + $0x1654] sm:$0xf]  ;;  %6881 = vmatpush.bf16.msrb.mxu3 %v15308_v15  ;;  %v15020_v51 = vor.u32 %v18537_v58, %v15017_v20  ;;  %6911 = vmatpush.bf16.msra.mxu1 %v12688_v49  ;;  %v13423_v12 = vld [vmem:[#allocation11 + $0x7d8] sm:$0xf]  ;;  %v20497_v49 = vadd.f32 %v6633_v59, %v6620_v36 }
 0x454   :  { %v15273_v47 = vld [vmem:[#allocation11 + $0x1670] sm:$0xf0]  ;;  %v18142_v18 = vld [vmem:[#allocation11 + $0x7f4] sm:$0xf0]  ;;  %6898 = vmatmul.bf16.vlgmr.msra.gmra.mxu0 %v20202_v44 }
 0x455   :  { %v15276_v21 = vor.u32 %v18601_v37, %v15273_v47  ;;  %v18529_v4 = vld [vmem:[#allocation11 + $0x1414] sm:$0xf]  ;;  %6946 = vmatpush.bf16.msrb.mxu0 %v13680_v32  ;;  %v13615_v2 = vld [vmem:[#allocation11 + $0x958] sm:$0xf]  ;;  %6868 = vmatpush.bf16.msrb.mxu2 %v15020_v51  ;;  %v13424_v29 = vor.u32 %v18142_v18, %v13423_v12 }
 0x456   :  { %v14985_v17 = vld [vmem:[#allocation11 + $0x1430] sm:$0xf0]  ;;  %v18190_v15 = vld [vmem:[#allocation11 + $0x974] sm:$0xf0]  ;;  %6912 = vmatmul.bf16.vlgmr.msra.gmra.mxu1 %v20204_v50 }
 0x457   :  { %v18593_v1 = vld [vmem:[#allocation11 + $0x1614] sm:$0xf]  ;;  %6960 = vmatpush.bf16.msrb.mxu1 %v13936_v7  ;;  %v13871_v58 = vld [vmem:[#allocation11 + $0xb58] sm:$0xf]  ;;  %6882 = vmatpush.bf16.msrb.mxu3 %v15276_v21  ;;  %v14988_v20 = vor.u32 %v18529_v4, %v14985_v17  ;;  %v13168_v7 = vor.u32 %v18078_v53, %v13167_v57  ;;  %v13616_v47 = vor.u32 %v18190_v15, %v13615_v2 }
 0x458   :  { %v15241_v33 = vld [vmem:[#allocation11 + $0x1630] sm:$0xf0]  ;;  %v18254_v5 = vld [vmem:[#allocation11 + $0xb74] sm:$0xf0] }
 0x459   :  { %v15244_v40 = vor.u32 %v18593_v1, %v15241_v33  ;;  %v13135_v35 = vld [vmem:[#allocation11 + $0x598] sm:$0xf]  ;;  %6947 = vmatpush.bf16.msrb.mxu0 %v13648_v42  ;;  %v13872_v11 = vor.u32 %v18254_v5, %v13871_v58  ;;  %6869 = vmatpush.bf16.msrb.mxu2 %v14988_v20 }
 0x45a   :  { %v18070_v37 = vld [vmem:[#allocation11 + $0x5b4] sm:$0xf0] }
 0x45b   :  { %6961 = vmatpush.bf16.msrb.mxu1 %v13904_v14  ;;  %v13391_v32 = vld [vmem:[#allocation11 + $0x798] sm:$0xf]  ;;  %6883 = vmatpush.bf16.msrb.mxu3 %v15244_v40  ;;  %v13136_v4 = vor.u32 %v18070_v37, %v13135_v35 }
 0x45c   :  { %v18134_v46 = vld [vmem:[#allocation11 + $0x7b4] sm:$0xf0]  ;;  %6870 = vmatmul.bf16.vlgmr.msrb.gmra.mxu2 %v20268_v16 }
 0x45d   :  { %v13583_v39 = vld [vmem:[#allocation11 + $0x918] sm:$0xf]  ;;  %6918 = vmatpush.bf16.msra.mxu2 %v13168_v7  ;;  %v13392_v17 = vor.u32 %v18134_v46, %v13391_v32  ;;  %6948 = vmatpush.bf16.msrb.mxu0 %v13616_v47 }
 0x45e   :  { %v18182_v56 = vld [vmem:[#allocation11 + $0x934] sm:$0xf0]  ;;  %6884 = vmatmul.bf16.vlgmr.msrb.gmra.mxu3 %v20270_v55 }
 0x45f   :  { %v13839_v51 = vld [vmem:[#allocation11 + $0xb18] sm:$0xf]  ;;  %6932 = vmatpush.bf16.msra.mxu3 %v13424_v29  ;;  %6962 = vmatpush.bf16.msrb.mxu1 %v13872_v11  ;;  %v13584_v33 = vor.u32 %v18182_v56, %v13583_v39  ;;  %v20503_v56 = vpop.f32.mrf.mxu2 }
 0x460   :  { %v18246_v21 = vld [vmem:[#allocation11 + $0xb34] sm:$0xf0]  ;;  %21281 = vst [vmem:[#allocation69_spill] sm:$0xff] %v20503_v56 }
 0x461   :  { %v13103_v1 = vld [vmem:[#allocation11 + $0x558] sm:$0xf]  ;;  %v13840_v57 = vor.u32 %v18246_v21, %v13839_v51  ;;  %6919 = vmatpush.bf16.msra.mxu2 %v13136_v4  ;;  %6949 = vmatpush.bf16.msrb.mxu0 %v13584_v33 }
 0x462   :  { %v18062_v3 = vld [vmem:[#allocation11 + $0x574] sm:$0xf0] }
 0x463   :  { %v13359_v53 = vld [vmem:[#allocation11 + $0x758] sm:$0xf]  ;;  %6933 = vmatpush.bf16.msra.mxu3 %v13392_v17  ;;  %v13104_v2 = vor.u32 %v18062_v3, %v13103_v1  ;;  %6963 = vmatpush.bf16.msrb.mxu1 %v13840_v57 }
 0x464   :  { %v18126_v36 = vld [vmem:[#allocation11 + $0x774] sm:$0xf0] }
 0x465   :  { %v13551_v42 = vld [vmem:[#allocation11 + $0x8d8] sm:$0xf]  ;;  %v13360_v59 = vor.u32 %v18126_v36, %v13359_v53  ;;  %6920 = vmatpush.bf16.msra.mxu2 %v13104_v2  ;;  %v20505_v53 = vpop.f32.mrf.mxu3  ;;  %v20507_v2 = vpop.f32.mrf.mxu0 }
 0x466   :  { %v18174_v14 = vld [vmem:[#allocation11 + $0x8f4] sm:$0xf0]  ;;  %21282 = vst [vmem:[#allocation70_spill] sm:$0xff] %v20505_v53 }
 0x467   :  { %v13807_v12 = vld [vmem:[#allocation11 + $0xad8] sm:$0xf]  ;;  %v13552_v5 = vor.u32 %v18174_v14, %v13551_v42  ;;  %6934 = vmatpush.bf16.msra.mxu3 %v13360_v59  ;;  %21283 = vst [vmem:[#allocation71_spill] sm:$0xff] %v20507_v2 }
 0x468   :  { %v18238_v18 = vld [vmem:[#allocation11 + $0xaf4] sm:$0xf0] }
 0x469   :  { %v13071_v15 = vld [vmem:[#allocation11 + $0x518] sm:$0xf]  ;;  %v13808_v20 = vor.u32 %v18238_v18, %v13807_v12  ;;  %6950 = vmatpush.bf16.msrb.mxu0 %v13552_v5 }
 0x46a   :  { %v18054_v58 = vld [vmem:[#allocation11 + $0x534] sm:$0xf0] }
 0x46b   :  { %v13327_v40 = vld [vmem:[#allocation11 + $0x718] sm:$0xf]  ;;  %v13072_v11 = vor.u32 %v18054_v58, %v13071_v15  ;;  %6964 = vmatpush.bf16.msrb.mxu1 %v13808_v20 }
 0x46c   :  { %v18118_v7 = vld [vmem:[#allocation11 + $0x734] sm:$0xf0] }
 0x46d   :  { %v13519_v29 = vld [vmem:[#allocation11 + $0x898] sm:$0xf]  ;;  %v13328_v32 = vor.u32 %v18118_v7, %v13327_v40  ;;  %6921 = vmatpush.bf16.msra.mxu2 %v13072_v11  ;;  %v6661_v53 = vpop.f32.mrf.mxu3 }
 0x46e   :  { %v18166_v35 = vld [vmem:[#allocation11 + $0x8b4] sm:$0xf0] }
 0x46f   :  { %v13775_v37 = vld [vmem:[#allocation11 + $0xa98] sm:$0xf]  ;;  %v13520_v51 = vor.u32 %v18166_v35, %v13519_v29  ;;  %6935 = vmatpush.bf16.msra.mxu3 %v13328_v32  ;;  %v20509_v35 = vpop.f32.mrf.mxu1 }
 0x470   :  { %v18230_v47 = vld [vmem:[#allocation11 + $0xab4] sm:$0xf0]  ;;  %21284 = vst [vmem:[#allocation72_spill] sm:$0xff] %v20509_v35 }
 0x471   :  { %v13039_v46 = vld [vmem:[#allocation11 + $0x4d8] sm:$0xf]  ;;  %v13776_v21 = vor.u32 %v18230_v47, %v13775_v37  ;;  %6951 = vmatpush.bf16.msrb.mxu0 %v13520_v51  ;;  %v6647_v51 = vpop.f32.mrf.mxu2 }
 0x472   :  { %v18046_v39 = vld [vmem:[#allocation11 + $0x4f4] sm:$0xf0] }
 0x473   :  { %v13295_v4 = vld [vmem:[#allocation11 + $0x6d8] sm:$0xf]  ;;  %v13040_v36 = vor.u32 %v18046_v39, %v13039_v46  ;;  %6965 = vmatpush.bf16.msrb.mxu1 %v13776_v21 }
 0x474   :  { %v18110_v17 = vld [vmem:[#allocation11 + $0x6f4] sm:$0xf0] }
 0x475   :  { %v13487_v1 = vld [vmem:[#allocation11 + $0x858] sm:$0xf]  ;;  %v13296_v42 = vor.u32 %v18110_v17, %v13295_v4  ;;  %6922 = vmatpush.bf16.msra.mxu2 %v13040_v36 }
 0x476   :  { %v18158_v3 = vld [vmem:[#allocation11 + $0x874] sm:$0xf0] }
 0x477   :  { %v13743_v33 = vld [vmem:[#allocation11 + $0xa58] sm:$0xf]  ;;  %v13488_v59 = vor.u32 %v18158_v3, %v13487_v1  ;;  %6936 = vmatpush.bf16.msra.mxu3 %v13296_v42 }
 0x478   :  { %v18222_v57 = vld [vmem:[#allocation11 + $0xa74] sm:$0xf0] }
 0x479   :  { %v13007_v14 = vld [vmem:[#allocation11 + $0x498] sm:$0xf]  ;;  %v13744_v15 = vor.u32 %v18222_v57, %v13743_v33  ;;  %6952 = vmatpush.bf16.msrb.mxu0 %v13488_v59  ;;  %v6648_v33 = vadd.f32 %v6647_v51, %v20497_v49 }
 0x47a   :  { %v18038_v12 = vld [vmem:[#allocation11 + $0x4b4] sm:$0xf0] }
 0x47b   :  { %v13263_v18 = vld [vmem:[#allocation11 + $0x698] sm:$0xf]  ;;  %v13008_v32 = vor.u32 %v18038_v12, %v13007_v14  ;;  %6966 = vmatpush.bf16.msrb.mxu1 %v13744_v15  ;;  %v6662_v14 = vadd.f32 %v6661_v53, %v6648_v33 }
 0x47c   :  { %v18102_v58 = vld [vmem:[#allocation11 + $0x6b4] sm:$0xf0] }
 0x47d   :  { %v13455_v5 = vld [vmem:[#allocation11 + $0x818] sm:$0xf]  ;;  %v13264_v46 = vor.u32 %v18102_v58, %v13263_v18  ;;  %6923 = vmatpush.bf16.msra.mxu2 %v13008_v32  ;;  %v6689_v32 = vpop.f32.mrf.mxu1 }
 0x47e   :  { %v18150_v20 = vld [vmem:[#allocation11 + $0x834] sm:$0xf0] }
 0x47f   :  { %v13711_v40 = vld [vmem:[#allocation11 + $0xa18] sm:$0xf]  ;;  %v13456_v21 = vor.u32 %v18150_v20, %v13455_v5  ;;  %6937 = vmatpush.bf16.msra.mxu3 %v13264_v46  ;;  %v6675_v5 = vpop.f32.mrf.mxu0 }
 0x480   :  { %v18214_v7 = vld [vmem:[#allocation11 + $0xa34] sm:$0xf0] }
 0x481   :  { %v14703_v29 = vld [vmem:[#allocation11 + $0x11d8] sm:$0xf]  ;;  %v13712_v4 = vor.u32 %v18214_v7, %v13711_v40  ;;  %6953 = vmatpush.bf16.msrb.mxu0 %v13456_v21  ;;  %v6676_v7 = vadd.f32 %v6675_v5, %v6662_v14 }
 0x482   :  { %v18462_v37 = vld [vmem:[#allocation11 + $0x11f4] sm:$0xf0] }
 0x483   :  { %v14959_v47 = vld [vmem:[#allocation11 + $0x13d8] sm:$0xf]  ;;  %v14704_v57 = vor.u32 %v18462_v37, %v14703_v29  ;;  %6967 = vmatpush.bf16.msrb.mxu1 %v13712_v4 }
 0x484   :  { %v18526_v11 = vld [vmem:[#allocation11 + $0x13f4] sm:$0xf0]  ;;  %6954 = vmatmul.bf16.vlgmr.msrb.gmra.mxu0 %v20237_v52 }
 0x485   :  { %v12975_v39 = vld [vmem:[#allocation11 + $0x458] sm:$0xf]  ;;  %v14960_v35 = vor.u32 %v18526_v11, %v14959_v47  ;;  %7002 = vmatpush.bf16.msra.mxu0 %v14704_v57 }
 0x486   :  { %v18030_v17 = vld [vmem:[#allocation11 + $0x474] sm:$0xf0]  ;;  %6968 = vmatmul.bf16.vlgmr.msrb.gmra.mxu1 %v20239_v34 }
 0x487   :  { %v13231_v1 = vld [vmem:[#allocation11 + $0x658] sm:$0xf]  ;;  %v12976_v12 = vor.u32 %v18030_v17, %v12975_v39  ;;  %7016 = vmatpush.bf16.msra.mxu1 %v14960_v35  ;;  %v20512_v17 = vadd.f32 %v6689_v32, %v6676_v7 }
 0x488   :  { %v18094_v3 = vld [vmem:[#allocation11 + $0x674] sm:$0xf0] }
 0x489   :  { %v14671_v2 = vld [vmem:[#allocation11 + $0x1198] sm:$0xf]  ;;  %v13232_v18 = vor.u32 %v18094_v3, %v13231_v1  ;;  %6924 = vmatpush.bf16.msra.mxu2 %v12976_v12 }
 0x48a   :  { %v18454_v56 = vld [vmem:[#allocation11 + $0x11b4] sm:$0xf0] }
 0x48b   :  { %v14927_v36 = vld [vmem:[#allocation11 + $0x1398] sm:$0xf]  ;;  %v14672_v29 = vor.u32 %v18454_v56, %v14671_v2  ;;  %6938 = vmatpush.bf16.msra.mxu3 %v13232_v18 }
 0x48c   :  { %v18518_v42 = vld [vmem:[#allocation11 + $0x13b4] sm:$0xf0] }
 0x48d   :  { %v12943_v59 = vld [vmem:[#allocation11 + $0x418] sm:$0xf]  ;;  %v14928_v37 = vor.u32 %v18518_v42, %v14927_v36  ;;  %7003 = vmatpush.bf16.msra.mxu0 %v14672_v29 }
 0x48e   :  { %v18022_v15 = vld [vmem:[#allocation11 + $0x434] sm:$0xf0] }
 0x48f   :  { %v13199_v58 = vld [vmem:[#allocation11 + $0x618] sm:$0xf]  ;;  %v12944_v21 = vor.u32 %v18022_v15, %v12943_v59  ;;  %7017 = vmatpush.bf16.msra.mxu1 %v14928_v37 }
 0x490   :  { %v18086_v20 = vld [vmem:[#allocation11 + $0x634] sm:$0xf0] }
 0x491   :  { %v14191_v49 = vld [vmem:[#allocation11 + $0xdd8] sm:$0xf]  ;;  %v13200_v4 = vor.u32 %v18086_v20, %v13199_v58  ;;  %6925 = vmatpush.bf16.msra.mxu2 %v12944_v21 }
 0x492   :  { %v18334_v40 = vld [vmem:[#allocation11 + $0xdf4] sm:$0xf0] }
 0x493   :  { %v14447_v47 = vld [vmem:[#allocation11 + $0xfd8] sm:$0xf]  ;;  %v14192_v35 = vor.u32 %v18334_v40, %v14191_v49  ;;  %6939 = vmatpush.bf16.msra.mxu3 %v13200_v4 }
 0x494   :  { %v18398_v53 = vld [vmem:[#allocation11 + $0xff4] sm:$0xf0]  ;;  %6926 = vmatmul.bf16.vlgmr.msra.gmra.mxu2 %v20219_v48 }
 0x495   :  { %v14639_v11 = vld [vmem:[#allocation11 + $0x1158] sm:$0xf]  ;;  %v14448_v56 = vor.u32 %v18398_v53, %v14447_v47  ;;  %6974 = vmatpush.bf16.msrb.mxu2 %v14192_v35 }
 0x496   :  { %v18446_v46 = vld [vmem:[#allocation11 + $0x1174] sm:$0xf0]  ;;  %6940 = vmatmul.bf16.vlgmr.msra.gmra.mxu3 %v20221_v19 }
 0x497   :  { %v14895_v39 = vld [vmem:[#allocation11 + $0x1358] sm:$0xf]  ;;  %v14640_v3 = vor.u32 %v18446_v46, %v14639_v11  ;;  %6988 = vmatpush.bf16.msrb.mxu3 %v14448_v56 }
 0x498   :  { %v18510_v51 = vld [vmem:[#allocation11 + $0x1374] sm:$0xf0] }
 0x499   :  { %v14159_v2 = vld [vmem:[#allocation11 + $0xd98] sm:$0xf]  ;;  %v14896_v33 = vor.u32 %v18510_v51, %v14895_v39  ;;  %7004 = vmatpush.bf16.msra.mxu0 %v14640_v3 }
 0x49a   :  { %v18326_v1 = vld [vmem:[#allocation11 + $0xdb4] sm:$0xf0] }
 0x49b   :  { %v14415_v57 = vld [vmem:[#allocation11 + $0xf98] sm:$0xf]  ;;  %v14160_v59 = vor.u32 %v18326_v1, %v14159_v2  ;;  %7018 = vmatpush.bf16.msra.mxu1 %v14896_v33 }
 0x49c   :  { %v18390_v36 = vld [vmem:[#allocation11 + $0xfb4] sm:$0xf0] }
 0x49d   :  { %v14607_v42 = vld [vmem:[#allocation11 + $0x1118] sm:$0xf]  ;;  %v14416_v15 = vor.u32 %v18390_v36, %v14415_v57  ;;  %6975 = vmatpush.bf16.msrb.mxu2 %v14160_v59 }
 0x49e   :  { %v18438_v14 = vld [vmem:[#allocation11 + $0x1134] sm:$0xf0] }
 0x49f   :  { %v14863_v12 = vld [vmem:[#allocation11 + $0x1318] sm:$0xf]  ;;  %v14608_v20 = vor.u32 %v18438_v14, %v14607_v42  ;;  %6989 = vmatpush.bf16.msrb.mxu3 %v14416_v15  ;;  %v20518_v14 = vpop.f32.mrf.mxu2 }
 0x4a0   :  { %v18502_v18 = vld [vmem:[#allocation11 + $0x1334] sm:$0xf0]  ;;  %21285 = vst [vmem:[#allocation73_spill] sm:$0xff] %v20518_v14  ;;  %v12625_v14 = vld [vmem:[#allocation11 + $0x1b8] sm:$0xf0] }
 0x4a1   :  { %v14127_v58 = vld [vmem:[#allocation11 + $0xd58] sm:$0xf]  ;;  %v14864_v49 = vor.u32 %v18502_v18, %v14863_v12  ;;  %7005 = vmatpush.bf16.msra.mxu0 %v14608_v20  ;;  %v20520_v12 = vpop.f32.mrf.mxu3 }
 0x4a2   :  { %v18318_v5 = vld [vmem:[#allocation11 + $0xd74] sm:$0xf0]  ;;  %21286 = vst [vmem:[#allocation74_spill] sm:$0xff] %v20520_v12  ;;  %v17938_v12 = vld [vmem:[#allocation11 + $0x19c] sm:$0xf] }
 0x4a3   :  { %v14383_v40 = vld [vmem:[#allocation11 + $0xf58] sm:$0xf]  ;;  %v14128_v11 = vor.u32 %v18318_v5, %v14127_v58  ;;  %7019 = vmatpush.bf16.msra.mxu1 %v14864_v49 }
 0x4a4   :  { %v18382_v7 = vld [vmem:[#allocation11 + $0xf74] sm:$0xf0] }
 0x4a5   :  { %v14575_v29 = vld [vmem:[#allocation11 + $0x10d8] sm:$0xf]  ;;  %v14384_v32 = vor.u32 %v18382_v7, %v14383_v40  ;;  %6976 = vmatpush.bf16.msrb.mxu2 %v14128_v11 }
 0x4a6   :  { %v18430_v37 = vld [vmem:[#allocation11 + $0x10f4] sm:$0xf0] }
 0x4a7   :  { %v14831_v47 = vld [vmem:[#allocation11 + $0x12d8] sm:$0xf]  ;;  %v14576_v51 = vor.u32 %v18430_v37, %v14575_v29  ;;  %6990 = vmatpush.bf16.msrb.mxu3 %v14384_v32 }
 0x4a8   :  { %v18494_v53 = vld [vmem:[#allocation11 + $0x12f4] sm:$0xf0] }
 0x4a9   :  { %v14095_v46 = vld [vmem:[#allocation11 + $0xd18] sm:$0xf]  ;;  %v14832_v21 = vor.u32 %v18494_v53, %v14831_v47  ;;  %7006 = vmatpush.bf16.msra.mxu0 %v14576_v51 }
 0x4aa   :  { %v18310_v39 = vld [vmem:[#allocation11 + $0xd34] sm:$0xf0] }
 0x4ab   :  { %v14351_v4 = vld [vmem:[#allocation11 + $0xf18] sm:$0xf]  ;;  %v14096_v33 = vor.u32 %v18310_v39, %v14095_v46  ;;  %7020 = vmatpush.bf16.msra.mxu1 %v14832_v21 }
 0x4ac   :  { %v18374_v35 = vld [vmem:[#allocation11 + $0xf34] sm:$0xf0] }
 0x4ad   :  { %v14543_v56 = vld [vmem:[#allocation11 + $0x1098] sm:$0xf]  ;;  %v14352_v57 = vor.u32 %v18374_v35, %v14351_v4  ;;  %6977 = vmatpush.bf16.msrb.mxu2 %v14096_v33  ;;  %v17946_v35 = vld [vmem:[#allocation11 + $0x1dc] sm:$0xf] }
 0x4ae   :  { %v18422_v2 = vld [vmem:[#allocation11 + $0x10b4] sm:$0xf0] }
 0x4af   :  { %v14799_v1 = vld [vmem:[#allocation11 + $0x1298] sm:$0xf]  ;;  %v14544_v18 = vor.u32 %v18422_v2, %v14543_v56  ;;  %6991 = vmatpush.bf16.msrb.mxu3 %v14352_v57  ;;  %v12657_v56 = vld [vmem:[#allocation11 + $0x1f8] sm:$0xf0] }
 0x4b0   :  { %v18486_v3 = vld [vmem:[#allocation11 + $0x12b4] sm:$0xf0]  ;;  %v18010_v2 = vld [vmem:[#allocation11 + $0x3dc] sm:$0xf] }
 0x4b1   :  { %v14063_v36 = vld [vmem:[#allocation11 + $0xcd8] sm:$0xf]  ;;  %v14800_v59 = vor.u32 %v18486_v3, %v14799_v1  ;;  %7007 = vmatpush.bf16.msra.mxu0 %v14544_v18  ;;  %v12913_v1 = vld [vmem:[#allocation11 + $0x3f8] sm:$0xf0] }
 0x4b2   :  { %v18302_v42 = vld [vmem:[#allocation11 + $0xcf4] sm:$0xf0] }
 0x4b3   :  { %v14319_v15 = vld [vmem:[#allocation11 + $0xed8] sm:$0xf]  ;;  %v14064_v7 = vor.u32 %v18302_v42, %v14063_v36  ;;  %7021 = vmatpush.bf16.msra.mxu1 %v14800_v59  ;;  %v6703_v36 = vpop.f32.mrf.mxu2  ;;  %v6717_v42 = vpop.f32.mrf.mxu3 }
 0x4b4   :  { %v18366_v58 = vld [vmem:[#allocation11 + $0xef4] sm:$0xf0] }
 0x4b5   :  { %v14511_v5 = vld [vmem:[#allocation11 + $0x1058] sm:$0xf]  ;;  %v14320_v29 = vor.u32 %v18366_v58, %v14319_v15  ;;  %6978 = vmatpush.bf16.msrb.mxu2 %v14064_v7  ;;  %v18002_v7 = vld [vmem:[#allocation11 + $0x39c] sm:$0xf] }
 0x4b6   :  { %v18414_v20 = vld [vmem:[#allocation11 + $0x1074] sm:$0xf0] }
 0x4b7   :  { %v14767_v49 = vld [vmem:[#allocation11 + $0x1258] sm:$0xf]  ;;  %v14512_v11 = vor.u32 %v18414_v20, %v14511_v5  ;;  %6992 = vmatpush.bf16.msrb.mxu3 %v14320_v29  ;;  %v6704_v20 = vadd.f32 %v6703_v36, %v20512_v17  ;;  %v12881_v29 = vld [vmem:[#allocation11 + $0x3b8] sm:$0xf0] }
 0x4b8   :  { %v18478_v40 = vld [vmem:[#allocation11 + $0x1274] sm:$0xf0] }
 0x4b9   :  { %v14031_v37 = vld [vmem:[#allocation11 + $0xc98] sm:$0xf]  ;;  %v14768_v32 = vor.u32 %v18478_v40, %v14767_v49  ;;  %7008 = vmatpush.bf16.msra.mxu0 %v14512_v11  ;;  %v12660_v49 = vor.u32 %v17946_v35, %v12657_v56  ;;  %v12916_v40 = vor.u32 %v18010_v2, %v12913_v1  ;;  %v17930_v2 = vld [vmem:[#allocation11 + $0x15c] sm:$0xf] }
 0x4ba   :  { %v18294_v47 = vld [vmem:[#allocation11 + $0xcb4] sm:$0xf0]  ;;  %v12593_v1 = vld [vmem:[#allocation11 + $0x178] sm:$0xf0] }
 0x4bb   :  { %v14287_v53 = vld [vmem:[#allocation11 + $0xe98] sm:$0xf]  ;;  %v14032_v3 = vor.u32 %v18294_v47, %v14031_v37  ;;  %7022 = vmatpush.bf16.msra.mxu1 %v14768_v32  ;;  %v20523_v37 = vadd.f32 %v6717_v42, %v6704_v20  ;;  %v17922_v20 = vld [vmem:[#allocation11 + $0x11c] sm:$0xf] }
 0x4bc   :  { %v18358_v46 = vld [vmem:[#allocation11 + $0xeb4] sm:$0xf0] }
 0x4bd   :  { %v14479_v39 = vld [vmem:[#allocation11 + $0x1018] sm:$0xf]  ;;  %v14288_v33 = vor.u32 %v18358_v46, %v14287_v53  ;;  %6979 = vmatpush.bf16.msrb.mxu2 %v14032_v3  ;;  %v17994_v3 = vld [vmem:[#allocation11 + $0x35c] sm:$0xf] }
 0x4be   :  { %v18406_v51 = vld [vmem:[#allocation11 + $0x1034] sm:$0xf0] }
 0x4bf   :  { %v14735_v21 = vld [vmem:[#allocation11 + $0x1218] sm:$0xf]  ;;  %v14480_v18 = vor.u32 %v18406_v51, %v14479_v39  ;;  %6993 = vmatpush.bf16.msrb.mxu3 %v14288_v33  ;;  %v12849_v33 = vld [vmem:[#allocation11 + $0x378] sm:$0xf0] }
 0x4c0   :  { %v18470_v4 = vld [vmem:[#allocation11 + $0x1234] sm:$0xf0] }
 0x4c1   :  { %v13999_v57 = vld [vmem:[#allocation11 + $0xc58] sm:$0xf]  ;;  %v14736_v59 = vor.u32 %v18470_v4, %v14735_v21  ;;  %7009 = vmatpush.bf16.msra.mxu0 %v14480_v18  ;;  %v12628_v21 = vor.u32 %v17938_v12, %v12625_v14  ;;  %v12884_v4 = vor.u32 %v18002_v7, %v12881_v29  ;;  %v12596_v14 = vor.u32 %v17930_v2, %v12593_v1  ;;  %v12817_v7 = vld [vmem:[#allocation11 + $0x338] sm:$0xf0] }
 0x4c2   :  { %v18286_v15 = vld [vmem:[#allocation11 + $0xc74] sm:$0xf0]  ;;  %v12852_v12 = vor.u32 %v17994_v3, %v12849_v33 }
 0x4c3   :  { %v14255_v58 = vld [vmem:[#allocation11 + $0xe58] sm:$0xf]  ;;  %v14000_v47 = vor.u32 %v18286_v15, %v13999_v57  ;;  %7023 = vmatpush.bf16.msra.mxu1 %v14736_v59 }
 0x4c4   :  { %v18350_v5 = vld [vmem:[#allocation11 + $0xe74] sm:$0xf0]  ;;  %7010 = vmatmul.bf16.vlgmr.msra.gmra.mxu0 %v20244_v9 }
 0x4c5   :  { %v14256_v53 = vor.u32 %v18350_v5, %v14255_v58  ;;  %v13967_v11 = vld [vmem:[#allocation11 + $0xc18] sm:$0xf]  ;;  %7058 = vmatpush.bf16.msrb.mxu0 %v12660_v49  ;;  %6980 = vmatpush.bf16.msrb.mxu2 %v14000_v47  ;;  %v12561_v49 = vld [vmem:[#allocation11 + $0x138] sm:$0xf0] }
 0x4c6   :  { %v18278_v32 = vld [vmem:[#allocation11 + $0xc34] sm:$0xf0]  ;;  %7024 = vmatmul.bf16.vlgmr.msra.gmra.mxu1 %v20246_v30 }
 0x4c7   :  { %v14223_v46 = vld [vmem:[#allocation11 + $0xe18] sm:$0xf]  ;;  %7072 = vmatpush.bf16.msrb.mxu1 %v12916_v40  ;;  %6994 = vmatpush.bf16.msrb.mxu3 %v14256_v53  ;;  %v13968_v57 = vor.u32 %v18278_v32, %v13967_v11  ;;  %v17986_v40 = vld [vmem:[#allocation11 + $0x31c] sm:$0xf]  ;;  %v12564_v32 = vor.u32 %v17922_v20, %v12561_v49 }
 0x4c8   :  { %v18342_v39 = vld [vmem:[#allocation11 + $0xe34] sm:$0xf0] }
 0x4c9   :  { %v15215_v51 = vld [vmem:[#allocation11 + $0x15d8] sm:$0xf]  ;;  %v14224_v36 = vor.u32 %v18342_v39, %v14223_v46  ;;  %7059 = vmatpush.bf16.msrb.mxu0 %v12628_v21  ;;  %6981 = vmatpush.bf16.msrb.mxu2 %v13968_v57  ;;  %v12820_v46 = vor.u32 %v17986_v40, %v12817_v7  ;;  %v12529_v21 = vld [vmem:[#allocation11 + $0xf8] sm:$0xf0] }
 0x4ca   :  { %v18590_v17 = vld [vmem:[#allocation11 + $0x15f4] sm:$0xf0] }
 0x4cb   :  { %v15471_v35 = vld [vmem:[#allocation11 + $0x17d8] sm:$0xf]  ;;  %v15216_v42 = vor.u32 %v18590_v17, %v15215_v51  ;;  %7073 = vmatpush.bf16.msrb.mxu1 %v12884_v4  ;;  %6995 = vmatpush.bf16.msrb.mxu3 %v14224_v36  ;;  %v17914_v17 = vld [vmem:[#allocation11 + $0xdc] sm:$0xf] }
 0x4cc   :  { %v18654_v56 = vld [vmem:[#allocation11 + $0x17f4] sm:$0xf0]  ;;  %6982 = vmatmul.bf16.vlgmr.msrb.gmra.mxu2 %v20257_v13  ;;  %v17978_v4 = vld [vmem:[#allocation11 + $0x2dc] sm:$0xf]  ;;  %v12532_v33 = vor.u32 %v17914_v17, %v12529_v21 }
 0x4cd   :  { %v15472_v18 = vor.u32 %v18654_v56, %v15471_v35  ;;  %v15183_v59 = vld [vmem:[#allocation11 + $0x1598] sm:$0xf]  ;;  %7030 = vmatpush.bf16.msra.mxu2 %v15216_v42  ;;  %7060 = vmatpush.bf16.msrb.mxu0 %v12596_v14  ;;  %v12785_v35 = vld [vmem:[#allocation11 + $0x2f8] sm:$0xf0] }
 0x4ce   :  { %v18582_v15 = vld [vmem:[#allocation11 + $0x15b4] sm:$0xf0]  ;;  %6996 = vmatmul.bf16.vlgmr.msrb.gmra.mxu3 %v20259_v22  ;;  %v12788_v57 = vor.u32 %v17978_v4, %v12785_v35  ;;  %v12753_v14 = vld [vmem:[#allocation11 + $0x2b8] sm:$0xf0] }
 0x4cf   :  { %v15439_v58 = vld [vmem:[#allocation11 + $0x1798] sm:$0xf]  ;;  %7044 = vmatpush.bf16.msra.mxu3 %v15472_v18  ;;  %v15184_v29 = vor.u32 %v18582_v15, %v15183_v59  ;;  %7074 = vmatpush.bf16.msrb.mxu1 %v12852_v12  ;;  %v17906_v18 = vld [vmem:[#allocation11 + $0x9c] sm:$0xf] }
 0x4d0   :  { %v18646_v5 = vld [vmem:[#allocation11 + $0x17b4] sm:$0xf0]  ;;  %v12497_v59 = vld [vmem:[#allocation11 + $0xb8] sm:$0xf0] }
 0x4d1   :  { %v15440_v47 = vor.u32 %v18646_v5, %v15439_v58  ;;  %v15151_v53 = vld [vmem:[#allocation11 + $0x1558] sm:$0xf]  ;;  %7031 = vmatpush.bf16.msra.mxu2 %v15184_v29  ;;  %7061 = vmatpush.bf16.msrb.mxu0 %v12564_v32  ;;  %v17970_v15 = vld [vmem:[#allocation11 + $0x29c] sm:$0xf]  ;;  %v12500_v49 = vor.u32 %v17906_v18, %v12497_v59 }
 0x4d2   :  { %v18574_v11 = vld [vmem:[#allocation11 + $0x1574] sm:$0xf0]  ;;  %v12756_v40 = vor.u32 %v17970_v15, %v12753_v14  ;;  %v12721_v32 = vld [vmem:[#allocation11 + $0x278] sm:$0xf0] }
 0x4d3   :  { %v15407_v39 = vld [vmem:[#allocation11 + $0x1758] sm:$0xf]  ;;  %7045 = vmatpush.bf16.msra.mxu3 %v15440_v47  ;;  %v15152_v56 = vor.u32 %v18574_v11, %v15151_v53  ;;  %7075 = vmatpush.bf16.msrb.mxu1 %v12820_v46  ;;  %v17898_v47 = vld [vmem:[#allocation11 + $0x5c] sm:$0xf] }
 0x4d4   :  { %v18638_v51 = vld [vmem:[#allocation11 + $0x1774] sm:$0xf0]  ;;  %v12465_v53 = vld [vmem:[#allocation11 + $0x78] sm:$0xf0] }
 0x4d5   :  { %v15408_v2 = vor.u32 %v18638_v51, %v15407_v39  ;;  %v15119_v1 = vld [vmem:[#allocation11 + $0x1518] sm:$0xf]  ;;  %7032 = vmatpush.bf16.msra.mxu2 %v15152_v56  ;;  %7062 = vmatpush.bf16.msrb.mxu0 %v12532_v33  ;;  %v17962_v11 = vld [vmem:[#allocation11 + $0x25c] sm:$0xf]  ;;  %v12468_v4 = vor.u32 %v17898_v47, %v12465_v53 }
 0x4d6   :  { %v18566_v3 = vld [vmem:[#allocation11 + $0x1534] sm:$0xf0]  ;;  %v12724_v35 = vor.u32 %v17962_v11, %v12721_v32  ;;  %v12689_v33 = vld [vmem:[#allocation11 + $0x238] sm:$0xf0] }
 0x4d7   :  { %v15375_v36 = vld [vmem:[#allocation11 + $0x1718] sm:$0xf]  ;;  %7046 = vmatpush.bf16.msra.mxu3 %v15408_v2  ;;  %v15120_v12 = vor.u32 %v18566_v3, %v15119_v1  ;;  %7076 = vmatpush.bf16.msrb.mxu1 %v12788_v57  ;;  %v17890_v2 = vld [vmem:[#allocation11 + $0x1c] sm:$0xf] }
 0x4d8   :  { %v18630_v42 = vld [vmem:[#allocation11 + $0x1734] sm:$0xf0]  ;;  %v12433_v1 = vld [vmem:[#allocation11 + $0x38] sm:$0xf0] }
 0x4d9   :  { %v15376_v58 = vor.u32 %v18630_v42, %v15375_v36  ;;  %v15087_v5 = vld [vmem:[#allocation11 + $0x14d8] sm:$0xf]  ;;  %7033 = vmatpush.bf16.msra.mxu2 %v15120_v12  ;;  %7063 = vmatpush.bf16.msrb.mxu0 %v12500_v49  ;;  %v17954_v3 = vld [vmem:[#allocation11 + $0x21c] sm:$0xf]  ;;  %v12436_v12 = vor.u32 %v17890_v2, %v12433_v1 }
 0x4da   :  { %v18558_v20 = vld [vmem:[#allocation11 + $0x14f4] sm:$0xf0]  ;;  %v18202_v57 = vld [vmem:[#allocation11 + $0x9dc] sm:$0xf] }
 0x4db   :  { %v15343_v7 = vld [vmem:[#allocation11 + $0x16d8] sm:$0xf]  ;;  %7047 = vmatpush.bf16.msra.mxu3 %v15376_v58  ;;  %v15088_v46 = vor.u32 %v18558_v20, %v15087_v5  ;;  %7077 = vmatpush.bf16.msrb.mxu1 %v12756_v40  ;;  %v13681_v36 = vld [vmem:[#allocation11 + $0x9f8] sm:$0xf0]  ;;  %v12692_v58 = vor.u32 %v17954_v3, %v12689_v33 }
 0x4dc   :  { %v18622_v29 = vld [vmem:[#allocation11 + $0x16f4] sm:$0xf0]  ;;  %v18266_v42 = vld [vmem:[#allocation11 + $0xbdc] sm:$0xf]  ;;  %v13684_v40 = vor.u32 %v18202_v57, %v13681_v36 }
 0x4dd   :  { %v15344_v39 = vor.u32 %v18622_v29, %v15343_v7  ;;  %v15055_v51 = vld [vmem:[#allocation11 + $0x1498] sm:$0xf]  ;;  %v13937_v18 = vld [vmem:[#allocation11 + $0xbf8] sm:$0xf0]  ;;  %7034 = vmatpush.bf16.msra.mxu2 %v15088_v46  ;;  %7064 = vmatpush.bf16.msrb.mxu0 %v12468_v4 }
 0x4de   :  { %v18550_v17 = vld [vmem:[#allocation11 + $0x14b4] sm:$0xf0]  ;;  %v13940_v7 = vor.u32 %v18266_v42, %v13937_v18  ;;  %v18194_v29 = vld [vmem:[#allocation11 + $0x99c] sm:$0xf] }
 0x4df   :  { %v15311_v21 = vld [vmem:[#allocation11 + $0x1698] sm:$0xf]  ;;  %7048 = vmatpush.bf16.msra.mxu3 %v15344_v39  ;;  %v15056_v59 = vor.u32 %v18550_v17, %v15055_v51  ;;  %7078 = vmatpush.bf16.msrb.mxu1 %v12724_v35  ;;  %v13649_v47 = vld [vmem:[#allocation11 + $0x9b8] sm:$0xf0] }
 0x4e0   :  { %v18614_v56 = vld [vmem:[#allocation11 + $0x16b4] sm:$0xf0]  ;;  %v18258_v53 = vld [vmem:[#allocation11 + $0xb9c] sm:$0xf] }
 0x4e1   :  { %v15312_v15 = vor.u32 %v18614_v56, %v15311_v21  ;;  %v15023_v14 = vld [vmem:[#allocation11 + $0x1458] sm:$0xf]  ;;  %v13905_v11 = vld [vmem:[#allocation11 + $0xbb8] sm:$0xf0]  ;;  %7035 = vmatpush.bf16.msra.mxu2 %v15056_v59  ;;  %7065 = vmatpush.bf16.msrb.mxu0 %v12436_v12  ;;  %v13652_v56 = vor.u32 %v18194_v29, %v13649_v47 }
 0x4e2   :  { %v18542_v5 = vld [vmem:[#allocation11 + $0x1474] sm:$0xf0]  ;;  %v18074_v4 = vld [vmem:[#allocation11 + $0x5dc] sm:$0xf]  ;;  %v13908_v2 = vor.u32 %v18258_v53, %v13905_v11 }
 0x4e3   :  { %v15279_v20 = vld [vmem:[#allocation11 + $0x1658] sm:$0xf]  ;;  %7049 = vmatpush.bf16.msra.mxu3 %v15312_v15  ;;  %v15024_v32 = vor.u32 %v18542_v5, %v15023_v14  ;;  %7079 = vmatpush.bf16.msrb.mxu1 %v12692_v58  ;;  %v13169_v35 = vld [vmem:[#allocation11 + $0x5f8] sm:$0xf0] }
 0x4e4   :  { %v18606_v49 = vld [vmem:[#allocation11 + $0x1674] sm:$0xf0]  ;;  %v18138_v1 = vld [vmem:[#allocation11 + $0x7dc] sm:$0xf]  ;;  %7066 = vmatmul.bf16.vlgmr.msrb.gmra.mxu0 %v20202_v44  ;;  %v13172_v15 = vor.u32 %v18074_v4, %v13169_v35 }
 0x4e5   :  { %v15280_v46 = vor.u32 %v18606_v49, %v15279_v20  ;;  %v14991_v39 = vld [vmem:[#allocation11 + $0x1418] sm:$0xf]  ;;  %7114 = vmatpush.bf16.msra.mxu0 %v13684_v40  ;;  %v13425_v3 = vld [vmem:[#allocation11 + $0x7f8] sm:$0xf0]  ;;  %7036 = vmatpush.bf16.msra.mxu2 %v15024_v32 }
 0x4e6   :  { %v18534_v51 = vld [vmem:[#allocation11 + $0x1434] sm:$0xf0]  ;;  %v18186_v33 = vld [vmem:[#allocation11 + $0x95c] sm:$0xf]  ;;  %7080 = vmatmul.bf16.vlgmr.msrb.gmra.mxu1 %v20204_v50  ;;  %v13428_v14 = vor.u32 %v18138_v1, %v13425_v3 }
 0x4e7   :  { %v15247_v17 = vld [vmem:[#allocation11 + $0x1618] sm:$0xf]  ;;  %7128 = vmatpush.bf16.msra.mxu1 %v13940_v7  ;;  %v13617_v57 = vld [vmem:[#allocation11 + $0x978] sm:$0xf0]  ;;  %7050 = vmatpush.bf16.msra.mxu3 %v15280_v46  ;;  %v14992_v18 = vor.u32 %v18534_v51, %v14991_v39 }
 0x4e8   :  { %v18598_v21 = vld [vmem:[#allocation11 + $0x1634] sm:$0xf0]  ;;  %v18250_v36 = vld [vmem:[#allocation11 + $0xb5c] sm:$0xf]  ;;  %v13620_v5 = vor.u32 %v18186_v33, %v13617_v57 }
 0x4e9   :  { %v13873_v42 = vld [vmem:[#allocation11 + $0xb78] sm:$0xf0]  ;;  %v15248_v59 = vor.u32 %v18598_v21, %v15247_v17  ;;  %7115 = vmatpush.bf16.msra.mxu0 %v13652_v56  ;;  %7037 = vmatpush.bf16.msra.mxu2 %v14992_v18 }
 0x4ea   :  { %v18066_v12 = vld [vmem:[#allocation11 + $0x59c] sm:$0xf]  ;;  %v13876_v20 = vor.u32 %v18250_v36, %v13873_v42 }
 0x4eb   :  { %v13137_v58 = vld [vmem:[#allocation11 + $0x5b8] sm:$0xf0]  ;;  %7129 = vmatpush.bf16.msra.mxu1 %v13908_v2  ;;  %7051 = vmatpush.bf16.msra.mxu3 %v15248_v59 }
 0x4ec   :  { %v18130_v49 = vld [vmem:[#allocation11 + $0x79c] sm:$0xf]  ;;  %v13140_v44 = vor.u32 %v18066_v12, %v13137_v58  ;;  %7038 = vmatmul.bf16.vlgmr.msra.gmra.mxu2 %v20268_v16 }
 0x4ed   :  { %v13393_v40 = vld [vmem:[#allocation11 + $0x7b8] sm:$0xf0]  ;;  %7086 = vmatpush.bf16.msrb.mxu2 %v13172_v15  ;;  %7116 = vmatpush.bf16.msra.mxu0 %v13620_v5 }
 0x4ee   :  { %v18178_v7 = vld [vmem:[#allocation11 + $0x91c] sm:$0xf]  ;;  %v13396_v50 = vor.u32 %v18130_v49, %v13393_v40  ;;  %7052 = vmatmul.bf16.vlgmr.msra.gmra.mxu3 %v20270_v55 }
 0x4ef   :  { %v13585_v29 = vld [vmem:[#allocation11 + $0x938] sm:$0xf0]  ;;  %7100 = vmatpush.bf16.msrb.mxu3 %v13428_v14  ;;  %7130 = vmatpush.bf16.msra.mxu1 %v13876_v20 }
 0x4f0   :  { %v18242_v47 = vld [vmem:[#allocation11 + $0xb1c] sm:$0xf]  ;;  %v13588_v46 = vor.u32 %v18178_v7, %v13585_v29 }
 0x4f1   :  { %v13841_v53 = vld [vmem:[#allocation11 + $0xb38] sm:$0xf0]  ;;  %7087 = vmatpush.bf16.msrb.mxu2 %v13140_v44 }
 0x4f2   :  { %v18058_v11 = vld [vmem:[#allocation11 + $0x55c] sm:$0xf]  ;;  %v13844_v39 = vor.u32 %v18242_v47, %v13841_v53  ;;  %7117 = vmatpush.bf16.msra.mxu0 %v13588_v46 }
 0x4f3   :  { %v13105_v32 = vld [vmem:[#allocation11 + $0x578] sm:$0xf0]  ;;  %7101 = vmatpush.bf16.msrb.mxu3 %v13396_v50 }
 0x4f4   :  { %v18122_v51 = vld [vmem:[#allocation11 + $0x75c] sm:$0xf]  ;;  %v13108_v2 = vor.u32 %v18058_v11, %v13105_v32  ;;  %7131 = vmatpush.bf16.msra.mxu1 %v13844_v39 }
 0x4f5   :  { %v13361_v17 = vld [vmem:[#allocation11 + $0x778] sm:$0xf0] }
 0x4f6   :  { %v18170_v21 = vld [vmem:[#allocation11 + $0x8dc] sm:$0xf]  ;;  %v13364_v1 = vor.u32 %v18122_v51, %v13361_v17  ;;  %7088 = vmatpush.bf16.msrb.mxu2 %v13108_v2 }
 0x4f7   :  { %v13553_v4 = vld [vmem:[#allocation11 + $0x8f8] sm:$0xf0] }
 0x4f8   :  { %v18234_v35 = vld [vmem:[#allocation11 + $0xadc] sm:$0xf]  ;;  %v13556_v57 = vor.u32 %v18170_v21, %v13553_v4  ;;  %7102 = vmatpush.bf16.msrb.mxu3 %v13364_v1 }
 0x4f9   :  { %v13809_v56 = vld [vmem:[#allocation11 + $0xaf8] sm:$0xf0] }
 0x4fa   :  { %v18050_v3 = vld [vmem:[#allocation11 + $0x51c] sm:$0xf]  ;;  %v13812_v36 = vor.u32 %v18234_v35, %v13809_v56  ;;  %7118 = vmatpush.bf16.msra.mxu0 %v13556_v57 }
 0x4fb   :  { %v13073_v33 = vld [vmem:[#allocation11 + $0x538] sm:$0xf0] }
 0x4fc   :  { %v18114_v42 = vld [vmem:[#allocation11 + $0x71c] sm:$0xf]  ;;  %v13076_v58 = vor.u32 %v18050_v3, %v13073_v33  ;;  %7132 = vmatpush.bf16.msra.mxu1 %v13812_v36 }
 0x4fd   :  { %v13329_v18 = vld [vmem:[#allocation11 + $0x738] sm:$0xf0] }
 0x4fe   :  { %v18162_v59 = vld [vmem:[#allocation11 + $0x89c] sm:$0xf]  ;;  %v13332_v5 = vor.u32 %v18114_v42, %v13329_v18  ;;  %7089 = vmatpush.bf16.msrb.mxu2 %v13076_v58 }
 0x4ff   :  { %v13521_v15 = vld [vmem:[#allocation11 + $0x8b8] sm:$0xf0] }
 0x500   :  { %v18226_v14 = vld [vmem:[#allocation11 + $0xa9c] sm:$0xf]  ;;  %v13524_v40 = vor.u32 %v18162_v59, %v13521_v15  ;;  %7103 = vmatpush.bf16.msrb.mxu3 %v13332_v5 }
 0x501   :  { %v13777_v12 = vld [vmem:[#allocation11 + $0xab8] sm:$0xf0] }
 0x502   :  { %v18042_v20 = vld [vmem:[#allocation11 + $0x4dc] sm:$0xf]  ;;  %v13780_v7 = vor.u32 %v18226_v14, %v13777_v12  ;;  %7119 = vmatpush.bf16.msra.mxu0 %v13524_v40 }
 0x503   :  { %v13041_v49 = vld [vmem:[#allocation11 + $0x4f8] sm:$0xf0] }
 0x504   :  { %v18106_v29 = vld [vmem:[#allocation11 + $0x6dc] sm:$0xf]  ;;  %v13044_v32 = vor.u32 %v18042_v20, %v13041_v49  ;;  %7133 = vmatpush.bf16.msra.mxu1 %v13780_v7 }
 0x505   :  { %v13297_v47 = vld [vmem:[#allocation11 + $0x6f8] sm:$0xf0] }
 0x506   :  { %v18154_v53 = vld [vmem:[#allocation11 + $0x85c] sm:$0xf]  ;;  %v13300_v46 = vor.u32 %v18106_v29, %v13297_v47  ;;  %7090 = vmatpush.bf16.msrb.mxu2 %v13044_v32  ;;  %v21287_v29 = vperm.slane %v20255_v43, 0 }
 0x507   :  { %v13489_v44 = vld [vmem:[#allocation11 + $0x878] sm:$0xf0] }
 0x508   :  { %v18218_v50 = vld [vmem:[#allocation11 + $0xa5c] sm:$0xf]  ;;  %v13492_v21 = vor.u32 %v18154_v53, %v13489_v44  ;;  %7104 = vmatpush.bf16.msrb.mxu3 %v13300_v46  ;;  %v5894_v47 = vadd.f32 %v20285_v62, %v21287_v29 }
 0x509   :  { %v13745_v11 = vld [vmem:[#allocation11 + $0xa78] sm:$0xf0] }
 0x50a   :  { %v18034_v39 = vld [vmem:[#allocation11 + $0x49c] sm:$0xf]  ;;  %v13748_v4 = vor.u32 %v18218_v50, %v13745_v11  ;;  %7120 = vmatpush.bf16.msra.mxu0 %v13492_v21 }
 0x50b   :  { %v13009_v51 = vld [vmem:[#allocation11 + $0x4b8] sm:$0xf0] }
 0x50c   :  { %v18098_v17 = vld [vmem:[#allocation11 + $0x69c] sm:$0xf]  ;;  %v13012_v18 = vor.u32 %v18034_v39, %v13009_v51  ;;  %7134 = vmatpush.bf16.msra.mxu1 %v13748_v4 }
 0x50d   :  { %v13265_v35 = vld [vmem:[#allocation11 + $0x6b8] sm:$0xf0] }
 0x50e   :  { %v18146_v56 = vld [vmem:[#allocation11 + $0x81c] sm:$0xf]  ;;  %v13268_v59 = vor.u32 %v18098_v17, %v13265_v35  ;;  %7091 = vmatpush.bf16.msrb.mxu2 %v13012_v18  ;;  %v20536_v35 = vpop.f32.mrf.mxu0 }
 0x50f   :  { %v13457_v2 = vld [vmem:[#allocation11 + $0x838] sm:$0xf0] }
 0x510   :  { %v18210_v1 = vld [vmem:[#allocation11 + $0xa1c] sm:$0xf]  ;;  %v13460_v14 = vor.u32 %v18146_v56, %v13457_v2  ;;  %7105 = vmatpush.bf16.msrb.mxu3 %v13268_v59 }
 0x511   :  { %v13713_v3 = vld [vmem:[#allocation11 + $0xa38] sm:$0xf0] }
 0x512   :  { %v18458_v33 = vld [vmem:[#allocation11 + $0x11dc] sm:$0xf]  ;;  %v13716_v12 = vor.u32 %v18210_v1, %v13713_v3  ;;  %7121 = vmatpush.bf16.msra.mxu0 %v13460_v14  ;;  %v5908_v3 = vadd.f32 %v20287_v6, %v5894_v47 }
 0x513   :  { %v14705_v57 = vld [vmem:[#allocation11 + $0x11f8] sm:$0xf0] }
 0x514   :  { %v18522_v36 = vld [vmem:[#allocation11 + $0x13dc] sm:$0xf]  ;;  %v14708_v49 = vor.u32 %v18458_v33, %v14705_v57  ;;  %7135 = vmatpush.bf16.msra.mxu1 %v13716_v12  ;;  %v5922_v59 = vadd.f32 %v20315_v61, %v5908_v3  ;;  %v20545_v61 = vpop.f32.mrf.mxu1 }
 0x515   :  { %v14961_v42 = vld [vmem:[#allocation11 + $0x13f8] sm:$0xf0]  ;;  %7122 = vmatmul.bf16.vlgmr.msra.gmra.mxu0 %v20237_v52 }
 0x516   :  { %v18026_v15 = vld [vmem:[#allocation11 + $0x45c] sm:$0xf]  ;;  %v14964_v40 = vor.u32 %v18522_v36, %v14961_v42  ;;  %7170 = vmatpush.bf16.msrb.mxu0 %v14708_v49 }
 0x517   :  { %v12977_v58 = vld [vmem:[#allocation11 + $0x478] sm:$0xf0]  ;;  %7136 = vmatmul.bf16.vlgmr.msra.gmra.mxu1 %v20239_v34 }
 0x518   :  { %v18090_v5 = vld [vmem:[#allocation11 + $0x65c] sm:$0xf]  ;;  %v12980_v11 = vor.u32 %v18026_v15, %v12977_v58  ;;  %7184 = vmatpush.bf16.msrb.mxu1 %v14964_v40 }
 0x519   :  { %v13233_v20 = vld [vmem:[#allocation11 + $0x678] sm:$0xf0] }
 0x51a   :  { %v18450_v7 = vld [vmem:[#allocation11 + $0x119c] sm:$0xf]  ;;  %v13236_v32 = vor.u32 %v18090_v5, %v13233_v20  ;;  %7092 = vmatpush.bf16.msrb.mxu2 %v12980_v11  ;;  %v21288_v5 = vperm.slane %v20310_v60, 1 }
 0x51b   :  { %v14673_v53 = vld [vmem:[#allocation11 + $0x11b8] sm:$0xf0] }
 0x51c   :  { %v18514_v44 = vld [vmem:[#allocation11 + $0x139c] sm:$0xf]  ;;  %v14676_v43 = vor.u32 %v18450_v7, %v14673_v53  ;;  %7106 = vmatpush.bf16.msrb.mxu3 %v13236_v32  ;;  %v6062_v6 = vadd.f32 %v20340_v31, %v21288_v5  ;;  %v5936_v53 = vadd.f32 %v20319_v25, %v5922_v59  ;;  %v20562_v5 = vpop.f32.mrf.mxu1 }
 0x51d   :  { %v14929_v50 = vld [vmem:[#allocation11 + $0x13b8] sm:$0xf0] }
 0x51e   :  { %v18018_v46 = vld [vmem:[#allocation11 + $0x41c] sm:$0xf]  ;;  %v14932_v62 = vor.u32 %v18514_v44, %v14929_v50  ;;  %7171 = vmatpush.bf16.msrb.mxu0 %v14676_v43  ;;  %v6076_v32 = vadd.f32 %v20342_v63, %v6062_v6  ;;  %v20555_v63 = vpop.f32.mrf.mxu2 }
 0x51f   :  { %v12945_v39 = vld [vmem:[#allocation11 + $0x438] sm:$0xf0] }
 0x520   :  { %v18082_v51 = vld [vmem:[#allocation11 + $0x61c] sm:$0xf]  ;;  %v12948_v42 = vor.u32 %v18018_v46, %v12945_v39  ;;  %7185 = vmatpush.bf16.msrb.mxu1 %v14932_v62 }
 0x521   :  { %v13201_v17 = vld [vmem:[#allocation11 + $0x638] sm:$0xf0] }
 0x522   :  { %v18330_v21 = vld [vmem:[#allocation11 + $0xddc] sm:$0xf]  ;;  %v13204_v18 = vor.u32 %v18082_v51, %v13201_v17  ;;  %7093 = vmatpush.bf16.msrb.mxu2 %v12948_v42 }
 0x523   :  { %v14193_v4 = vld [vmem:[#allocation11 + $0xdf8] sm:$0xf0] }
 0x524   :  { %v18394_v56 = vld [vmem:[#allocation11 + $0xfdc] sm:$0xf]  ;;  %v14196_v15 = vor.u32 %v18330_v21, %v14193_v4  ;;  %7107 = vmatpush.bf16.msrb.mxu3 %v13204_v18  ;;  %v5950_v4 = vadd.f32 %v20296_v27, %v5936_v53 }
 0x525   :  { %v14449_v2 = vld [vmem:[#allocation11 + $0xff8] sm:$0xf0]  ;;  %7094 = vmatmul.bf16.vlgmr.msrb.gmra.mxu2 %v20219_v48 }
 0x526   :  { %v18442_v1 = vld [vmem:[#allocation11 + $0x115c] sm:$0xf]  ;;  %v14452_v14 = vor.u32 %v18394_v56, %v14449_v2  ;;  %7142 = vmatpush.bf16.msra.mxu2 %v14196_v15  ;;  %v6090_v56 = vadd.f32 %v20355_v38, %v6076_v32  ;;  %v20553_v2 = vpop.f32.mrf.mxu0  ;;  %v5964_v18 = vadd.f32 %v20298_v28, %v5950_v4  ;;  %v20558_v38 = vpop.f32.mrf.mxu3 }
 0x527   :  { %v14641_v33 = vld [vmem:[#allocation11 + $0x1178] sm:$0xf0]  ;;  %7108 = vmatmul.bf16.vlgmr.msrb.gmra.mxu3 %v20221_v19 }
 0x528   :  { %v18506_v57 = vld [vmem:[#allocation11 + $0x135c] sm:$0xf]  ;;  %v14644_v20 = vor.u32 %v18442_v1, %v14641_v33  ;;  %7156 = vmatpush.bf16.msra.mxu3 %v14452_v14 }
 0x529   :  { %v14897_v36 = vld [vmem:[#allocation11 + $0x1378] sm:$0xf0] }
 0x52a   :  { %v18322_v12 = vld [vmem:[#allocation11 + $0xd9c] sm:$0xf]  ;;  %v14900_v49 = vor.u32 %v18506_v57, %v14897_v36  ;;  %7172 = vmatpush.bf16.msrb.mxu0 %v14644_v20 }
 0x52b   :  { %v14161_v58 = vld [vmem:[#allocation11 + $0xdb8] sm:$0xf0] }
 0x52c   :  { %v18386_v40 = vld [vmem:[#allocation11 + $0xf9c] sm:$0xf]  ;;  %v14164_v44 = vor.u32 %v18322_v12, %v14161_v58  ;;  %7186 = vmatpush.bf16.msrb.mxu1 %v14900_v49  ;;  %v6104_v12 = vadd.f32 %v20357_v0, %v6090_v56  ;;  %v5978_v58 = vadd.f32 %v20326_v23, %v5964_v18  ;;  %v15703_v56 = vld [vmem:[#allocation14 + $0x1c0] sm:$0xf] }
 0x52d   :  { %v14417_v7 = vld [vmem:[#allocation11 + $0xfb8] sm:$0xf0] }
 0x52e   :  { %v18434_v29 = vld [vmem:[#allocation11 + $0x111c] sm:$0xf]  ;;  %v14420_v31 = vor.u32 %v18386_v40, %v14417_v7  ;;  %7143 = vmatpush.bf16.msra.mxu2 %v14164_v44  ;;  %v6118_v23 = vadd.f32 %v20351_v45, %v6104_v12  ;;  %v5992_v44 = vadd.f32 %v20328_v8, %v5978_v58 }
 0x52f   :  { %v14609_v52 = vld [vmem:[#allocation11 + $0x1138] sm:$0xf0] }
 0x530   :  { %v18498_v47 = vld [vmem:[#allocation11 + $0x131c] sm:$0xf]  ;;  %v14612_v46 = vor.u32 %v18434_v29, %v14609_v52  ;;  %7157 = vmatpush.bf16.msra.mxu3 %v14420_v31  ;;  %v20566_v31 = vpop.f32.mrf.mxu2 }
 0x531   :  { %v14865_v34 = vld [vmem:[#allocation11 + $0x1338] sm:$0xf0] }
 0x532   :  { %v18314_v50 = vld [vmem:[#allocation11 + $0xd5c] sm:$0xf]  ;;  %v14868_v39 = vor.u32 %v18498_v47, %v14865_v34  ;;  %7173 = vmatpush.bf16.msrb.mxu0 %v14612_v46 }
 0x533   :  { %v14129_v11 = vld [vmem:[#allocation11 + $0xd78] sm:$0xf0] }
 0x534   :  { %v18378_v51 = vld [vmem:[#allocation11 + $0xf5c] sm:$0xf]  ;;  %v14132_v1 = vor.u32 %v18314_v50, %v14129_v11  ;;  %7187 = vmatpush.bf16.msrb.mxu1 %v14868_v39 }
 0x535   :  { %v14385_v17 = vld [vmem:[#allocation11 + $0xf78] sm:$0xf0] }
 0x536   :  { %v18426_v21 = vld [vmem:[#allocation11 + $0x10dc] sm:$0xf]  ;;  %v14388_v3 = vor.u32 %v18378_v51, %v14385_v17  ;;  %7144 = vmatpush.bf16.msra.mxu2 %v14132_v1  ;;  %v20568_v51 = vpop.f32.mrf.mxu0  ;;  %v6132_v1 = vadd.f32 %v20353_v24, %v6118_v23  ;;  %v20575_v24 = vpop.f32.mrf.mxu1 }
 0x537   :  { %v14577_v25 = vld [vmem:[#allocation11 + $0x10f8] sm:$0xf0] }
 0x538   :  { %v18490_v43 = vld [vmem:[#allocation11 + $0x12dc] sm:$0xf]  ;;  %v14580_v48 = vor.u32 %v18426_v21, %v14577_v25  ;;  %7158 = vmatpush.bf16.msra.mxu3 %v14388_v3  ;;  %v18715_v3 = vld [vmem:[#allocation14 + $0x1dc] sm:$0xf0] }
 0x539   :  { %v14833_v62 = vld [vmem:[#allocation11 + $0x12f8] sm:$0xf0] }
 0x53a   :  { %v18306_v33 = vld [vmem:[#allocation11 + $0xd1c] sm:$0xf]  ;;  %v14836_v27 = vor.u32 %v18490_v43, %v14833_v62  ;;  %7174 = vmatpush.bf16.msrb.mxu0 %v14580_v48  ;;  %v20570_v43 = vpop.f32.mrf.mxu3  ;;  %v6006_v48 = vadd.f32 %v20306_v54, %v5992_v44  ;;  %v18707_v54 = vld [vmem:[#allocation14 + $0x19c] sm:$0xf0] }
 0x53b   :  { %v14097_v57 = vld [vmem:[#allocation11 + $0xd38] sm:$0xf0] }
 0x53c   :  { %v18370_v19 = vld [vmem:[#allocation11 + $0xf1c] sm:$0xf]  ;;  %v14100_v6 = vor.u32 %v18306_v33, %v14097_v57  ;;  %7188 = vmatpush.bf16.msrb.mxu1 %v14836_v27  ;;  %v15959_v33 = vld [vmem:[#allocation14 + $0x3c0] sm:$0xf] }
 0x53d   :  { %v14353_v36 = vld [vmem:[#allocation11 + $0xf38] sm:$0xf0]  ;;  %v18779_v57 = vld [vmem:[#allocation14 + $0x3dc] sm:$0xf0] }
 0x53e   :  { %v18418_v42 = vld [vmem:[#allocation11 + $0x109c] sm:$0xf]  ;;  %v14356_v20 = vor.u32 %v18370_v19, %v14353_v36  ;;  %7145 = vmatpush.bf16.msra.mxu2 %v14100_v6  ;;  %v15704_v6 = vor.u32 %v18715_v3, %v15703_v56  ;;  %v18699_v56 = vld [vmem:[#allocation14 + $0x15c] sm:$0xf0] }
 0x53f   :  { %v14545_v59 = vld [vmem:[#allocation11 + $0x10b8] sm:$0xf0]  ;;  %v18763_v3 = vld [vmem:[#allocation14 + $0x35c] sm:$0xf0] }
 0x540   :  { %v18482_v15 = vld [vmem:[#allocation11 + $0x129c] sm:$0xf]  ;;  %v14548_v28 = vor.u32 %v18418_v42, %v14545_v59  ;;  %7159 = vmatpush.bf16.msra.mxu3 %v14356_v20  ;;  %v21289_v42 = vld [vmem:[#allocation38_spill] sm:$0xff]  ;;  %v15960_v20 = vor.u32 %v18779_v57, %v15959_v33 }
 0x541   :  { %v14801_v14 = vld [vmem:[#allocation11 + $0x12b8] sm:$0xf0]  ;;  %v6146_v18 = vadd.f32 %v21289_v42, %v6132_v1  ;;  %v15895_v1 = vld [vmem:[#allocation14 + $0x340] sm:$0xf]  ;;  %v21293_v33 = vld [vmem:[#allocation34_spill] sm:$0xff] }
 0x542   :  { %v18298_v49 = vld [vmem:[#allocation11 + $0xcdc] sm:$0xf]  ;;  %v14804_v7 = vor.u32 %v18482_v15, %v14801_v14  ;;  %7175 = vmatpush.bf16.msrb.mxu0 %v14548_v28  ;;  %v18771_v28 = vld [vmem:[#allocation14 + $0x39c] sm:$0xf0]  ;;  %v20590_v42 = vld [vmem:[#allocation13] sm:$0xff] }
 0x543   :  { %v14065_v40 = vld [vmem:[#allocation11 + $0xcf8] sm:$0xf0] }
 0x544   :  { %v18362_v29 = vld [vmem:[#allocation11 + $0xedc] sm:$0xf]  ;;  %v14068_v50 = vor.u32 %v18298_v49, %v14065_v40  ;;  %7189 = vmatpush.bf16.msrb.mxu1 %v14804_v7  ;;  %v15671_v49 = vld [vmem:[#allocation14 + $0x180] sm:$0xf] }
 0x545   :  { %v14321_v52 = vld [vmem:[#allocation11 + $0xef8] sm:$0xf0]  ;;  %v15927_v40 = vld [vmem:[#allocation14 + $0x380] sm:$0xf] }
 0x546   :  { %v18410_v47 = vld [vmem:[#allocation11 + $0x105c] sm:$0xf]  ;;  %v14324_v11 = vor.u32 %v18362_v29, %v14321_v52  ;;  %7146 = vmatpush.bf16.msra.mxu2 %v14068_v50  ;;  %v20579_v50 = vpop.f32.mrf.mxu0 }
 0x547   :  { %v14513_v34 = vld [vmem:[#allocation11 + $0x1078] sm:$0xf0] }
 0x548   :  { %v18474_v53 = vld [vmem:[#allocation11 + $0x125c] sm:$0xf]  ;;  %v14516_v17 = vor.u32 %v18410_v47, %v14513_v34  ;;  %7160 = vmatpush.bf16.msra.mxu3 %v14324_v11 }
 0x549   :  { %v14769_v0 = vld [vmem:[#allocation11 + $0x1278] sm:$0xf0] }
 0x54a   :  { %v18290_v32 = vld [vmem:[#allocation11 + $0xc9c] sm:$0xf]  ;;  %v14772_v21 = vor.u32 %v18474_v53, %v14769_v0  ;;  %7176 = vmatpush.bf16.msrb.mxu0 %v14516_v17  ;;  %v21290_v53 = vld [vmem:[#allocation32_spill] sm:$0xff] }
 0x54b   :  { %v14033_v46 = vld [vmem:[#allocation11 + $0xcb8] sm:$0xf0]  ;;  %v6020_v0 = vadd.f32 %v21290_v53, %v6006_v48  ;;  %v20587_v48 = vpop.f32.mrf.mxu3 }
 0x54c   :  { %v18354_v39 = vld [vmem:[#allocation11 + $0xe9c] sm:$0xf]  ;;  %v14036_v27 = vor.u32 %v18290_v32, %v14033_v46  ;;  %7190 = vmatpush.bf16.msrb.mxu1 %v14772_v21  ;;  %v20584_v21 = vpop.f32.mrf.mxu2 }
 0x54d   :  { %v14289_v4 = vld [vmem:[#allocation11 + $0xeb8] sm:$0xf0]  ;;  %v6034_v57 = vadd.f32 %v21293_v33, %v6020_v0  ;;  %v21298_v0 = vld [vmem:[#allocation69_spill] sm:$0xff] }
 0x54e   :  { %v18402_v25 = vld [vmem:[#allocation11 + $0x101c] sm:$0xf]  ;;  %v14292_v19 = vor.u32 %v18354_v39, %v14289_v4  ;;  %7147 = vmatpush.bf16.msra.mxu2 %v14036_v27  ;;  %v21292_v39 = vperm.slane %v20418_v10, 4  ;;  %v15672_v4 = vor.u32 %v18707_v54, %v15671_v49  ;;  %v15896_v49 = vor.u32 %v18763_v3, %v15895_v1  ;;  %v15575_v1 = vld [vmem:[#allocation14 + $0xc0] sm:$0xf] }
 0x54f   :  { %v14481_v45 = vld [vmem:[#allocation11 + $0x1038] sm:$0xf0]  ;;  %v21302_v3 = vld [vmem:[#allocation41_spill] sm:$0xff] }
 0x550   :  { %v18466_v8 = vld [vmem:[#allocation11 + $0x121c] sm:$0xf]  ;;  %v14484_v59 = vor.u32 %v18402_v25, %v14481_v45  ;;  %7161 = vmatpush.bf16.msra.mxu3 %v14292_v19  ;;  %v6566_v17 = vadd.f32 %v20492_v26, %v21292_v39  ;;  %v15928_v25 = vor.u32 %v18771_v28, %v15927_v40  ;;  %v21294_v19 = vld [vmem:[#allocation36_spill] sm:$0xff] }
 0x551   :  { %v14737_v62 = vld [vmem:[#allocation11 + $0x1238] sm:$0xf0]  ;;  %v15607_v28 = vld [vmem:[#allocation14 + $0x100] sm:$0xf] }
 0x552   :  { %v18282_v36 = vld [vmem:[#allocation11 + $0xc5c] sm:$0xf]  ;;  %v14740_v15 = vor.u32 %v18466_v8, %v14737_v62  ;;  %7177 = vmatpush.bf16.msrb.mxu0 %v14484_v59  ;;  %v15639_v62 = vld [vmem:[#allocation14 + $0x140] sm:$0xf] }
 0x553   :  { %v14001_v14 = vld [vmem:[#allocation11 + $0xc78] sm:$0xf0] }
 0x554   :  { %v18346_v12 = vld [vmem:[#allocation11 + $0xe5c] sm:$0xf]  ;;  %v14004_v7 = vor.u32 %v18282_v36, %v14001_v14  ;;  %7191 = vmatpush.bf16.msrb.mxu1 %v14740_v15 }
 0x555   :  { %v14257_v58 = vld [vmem:[#allocation11 + $0xe78] sm:$0xf0]  ;;  %7178 = vmatmul.bf16.vlgmr.msrb.gmra.mxu0 %v20244_v9 }
 0x556   :  { %v14260_v29 = vor.u32 %v18346_v12, %v14257_v58  ;;  %v18274_v52 = vld [vmem:[#allocation11 + $0xc1c] sm:$0xf]  ;;  %10356 = vmatpush.bf16.msra.mxu0 %v15704_v6  ;;  %7148 = vmatpush.bf16.msra.mxu2 %v14004_v7  ;;  %v6580_v58 = vadd.f32 %v20494_v41, %v6566_v17  ;;  %v20596_v6 = vpop.f32.mrf.mxu1  ;;  %v21300_v17 = vperm.slane %v20418_v10, 3  ;;  %v18683_v10 = vld [vmem:[#allocation14 + $0xdc] sm:$0xf0] }
 0x557   :  { %v13969_v47 = vld [vmem:[#allocation11 + $0xc38] sm:$0xf0]  ;;  %7192 = vmatmul.bf16.vlgmr.msrb.gmra.mxu1 %v20246_v30  ;;  %v21296_v30 = vperm.slane %v20310_v60, 2 }
 0x558   :  { %v18338_v34 = vld [vmem:[#allocation11 + $0xe1c] sm:$0xf]  ;;  %10370 = vmatpush.bf16.msra.mxu1 %v15960_v20  ;;  %7162 = vmatpush.bf16.msra.mxu3 %v14260_v29  ;;  %v13972_v27 = vor.u32 %v18274_v52, %v13969_v47  ;;  %v15640_v20 = vor.u32 %v18699_v56, %v15639_v62  ;;  %v18691_v29 = vld [vmem:[#allocation14 + $0x11c] sm:$0xf0] }
 0x559   :  { %v21291_v23 = vld [vmem:[#allocation39_spill] sm:$0xff]  ;;  %v15863_v52 = vld [vmem:[#allocation14 + $0x300] sm:$0xf]  ;;  %v15608_v60 = vor.u32 %v18691_v29, %v15607_v28 }
 0x55a   :  { %v6160_v44 = vadd.f32 %v21291_v23, %v6146_v18  ;;  %v14225_v11 = vld [vmem:[#allocation11 + $0xe38] sm:$0xf0]  ;;  %v2031_v18 = vperm.slane %v20590_v42, 5  ;;  %10357 = vmatpush.bf16.msra.mxu0 %v15672_v4  ;;  %v18755_v47 = vld [vmem:[#allocation14 + $0x31c] sm:$0xf0]  ;;  %v6594_v23 = vadd.f32 %v21298_v0, %v6580_v58  ;;  %7149 = vmatpush.bf16.msra.mxu2 %v13972_v27  ;;  %v6789_v27 = vpop.f32.mrf.mxu0 }
 0x55b   :  { %v18586_v32 = vld [vmem:[#allocation11 + $0x15dc] sm:$0xf]  ;;  %v14228_v26 = vor.u32 %v18338_v34, %v14225_v11  ;;  %v21301_v4 = vld [vmem:[#allocation56_spill] sm:$0xff] }
 0x55c   :  { %v15217_v46 = vld [vmem:[#allocation11 + $0x15f8] sm:$0xf0]  ;;  %v6174_v36 = vadd.f32 %v21294_v19, %v6160_v44  ;;  %10371 = vmatpush.bf16.msra.mxu1 %v15928_v25  ;;  %v6734_v7 = vadd.f32 %v20568_v51, %v2031_v18  ;;  %v21299_v44 = vld [vmem:[#allocation37_spill] sm:$0xff]  ;;  %v6398_v25 = vadd.f32 %v21301_v4, %v21300_v17  ;;  %v21311_v4 = vld [vmem:[#allocation40_spill] sm:$0xff] }
 0x55d   :  { %v18650_v45 = vld [vmem:[#allocation11 + $0x17dc] sm:$0xf]  ;;  %v15220_v59 = vor.u32 %v18586_v32, %v15217_v46  ;;  %7163 = vmatpush.bf16.msra.mxu3 %v14228_v26  ;;  %7150 = vmatmul.bf16.vlgmr.msra.gmra.mxu2 %v20257_v13  ;;  %v15831_v26 = vld [vmem:[#allocation14 + $0x2c0] sm:$0xf] }
 0x55e   :  { %v15473_v8 = vld [vmem:[#allocation11 + $0x17f8] sm:$0xf0]  ;;  %v6188_v11 = vadd.f32 %v21299_v44, %v6174_v36  ;;  %10358 = vmatpush.bf16.msra.mxu0 %v15640_v20  ;;  %v18747_v19 = vld [vmem:[#allocation14 + $0x2dc] sm:$0xf0]  ;;  %v6732_v20 = vadd.f32 %v20553_v2, %v2031_v18  ;;  %v6803_v17 = vpop.f32.mrf.mxu1 }
 0x55f   :  { %v15476_v15 = vor.u32 %v18650_v45, %v15473_v8  ;;  %v18578_v14 = vld [vmem:[#allocation11 + $0x159c] sm:$0xf]  ;;  %7198 = vmatpush.bf16.msrb.mxu2 %v15220_v59  ;;  %v20610_v45 = vpop.f32.mrf.mxu2  ;;  %v15864_v8 = vor.u32 %v18755_v47, %v15863_v52  ;;  %v21303_v36 = vld [vmem:[#allocation33_spill] sm:$0xff]  ;;  %v15576_v52 = vor.u32 %v18683_v10, %v15575_v1  ;;  %v15832_v47 = vor.u32 %v18747_v19, %v15831_v26 }
 0x560   :  { %v15185_v12 = vld [vmem:[#allocation11 + $0x15b8] sm:$0xf0]  ;;  %10372 = vmatpush.bf16.msra.mxu1 %v15896_v49  ;;  %v6202_v33 = vadd.f32 %v21302_v3, %v6188_v11  ;;  %7164 = vmatmul.bf16.vlgmr.msra.gmra.mxu3 %v20259_v22  ;;  %v20617_v59 = vmul.f32 0.01, %v21303_v36  ;;  %v20622_v49 = vpop.f32.mrf.mxu3  ;;  %v18739_v0 = vld [vmem:[#allocation14 + $0x29c] sm:$0xf0] }
 0x561   :  { %v18642_v54 = vld [vmem:[#allocation11 + $0x179c] sm:$0xf]  ;;  %7212 = vmatpush.bf16.msrb.mxu3 %v15476_v15  ;;  %v15188_v32 = vor.u32 %v18578_v14, %v15185_v12  ;;  %v21304_v15 = vld [vmem:[#allocation44_spill] sm:$0xff]  ;;  %v21305_v12 = vld [vmem:[#allocation70_spill] sm:$0xff] }
 0x562   :  { %v15441_v40 = vld [vmem:[#allocation11 + $0x17b8] sm:$0xf0]  ;;  %v6608_v58 = vadd.f32 %v21305_v12, %v6594_v23  ;;  %10359 = vmatpush.bf16.msra.mxu0 %v15608_v60  ;;  %v21309_v11 = vld [vmem:[#allocation60_spill] sm:$0xff]  ;;  %v20641_v19 = vpop.f32.mrf.mxu0 }
 0x563   :  { %v21295_v34 = vld [vmem:[#allocation35_spill] sm:$0xff]  ;;  %v15444_v51 = vor.u32 %v18642_v54, %v15441_v40  ;;  %7199 = vmatpush.bf16.msrb.mxu2 %v15188_v32  ;;  %v15511_v26 = vld [vmem:[#allocation14 + $0x40] sm:$0xf] }
 0x564   :  { %v20600_v9 = vadd.f32 %v21295_v34, %v6034_v57  ;;  %v21297_v41 = vld [vmem:[#allocation43_spill] sm:$0xff]  ;;  %v6748_v57 = vadd.f32 %v20575_v24, %v6734_v7  ;;  %v21306_v7 = vld [vmem:[#allocation57_spill] sm:$0xff]  ;;  %10373 = vmatpush.bf16.msra.mxu1 %v15864_v8 }
 0x565   :  { %v6230_v53 = vadd.f32 %v21297_v41, %v21296_v30  ;;  %v18570_v46 = vld [vmem:[#allocation11 + $0x155c] sm:$0xf]  ;;  %7213 = vmatpush.bf16.msrb.mxu3 %v15444_v51  ;;  %v6412_v29 = vadd.f32 %v21306_v7, %v6398_v25  ;;  %v15543_v34 = vld [vmem:[#allocation14 + $0x80] sm:$0xf]  ;;  %v21307_v30 = vld [vmem:[#allocation42_spill] sm:$0xff] }
 0x566   :  { %v15153_v39 = vld [vmem:[#allocation11 + $0x1578] sm:$0xf0]  ;;  %v20625_v24 = vmul.f32 0.01, %v20600_v9  ;;  %v6762_v13 = vadd.f32 %v20584_v21, %v6748_v57  ;;  %v20630_v41 = vadd.f32 %v21307_v30, %v6202_v33  ;;  %v15799_v21 = vld [vmem:[#allocation14 + $0x280] sm:$0xf]  ;;  %10360 = vmatpush.bf16.msra.mxu0 %v15576_v52 }
 0x567   :  { %v18634_v62 = vld [vmem:[#allocation11 + $0x175c] sm:$0xf]  ;;  %v6244_v14 = vadd.f32 %v21304_v15, %v6230_v53  ;;  %v15156_v22 = vor.u32 %v18570_v46, %v15153_v39  ;;  %v18675_v53 = vld [vmem:[#allocation14 + $0x9c] sm:$0xf0]  ;;  %v6426_v32 = vadd.f32 %v21309_v11, %v6412_v29  ;;  %v6746_v39 = vadd.f32 %v20562_v5, %v6732_v20 }
 0x568   :  { %v15409_v56 = vld [vmem:[#allocation11 + $0x1778] sm:$0xf0]  ;;  %v20637_v25 = vmul.f32 0.01, %v21311_v4  ;;  %v6776_v60 = vadd.f32 %v20587_v48, %v6762_v13  ;;  %10374 = vmatpush.bf16.msra.mxu1 %v15832_v47  ;;  %v15544_v33 = vor.u32 %v18675_v53, %v15543_v34  ;;  %v15800_v57 = vor.u32 %v18739_v0, %v15799_v21  ;;  %v18667_v15 = vld [vmem:[#allocation14 + $0x5c] sm:$0xf0]  ;;  %v6831_v34 = vpop.f32.mrf.mxu3 }
 0x569   :  { %v15412_v54 = vor.u32 %v18634_v62, %v15409_v56  ;;  %v18562_v40 = vld [vmem:[#allocation11 + $0x151c] sm:$0xf]  ;;  %7200 = vmatpush.bf16.msrb.mxu2 %v15156_v22  ;;  %v6760_v3 = vadd.f32 %v20566_v31, %v6746_v39  ;;  %v18731_v48 = vld [vmem:[#allocation14 + $0x25c] sm:$0xf0]  ;;  %v20644_v12 = vmul.f32 0.01, %v20630_v41  ;;  %v15512_v30 = vor.u32 %v18667_v15, %v15511_v26 }
 0x56a   :  { %v15121_v28 = vld [vmem:[#allocation11 + $0x1538] sm:$0xf0]  ;;  %v21313_v13 = vld [vmem:[#allocation61_spill] sm:$0xff]  ;;  %v21314_v31 = vld [vmem:[#allocation72_spill] sm:$0xff]  ;;  %10361 = vmatpush.bf16.msra.mxu0 %v15544_v33 }
 0x56b   :  { %v18626_v2 = vld [vmem:[#allocation11 + $0x171c] sm:$0xf]  ;;  %7214 = vmatpush.bf16.msrb.mxu3 %v15412_v54  ;;  %v15124_v8 = vor.u32 %v18562_v40, %v15121_v28  ;;  %v6440_v22 = vadd.f32 %v21313_v13, %v6426_v32  ;;  %v6817_v40 = vpop.f32.mrf.mxu2  ;;  %v6790_v28 = vadd.f32 %v6789_v27, %v6776_v60  ;;  %v15479_v0 = vld [vmem:[#allocation14] sm:$0xf] }
 0x56c   :  { %v15377_v18 = vld [vmem:[#allocation11 + $0x1738] sm:$0xf0]  ;;  %10375 = vmatpush.bf16.msra.mxu1 %v15800_v57  ;;  %v18723_v11 = vld [vmem:[#allocation14 + $0x21c] sm:$0xf0] }
 0x56d   :  { %v21308_v23 = vld [vmem:[#allocation47_spill] sm:$0xff]  ;;  %v15380_v62 = vor.u32 %v18626_v2, %v15377_v18  ;;  %7201 = vmatpush.bf16.msrb.mxu2 %v15124_v8  ;;  %v6774_v18 = vadd.f32 %v20570_v43, %v6760_v3  ;;  %v16727_v27 = vld [vmem:[#allocation14 + $0x9c0] sm:$0xf]  ;;  %v6804_v3 = vadd.f32 %v6803_v17, %v6790_v28  ;;  %v7242_v17 = vmax.f32 %v21303_v36, %v20617_v59 }
 0x56e   :  { %v6258_v44 = vadd.f32 %v21308_v23, %v6244_v14  ;;  %v21310_v51 = vld [vmem:[#allocation71_spill] sm:$0xff]  ;;  %v15767_v14 = vld [vmem:[#allocation14 + $0x240] sm:$0xf]  ;;  %10362 = vmatpush.bf16.msra.mxu0 %v15512_v30  ;;  %v7251_v28 = vmax.f32 %v20630_v41, %v20644_v12 }
 0x56f   :  { %v6622_v46 = vadd.f32 %v21310_v51, %v6608_v58  ;;  %v18554_v56 = vld [vmem:[#allocation11 + $0x14dc] sm:$0xf]  ;;  %v21312_v58 = vld [vmem:[#allocation48_spill] sm:$0xff]  ;;  %7215 = vmatpush.bf16.msrb.mxu3 %v15380_v62  ;;  %v15768_v53 = vor.u32 %v18731_v48, %v15767_v14  ;;  %v21315_v32 = vld [vmem:[#allocation45_spill] sm:$0xff]  ;;  %v20653_v62 = vpop.f32.mrf.mxu1 }
 0x570   :  { %v15089_v1 = vld [vmem:[#allocation11 + $0x14f8] sm:$0xf0]  ;;  %v6272_v20 = vadd.f32 %v21312_v58, %v6258_v44  ;;  %v18659_v23 = vld [vmem:[#allocation14 + $0x1c] sm:$0xf0]  ;;  %v20670_v12 = vpop.f32.mrf.mxu3 }
 0x571   :  { %v18618_v10 = vld [vmem:[#allocation11 + $0x16dc] sm:$0xf]  ;;  %v6636_v54 = vadd.f32 %v21314_v31, %v6622_v46  ;;  %v15092_v7 = vor.u32 %v18554_v56, %v15089_v1  ;;  %v15735_v44 = vld [vmem:[#allocation14 + $0x200] sm:$0xf]  ;;  %v21316_v46 = vld [vmem:[#allocation58_spill] sm:$0xff]  ;;  %10376 = vmatpush.bf16.msra.mxu1 %v15768_v53  ;;  %v15480_v26 = vor.u32 %v18659_v23, %v15479_v0 }
 0x572   :  { %v15345_v5 = vld [vmem:[#allocation11 + $0x16f8] sm:$0xf0]  ;;  %v6286_v51 = vadd.f32 %v21315_v32, %v6272_v20  ;;  %v6454_v39 = vadd.f32 %v21316_v46, %v6440_v22  ;;  %v21317_v60 = vld [vmem:[#allocation73_spill] sm:$0xff]  ;;  %v15736_v15 = vor.u32 %v18723_v11, %v15735_v44  ;;  %v6818_v20 = vadd.f32 %v6817_v40, %v6804_v3 }
 0x573   :  { %v15348_v29 = vor.u32 %v18618_v10, %v15345_v5  ;;  %v18546_v52 = vld [vmem:[#allocation11 + $0x149c] sm:$0xf]  ;;  %v6650_v8 = vadd.f32 %v21317_v60, %v6636_v54  ;;  %v18971_v43 = vld [vmem:[#allocation14 + $0x9dc] sm:$0xf0]  ;;  %7202 = vmatpush.bf16.msrb.mxu2 %v15092_v7  ;;  %v6788_v5 = vadd.f32 %v20579_v50, %v6774_v18  ;;  %v7250_v54 = vmax.f32 %v20600_v9, %v20625_v24  ;;  %v20664_v7 = vpop.f32.mrf.mxu2  ;;  %v6845_v18 = vpop.f32.mrf.mxu0 }
 0x574   :  { %v15057_v47 = vld [vmem:[#allocation11 + $0x14b8] sm:$0xf0]  ;;  %v16983_v56 = vld [vmem:[#allocation14 + $0xbc0] sm:$0xf]  ;;  %v16728_v13 = vor.u32 %v18971_v43, %v16727_v27  ;;  %v7243_v50 = vmax.f32 %v21311_v4, %v20637_v25  ;;  %v21320_v25 = vld [vmem:[#allocation74_spill] sm:$0xff]  ;;  %10363 = vmatpush.bf16.msra.mxu0 %v15480_v26  ;;  %v6832_v11 = vadd.f32 %v6831_v34, %v6818_v20 }
 0x575   :  { %v18610_v2 = vld [vmem:[#allocation11 + $0x169c] sm:$0xf]  ;;  %v19035_v1 = vld [vmem:[#allocation14 + $0xbdc] sm:$0xf0]  ;;  %7216 = vmatpush.bf16.msrb.mxu3 %v15348_v29  ;;  %v15060_v33 = vor.u32 %v18546_v52, %v15057_v47  ;;  %v21318_v47 = vld [vmem:[#allocation46_spill] sm:$0xff]  ;;  %v6802_v41 = vadd.f32 %v20596_v6, %v6788_v5  ;;  %10377 = vmatpush.bf16.msra.mxu1 %v15736_v15 }
 0x576   :  { %v15313_v21 = vld [vmem:[#allocation11 + $0x16b8] sm:$0xf0]  ;;  %v16984_v22 = vor.u32 %v19035_v1, %v16983_v56  ;;  %v16695_v31 = vld [vmem:[#allocation14 + $0x980] sm:$0xf]  ;;  %v6846_v20 = vadd.f32 %v6845_v18, %v6832_v11 }
 0x577   :  { %v15316_v57 = vor.u32 %v18610_v2, %v15313_v21  ;;  %v18538_v10 = vld [vmem:[#allocation11 + $0x145c] sm:$0xf]  ;;  %v18963_v29 = vld [vmem:[#allocation14 + $0x99c] sm:$0xf0]  ;;  %v6300_v2 = vadd.f32 %v21318_v47, %v6286_v51  ;;  %7203 = vmatpush.bf16.msrb.mxu2 %v15060_v33  ;;  %v6664_v21 = vadd.f32 %v21320_v25, %v6650_v8  ;;  %v20674_v8 = vpack.c.bf16 %v7251_v28, %v7243_v50  ;;  %v6859_v15 = vpop.f32.mrf.mxu1 }
 0x578   :  { %v15025_v14 = vld [vmem:[#allocation11 + $0x1478] sm:$0xf0]  ;;  %v16951_v52 = vld [vmem:[#allocation14 + $0xb80] sm:$0xf]  ;;  %10412 = vmatpush.bf16.msrb.mxu0 %v16728_v13  ;;  %v16696_v27 = vor.u32 %v18963_v29, %v16695_v31  ;;  %v6816_v56 = vadd.f32 %v20610_v45, %v6802_v41 }
 0x579   :  { %v18602_v48 = vld [vmem:[#allocation11 + $0x165c] sm:$0xf]  ;;  %v19027_v40 = vld [vmem:[#allocation14 + $0xb9c] sm:$0xf0]  ;;  %7217 = vmatpush.bf16.msrb.mxu3 %v15316_v57  ;;  %v15028_v36 = vor.u32 %v18538_v10, %v15025_v14  ;;  %10426 = vmatpush.bf16.msrb.mxu1 %v16984_v22  ;;  %v6678_v26 = vadd.f32 %v20536_v35, %v6664_v21 }
 0x57a   :  { %v15281_v58 = vld [vmem:[#allocation11 + $0x1678] sm:$0xf0]  ;;  %v16215_v23 = vld [vmem:[#allocation14 + $0x5c0] sm:$0xf]  ;;  %v16952_v32 = vor.u32 %v19027_v40, %v16951_v52  ;;  %10378 = vmatmul.bf16.vlgmr.msra.gmra.mxu1 %v20674_v8  ;;  %v6830_v50 = vadd.f32 %v20622_v49, %v6816_v56 }
 0x57b   :  { %v15284_v59 = vor.u32 %v18602_v48, %v15281_v58  ;;  %v18530_v30 = vld [vmem:[#allocation11 + $0x141c] sm:$0xf]  ;;  %v18843_v44 = vld [vmem:[#allocation14 + $0x5dc] sm:$0xf0]  ;;  %7204 = vmatpush.bf16.msrb.mxu2 %v15028_v36  ;;  %v6692_v18 = vadd.f32 %v20545_v61, %v6678_v26  ;;  %v6873_v36 = vpop.f32.mrf.mxu2  ;;  %v20686_v49 = vpop.f32.mrf.mxu0 }
 0x57c   :  { %v14993_v9 = vld [vmem:[#allocation11 + $0x1438] sm:$0xf0]  ;;  %v16471_v51 = vld [vmem:[#allocation14 + $0x7c0] sm:$0xf]  ;;  %v16216_v14 = vor.u32 %v18843_v44, %v16215_v23  ;;  %10413 = vmatpush.bf16.msrb.mxu0 %v16696_v27  ;;  %v6844_v23 = vadd.f32 %v20641_v19, %v6830_v50  ;;  %v6887_v61 = vpop.f32.mrf.mxu3  ;;  %v21326_v19 = vld [vmem:[#allocation62_spill] sm:$0xff] }
 0x57d   :  { %v18594_v24 = vld [vmem:[#allocation11 + $0x161c] sm:$0xf]  ;;  %v18907_v46 = vld [vmem:[#allocation14 + $0x7dc] sm:$0xf0]  ;;  %7218 = vmatpush.bf16.msrb.mxu3 %v15284_v59  ;;  %v14996_v10 = vor.u32 %v18530_v30, %v14993_v9  ;;  %10427 = vmatpush.bf16.msrb.mxu1 %v16952_v32 }
 0x57e   :  { %v21319_v53 = vld [vmem:[#allocation59_spill] sm:$0xff]  ;;  %v16663_v60 = vld [vmem:[#allocation14 + $0x940] sm:$0xf]  ;;  %v16472_v48 = vor.u32 %v18907_v46, %v16471_v51  ;;  %v6706_v46 = vadd.f32 %v20555_v63, %v6692_v18 }
 0x57f   :  { %v6468_v4 = vadd.f32 %v21319_v53, %v6454_v39  ;;  %v15249_v0 = vld [vmem:[#allocation11 + $0x1638] sm:$0xf0]  ;;  %v20672_v39 = vpack.c.bf16 %v7250_v54, %v7242_v17  ;;  %v18955_v1 = vld [vmem:[#allocation14 + $0x95c] sm:$0xf0]  ;;  %7205 = vmatpush.bf16.msrb.mxu2 %v14996_v10  ;;  %v6860_v53 = vadd.f32 %v6859_v15, %v6846_v20  ;;  %v6858_v10 = vadd.f32 %v20653_v62, %v6844_v23 }
 0x580   :  { %v21321_v6 = vld [vmem:[#allocation51_spill] sm:$0xff]  ;;  %v16919_v3 = vld [vmem:[#allocation14 + $0xb40] sm:$0xf]  ;;  %v15252_v5 = vor.u32 %v18594_v24, %v15249_v0  ;;  %v16664_v13 = vor.u32 %v18955_v1, %v16663_v60 }
 0x581   :  { %v6314_v43 = vadd.f32 %v21321_v6, %v6300_v2  ;;  %v19019_v33 = vld [vmem:[#allocation14 + $0xb5c] sm:$0xf0]  ;;  %10364 = vmatmul.bf16.vlgmr.msra.gmra.mxu0 %v20672_v39  ;;  %v6874_v60 = vadd.f32 %v6873_v36, %v6860_v53  ;;  %v21329_v50 = vld [vmem:[#allocation63_spill] sm:$0xff] }
 0x582   :  { %v21322_v57 = vld [vmem:[#allocation64_spill] sm:$0xff]  ;;  %v16920_v22 = vor.u32 %v19019_v33, %v16919_v3  ;;  %v21324_v47 = vld [vmem:[#allocation65_spill] sm:$0xff]  ;;  %7219 = vmatpush.bf16.msrb.mxu3 %v15252_v5  ;;  %10414 = vmatpush.bf16.msrb.mxu0 %v16664_v13  ;;  %v20695_v5 = vpop.f32.mrf.mxu1 }
 0x583   :  { %v6482_v34 = vadd.f32 %v21322_v57, %v6468_v4  ;;  %v16183_v58 = vld [vmem:[#allocation14 + $0x580] sm:$0xf]  ;;  %10384 = vmatpush.bf16.msra.mxu2 %v16216_v14  ;;  %v21327_v14 = vld [vmem:[#allocation50_spill] sm:$0xff]  ;;  %v20709_v18 = vpop.f32.mrf.mxu2 }
 0x584   :  { %v18835_v45 = vld [vmem:[#allocation14 + $0x59c] sm:$0xf0]  ;;  %10428 = vmatpush.bf16.msrb.mxu1 %v16920_v22  ;;  %7206 = vmatmul.bf16.vlgmr.msrb.gmra.mxu2 %v20268_v16  ;;  %v6872_v22 = vadd.f32 %v20664_v7, %v6858_v10  ;;  %v20711_v7 = vpop.f32.mrf.mxu3 }
 0x585   :  { %v16439_v31 = vld [vmem:[#allocation14 + $0x780] sm:$0xf]  ;;  %v6496_v2 = vadd.f32 %v21324_v47, %v6482_v34  ;;  %v16184_v59 = vor.u32 %v18835_v45, %v16183_v58  ;;  %7220 = vmatmul.bf16.vlgmr.msrb.gmra.mxu3 %v20270_v55  ;;  %v20699_v58 = vadd.f32 %v20558_v38, %v6706_v46  ;;  %v20701_v45 = vadd.f32 %v6887_v61, %v6874_v60  ;;  %v21330_v47 = vld [vmem:[#allocation54_spill] sm:$0xff] }
 0x586   :  { %v18899_v17 = vld [vmem:[#allocation14 + $0x79c] sm:$0xf0]  ;;  %10398 = vmatpush.bf16.msra.mxu3 %v16472_v48 }
 0x587   :  { %v16631_v54 = vld [vmem:[#allocation14 + $0x900] sm:$0xf]  ;;  %v16440_v30 = vor.u32 %v18899_v17, %v16439_v31  ;;  %10385 = vmatpush.bf16.msra.mxu2 %v16184_v59  ;;  %v6510_v3 = vadd.f32 %v21326_v19, %v6496_v2  ;;  %v20715_v53 = vmul.f32 0.01, %v20699_v58 }
 0x588   :  { %v18947_v35 = vld [vmem:[#allocation14 + $0x91c] sm:$0xf0] }
 0x589   :  { %v16887_v28 = vld [vmem:[#allocation14 + $0xb00] sm:$0xf]  ;;  %v16632_v4 = vor.u32 %v18947_v35, %v16631_v54  ;;  %v6524_v35 = vadd.f32 %v21329_v50, %v6510_v3 }
 0x58a   :  { %v19011_v29 = vld [vmem:[#allocation14 + $0xb1c] sm:$0xf0]  ;;  %10399 = vmatpush.bf16.msra.mxu3 %v16440_v30  ;;  %v6915_v10 = vpop.f32.mrf.mxu1 }
 0x58b   :  { %v21323_v52 = vld [vmem:[#allocation52_spill] sm:$0xff]  ;;  %v16888_v25 = vor.u32 %v19011_v29, %v16887_v28  ;;  %v21325_v32 = vld [vmem:[#allocation49_spill] sm:$0xff]  ;;  %10415 = vmatpush.bf16.msrb.mxu0 %v16632_v4  ;;  %v2032_v4 = vperm.slane %v20590_v42, 6 }
 0x58c   :  { %v6328_v40 = vadd.f32 %v21323_v52, %v6314_v43  ;;  %v16151_v9 = vld [vmem:[#allocation14 + $0x540] sm:$0xf] }
 0x58d   :  { %v18827_v24 = vld [vmem:[#allocation14 + $0x55c] sm:$0xf0]  ;;  %10429 = vmatpush.bf16.msrb.mxu1 %v16888_v25  ;;  %v6901_v25 = vpop.f32.mrf.mxu0 }
 0x58e   :  { %v16407_v21 = vld [vmem:[#allocation14 + $0x740] sm:$0xf]  ;;  %v6342_v51 = vadd.f32 %v21325_v32, %v6328_v40  ;;  %v16152_v6 = vor.u32 %v18827_v24, %v16151_v9  ;;  %v21331_v9 = vld [vmem:[#allocation67_spill] sm:$0xff] }
 0x58f   :  { %v18891_v41 = vld [vmem:[#allocation14 + $0x75c] sm:$0xf0]  ;;  %v6538_v24 = vadd.f32 %v21331_v9, %v6524_v35 }
 0x590   :  { %v16599_v0 = vld [vmem:[#allocation14 + $0x8c0] sm:$0xf]  ;;  %v16408_v43 = vor.u32 %v18891_v41, %v16407_v21  ;;  %v6356_v48 = vadd.f32 %v21327_v14, %v6342_v51  ;;  %10386 = vmatpush.bf16.msra.mxu2 %v16152_v6  ;;  %v20719_v21 = vmul.f32 0.01, %v20701_v45  ;;  %v20722_v41 = vadd.f32 %v20670_v12, %v6872_v22  ;;  %v21332_v6 = vld [vmem:[#allocation55_spill] sm:$0xff] }
 0x591   :  { %v18939_v44 = vld [vmem:[#allocation14 + $0x8dc] sm:$0xf0] }
 0x592   :  { %v16855_v11 = vld [vmem:[#allocation14 + $0xac0] sm:$0xf]  ;;  %v16600_v16 = vor.u32 %v18939_v44, %v16599_v0  ;;  %10400 = vmatpush.bf16.msra.mxu3 %v16408_v43  ;;  %v6370_v2 = vadd.f32 %v21330_v47, %v6356_v48 }
 0x593   :  { %v19003_v27 = vld [vmem:[#allocation14 + $0xadc] sm:$0xf0] }
 0x594   :  { %v16119_v56 = vld [vmem:[#allocation14 + $0x500] sm:$0xf]  ;;  %v16856_v55 = vor.u32 %v19003_v27, %v16855_v11  ;;  %10416 = vmatpush.bf16.msrb.mxu0 %v16600_v16  ;;  %v20725_v43 = vadd.f32 %v21332_v6, %v6370_v2  ;;  %v6900_v16 = vadd.f32 %v20686_v49, %v2032_v4  ;;  %v15673_v2 = vld [vmem:[#allocation14 + $0x1a0] sm:$0xf0] }
 0x595   :  { %v18819_v1 = vld [vmem:[#allocation14 + $0x51c] sm:$0xf0]  ;;  %v20746_v47 = vpop.f32.mrf.mxu0 }
 0x596   :  { %v16375_v33 = vld [vmem:[#allocation14 + $0x700] sm:$0xf]  ;;  %v16120_v62 = vor.u32 %v18819_v1, %v16119_v56  ;;  %10430 = vmatpush.bf16.msrb.mxu1 %v16856_v55  ;;  %v18711_v1 = vld [vmem:[#allocation14 + $0x1c4] sm:$0xf] }
 0x597   :  { %v18883_v57 = vld [vmem:[#allocation14 + $0x71c] sm:$0xf0]  ;;  %v15705_v55 = vld [vmem:[#allocation14 + $0x1e0] sm:$0xf0] }
 0x598   :  { %v16567_v34 = vld [vmem:[#allocation14 + $0x880] sm:$0xf]  ;;  %v16376_v31 = vor.u32 %v18883_v57, %v16375_v33  ;;  %10387 = vmatpush.bf16.msra.mxu2 %v16120_v62  ;;  %v18775_v33 = vld [vmem:[#allocation14 + $0x3c4] sm:$0xf]  ;;  %v15708_v35 = vor.u32 %v18711_v1, %v15705_v55 }
 0x599   :  { %v18931_v63 = vld [vmem:[#allocation14 + $0x89c] sm:$0xf0]  ;;  %v15961_v57 = vld [vmem:[#allocation14 + $0x3e0] sm:$0xf0] }
 0x59a   :  { %v16823_v26 = vld [vmem:[#allocation14 + $0xa80] sm:$0xf]  ;;  %v16568_v28 = vor.u32 %v18931_v63, %v16567_v34  ;;  %10401 = vmatpush.bf16.msra.mxu3 %v16376_v31  ;;  %v7230_v34 = vmul.f32 0.01, %v20523_v37  ;;  %v7231_v63 = vmul.f32 0.01, %v20722_v41 }
 0x59b   :  { %v18995_v15 = vld [vmem:[#allocation14 + $0xa9c] sm:$0xf0] }
 0x59c   :  { %v21328_v20 = vld [vmem:[#allocation53_spill] sm:$0xff]  ;;  %v16824_v38 = vor.u32 %v18995_v15, %v16823_v26  ;;  %10417 = vmatpush.bf16.msrb.mxu0 %v16568_v28  ;;  %v21333_v19 = vld [vmem:[#allocation68_spill] sm:$0xff]  ;;  %v15964_v28 = vor.u32 %v18775_v33, %v15961_v57  ;;  %v7246_v9 = vmax.f32 %v20523_v37, %v7230_v34 }
 0x59d   :  { %v20704_v13 = vmul.f32 0.01, %v21328_v20  ;;  %v16087_v17 = vld [vmem:[#allocation14 + $0x4c0] sm:$0xf]  ;;  %v20728_v3 = vadd.f32 %v21333_v19, %v6538_v24  ;;  %v6929_v24 = vpop.f32.mrf.mxu2 }
 0x59e   :  { %v18811_v54 = vld [vmem:[#allocation14 + $0x4dc] sm:$0xf0]  ;;  %10431 = vmatpush.bf16.msrb.mxu1 %v16824_v38  ;;  %v18703_v38 = vld [vmem:[#allocation14 + $0x184] sm:$0xf] }
 0x59f   :  { %v16343_v29 = vld [vmem:[#allocation14 + $0x6c0] sm:$0xf]  ;;  %v16088_v0 = vor.u32 %v18811_v54, %v16087_v17  ;;  %v20736_v17 = vmul.f32 0.01, %v20725_v43  ;;  %v21334_v54 = vld [vmem:[#allocation66_spill] sm:$0xff] }
 0x5a0   :  { %v18875_v52 = vld [vmem:[#allocation14 + $0x6dc] sm:$0xf0]  ;;  %v20739_v50 = vmul.f32 0.01, %v21334_v54 }
 0x5a1   :  { %v16535_v40 = vld [vmem:[#allocation14 + $0x840] sm:$0xf]  ;;  %v16344_v23 = vor.u32 %v18875_v52, %v16343_v29  ;;  %10388 = vmatpush.bf16.msra.mxu2 %v16088_v0  ;;  %v7254_v29 = vmax.f32 %v20699_v58, %v20715_v53  ;;  %v6914_v52 = vadd.f32 %v20695_v5, %v6900_v16  ;;  %v20750_v0 = vpop.f32.mrf.mxu3  ;;  %v7252_v42 = vmax.f32 %v20725_v43, %v20736_v17 }
 0x5a2   :  { %v18923_v36 = vld [vmem:[#allocation14 + $0x85c] sm:$0xf0] }
 0x5a3   :  { %v16791_v59 = vld [vmem:[#allocation14 + $0xa40] sm:$0xf]  ;;  %v16536_v27 = vor.u32 %v18923_v36, %v16535_v40  ;;  %10402 = vmatpush.bf16.msra.mxu3 %v16344_v23  ;;  %v7255_v40 = vmax.f32 %v20701_v45, %v20719_v21  ;;  %v18767_v36 = vld [vmem:[#allocation14 + $0x384] sm:$0xf]  ;;  %v6902_v45 = vadd.f32 %v6901_v25, %v2032_v4  ;;  %v7247_v21 = vmax.f32 %v20722_v41, %v7231_v63 }
 0x5a4   :  { %v18987_v30 = vld [vmem:[#allocation14 + $0xa5c] sm:$0xf0]  ;;  %v6928_v23 = vadd.f32 %v20709_v18, %v6914_v52  ;;  %v20758_v4 = vpack.c.bf16 %v7254_v29, %v7246_v9  ;;  %v15641_v18 = vld [vmem:[#allocation14 + $0x160] sm:$0xf0]  ;;  %v7244_v63 = vmax.f32 %v21328_v20, %v20704_v13 }
 0x5a5   :  { %v16055_v61 = vld [vmem:[#allocation14 + $0x480] sm:$0xf]  ;;  %v16792_v32 = vor.u32 %v18987_v30, %v16791_v59  ;;  %10418 = vmatpush.bf16.msrb.mxu0 %v16536_v27  ;;  %v15929_v59 = vld [vmem:[#allocation14 + $0x3a0] sm:$0xf0]  ;;  %v7237_v30 = vmul.f32 0.01, %v20728_v3  ;;  %v20760_v25 = vpack.c.bf16 %v7255_v40, %v7247_v21  ;;  %v6916_v19 = vadd.f32 %v6915_v10, %v6902_v45 }
 0x5a6   :  { %v18803_v44 = vld [vmem:[#allocation14 + $0x49c] sm:$0xf0]  ;;  %v15932_v27 = vor.u32 %v18767_v36, %v15929_v59  ;;  %v18759_v41 = vld [vmem:[#allocation14 + $0x344] sm:$0xf]  ;;  %v6942_v16 = vadd.f32 %v20711_v7, %v6928_v23  ;;  %v7245_v10 = vmax.f32 %v21334_v54, %v20739_v50 }
 0x5a7   :  { %v16311_v11 = vld [vmem:[#allocation14 + $0x680] sm:$0xf]  ;;  %v16056_v26 = vor.u32 %v18803_v44, %v16055_v61  ;;  %10432 = vmatpush.bf16.msrb.mxu1 %v16792_v32  ;;  %v7253_v6 = vmax.f32 %v20728_v3, %v7237_v30  ;;  %v18687_v3 = vld [vmem:[#allocation14 + $0x104] sm:$0xf] }
 0x5a8   :  { %v18867_v51 = vld [vmem:[#allocation14 + $0x69c] sm:$0xf0]  ;;  %v15609_v7 = vld [vmem:[#allocation14 + $0x120] sm:$0xf0]  ;;  %v6956_v17 = vadd.f32 %v20746_v47, %v6942_v16 }
 0x5a9   :  { %v16503_v46 = vld [vmem:[#allocation14 + $0x800] sm:$0xf]  ;;  %v16312_v15 = vor.u32 %v18867_v51, %v16311_v11  ;;  %10389 = vmatpush.bf16.msra.mxu2 %v16056_v26  ;;  %v15676_v11 = vor.u32 %v18703_v38, %v15673_v2  ;;  %v6930_v26 = vadd.f32 %v6929_v24, %v6916_v19  ;;  %v15612_v13 = vor.u32 %v18687_v3, %v15609_v7  ;;  %v15577_v29 = vld [vmem:[#allocation14 + $0xe0] sm:$0xf0] }
 0x5aa   :  { %v18915_v60 = vld [vmem:[#allocation14 + $0x81c] sm:$0xf0]  ;;  %v18743_v52 = vld [vmem:[#allocation14 + $0x2c4] sm:$0xf] }
 0x5ab   :  { %v16759_v56 = vld [vmem:[#allocation14 + $0xa00] sm:$0xf]  ;;  %v16504_v48 = vor.u32 %v18915_v60, %v16503_v46  ;;  %10403 = vmatpush.bf16.msra.mxu3 %v16312_v15  ;;  %v18695_v46 = vld [vmem:[#allocation14 + $0x144] sm:$0xf]  ;;  %v6944_v38 = vadd.f32 %v20750_v0, %v6930_v26 }
 0x5ac   :  { %v18979_v12 = vld [vmem:[#allocation14 + $0xa1c] sm:$0xf0]  ;;  %v15897_v60 = vld [vmem:[#allocation14 + $0x360] sm:$0xf0]  ;;  %v15644_v55 = vor.u32 %v18695_v46, %v15641_v18 }
 0x5ad   :  { %v16023_v14 = vld [vmem:[#allocation14 + $0x440] sm:$0xf]  ;;  %v16760_v22 = vor.u32 %v18979_v12, %v16759_v56  ;;  %10419 = vmatpush.bf16.msrb.mxu0 %v16504_v48  ;;  %v6969_v56 = vpop.f32.mrf.mxu1  ;;  %v15900_v33 = vor.u32 %v18759_v41, %v15897_v60  ;;  %v18751_v15 = vld [vmem:[#allocation14 + $0x304] sm:$0xf]  ;;  %v6983_v48 = vpop.f32.mrf.mxu2 }
 0x5ae   :  { %v18795_v62 = vld [vmem:[#allocation14 + $0x45c] sm:$0xf0]  ;;  %v15833_v40 = vld [vmem:[#allocation14 + $0x2e0] sm:$0xf0]  ;;  %v6970_v2 = vadd.f32 %v6969_v56, %v6956_v17 }
 0x5af   :  { %v16279_v31 = vld [vmem:[#allocation14 + $0x640] sm:$0xf]  ;;  %v16024_v58 = vor.u32 %v18795_v62, %v16023_v14  ;;  %10433 = vmatpush.bf16.msrb.mxu1 %v16760_v22  ;;  %v15865_v14 = vld [vmem:[#allocation14 + $0x320] sm:$0xf0]  ;;  %v6997_v22 = vpop.f32.mrf.mxu3  ;;  %v20770_v62 = vpack.c.bf16 %v7252_v42, %v7244_v63  ;;  %v15836_v30 = vor.u32 %v18743_v52, %v15833_v40 }
 0x5b0   :  { %v18859_v49 = vld [vmem:[#allocation14 + $0x65c] sm:$0xf0]  ;;  %10420 = vmatmul.bf16.vlgmr.msrb.gmra.mxu0 %v20758_v4  ;;  %v15868_v54 = vor.u32 %v18751_v15, %v15865_v14  ;;  %v6984_v0 = vadd.f32 %v6983_v48, %v6970_v2  ;;  %v18735_v45 = vld [vmem:[#allocation14 + $0x284] sm:$0xf] }
 0x5b1   :  { %v16280_v53 = vor.u32 %v18859_v49, %v16279_v31  ;;  %v15991_v5 = vld [vmem:[#allocation14 + $0x400] sm:$0xf]  ;;  %10468 = vmatpush.bf16.msra.mxu0 %v15708_v35  ;;  %10390 = vmatpush.bf16.msra.mxu2 %v16024_v58  ;;  %v20772_v31 = vpack.c.bf16 %v7253_v6, %v7245_v10  ;;  %v6957_v49 = vpop.f32.mrf.mxu0  ;;  %v18671_v58 = vld [vmem:[#allocation14 + $0x84] sm:$0xf] }
 0x5b2   :  { %v18787_v61 = vld [vmem:[#allocation14 + $0x41c] sm:$0xf0]  ;;  %10434 = vmatmul.bf16.vlgmr.msrb.gmra.mxu1 %v20760_v25  ;;  %v15801_v21 = vld [vmem:[#allocation14 + $0x2a0] sm:$0xf0]  ;;  %v6998_v42 = vadd.f32 %v6997_v22, %v6984_v0 }
 0x5b3   :  { %v16247_v44 = vld [vmem:[#allocation14 + $0x600] sm:$0xf]  ;;  %10482 = vmatpush.bf16.msra.mxu1 %v15964_v28  ;;  %10404 = vmatpush.bf16.msra.mxu3 %v16280_v53  ;;  %v15992_v12 = vor.u32 %v18787_v61, %v15991_v5  ;;  %v18679_v28 = vld [vmem:[#allocation14 + $0xc4] sm:$0xf]  ;;  %v6958_v53 = vadd.f32 %v6957_v49, %v6944_v38 }
 0x5b4   :  { %v18851_v37 = vld [vmem:[#allocation14 + $0x61c] sm:$0xf0]  ;;  %v15580_v59 = vor.u32 %v18679_v28, %v15577_v29  ;;  %v15545_v5 = vld [vmem:[#allocation14 + $0xa0] sm:$0xf0] }
 0x5b5   :  { %v17239_v32 = vld [vmem:[#allocation14 + $0xdc0] sm:$0xf]  ;;  %v16248_v1 = vor.u32 %v18851_v37, %v16247_v44  ;;  %10469 = vmatpush.bf16.msra.mxu0 %v15676_v11  ;;  %10391 = vmatpush.bf16.msra.mxu2 %v15992_v12  ;;  %v6971_v36 = vpop.f32.mrf.mxu1  ;;  %v6985_v44 = vpop.f32.mrf.mxu2  ;;  %v15548_v11 = vor.u32 %v18671_v58, %v15545_v5  ;;  %v18663_v46 = vld [vmem:[#allocation14 + $0x44] sm:$0xf] }
 0x5b6   :  { %v19099_v51 = vld [vmem:[#allocation14 + $0xddc] sm:$0xf0]  ;;  %v6972_v18 = vadd.f32 %v6971_v36, %v6958_v53  ;;  %v15513_v41 = vld [vmem:[#allocation14 + $0x60] sm:$0xf0] }
 0x5b7   :  { %v17240_v43 = vor.u32 %v19099_v51, %v17239_v32  ;;  %10483 = vmatpush.bf16.msra.mxu1 %v15932_v27  ;;  %v17207_v57 = vld [vmem:[#allocation14 + $0xd80] sm:$0xf]  ;;  %10405 = vmatpush.bf16.msra.mxu3 %v16248_v1  ;;  %v6999_v37 = vpop.f32.mrf.mxu3  ;;  %v15804_v27 = vor.u32 %v18735_v45, %v15801_v21  ;;  %v18727_v60 = vld [vmem:[#allocation14 + $0x244] sm:$0xf]  ;;  %v15516_v16 = vor.u32 %v18663_v46, %v15513_v41 }
 0x5b8   :  { %v19091_v34 = vld [vmem:[#allocation14 + $0xd9c] sm:$0xf0]  ;;  %10392 = vmatmul.bf16.vlgmr.msra.gmra.mxu2 %v20770_v62  ;;  %v15769_v6 = vld [vmem:[#allocation14 + $0x260] sm:$0xf0]  ;;  %v6986_v56 = vadd.f32 %v6985_v44, %v6972_v18 }
 0x5b9   :  { %10440 = vmatpush.bf16.msrb.mxu2 %v17240_v43  ;;  %v17208_v20 = vor.u32 %v19091_v34, %v17207_v57  ;;  %10470 = vmatpush.bf16.msra.mxu0 %v15644_v55  ;;  %v17175_v50 = vld [vmem:[#allocation14 + $0xd40] sm:$0xf]  ;;  %v7011_v23 = vpop.f32.mrf.mxu0  ;;  %v15772_v43 = vor.u32 %v18727_v60, %v15769_v6  ;;  %v15481_v57 = vld [vmem:[#allocation14 + $0x20] sm:$0xf0] }
 0x5ba   :  { %v19083_v35 = vld [vmem:[#allocation14 + $0xd5c] sm:$0xf0]  ;;  %10406 = vmatmul.bf16.vlgmr.msra.gmra.mxu3 %v20772_v31  ;;  %v7012_v34 = vadd.f32 %v7011_v23, %v6998_v42  ;;  %v18719_v3 = vld [vmem:[#allocation14 + $0x204] sm:$0xf]  ;;  %v7000_v14 = vadd.f32 %v6999_v37, %v6986_v56 }
 0x5bb   :  { %10484 = vmatpush.bf16.msra.mxu1 %v15900_v33  ;;  %v17176_v47 = vor.u32 %v19083_v35, %v17175_v50  ;;  %v17143_v9 = vld [vmem:[#allocation14 + $0xd00] sm:$0xf]  ;;  %v18655_v33 = vld [vmem:[#allocation14 + $0x4] sm:$0xf] }
 0x5bc   :  { %v19075_v24 = vld [vmem:[#allocation14 + $0xd1c] sm:$0xf0]  ;;  %v15737_v63 = vld [vmem:[#allocation14 + $0x220] sm:$0xf0]  ;;  %v15484_v17 = vor.u32 %v18655_v33, %v15481_v57 }
 0x5bd   :  { %10441 = vmatpush.bf16.msrb.mxu2 %v17208_v20  ;;  %10471 = vmatpush.bf16.msra.mxu0 %v15612_v13  ;;  %v17144_v61 = vor.u32 %v19075_v24, %v17143_v9  ;;  %v17111_v32 = vld [vmem:[#allocation14 + $0xcc0] sm:$0xf]  ;;  %v7025_v19 = vpop.f32.mrf.mxu1  ;;  %v18967_v10 = vld [vmem:[#allocation14 + $0x9c4] sm:$0xf]  ;;  %v7039_v22 = vpop.f32.mrf.mxu2  ;;  %v15740_v20 = vor.u32 %v18719_v3, %v15737_v63 }
 0x5be   :  { %v19067_v51 = vld [vmem:[#allocation14 + $0xcdc] sm:$0xf0]  ;;  %v16729_v26 = vld [vmem:[#allocation14 + $0x9e0] sm:$0xf0]  ;;  %v7026_v50 = vadd.f32 %v7025_v19, %v7012_v34 }
 0x5bf   :  { %10485 = vmatpush.bf16.msra.mxu1 %v15868_v54  ;;  %v17112_v12 = vor.u32 %v19067_v51, %v17111_v32  ;;  %v17079_v1 = vld [vmem:[#allocation14 + $0xc80] sm:$0xf]  ;;  %v19031_v7 = vld [vmem:[#allocation14 + $0xbc4] sm:$0xf]  ;;  %v7053_v49 = vpop.f32.mrf.mxu3  ;;  %v16732_v35 = vor.u32 %v18967_v10, %v16729_v26 }
 0x5c0   :  { %v19059_v55 = vld [vmem:[#allocation14 + $0xc9c] sm:$0xf0]  ;;  %v16985_v15 = vld [vmem:[#allocation14 + $0xbe0] sm:$0xf0]  ;;  %v7040_v36 = vadd.f32 %v7039_v22, %v7026_v50 }
 0x5c1   :  { %10442 = vmatpush.bf16.msrb.mxu2 %v17176_v47  ;;  %10472 = vmatpush.bf16.msra.mxu0 %v15580_v59  ;;  %v17080_v48 = vor.u32 %v19059_v55, %v17079_v1  ;;  %v17047_v13 = vld [vmem:[#allocation14 + $0xc40] sm:$0xf]  ;;  %v16988_v28 = vor.u32 %v19031_v7, %v16985_v15  ;;  %v18959_v38 = vld [vmem:[#allocation14 + $0x984] sm:$0xf]  ;;  %v7013_v29 = vpop.f32.mrf.mxu0 }
 0x5c2   :  { %v19051_v54 = vld [vmem:[#allocation14 + $0xc5c] sm:$0xf0]  ;;  %v16697_v52 = vld [vmem:[#allocation14 + $0x9a0] sm:$0xf0]  ;;  %v7014_v47 = vadd.f32 %v7013_v29, %v7000_v14  ;;  %v7054_v37 = vadd.f32 %v7053_v49, %v7040_v36 }
 0x5c3   :  { %10486 = vmatpush.bf16.msra.mxu1 %v15836_v30  ;;  %v19023_v40 = vld [vmem:[#allocation14 + $0xb84] sm:$0xf]  ;;  %v17048_v59 = vor.u32 %v19051_v54, %v17047_v13  ;;  %v17015_v30 = vld [vmem:[#allocation14 + $0xc00] sm:$0xf]  ;;  %v16700_v24 = vor.u32 %v18959_v38, %v16697_v52 }
 0x5c4   :  { %v16953_v2 = vld [vmem:[#allocation14 + $0xba0] sm:$0xf0]  ;;  %v19043_v9 = vld [vmem:[#allocation14 + $0xc1c] sm:$0xf0]  ;;  %v7232_v19 = vmul.f32 0.01, %v7054_v37 }
 0x5c5   :  { %10443 = vmatpush.bf16.msrb.mxu2 %v17144_v61  ;;  %10473 = vmatpush.bf16.msra.mxu0 %v15548_v11  ;;  %v16956_v58 = vor.u32 %v19023_v40, %v16953_v2  ;;  %v18839_v53 = vld [vmem:[#allocation14 + $0x5c4] sm:$0xf]  ;;  %v7027_v45 = vpop.f32.mrf.mxu1  ;;  %v17016_v11 = vor.u32 %v19043_v9, %v17015_v30  ;;  %v17495_v26 = vld [vmem:[#allocation14 + $0xfc0] sm:$0xf] }
 0x5c6   :  { %v16217_v0 = vld [vmem:[#allocation14 + $0x5e0] sm:$0xf0]  ;;  %v7028_v44 = vadd.f32 %v7027_v45, %v7014_v47  ;;  %v19163_v14 = vld [vmem:[#allocation14 + $0xfdc] sm:$0xf0] }
 0x5c7   :  { %10487 = vmatpush.bf16.msra.mxu1 %v15804_v27  ;;  %v18951_v5 = vld [vmem:[#allocation14 + $0x944] sm:$0xf]  ;;  %v7041_v27 = vpop.f32.mrf.mxu2  ;;  %v7055_v32 = vpop.f32.mrf.mxu3  ;;  %v16220_v51 = vor.u32 %v18839_v53, %v16217_v0  ;;  %v17496_v49 = vor.u32 %v19163_v14, %v17495_v26  ;;  %v17463_v38 = vld [vmem:[#allocation14 + $0xf80] sm:$0xf] }
 0x5c8   :  { %v16665_v21 = vld [vmem:[#allocation14 + $0x960] sm:$0xf0]  ;;  %v7042_v46 = vadd.f32 %v7041_v27, %v7028_v44  ;;  %v19155_v29 = vld [vmem:[#allocation14 + $0xf9c] sm:$0xf0] }
 0x5c9   :  { %10444 = vmatpush.bf16.msrb.mxu2 %v17112_v12  ;;  %10474 = vmatpush.bf16.msra.mxu0 %v15516_v16  ;;  %v19015_v23 = vld [vmem:[#allocation14 + $0xb44] sm:$0xf]  ;;  %v16668_v42 = vor.u32 %v18951_v5, %v16665_v21  ;;  %v17464_v47 = vor.u32 %v19155_v29, %v17463_v38  ;;  %v20782_v36 = vpop.f32.mrf.mxu0  ;;  %v17431_v5 = vld [vmem:[#allocation14 + $0xf40] sm:$0xf] }
 0x5ca   :  { %v16921_v61 = vld [vmem:[#allocation14 + $0xb60] sm:$0xf0]  ;;  %v7056_v16 = vadd.f32 %v7055_v32, %v7042_v46  ;;  %10454 = vmatpush.bf16.msrb.mxu3 %v17496_v49  ;;  %v19147_v45 = vld [vmem:[#allocation14 + $0xf5c] sm:$0xf0]  ;;  %v18772_v49 = vld [vmem:[#allocation14 + $0x3a4] sm:$0xf0] }
 0x5cb   :  { %10488 = vmatpush.bf16.msra.mxu1 %v15772_v43  ;;  %v16924_v18 = vor.u32 %v19015_v23, %v16921_v61  ;;  %v18831_v41 = vld [vmem:[#allocation14 + $0x584] sm:$0xf]  ;;  %v17432_v44 = vor.u32 %v19147_v45, %v17431_v5  ;;  %v17303_v5 = vld [vmem:[#allocation14 + $0xe40] sm:$0xf] }
 0x5cc   :  { %v16185_v60 = vld [vmem:[#allocation14 + $0x5a0] sm:$0xf0]  ;;  %v7240_v34 = vmul.f32 0.01, %v7056_v16  ;;  %v19115_v45 = vld [vmem:[#allocation14 + $0xe5c] sm:$0xf0] }
 0x5cd   :  { %10445 = vmatpush.bf16.msrb.mxu2 %v17080_v48  ;;  %10475 = vmatpush.bf16.msra.mxu0 %v15484_v17  ;;  %v18943_v6 = vld [vmem:[#allocation14 + $0x904] sm:$0xf]  ;;  %v16188_v43 = vor.u32 %v18831_v41, %v16185_v60  ;;  %v7248_v48 = vmax.f32 %v7054_v37, %v7232_v19  ;;  %v19139_v41 = vld [vmem:[#allocation14 + $0xf1c] sm:$0xf0]  ;;  %v15967_v19 = vld [vmem:[#allocation14 + $0x3c8] sm:$0xf] }
 0x5ce   :  { %v16633_v56 = vld [vmem:[#allocation14 + $0x920] sm:$0xf0]  ;;  %v7256_v22 = vmax.f32 %v7056_v16, %v7240_v34  ;;  %10455 = vmatpush.bf16.msrb.mxu3 %v17464_v47  ;;  %v18780_v16 = vld [vmem:[#allocation14 + $0x3e4] sm:$0xf0] }
 0x5cf   :  { %10489 = vmatpush.bf16.msra.mxu1 %v15740_v20  ;;  %v19007_v12 = vld [vmem:[#allocation14 + $0xb04] sm:$0xf]  ;;  %v16636_v3 = vor.u32 %v18943_v6, %v16633_v56  ;;  %v15711_v56 = vld [vmem:[#allocation14 + $0x1c8] sm:$0xf] }
 0x5d0   :  { %10476 = vmatmul.bf16.vlgmr.msra.gmra.mxu0 %v20672_v39  ;;  %v16889_v1 = vld [vmem:[#allocation14 + $0xb20] sm:$0xf0]  ;;  %v20780_v54 = vpack.c.bf16 %v7256_v22, %v7248_v48  ;;  %v18708_v48 = vld [vmem:[#allocation14 + $0x1a4] sm:$0xf0] }
 0x5d1   :  { %10524 = vmatpush.bf16.msrb.mxu0 %v16732_v35  ;;  %10446 = vmatpush.bf16.msrb.mxu2 %v17048_v59  ;;  %v18823_v55 = vld [vmem:[#allocation14 + $0x544] sm:$0xf]  ;;  %v16892_v63 = vor.u32 %v19007_v12, %v16889_v1  ;;  %v18716_v1 = vld [vmem:[#allocation14 + $0x1e4] sm:$0xf0] }
 0x5d2   :  { %10490 = vmatmul.bf16.vlgmr.msra.gmra.mxu1 %v20674_v8  ;;  %v16153_v33 = vld [vmem:[#allocation14 + $0x560] sm:$0xf0]  ;;  %10456 = vmatpush.bf16.msrb.mxu3 %v17432_v44  ;;  %v15712_v26 = vor.u32 %v18716_v1, %v15711_v56  ;;  %v15935_v22 = vld [vmem:[#allocation14 + $0x388] sm:$0xf] }
 0x5d3   :  { %10538 = vmatpush.bf16.msrb.mxu1 %v16988_v28  ;;  %v18935_v57 = vld [vmem:[#allocation14 + $0x8c4] sm:$0xf]  ;;  %v16156_v17 = vor.u32 %v18823_v55, %v16153_v33  ;;  %v20787_v33 = vpop.f32.mrf.mxu0  ;;  %v15936_v29 = vor.u32 %v18772_v49, %v15935_v22  ;;  %v18700_v47 = vld [vmem:[#allocation14 + $0x164] sm:$0xf0] }
 0x5d4   :  { %v16601_v10 = vld [vmem:[#allocation14 + $0x8e0] sm:$0xf0]  ;;  %v15583_v1 = vld [vmem:[#allocation14 + $0xc8] sm:$0xf] }
 0x5d5   :  { %10525 = vmatpush.bf16.msrb.mxu0 %v16700_v24  ;;  %10447 = vmatpush.bf16.msrb.mxu2 %v17016_v11  ;;  %v18999_v7 = vld [vmem:[#allocation14 + $0xac4] sm:$0xf]  ;;  %v16604_v50 = vor.u32 %v18935_v57, %v16601_v10  ;;  %v20785_v24 = vpop.f32.mrf.mxu1  ;;  %v19131_v10 = vld [vmem:[#allocation14 + $0xedc] sm:$0xf0] }
 0x5d6   :  { %v16857_v15 = vld [vmem:[#allocation14 + $0xae0] sm:$0xf0] }
 0x5d7   :  { %10539 = vmatpush.bf16.msrb.mxu1 %v16956_v58  ;;  %v18815_v20 = vld [vmem:[#allocation14 + $0x504] sm:$0xf]  ;;  %v16860_v35 = vor.u32 %v18999_v7, %v16857_v15  ;;  %v15968_v7 = vor.u32 %v18780_v16, %v15967_v19  ;;  %v15679_v15 = vld [vmem:[#allocation14 + $0x188] sm:$0xf] }
 0x5d8   :  { %v16121_v13 = vld [vmem:[#allocation14 + $0x520] sm:$0xf0]  ;;  %10448 = vmatmul.bf16.vlgmr.msrb.gmra.mxu2 %v20780_v54  ;;  %v15680_v38 = vor.u32 %v18708_v48, %v15679_v15  ;;  %v18684_v19 = vld [vmem:[#allocation14 + $0xe4] sm:$0xf0] }
 0x5d9   :  { %10496 = vmatpush.bf16.msra.mxu2 %v16220_v51  ;;  %10526 = vmatpush.bf16.msrb.mxu0 %v16668_v42  ;;  %v18927_v28 = vld [vmem:[#allocation14 + $0x884] sm:$0xf]  ;;  %v16124_v59 = vor.u32 %v18815_v20, %v16121_v13  ;;  %v15839_v16 = vld [vmem:[#allocation14 + $0x2c8] sm:$0xf] }
 0x5da   :  { %v16569_v52 = vld [vmem:[#allocation14 + $0x8a0] sm:$0xf0]  ;;  %v15551_v48 = vld [vmem:[#allocation14 + $0x88] sm:$0xf] }
 0x5db   :  { %10540 = vmatpush.bf16.msrb.mxu1 %v16924_v18  ;;  %v18991_v40 = vld [vmem:[#allocation14 + $0xa84] sm:$0xf]  ;;  %v16572_v58 = vor.u32 %v18927_v28, %v16569_v52  ;;  %v17399_v18 = vld [vmem:[#allocation14 + $0xf00] sm:$0xf] }
 0x5dc   :  { %v16825_v2 = vld [vmem:[#allocation14 + $0xaa0] sm:$0xf0]  ;;  %v17400_v12 = vor.u32 %v19139_v41, %v17399_v18  ;;  %v19123_v28 = vld [vmem:[#allocation14 + $0xe9c] sm:$0xf0] }
 0x5dd   :  { %10497 = vmatpush.bf16.msra.mxu2 %v16188_v43  ;;  %10527 = vmatpush.bf16.msrb.mxu0 %v16636_v3  ;;  %v18807_v30 = vld [vmem:[#allocation14 + $0x4c4] sm:$0xf]  ;;  %v16828_v53 = vor.u32 %v18991_v40, %v16825_v2  ;;  %v20789_v14 = vpop.f32.mrf.mxu1  ;;  %v15647_v2 = vld [vmem:[#allocation14 + $0x148] sm:$0xf]  ;;  %v17271_v41 = vld [vmem:[#allocation14 + $0xe00] sm:$0xf] }
 0x5de   :  { %v16089_v9 = vld [vmem:[#allocation14 + $0x4e0] sm:$0xf0]  ;;  %10457 = vmatpush.bf16.msrb.mxu3 %v17400_v12 }
 0x5df   :  { %10541 = vmatpush.bf16.msrb.mxu1 %v16892_v63  ;;  %v18919_v0 = vld [vmem:[#allocation14 + $0x844] sm:$0xf]  ;;  %v16092_v37 = vor.u32 %v18807_v30, %v16089_v9  ;;  %v17367_v63 = vld [vmem:[#allocation14 + $0xec0] sm:$0xf]  ;;  %v18764_v30 = vld [vmem:[#allocation14 + $0x364] sm:$0xf0] }
 0x5e0   :  { %v16537_v21 = vld [vmem:[#allocation14 + $0x860] sm:$0xf0] }
 0x5e1   :  { %10498 = vmatpush.bf16.msra.mxu2 %v16156_v17  ;;  %10528 = vmatpush.bf16.msrb.mxu0 %v16604_v50  ;;  %v18983_v23 = vld [vmem:[#allocation14 + $0xa44] sm:$0xf]  ;;  %v16540_v51 = vor.u32 %v18919_v0, %v16537_v21  ;;  %v17368_v17 = vor.u32 %v19131_v10, %v17367_v63  ;;  %v15648_v21 = vor.u32 %v18700_v47, %v15647_v2  ;;  %v15519_v47 = vld [vmem:[#allocation14 + $0x48] sm:$0xf] }
 0x5e2   :  { %v16793_v61 = vld [vmem:[#allocation14 + $0xa60] sm:$0xf0] }
 0x5e3   :  { %10542 = vmatpush.bf16.msrb.mxu1 %v16860_v35  ;;  %v18799_v11 = vld [vmem:[#allocation14 + $0x484] sm:$0xf]  ;;  %v16796_v46 = vor.u32 %v18983_v23, %v16793_v61  ;;  %v17335_v35 = vld [vmem:[#allocation14 + $0xe80] sm:$0xf]  ;;  %10458 = vmatpush.bf16.msrb.mxu3 %v17368_v17 }
 0x5e4   :  { %v16057_v27 = vld [vmem:[#allocation14 + $0x4a0] sm:$0xf0]  ;;  %v17336_v9 = vor.u32 %v19123_v28, %v17335_v35 }
 0x5e5   :  { %10499 = vmatpush.bf16.msra.mxu2 %v16124_v59  ;;  %v18911_v32 = vld [vmem:[#allocation14 + $0x804] sm:$0xf]  ;;  %10529 = vmatpush.bf16.msrb.mxu0 %v16572_v58  ;;  %v16060_v43 = vor.u32 %v18799_v11, %v16057_v27  ;;  %v15903_v59 = vld [vmem:[#allocation14 + $0x348] sm:$0xf]  ;;  %v20795_v11 = vpop.f32.mrf.mxu1 }
 0x5e6   :  { %v16505_v42 = vld [vmem:[#allocation14 + $0x820] sm:$0xf0]  ;;  %v15904_v23 = vor.u32 %v18764_v30, %v15903_v59  ;;  %v18692_v27 = vld [vmem:[#allocation14 + $0x124] sm:$0xf0] }
 0x5e7   :  { %10543 = vmatpush.bf16.msrb.mxu1 %v16828_v53  ;;  %v18975_v60 = vld [vmem:[#allocation14 + $0xa04] sm:$0xf]  ;;  %v16508_v57 = vor.u32 %v18911_v32, %v16505_v42  ;;  %v20792_v53 = vpop.f32.mrf.mxu0  ;;  %v15871_v32 = vld [vmem:[#allocation14 + $0x308] sm:$0xf]  ;;  %10459 = vmatpush.bf16.msrb.mxu3 %v17336_v9  ;;  %v7095_v9 = vpop.f32.mrf.mxu2 }
 0x5e8   :  { %v16761_v6 = vld [vmem:[#allocation14 + $0xa20] sm:$0xf0] }
 0x5e9   :  { %10500 = vmatpush.bf16.msra.mxu2 %v16092_v37  ;;  %v18791_v55 = vld [vmem:[#allocation14 + $0x444] sm:$0xf]  ;;  %10530 = vmatpush.bf16.msrb.mxu0 %v16540_v51  ;;  %v16764_v34 = vor.u32 %v18975_v60, %v16761_v6  ;;  %v15615_v37 = vld [vmem:[#allocation14 + $0x108] sm:$0xf]  ;;  %v19107_v60 = vld [vmem:[#allocation14 + $0xe1c] sm:$0xf0] }
 0x5ea   :  { %v16025_v3 = vld [vmem:[#allocation14 + $0x460] sm:$0xf0]  ;;  %v18756_v51 = vld [vmem:[#allocation14 + $0x324] sm:$0xf0]  ;;  %v15616_v6 = vor.u32 %v18692_v27, %v15615_v37 }
 0x5eb   :  { %10544 = vmatpush.bf16.msrb.mxu1 %v16796_v46  ;;  %v16028_v20 = vor.u32 %v18791_v55, %v16025_v3  ;;  %v18783_v13 = vld [vmem:[#allocation14 + $0x404] sm:$0xf]  ;;  %v17304_v46 = vor.u32 %v19115_v45, %v17303_v5  ;;  %v15872_v56 = vor.u32 %v18756_v51, %v15871_v32  ;;  %v17272_v55 = vor.u32 %v19107_v60, %v17271_v41  ;;  %v15775_v5 = vld [vmem:[#allocation14 + $0x248] sm:$0xf] }
 0x5ec   :  { %v15993_v50 = vld [vmem:[#allocation14 + $0x420] sm:$0xf0]  ;;  %v18732_v45 = vld [vmem:[#allocation14 + $0x264] sm:$0xf0] }
 0x5ed   :  { %10501 = vmatpush.bf16.msra.mxu2 %v16060_v43  ;;  %10531 = vmatpush.bf16.msrb.mxu0 %v16508_v57  ;;  %v19095_v52 = vld [vmem:[#allocation14 + $0xdc4] sm:$0xf]  ;;  %v15996_v58 = vor.u32 %v18783_v13, %v15993_v50  ;;  %v18748_v43 = vld [vmem:[#allocation14 + $0x2e4] sm:$0xf0]  ;;  %v20800_v28 = vpop.f32.mrf.mxu1 }
 0x5ee   :  { %v17241_v40 = vld [vmem:[#allocation14 + $0xde0] sm:$0xf0]  ;;  %10460 = vmatpush.bf16.msrb.mxu3 %v17304_v46  ;;  %v15840_v15 = vor.u32 %v18748_v43, %v15839_v16  ;;  %v15807_v13 = vld [vmem:[#allocation14 + $0x288] sm:$0xf]  ;;  %v15776_v46 = vor.u32 %v18732_v45, %v15775_v5 }
 0x5ef   :  { %10545 = vmatpush.bf16.msrb.mxu1 %v16764_v34  ;;  %v17244_v0 = vor.u32 %v19095_v52, %v17241_v40  ;;  %v19087_v61 = vld [vmem:[#allocation14 + $0xd84] sm:$0xf]  ;;  %v20798_v17 = vpop.f32.mrf.mxu0  ;;  %v18740_v50 = vld [vmem:[#allocation14 + $0x2a4] sm:$0xf0] }
 0x5f0   :  { %10532 = vmatmul.bf16.vlgmr.msrb.gmra.mxu0 %v20758_v4  ;;  %v17209_v44 = vld [vmem:[#allocation14 + $0xda0] sm:$0xf0]  ;;  %v15808_v2 = vor.u32 %v18740_v50, %v15807_v13  ;;  %v15487_v32 = vld [vmem:[#allocation14 + $0x8] sm:$0xf] }
 0x5f1   :  { %10580 = vmatpush.bf16.msra.mxu0 %v15712_v26  ;;  %10502 = vmatpush.bf16.msra.mxu2 %v16028_v20  ;;  %v17212_v42 = vor.u32 %v19087_v61, %v17209_v44  ;;  %v19079_v18 = vld [vmem:[#allocation14 + $0xd44] sm:$0xf]  ;;  %v18676_v20 = vld [vmem:[#allocation14 + $0xa4] sm:$0xf0] }
 0x5f2   :  { %10546 = vmatmul.bf16.vlgmr.msrb.gmra.mxu1 %v20760_v25  ;;  %v17177_v12 = vld [vmem:[#allocation14 + $0xd60] sm:$0xf0]  ;;  %10461 = vmatpush.bf16.msrb.mxu3 %v17272_v55  ;;  %v15552_v40 = vor.u32 %v18676_v20, %v15551_v48  ;;  %v16991_v16 = vld [vmem:[#allocation14 + $0xbc8] sm:$0xf] }
 0x5f3   :  { %10594 = vmatpush.bf16.msra.mxu1 %v15968_v7  ;;  %v18903_v57 = vld [vmem:[#allocation14 + $0x7c4] sm:$0xf]  ;;  %v17180_v3 = vor.u32 %v19079_v18, %v17177_v12  ;;  %v15584_v7 = vor.u32 %v18684_v19, %v15583_v1  ;;  %v16735_v12 = vld [vmem:[#allocation14 + $0x9c8] sm:$0xf] }
 0x5f4   :  { %v16473_v34 = vld [vmem:[#allocation14 + $0x7e0] sm:$0xf0]  ;;  %v18972_v19 = vld [vmem:[#allocation14 + $0x9e4] sm:$0xf0] }
 0x5f5   :  { %10581 = vmatpush.bf16.msra.mxu0 %v15680_v38  ;;  %10503 = vmatpush.bf16.msra.mxu2 %v15996_v58  ;;  %v19071_v63 = vld [vmem:[#allocation14 + $0xd04] sm:$0xf]  ;;  %v16476_v26 = vor.u32 %v18903_v57, %v16473_v34  ;;  %v20802_v58 = vpop.f32.mrf.mxu3  ;;  %v19036_v43 = vld [vmem:[#allocation14 + $0xbe4] sm:$0xf0]  ;;  %v20807_v57 = vpop.f32.mrf.mxu1  ;;  %v16736_v48 = vor.u32 %v18972_v19, %v16735_v12 }
 0x5f6   :  { %v17145_v10 = vld [vmem:[#allocation14 + $0xd20] sm:$0xf0]  ;;  %v18964_v20 = vld [vmem:[#allocation14 + $0x9a4] sm:$0xf0] }
 0x5f7   :  { %10595 = vmatpush.bf16.msra.mxu1 %v15936_v29  ;;  %v18895_v22 = vld [vmem:[#allocation14 + $0x784] sm:$0xf]  ;;  %10510 = vmatpush.bf16.msra.mxu3 %v16476_v26  ;;  %v17148_v38 = vor.u32 %v19071_v63, %v17145_v10  ;;  %v20804_v60 = vpop.f32.mrf.mxu0  ;;  %v16959_v13 = vld [vmem:[#allocation14 + $0xb88] sm:$0xf] }
 0x5f8   :  { %10504 = vmatmul.bf16.vlgmr.msra.gmra.mxu2 %v20770_v62  ;;  %v16441_v49 = vld [vmem:[#allocation14 + $0x7a0] sm:$0xf0]  ;;  %v19028_v50 = vld [vmem:[#allocation14 + $0xba4] sm:$0xf0] }
 0x5f9   :  { %10552 = vmatpush.bf16.msrb.mxu2 %v17244_v0  ;;  %10582 = vmatpush.bf16.msra.mxu0 %v15648_v21  ;;  %v16444_v35 = vor.u32 %v18895_v22, %v16441_v49  ;;  %v19063_v29 = vld [vmem:[#allocation14 + $0xcc4] sm:$0xf]  ;;  %v18668_v0 = vld [vmem:[#allocation14 + $0x64] sm:$0xf0]  ;;  %v19259_v21 = vld [vmem:[#allocation13] sm:$0xff]  ;;  %v16992_v22 = vor.u32 %v19036_v43, %v16991_v16  ;;  %v16960_v5 = vor.u32 %v19028_v50, %v16959_v13 }
 0x5fa   :  { %v17113_v52 = vld [vmem:[#allocation14 + $0xce0] sm:$0xf0]  ;;  %v15520_v51 = vor.u32 %v18668_v0, %v15519_v47  ;;  %v16223_v45 = vld [vmem:[#allocation14 + $0x5c8] sm:$0xf] }
 0x5fb   :  { %10596 = vmatpush.bf16.msra.mxu1 %v15904_v23  ;;  %v18887_v59 = vld [vmem:[#allocation14 + $0x744] sm:$0xf]  ;;  %v2033_v23 = vperm.slane %v19259_v21, 7  ;;  %10511 = vmatpush.bf16.msra.mxu3 %v16444_v35  ;;  %v17116_v44 = vor.u32 %v19063_v29, %v17113_v52  ;;  %v18844_v21 = vld [vmem:[#allocation14 + $0x5e4] sm:$0xf0] }
 0x5fc   :  { %v16409_v30 = vld [vmem:[#allocation14 + $0x760] sm:$0xf0]  ;;  %v16639_v16 = vld [vmem:[#allocation14 + $0x908] sm:$0xf] }
 0x5fd   :  { %10553 = vmatpush.bf16.msrb.mxu2 %v17212_v42  ;;  %10583 = vmatpush.bf16.msra.mxu0 %v15616_v6  ;;  %v16412_v61 = vor.u32 %v18887_v59, %v16409_v30  ;;  %v19055_v37 = vld [vmem:[#allocation14 + $0xc84] sm:$0xf]  ;;  %v18660_v42 = vld [vmem:[#allocation14 + $0x24] sm:$0xf0]  ;;  %v7068_v1 = vadd.f32 %v20782_v36, %v2033_v23  ;;  %v20810_v29 = vpop.f32.mrf.mxu3 }
 0x5fe   :  { %v17081_v27 = vld [vmem:[#allocation14 + $0xca0] sm:$0xf0]  ;;  %v15743_v6 = vld [vmem:[#allocation14 + $0x208] sm:$0xf]  ;;  %v15488_v63 = vor.u32 %v18660_v42, %v15487_v32 }
 0x5ff   :  { %10597 = vmatpush.bf16.msra.mxu1 %v15872_v56  ;;  %v18879_v18 = vld [vmem:[#allocation14 + $0x704] sm:$0xf]  ;;  %v18724_v56 = vld [vmem:[#allocation14 + $0x224] sm:$0xf0]  ;;  %10512 = vmatpush.bf16.msra.mxu3 %v16412_v61  ;;  %v17084_v34 = vor.u32 %v19055_v37, %v17081_v27  ;;  %v7082_v49 = vadd.f32 %v20785_v24, %v7068_v1 }
 0x600   :  { %v16377_v41 = vld [vmem:[#allocation14 + $0x720] sm:$0xf0]  ;;  %v15744_v10 = vor.u32 %v18724_v56, %v15743_v6  ;;  %v16703_v36 = vld [vmem:[#allocation14 + $0x988] sm:$0xf]  ;;  %v20819_v6 = vpop.f32.mrf.mxu1 }
 0x601   :  { %10554 = vmatpush.bf16.msrb.mxu2 %v17180_v3  ;;  %10584 = vmatpush.bf16.msra.mxu0 %v15584_v7  ;;  %v16380_v55 = vor.u32 %v18879_v18, %v16377_v41  ;;  %v19047_v3 = vld [vmem:[#allocation14 + $0xc44] sm:$0xf]  ;;  %v7096_v47 = vadd.f32 %v7095_v9, %v7082_v49  ;;  %v16704_v24 = vor.u32 %v18964_v20, %v16703_v36  ;;  %v16671_v61 = vld [vmem:[#allocation14 + $0x948] sm:$0xf] }
 0x602   :  { %v17049_v26 = vld [vmem:[#allocation14 + $0xc60] sm:$0xf0]  ;;  %v16927_v37 = vld [vmem:[#allocation14 + $0xb48] sm:$0xf] }
 0x603   :  { %10598 = vmatpush.bf16.msra.mxu1 %v15840_v15  ;;  %v18871_v7 = vld [vmem:[#allocation14 + $0x6c4] sm:$0xf]  ;;  %10513 = vmatpush.bf16.msra.mxu3 %v16380_v55  ;;  %v17052_v52 = vor.u32 %v19047_v3, %v17049_v26  ;;  %v19020_v27 = vld [vmem:[#allocation14 + $0xb64] sm:$0xf0] }
 0x604   :  { %v16345_v15 = vld [vmem:[#allocation14 + $0x6e0] sm:$0xf0]  ;;  %v16191_v42 = vld [vmem:[#allocation14 + $0x588] sm:$0xf]  ;;  %v16928_v12 = vor.u32 %v19020_v27, %v16927_v37 }
 0x605   :  { %10555 = vmatpush.bf16.msrb.mxu2 %v17148_v38  ;;  %10585 = vmatpush.bf16.msra.mxu0 %v15552_v40  ;;  %v16348_v35 = vor.u32 %v18871_v7, %v16345_v15  ;;  %v7097_v38 = vpop.f32.mrf.mxu2  ;;  %v19039_v40 = vld [vmem:[#allocation14 + $0xc04] sm:$0xf]  ;;  %v18836_v1 = vld [vmem:[#allocation14 + $0x5a4] sm:$0xf0] }
 0x606   :  { %v17017_v59 = vld [vmem:[#allocation14 + $0xc20] sm:$0xf0]  ;;  %v16895_v55 = vld [vmem:[#allocation14 + $0xb08] sm:$0xf]  ;;  %v16192_v26 = vor.u32 %v18836_v1, %v16191_v42 }
 0x607   :  { %10599 = vmatpush.bf16.msra.mxu1 %v15808_v2  ;;  %v7070_v2 = vadd.f32 %v20787_v33, %v2033_v23  ;;  %v18863_v30 = vld [vmem:[#allocation14 + $0x684] sm:$0xf]  ;;  %10514 = vmatpush.bf16.msra.mxu3 %v16348_v35  ;;  %v20814_v33 = vpop.f32.mrf.mxu0  ;;  %v17020_v9 = vor.u32 %v19039_v40, %v17017_v59  ;;  %v16159_v49 = vld [vmem:[#allocation14 + $0x548] sm:$0xf] }
 0x608   :  { %v16313_v0 = vld [vmem:[#allocation14 + $0x6a0] sm:$0xf0]  ;;  %v18828_v20 = vld [vmem:[#allocation14 + $0x564] sm:$0xf0] }
 0x609   :  { %10556 = vmatpush.bf16.msrb.mxu2 %v17116_v44  ;;  %10586 = vmatpush.bf16.msra.mxu0 %v15520_v51  ;;  %v18956_v44 = vld [vmem:[#allocation14 + $0x964] sm:$0xf0]  ;;  %v16316_v32 = vor.u32 %v18863_v30, %v16313_v0  ;;  %v7084_v23 = vadd.f32 %v20789_v14, %v7070_v2  ;;  %v7110_v51 = vadd.f32 %v20802_v58, %v7096_v47  ;;  %v18855_v18 = vld [vmem:[#allocation14 + $0x644] sm:$0xf] }
 0x60a   :  { %v16281_v41 = vld [vmem:[#allocation14 + $0x660] sm:$0xf0]  ;;  %v16672_v56 = vor.u32 %v18956_v44, %v16671_v61  ;;  %v18948_v14 = vld [vmem:[#allocation14 + $0x924] sm:$0xf0]  ;;  %v16160_v2 = vor.u32 %v18828_v20, %v16159_v49  ;;  %v15969_v49 = vld [vmem:[#allocation14 + $0x3e8] sm:$0xf0] }
 0x60b   :  { %10600 = vmatpush.bf16.msra.mxu1 %v15776_v46  ;;  %v16224_v46 = vor.u32 %v18844_v21, %v16223_v45  ;;  %v20821_v19 = vld [vmem:[#allocation16] sm:$0xff]  ;;  %v7098_v43 = vadd.f32 %v7097_v38, %v7084_v23  ;;  %v19012_v58 = vld [vmem:[#allocation14 + $0xb24] sm:$0xf0]  ;;  %10515 = vmatpush.bf16.msra.mxu3 %v16316_v32 }
 0x60c   :  { %v21150_v7 = vperm.slane %v20821_v19, 0  ;;  %v18847_v15 = vld [vmem:[#allocation14 + $0x604] sm:$0xf]  ;;  %v16896_v36 = vor.u32 %v19012_v58, %v16895_v55  ;;  %v16607_v13 = vld [vmem:[#allocation14 + $0x8c8] sm:$0xf] }
 0x60d   :  { %10557 = vmatpush.bf16.msrb.mxu2 %v17084_v34  ;;  %10587 = vmatpush.bf16.msra.mxu0 %v15488_v63  ;;  %v16284_v34 = vor.u32 %v18855_v18, %v16281_v41  ;;  %v7151_v3 = vpop.f32.mrf.mxu2  ;;  %v7165_v63 = vpop.f32.mrf.mxu3  ;;  %v7112_v50 = vadd.f32 %v20810_v29, %v7098_v43  ;;  %v18940_v35 = vld [vmem:[#allocation14 + $0x8e4] sm:$0xf0] }
 0x60e   :  { %v16863_v38 = vld [vmem:[#allocation14 + $0xac8] sm:$0xf]  ;;  %v16608_v59 = vor.u32 %v18940_v35, %v16607_v13 }
 0x60f   :  { %10601 = vmatpush.bf16.msra.mxu1 %v15744_v10  ;;  %v7124_v10 = vadd.f32 %v20792_v53, %v7110_v51  ;;  %v19004_v53 = vld [vmem:[#allocation14 + $0xae4] sm:$0xf0]  ;;  %10516 = vmatpush.bf16.msra.mxu3 %v16284_v34  ;;  %v10365_v47 = vpop.f32.mrf.mxu0  ;;  %v7126_v29 = vadd.f32 %v20798_v17, %v7112_v50 }
 0x610   :  { %10588 = vmatmul.bf16.vlgmr.msra.gmra.mxu0 %v20672_v39  ;;  %v16864_v30 = vor.u32 %v19004_v53, %v16863_v38  ;;  %v16127_v0 = vld [vmem:[#allocation14 + $0x508] sm:$0xf]  ;;  %v10366_v21 = vadd.f32 %v10365_v47, %v21150_v7 }
 0x611   :  { %10636 = vmatpush.bf16.msrb.mxu0 %v16736_v48  ;;  %10558 = vmatpush.bf16.msrb.mxu2 %v17052_v52  ;;  %v16249_v48 = vld [vmem:[#allocation14 + $0x620] sm:$0xf0]  ;;  %v7138_v40 = vadd.f32 %v20795_v11, %v7124_v10  ;;  %v18932_v61 = vld [vmem:[#allocation14 + $0x8a4] sm:$0xf0]  ;;  %v10379_v11 = vpop.f32.mrf.mxu1 }
 0x612   :  { %10602 = vmatmul.bf16.vlgmr.msra.gmra.mxu1 %v20674_v8  ;;  %v16252_v52 = vor.u32 %v18847_v15, %v16249_v48  ;;  %v16831_v44 = vld [vmem:[#allocation14 + $0xa88] sm:$0xf]  ;;  %v20831_v27 = vadd.f32 %v10379_v11, %v10366_v21 }
 0x613   :  { %10650 = vmatpush.bf16.msrb.mxu1 %v16992_v22  ;;  %v16640_v22 = vor.u32 %v18948_v14, %v16639_v16  ;;  %v7152_v45 = vadd.f32 %v7151_v3, %v7138_v40  ;;  %v18996_v37 = vld [vmem:[#allocation14 + $0xaa4] sm:$0xf0] }
 0x614   :  { %10517 = vmatpush.bf16.msra.mxu3 %v16252_v52  ;;  %v16095_v17 = vld [vmem:[#allocation14 + $0x4c8] sm:$0xf] }
 0x615   :  { %10637 = vmatpush.bf16.msrb.mxu0 %v16704_v24  ;;  %10559 = vmatpush.bf16.msrb.mxu2 %v17020_v9  ;;  %v18820_v24 = vld [vmem:[#allocation14 + $0x524] sm:$0xf0]  ;;  %v7153_v9 = vpop.f32.mrf.mxu2  ;;  %v7167_v23 = vpop.f32.mrf.mxu3  ;;  %v7166_v41 = vadd.f32 %v7165_v63, %v7152_v45 }
 0x616   :  { %v16128_v32 = vor.u32 %v18820_v24, %v16127_v0  ;;  %v18812_v42 = vld [vmem:[#allocation14 + $0x4e4] sm:$0xf0]  ;;  %v18768_v0 = vld [vmem:[#allocation14 + $0x38c] sm:$0xf] }
 0x617   :  { %10651 = vmatpush.bf16.msrb.mxu1 %v16960_v5  ;;  %v16575_v5 = vld [vmem:[#allocation14 + $0x888] sm:$0xf]  ;;  %v16096_v14 = vor.u32 %v18812_v42, %v16095_v17  ;;  %v7180_v15 = vadd.f32 %v20804_v60, %v7166_v41  ;;  %v15937_v24 = vld [vmem:[#allocation14 + $0x3a8] sm:$0xf0] }
 0x618   :  { %10560 = vmatmul.bf16.vlgmr.msrb.gmra.mxu2 %v20780_v54  ;;  %v16576_v51 = vor.u32 %v18932_v61, %v16575_v5  ;;  %v16543_v18 = vld [vmem:[#allocation14 + $0x848] sm:$0xf] }
 0x619   :  { %10608 = vmatpush.bf16.msra.mxu2 %v16224_v46  ;;  %10638 = vmatpush.bf16.msrb.mxu0 %v16672_v56  ;;  %v16832_v46 = vor.u32 %v18996_v37, %v16831_v44  ;;  %v7140_v56 = vadd.f32 %v20800_v28, %v7126_v29  ;;  %v16799_v1 = vld [vmem:[#allocation14 + $0xa48] sm:$0xf]  ;;  %v15713_v28 = vld [vmem:[#allocation14 + $0x1e8] sm:$0xf0]  ;;  %v15940_v37 = vor.u32 %v18768_v0, %v15937_v24 }
 0x61a   :  { %v18988_v16 = vld [vmem:[#allocation14 + $0xa64] sm:$0xf0]  ;;  %v18672_v24 = vld [vmem:[#allocation14 + $0x8c] sm:$0xf] }
 0x61b   :  { %10652 = vmatpush.bf16.msrb.mxu1 %v16928_v12  ;;  %v18924_v12 = vld [vmem:[#allocation14 + $0x864] sm:$0xf0]  ;;  %v7154_v43 = vadd.f32 %v7153_v9, %v7140_v56  ;;  %v16800_v34 = vor.u32 %v18988_v16, %v16799_v1  ;;  %v15649_v9 = vld [vmem:[#allocation14 + $0x168] sm:$0xf0] }
 0x61c   :  { %v16063_v55 = vld [vmem:[#allocation14 + $0x488] sm:$0xf]  ;;  %v16544_v58 = vor.u32 %v18924_v12, %v16543_v18 }
 0x61d   :  { %10609 = vmatpush.bf16.msra.mxu2 %v16192_v26  ;;  %10639 = vmatpush.bf16.msrb.mxu0 %v16640_v22  ;;  %v18804_v3 = vld [vmem:[#allocation14 + $0x4a4] sm:$0xf0]  ;;  %v18712_v22 = vld [vmem:[#allocation14 + $0x1cc] sm:$0xf]  ;;  %v7168_v20 = vadd.f32 %v7167_v23, %v7154_v43  ;;  %v7207_v50 = vpop.f32.mrf.mxu2  ;;  %v7221_v35 = vpop.f32.mrf.mxu3 }
 0x61e   :  { %v16511_v10 = vld [vmem:[#allocation14 + $0x808] sm:$0xf]  ;;  %v16064_v13 = vor.u32 %v18804_v3, %v16063_v55  ;;  %v15716_v60 = vor.u32 %v18712_v22, %v15713_v28  ;;  %v18760_v23 = vld [vmem:[#allocation14 + $0x34c] sm:$0xf] }
 0x61f   :  { %10653 = vmatpush.bf16.msrb.mxu1 %v16896_v36  ;;  %v18916_v26 = vld [vmem:[#allocation14 + $0x824] sm:$0xf0]  ;;  %v18776_v36 = vld [vmem:[#allocation14 + $0x3cc] sm:$0xf]  ;;  %v7182_v5 = vadd.f32 %v20814_v33, %v7168_v20 }
 0x620   :  { %v16767_v48 = vld [vmem:[#allocation14 + $0xa08] sm:$0xf]  ;;  %v16512_v38 = vor.u32 %v18916_v26, %v16511_v10  ;;  %v15972_v47 = vor.u32 %v18776_v36, %v15969_v49  ;;  %v18688_v43 = vld [vmem:[#allocation14 + $0x10c] sm:$0xf]  ;;  %v19159_v26 = vld [vmem:[#allocation14 + $0xfc4] sm:$0xf] }
 0x621   :  { %10610 = vmatpush.bf16.msra.mxu2 %v16160_v2  ;;  %10640 = vmatpush.bf16.msrb.mxu0 %v16608_v59  ;;  %v18980_v63 = vld [vmem:[#allocation14 + $0xa24] sm:$0xf0]  ;;  %v7194_v2 = vadd.f32 %v20807_v57, %v7180_v15  ;;  %v18704_v59 = vld [vmem:[#allocation14 + $0x18c] sm:$0xf]  ;;  %v17497_v15 = vld [vmem:[#allocation14 + $0xfe0] sm:$0xf0] }
 0x622   :  { %v16768_v53 = vor.u32 %v18980_v63, %v16767_v48  ;;  %v16031_v52 = vld [vmem:[#allocation14 + $0x448] sm:$0xf]  ;;  %v15617_v55 = vld [vmem:[#allocation14 + $0x128] sm:$0xf0] }
 0x623   :  { %10654 = vmatpush.bf16.msrb.mxu1 %v16864_v30  ;;  %v18796_v40 = vld [vmem:[#allocation14 + $0x464] sm:$0xf0]  ;;  %v15681_v30 = vld [vmem:[#allocation14 + $0x1a8] sm:$0xf0]  ;;  %v7208_v29 = vadd.f32 %v7207_v50, %v7194_v2  ;;  %v15620_v22 = vor.u32 %v18688_v43, %v15617_v55  ;;  %v17465_v2 = vld [vmem:[#allocation14 + $0xfa0] sm:$0xf0] }
 0x624   :  { %v16032_v45 = vor.u32 %v18796_v40, %v16031_v52  ;;  %v15999_v21 = vld [vmem:[#allocation14 + $0x408] sm:$0xf]  ;;  %v15684_v44 = vor.u32 %v18704_v59, %v15681_v30  ;;  %v18680_v49 = vld [vmem:[#allocation14 + $0xcc] sm:$0xf]  ;;  %v19151_v40 = vld [vmem:[#allocation14 + $0xf84] sm:$0xf] }
 0x625   :  { %10611 = vmatpush.bf16.msra.mxu2 %v16128_v32  ;;  %10641 = vmatpush.bf16.msrb.mxu0 %v16576_v51  ;;  %v18788_v61 = vld [vmem:[#allocation14 + $0x424] sm:$0xf0]  ;;  %v18696_v32 = vld [vmem:[#allocation14 + $0x14c] sm:$0xf]  ;;  %v7222_v33 = vadd.f32 %v7221_v35, %v7208_v29  ;;  %v7209_v42 = vpop.f32.mrf.mxu2 }
 0x626   :  { %v17247_v57 = vld [vmem:[#allocation14 + $0xdc8] sm:$0xf]  ;;  %v15905_v51 = vld [vmem:[#allocation14 + $0x368] sm:$0xf0]  ;;  %v16000_v17 = vor.u32 %v18788_v61, %v15999_v21  ;;  %v15652_v56 = vor.u32 %v18696_v32, %v15649_v9  ;;  %v20843_v21 = vpop.f32.mrf.mxu0  ;;  %v17468_v61 = vor.u32 %v19151_v40, %v17465_v2 }
 0x627   :  { %10655 = vmatpush.bf16.msrb.mxu1 %v16832_v46  ;;  %v19100_v11 = vld [vmem:[#allocation14 + $0xde4] sm:$0xf0]  ;;  %v7196_v46 = vadd.f32 %v20819_v6, %v7182_v5  ;;  %v15908_v12 = vor.u32 %v18760_v23, %v15905_v51  ;;  %v18752_v6 = vld [vmem:[#allocation14 + $0x30c] sm:$0xf] }
 0x628   :  { %v17248_v18 = vor.u32 %v19100_v11, %v17247_v57  ;;  %v17215_v1 = vld [vmem:[#allocation14 + $0xd88] sm:$0xf]  ;;  %v15585_v20 = vld [vmem:[#allocation14 + $0xe8] sm:$0xf0]  ;;  %v17433_v57 = vld [vmem:[#allocation14 + $0xf60] sm:$0xf0]  ;;  %v20846_v11 = vpop.f32.mrf.mxu1 }
 0x629   :  { %10612 = vmatpush.bf16.msra.mxu2 %v16096_v14  ;;  %10642 = vmatpush.bf16.msrb.mxu0 %v16544_v58  ;;  %v7210_v41 = vadd.f32 %v7209_v42, %v7196_v46  ;;  %v19092_v16 = vld [vmem:[#allocation14 + $0xda4] sm:$0xf0]  ;;  %v7223_v14 = vpop.f32.mrf.mxu3  ;;  %v15873_v58 = vld [vmem:[#allocation14 + $0x328] sm:$0xf0] }
 0x62a   :  { %v17216_v10 = vor.u32 %v19092_v16, %v17215_v1  ;;  %v17183_v48 = vld [vmem:[#allocation14 + $0xd48] sm:$0xf]  ;;  %v15876_v28 = vor.u32 %v18752_v6, %v15873_v58  ;;  %v15841_v50 = vld [vmem:[#allocation14 + $0x2e8] sm:$0xf0] }
 0x62b   :  { %10656 = vmatpush.bf16.msrb.mxu1 %v16800_v34  ;;  %v7233_v34 = vmul.f32 0.01, %v7222_v33  ;;  %v7224_v3 = vadd.f32 %v7223_v14, %v7210_v41  ;;  %v19084_v36 = vld [vmem:[#allocation14 + $0xd64] sm:$0xf0]  ;;  %v15553_v5 = vld [vmem:[#allocation14 + $0xa8] sm:$0xf0] }
 0x62c   :  { %v17184_v52 = vor.u32 %v19084_v36, %v17183_v48  ;;  %v17151_v30 = vld [vmem:[#allocation14 + $0xd08] sm:$0xf]  ;;  %v18736_v29 = vld [vmem:[#allocation14 + $0x28c] sm:$0xf]  ;;  %v15556_v32 = vor.u32 %v18672_v24, %v15553_v5 }
 0x62d   :  { %10613 = vmatpush.bf16.msra.mxu2 %v16064_v13  ;;  %10643 = vmatpush.bf16.msrb.mxu0 %v16512_v38  ;;  %v7241_v63 = vmul.f32 0.01, %v7224_v3  ;;  %v18744_v13 = vld [vmem:[#allocation14 + $0x2cc] sm:$0xf]  ;;  %v7249_v35 = vmax.f32 %v7222_v33, %v7233_v34  ;;  %v19076_v0 = vld [vmem:[#allocation14 + $0xd24] sm:$0xf0] }
 0x62e   :  { %v15844_v59 = vor.u32 %v18744_v13, %v15841_v50  ;;  %v17119_v23 = vld [vmem:[#allocation14 + $0xcc8] sm:$0xf]  ;;  %v18664_v46 = vld [vmem:[#allocation14 + $0x4c] sm:$0xf]  ;;  %v17369_v50 = vld [vmem:[#allocation14 + $0xee0] sm:$0xf0] }
 0x62f   :  { %10657 = vmatpush.bf16.msrb.mxu1 %v16768_v53  ;;  %v7257_v38 = vmax.f32 %v7224_v3, %v7241_v63  ;;  %v17500_v53 = vor.u32 %v19159_v26, %v17497_v15  ;;  %v19068_v51 = vld [vmem:[#allocation14 + $0xce4] sm:$0xf0]  ;;  %v15521_v33 = vld [vmem:[#allocation14 + $0x68] sm:$0xf0] }
 0x630   :  { %10644 = vmatmul.bf16.vlgmr.msrb.gmra.mxu0 %v20758_v4  ;;  %v15777_v42 = vld [vmem:[#allocation14 + $0x268] sm:$0xf0]  ;;  %v17120_v41 = vor.u32 %v19068_v51, %v17119_v23  ;;  %v17087_v1 = vld [vmem:[#allocation14 + $0xc88] sm:$0xf]  ;;  %v15524_v16 = vor.u32 %v18664_v46, %v15521_v33  ;;  %v10435_v36 = vpop.f32.mrf.mxu1 }
 0x631   :  { %10692 = vmatpush.bf16.msra.mxu0 %v15716_v60  ;;  %10614 = vmatpush.bf16.msra.mxu2 %v16032_v45  ;;  %v20841_v60 = vpack.c.bf16 %v7257_v38, %v7249_v35  ;;  %v15809_v45 = vld [vmem:[#allocation14 + $0x2a8] sm:$0xf0]  ;;  %v19060_v14 = vld [vmem:[#allocation14 + $0xca4] sm:$0xf0] }
 0x632   :  { %10658 = vmatmul.bf16.vlgmr.msrb.gmra.mxu1 %v20760_v25  ;;  %v15812_v9 = vor.u32 %v18736_v29, %v15809_v45  ;;  %v18656_v55 = vld [vmem:[#allocation14 + $0xc] sm:$0xf]  ;;  %v17055_v35 = vld [vmem:[#allocation14 + $0xc48] sm:$0xf]  ;;  %v19119_v45 = vld [vmem:[#allocation14 + $0xe84] sm:$0xf] }
 0x633   :  { %10706 = vmatpush.bf16.msra.mxu1 %v15972_v47  ;;  %v15588_v47 = vor.u32 %v18680_v49, %v15585_v20  ;;  %10462 = vmatmul.bf16.vlgmr.msrb.gmra.mxu3 %v20841_v60  ;;  %v15489_v6 = vld [vmem:[#allocation14 + $0x28] sm:$0xf0]  ;;  %v19052_v38 = vld [vmem:[#allocation14 + $0xc64] sm:$0xf0] }
 0x634   :  { %10566 = vmatpush.bf16.msrb.mxu3 %v17500_v53  ;;  %v18720_v58 = vld [vmem:[#allocation14 + $0x20c] sm:$0xf]  ;;  %v15492_v20 = vor.u32 %v18656_v55, %v15489_v6  ;;  %v17056_v29 = vor.u32 %v19052_v38, %v17055_v35 }
 0x635   :  { %10693 = vmatpush.bf16.msra.mxu0 %v15684_v44  ;;  %10615 = vmatpush.bf16.msra.mxu2 %v16000_v17  ;;  %v17152_v44 = vor.u32 %v19076_v0, %v17151_v30  ;;  %v18728_v17 = vld [vmem:[#allocation14 + $0x24c] sm:$0xf] }
 0x636   :  { %v15780_v43 = vor.u32 %v18728_v17, %v15777_v42  ;;  %v15745_v34 = vld [vmem:[#allocation14 + $0x228] sm:$0xf0] }
 0x637   :  { %10707 = vmatpush.bf16.msra.mxu1 %v15940_v37  ;;  %v19143_v37 = vld [vmem:[#allocation14 + $0xf44] sm:$0xf]  ;;  %v18968_v3 = vld [vmem:[#allocation14 + $0x9cc] sm:$0xf]  ;;  %v15748_v13 = vor.u32 %v18720_v58, %v15745_v34 }
 0x638   :  { %10616 = vmatmul.bf16.vlgmr.msra.gmra.mxu2 %v20770_v62  ;;  %10567 = vmatpush.bf16.msrb.mxu3 %v17468_v61  ;;  %v16737_v26 = vld [vmem:[#allocation14 + $0x9e8] sm:$0xf0]  ;;  %v17337_v61 = vld [vmem:[#allocation14 + $0xea0] sm:$0xf0]  ;;  %v20856_v34 = vpop.f32.mrf.mxu1 }
 0x639   :  { %10664 = vmatpush.bf16.msrb.mxu2 %v17248_v18  ;;  %10694 = vmatpush.bf16.msra.mxu0 %v15652_v56  ;;  %v17436_v18 = vor.u32 %v19143_v37, %v17433_v57  ;;  %v19135_v56 = vld [vmem:[#allocation14 + $0xf04] sm:$0xf]  ;;  %v19032_v15 = vld [vmem:[#allocation14 + $0xbcc] sm:$0xf]  ;;  %v19044_v37 = vld [vmem:[#allocation14 + $0xc24] sm:$0xf0]  ;;  %v17340_v42 = vor.u32 %v19119_v45, %v17337_v61 }
 0x63a   :  { %v16993_v48 = vld [vmem:[#allocation14 + $0xbe8] sm:$0xf0] }
 0x63b   :  { %10708 = vmatpush.bf16.msra.mxu1 %v15908_v12  ;;  %v17401_v12 = vld [vmem:[#allocation14 + $0xf20] sm:$0xf0]  ;;  %v10393_v49 = vpop.f32.mrf.mxu2  ;;  %v16996_v40 = vor.u32 %v19032_v15, %v16993_v48  ;;  %v18960_v2 = vld [vmem:[#allocation14 + $0x98c] sm:$0xf]  ;;  %v21149_v48 = vperm.slane %v20821_v19, 1 }
 0x63c   :  { %10568 = vmatpush.bf16.msrb.mxu3 %v17436_v18  ;;  %v17404_v63 = vor.u32 %v19135_v56, %v17401_v12  ;;  %v10394_v53 = vadd.f32 %v10393_v49, %v20831_v27  ;;  %v19024_v30 = vld [vmem:[#allocation14 + $0xb8c] sm:$0xf]  ;;  %v18908_v49 = vld [vmem:[#allocation14 + $0x7e4] sm:$0xf0] }
 0x63d   :  { %10665 = vmatpush.bf16.msrb.mxu2 %v17216_v10  ;;  %10695 = vmatpush.bf16.msra.mxu0 %v15620_v22  ;;  %v10421_v10 = vpop.f32.mrf.mxu0  ;;  %v17088_v22 = vor.u32 %v19060_v14, %v17087_v1  ;;  %v16961_v0 = vld [vmem:[#allocation14 + $0xba8] sm:$0xf0]  ;;  %v19111_v1 = vld [vmem:[#allocation14 + $0xe44] sm:$0xf] }
 0x63e   :  { %v16225_v23 = vld [vmem:[#allocation14 + $0x5e8] sm:$0xf0] }
 0x63f   :  { %10709 = vmatpush.bf16.msra.mxu1 %v15876_v28  ;;  %v19127_v28 = vld [vmem:[#allocation14 + $0xec4] sm:$0xf]  ;;  %v18952_v51 = vld [vmem:[#allocation14 + $0x94c] sm:$0xf] }
 0x640   :  { %10569 = vmatpush.bf16.msrb.mxu3 %v17404_v63  ;;  %v17372_v5 = vor.u32 %v19127_v28, %v17369_v50  ;;  %v16673_v46 = vld [vmem:[#allocation14 + $0x968] sm:$0xf0]  ;;  %v19103_v63 = vld [vmem:[#allocation14 + $0xe04] sm:$0xf] }
 0x641   :  { %10666 = vmatpush.bf16.msrb.mxu2 %v17184_v52  ;;  %10696 = vmatpush.bf16.msra.mxu0 %v15588_v47  ;;  %v16740_v52 = vor.u32 %v18968_v3, %v16737_v26  ;;  %v10407_v47 = vpop.f32.mrf.mxu3  ;;  %v19016_v33 = vld [vmem:[#allocation14 + $0xb4c] sm:$0xf]  ;;  %v17273_v28 = vld [vmem:[#allocation14 + $0xe20] sm:$0xf0] }
 0x642   :  { %v10408_v24 = vadd.f32 %v10407_v47, %v10394_v53  ;;  %v16929_v17 = vld [vmem:[#allocation14 + $0xb68] sm:$0xf0] }
 0x643   :  { %10710 = vmatpush.bf16.msra.mxu1 %v15844_v59  ;;  %v16705_v59 = vld [vmem:[#allocation14 + $0x9a8] sm:$0xf0]  ;;  %10518 = vmatmul.bf16.vlgmr.msra.gmra.mxu3 %v20772_v31  ;;  %v16932_v14 = vor.u32 %v19016_v33, %v16929_v17  ;;  %v16415_v33 = vld [vmem:[#allocation14 + $0x748] sm:$0xf] }
 0x644   :  { %v10422_v57 = vadd.f32 %v10421_v10, %v10408_v24  ;;  %v16708_v27 = vor.u32 %v18960_v2, %v16705_v59  ;;  %10570 = vmatpush.bf16.msrb.mxu3 %v17372_v5  ;;  %v18832_v55 = vld [vmem:[#allocation14 + $0x58c] sm:$0xf]  ;;  %v17276_v2 = vor.u32 %v19103_v63, %v17273_v28  ;;  %v18900_v24 = vld [vmem:[#allocation14 + $0x7a4] sm:$0xf0] }
 0x645   :  { %10667 = vmatpush.bf16.msrb.mxu2 %v17152_v44  ;;  %10697 = vmatpush.bf16.msra.mxu0 %v15556_v32  ;;  %v17023_v44 = vld [vmem:[#allocation14 + $0xc08] sm:$0xf]  ;;  %v16964_v32 = vor.u32 %v19024_v30, %v16961_v0  ;;  %v20852_v56 = vpop.f32.mrf.mxu0  ;;  %v16193_v6 = vld [vmem:[#allocation14 + $0x5a8] sm:$0xf0] }
 0x646   :  { %v17024_v18 = vor.u32 %v19044_v37, %v17023_v44  ;;  %v18944_v58 = vld [vmem:[#allocation14 + $0x90c] sm:$0xf]  ;;  %v16447_v0 = vld [vmem:[#allocation14 + $0x788] sm:$0xf] }
 0x647   :  { %10711 = vmatpush.bf16.msra.mxu1 %v15812_v9  ;;  %v18840_v9 = vld [vmem:[#allocation14 + $0x5cc] sm:$0xf]  ;;  %v18892_v17 = vld [vmem:[#allocation14 + $0x764] sm:$0xf0] }
 0x648   :  { %v16228_v12 = vor.u32 %v18840_v9, %v16225_v23  ;;  %v16641_v3 = vld [vmem:[#allocation14 + $0x928] sm:$0xf0]  ;;  %10571 = vmatpush.bf16.msrb.mxu3 %v17340_v42 }
 0x649   :  { %10668 = vmatpush.bf16.msrb.mxu2 %v17120_v41  ;;  %10698 = vmatpush.bf16.msra.mxu0 %v15524_v16  ;;  %v20850_v41 = vadd.f32 %v10435_v36, %v10422_v57  ;;  %v17305_v16 = vld [vmem:[#allocation14 + $0xe60] sm:$0xf0]  ;;  %v19008_v10 = vld [vmem:[#allocation14 + $0xb0c] sm:$0xf]  ;;  %v16479_v36 = vld [vmem:[#allocation14 + $0x7c8] sm:$0xf] }
 0x64a   :  { %v16897_v26 = vld [vmem:[#allocation14 + $0xb28] sm:$0xf0]  ;;  %v17308_v15 = vor.u32 %v19111_v1, %v17305_v16  ;;  %v16480_v59 = vor.u32 %v18908_v49, %v16479_v36  ;;  %v20865_v49 = vpop.f32.mrf.mxu2 }
 0x64b   :  { %10712 = vmatpush.bf16.msra.mxu1 %v15780_v43  ;;  %v16676_v43 = vor.u32 %v18952_v51, %v16673_v46  ;;  %v18824_v50 = vld [vmem:[#allocation14 + $0x54c] sm:$0xf]  ;;  %v16448_v51 = vor.u32 %v18900_v24, %v16447_v0 }
 0x64c   :  { %v16161_v35 = vld [vmem:[#allocation14 + $0x568] sm:$0xf0]  ;;  %10572 = vmatpush.bf16.msrb.mxu3 %v17308_v15 }
 0x64d   :  { %10669 = vmatpush.bf16.msrb.mxu2 %v17088_v22  ;;  %10699 = vmatpush.bf16.msra.mxu0 %v15492_v20  ;;  %v16196_v22 = vor.u32 %v18832_v55, %v16193_v6  ;;  %v16644_v20 = vor.u32 %v18944_v58, %v16641_v3  ;;  %v18936_v38 = vld [vmem:[#allocation14 + $0x8cc] sm:$0xf]  ;;  %v10477_v47 = vpop.f32.mrf.mxu0  ;;  %v16164_v30 = vor.u32 %v18824_v50, %v16161_v35  ;;  %v16383_v3 = vld [vmem:[#allocation14 + $0x708] sm:$0xf]  ;;  %v15719_v50 = vld [vmem:[#allocation14 + $0x1d0] sm:$0xf] }
 0x64e   :  { %v16609_v53 = vld [vmem:[#allocation14 + $0x8e8] sm:$0xf0]  ;;  %v10478_v5 = vadd.f32 %v10477_v47, %v21149_v48  ;;  %v16416_v6 = vor.u32 %v18892_v17, %v16415_v33  ;;  %v18717_v35 = vld [vmem:[#allocation14 + $0x1ec] sm:$0xf0]  ;;  %v16713_v48 = vld [vmem:[#allocation14 + $0x9b0] sm:$0xf0] }
 0x64f   :  { %10713 = vmatpush.bf16.msra.mxu1 %v15748_v13  ;;  %v16900_v13 = vor.u32 %v19008_v10, %v16897_v26  ;;  %v18816_v61 = vld [vmem:[#allocation14 + $0x50c] sm:$0xf]  ;;  %v10491_v57 = vpop.f32.mrf.mxu1  ;;  %v18884_v10 = vld [vmem:[#allocation14 + $0x724] sm:$0xf0] }
 0x650   :  { %10700 = vmatmul.bf16.vlgmr.msra.gmra.mxu0 %v20672_v39  ;;  %v16129_v44 = vld [vmem:[#allocation14 + $0x528] sm:$0xf0]  ;;  %v20862_v23 = vadd.f32 %v10491_v57, %v10478_v5  ;;  %10573 = vmatpush.bf16.msrb.mxu3 %v17276_v2  ;;  %v16351_v2 = vld [vmem:[#allocation14 + $0x6c8] sm:$0xf]  ;;  %v15720_v5 = vor.u32 %v18717_v35, %v15719_v50 }
 0x651   :  { %10748 = vmatpush.bf16.msrb.mxu0 %v16740_v52  ;;  %10670 = vmatpush.bf16.msrb.mxu2 %v17056_v29  ;;  %v19000_v52 = vld [vmem:[#allocation14 + $0xacc] sm:$0xf]  ;;  %v16612_v29 = vor.u32 %v18936_v38, %v16609_v53  ;;  %v16132_v46 = vor.u32 %v18816_v61, %v16129_v44  ;;  %v15975_v38 = vld [vmem:[#allocation14 + $0x3d0] sm:$0xf]  ;;  %v16255_v35 = vld [vmem:[#allocation14 + $0x608] sm:$0xf] }
 0x652   :  { %10714 = vmatmul.bf16.vlgmr.msra.gmra.mxu1 %v20674_v8  ;;  %v18928_v37 = vld [vmem:[#allocation14 + $0x88c] sm:$0xf]  ;;  %v18781_v53 = vld [vmem:[#allocation14 + $0x3ec] sm:$0xf0] }
 0x653   :  { %10762 = vmatpush.bf16.msrb.mxu1 %v16996_v40  ;;  %v16865_v40 = vld [vmem:[#allocation14 + $0xae8] sm:$0xf0]  ;;  %10574 = vmatmul.bf16.vlgmr.msrb.gmra.mxu3 %v20841_v60  ;;  %v18709_v61 = vld [vmem:[#allocation14 + $0x1ac] sm:$0xf0] }
 0x654   :  { %v16868_v45 = vor.u32 %v19000_v52, %v16865_v40  ;;  %v16833_v9 = vld [vmem:[#allocation14 + $0xaa8] sm:$0xf0]  ;;  %10622 = vmatpush.bf16.msra.mxu3 %v16480_v59  ;;  %v16384_v52 = vor.u32 %v18884_v10, %v16383_v3  ;;  %v15943_v44 = vld [vmem:[#allocation14 + $0x390] sm:$0xf]  ;;  %v16287_v10 = vld [vmem:[#allocation14 + $0x648] sm:$0xf] }
 0x655   :  { %10749 = vmatpush.bf16.msrb.mxu0 %v16708_v27  ;;  %10671 = vmatpush.bf16.msrb.mxu2 %v17024_v18  ;;  %v16577_v27 = vld [vmem:[#allocation14 + $0x8a8] sm:$0xf0] }
 0x656   :  { %v16580_v42 = vor.u32 %v18928_v37, %v16577_v27  ;;  %v16097_v1 = vld [vmem:[#allocation14 + $0x4e8] sm:$0xf0]  ;;  %v18773_v37 = vld [vmem:[#allocation14 + $0x3ac] sm:$0xf0] }
 0x657   :  { %10763 = vmatpush.bf16.msrb.mxu1 %v16964_v32  ;;  %v18992_v32 = vld [vmem:[#allocation14 + $0xa8c] sm:$0xf] }
 0x658   :  { %10672 = vmatmul.bf16.vlgmr.msrb.gmra.mxu2 %v20780_v54  ;;  %v16836_v18 = vor.u32 %v18992_v32, %v16833_v9  ;;  %v18920_v16 = vld [vmem:[#allocation14 + $0x84c] sm:$0xf]  ;;  %10623 = vmatpush.bf16.msra.mxu3 %v16448_v51  ;;  %v16319_v32 = vld [vmem:[#allocation14 + $0x688] sm:$0xf] }
 0x659   :  { %10720 = vmatpush.bf16.msra.mxu2 %v16228_v12  ;;  %10750 = vmatpush.bf16.msrb.mxu0 %v16676_v43  ;;  %v18808_v12 = vld [vmem:[#allocation14 + $0x4cc] sm:$0xf]  ;;  %v18868_v9 = vld [vmem:[#allocation14 + $0x6a4] sm:$0xf0] }
 0x65a   :  { %v16545_v43 = vld [vmem:[#allocation14 + $0x868] sm:$0xf0]  ;;  %v16100_v58 = vor.u32 %v18808_v12, %v16097_v1  ;;  %v15655_v1 = vld [vmem:[#allocation14 + $0x150] sm:$0xf] }
 0x65b   :  { %10764 = vmatpush.bf16.msrb.mxu1 %v16932_v14  ;;  %v18984_v14 = vld [vmem:[#allocation14 + $0xa4c] sm:$0xf]  ;;  %v16548_v15 = vor.u32 %v18920_v16, %v16545_v43  ;;  %v10449_v33 = vpop.f32.mrf.mxu2  ;;  %v18701_v43 = vld [vmem:[#allocation14 + $0x16c] sm:$0xf0] }
 0x65c   :  { %v16801_v55 = vld [vmem:[#allocation14 + $0xa68] sm:$0xf0]  ;;  %10624 = vmatpush.bf16.msra.mxu3 %v16416_v6  ;;  %v20868_v16 = vadd.f32 %v10449_v33, %v20850_v41  ;;  %v16320_v6 = vor.u32 %v18868_v9, %v16319_v32  ;;  %v18677_v33 = vld [vmem:[#allocation14 + $0xac] sm:$0xf0] }
 0x65d   :  { %10721 = vmatpush.bf16.msra.mxu2 %v16196_v22  ;;  %10751 = vmatpush.bf16.msrb.mxu0 %v16644_v20  ;;  %v18800_v26 = vld [vmem:[#allocation14 + $0x48c] sm:$0xf]  ;;  %v16804_v63 = vor.u32 %v18984_v14, %v16801_v55  ;;  %v15911_v14 = vld [vmem:[#allocation14 + $0x350] sm:$0xf] }
 0x65e   :  { %v16065_v22 = vld [vmem:[#allocation14 + $0x4a8] sm:$0xf0]  ;;  %v18765_v55 = vld [vmem:[#allocation14 + $0x36c] sm:$0xf0] }
 0x65f   :  { %10765 = vmatpush.bf16.msrb.mxu1 %v16900_v13  ;;  %v18912_v28 = vld [vmem:[#allocation14 + $0x80c] sm:$0xf]  ;;  %v16068_v40 = vor.u32 %v18800_v26, %v16065_v22  ;;  %v18860_v26 = vld [vmem:[#allocation14 + $0x664] sm:$0xf0] }
 0x660   :  { %v16513_v36 = vld [vmem:[#allocation14 + $0x828] sm:$0xf0]  ;;  %10625 = vmatpush.bf16.msra.mxu3 %v16384_v52  ;;  %v16288_v50 = vor.u32 %v18860_v26, %v16287_v10  ;;  %v17503_v52 = vld [vmem:[#allocation14 + $0xfc8] sm:$0xf] }
 0x661   :  { %10722 = vmatpush.bf16.msra.mxu2 %v16164_v30  ;;  %10752 = vmatpush.bf16.msrb.mxu0 %v16612_v29  ;;  %v18976_v20 = vld [vmem:[#allocation14 + $0xa0c] sm:$0xf]  ;;  %v16516_v47 = vor.u32 %v18912_v28, %v16513_v36  ;;  %v18876_v30 = vld [vmem:[#allocation14 + $0x6e4] sm:$0xf0]  ;;  %v15976_v29 = vor.u32 %v18781_v53, %v15975_v38  ;;  %v15623_v28 = vld [vmem:[#allocation14 + $0x110] sm:$0xf] }
 0x662   :  { %v16769_v13 = vld [vmem:[#allocation14 + $0xa28] sm:$0xf0]  ;;  %v16352_v57 = vor.u32 %v18876_v30, %v16351_v2  ;;  %v18693_v36 = vld [vmem:[#allocation14 + $0x12c] sm:$0xf0]  ;;  %v18852_v53 = vld [vmem:[#allocation14 + $0x624] sm:$0xf0] }
 0x663   :  { %10766 = vmatpush.bf16.msrb.mxu1 %v16868_v45  ;;  %v16772_v59 = vor.u32 %v18976_v20, %v16769_v13  ;;  %v18792_v0 = vld [vmem:[#allocation14 + $0x44c] sm:$0xf]  ;;  %v15687_v45 = vld [vmem:[#allocation14 + $0x190] sm:$0xf]  ;;  %v15624_v2 = vor.u32 %v18693_v36, %v15623_v28 }
 0x664   :  { %v16033_v24 = vld [vmem:[#allocation14 + $0x468] sm:$0xf0]  ;;  %v15688_v17 = vor.u32 %v18709_v61, %v15687_v45  ;;  %10626 = vmatpush.bf16.msra.mxu3 %v16352_v57  ;;  %v15879_v20 = vld [vmem:[#allocation14 + $0x310] sm:$0xf]  ;;  %v16256_v45 = vor.u32 %v18852_v53, %v16255_v35  ;;  %v19156_v57 = vld [vmem:[#allocation14 + $0xfa4] sm:$0xf0] }
 0x665   :  { %10723 = vmatpush.bf16.msra.mxu2 %v16132_v46  ;;  %10753 = vmatpush.bf16.msrb.mxu0 %v16580_v42  ;;  %v16036_v27 = vor.u32 %v18792_v0, %v16033_v24  ;;  %v18784_v51 = vld [vmem:[#allocation14 + $0x40c] sm:$0xf]  ;;  %v15944_v42 = vor.u32 %v18773_v37, %v15943_v44  ;;  %v18757_v13 = vld [vmem:[#allocation14 + $0x32c] sm:$0xf0]  ;;  %v17471_v37 = vld [vmem:[#allocation14 + $0xf88] sm:$0xf] }
 0x666   :  { %v16001_v46 = vld [vmem:[#allocation14 + $0x428] sm:$0xf0]  ;;  %v15591_v0 = vld [vmem:[#allocation14 + $0xd0] sm:$0xf] }
 0x667   :  { %10767 = vmatpush.bf16.msrb.mxu1 %v16836_v18  ;;  %v19096_v18 = vld [vmem:[#allocation14 + $0xdcc] sm:$0xf]  ;;  %v18685_v24 = vld [vmem:[#allocation14 + $0xec] sm:$0xf0] }
 0x668   :  { %v17249_v12 = vld [vmem:[#allocation14 + $0xde8] sm:$0xf0]  ;;  %10627 = vmatpush.bf16.msra.mxu3 %v16320_v6  ;;  %v20877_v6 = vpop.f32.mrf.mxu2 }
 0x669   :  { %10724 = vmatpush.bf16.msra.mxu2 %v16100_v58  ;;  %10754 = vmatpush.bf16.msrb.mxu0 %v16548_v15  ;;  %v16004_v58 = vor.u32 %v18784_v51, %v16001_v46  ;;  %v17252_v3 = vor.u32 %v19096_v18, %v17249_v12  ;;  %v15656_v15 = vor.u32 %v18701_v43, %v15655_v1  ;;  %v19088_v41 = vld [vmem:[#allocation14 + $0xd8c] sm:$0xf]  ;;  %v15559_v46 = vld [vmem:[#allocation14 + $0x90] sm:$0xf]  ;;  %v20873_v18 = vpop.f32.mrf.mxu0  ;;  %v17439_v43 = vld [vmem:[#allocation14 + $0xf48] sm:$0xf] }
 0x66a   :  { %v17217_v22 = vld [vmem:[#allocation14 + $0xda8] sm:$0xf0]  ;;  %v17472_v12 = vor.u32 %v19156_v57, %v17471_v37 }
 0x66b   :  { %10768 = vmatpush.bf16.msrb.mxu1 %v16804_v63  ;;  %v15912_v63 = vor.u32 %v18765_v55, %v15911_v14  ;;  %v17220_v38 = vor.u32 %v19088_v41, %v17217_v22  ;;  %v17185_v30 = vld [vmem:[#allocation14 + $0xd68] sm:$0xf0]  ;;  %v19148_v14 = vld [vmem:[#allocation14 + $0xf64] sm:$0xf0]  ;;  %v20875_v55 = vpop.f32.mrf.mxu1  ;;  %v15783_v41 = vld [vmem:[#allocation14 + $0x250] sm:$0xf] }
 0x66c   :  { %10628 = vmatpush.bf16.msra.mxu3 %v16288_v50  ;;  %v19072_v9 = vld [vmem:[#allocation14 + $0xd0c] sm:$0xf]  ;;  %v18733_v22 = vld [vmem:[#allocation14 + $0x26c] sm:$0xf0]  ;;  %v17440_v28 = vor.u32 %v19148_v14, %v17439_v43 }
 0x66d   :  { %10725 = vmatpush.bf16.msra.mxu2 %v16068_v40  ;;  %10755 = vmatpush.bf16.msrb.mxu0 %v16516_v47  ;;  %v19164_v40 = vld [vmem:[#allocation14 + $0xfe4] sm:$0xf0]  ;;  %v15880_v47 = vor.u32 %v18757_v13, %v15879_v20  ;;  %v17153_v51 = vld [vmem:[#allocation14 + $0xd28] sm:$0xf0]  ;;  %v19029_v43 = vld [vmem:[#allocation14 + $0xbac] sm:$0xf0] }
 0x66e   :  { %v17504_v61 = vor.u32 %v19164_v40, %v17503_v52  ;;  %v17156_v1 = vor.u32 %v19072_v9, %v17153_v51  ;;  %v19064_v10 = vld [vmem:[#allocation14 + $0xccc] sm:$0xf]  ;;  %v17407_v20 = vld [vmem:[#allocation14 + $0xf08] sm:$0xf]  ;;  %v15495_v52 = vld [vmem:[#allocation14 + $0x10] sm:$0xf] }
 0x66f   :  { %10769 = vmatpush.bf16.msrb.mxu1 %v16772_v59  ;;  %v19080_v59 = vld [vmem:[#allocation14 + $0xd4c] sm:$0xf]  ;;  %v19140_v13 = vld [vmem:[#allocation14 + $0xf24] sm:$0xf0]  ;;  %v18661_v40 = vld [vmem:[#allocation14 + $0x2c] sm:$0xf0] }
 0x670   :  { %10756 = vmatmul.bf16.vlgmr.msrb.gmra.mxu0 %v20758_v4  ;;  %v17188_v44 = vor.u32 %v19080_v59, %v17185_v30  ;;  %10629 = vmatpush.bf16.msra.mxu3 %v16256_v45  ;;  %v17121_v26 = vld [vmem:[#allocation14 + $0xce8] sm:$0xf0]  ;;  %v16743_v59 = vld [vmem:[#allocation14 + $0x9d0] sm:$0xf]  ;;  %v15496_v57 = vor.u32 %v18661_v40, %v15495_v52  ;;  %v17311_v52 = vld [vmem:[#allocation14 + $0xe48] sm:$0xf] }
 0x671   :  { %10804 = vmatpush.bf16.msra.mxu0 %v15720_v5  ;;  %10726 = vmatpush.bf16.msra.mxu2 %v16036_v27  ;;  %v15847_v5 = vld [vmem:[#allocation14 + $0x2d0] sm:$0xf]  ;;  %v15592_v27 = vor.u32 %v18685_v24, %v15591_v0  ;;  %v17124_v36 = vor.u32 %v19064_v10, %v17121_v26  ;;  %v19056_v50 = vld [vmem:[#allocation14 + $0xc8c] sm:$0xf]  ;;  %v20880_v30 = vpop.f32.mrf.mxu0  ;;  %v19124_v10 = vld [vmem:[#allocation14 + $0xea4] sm:$0xf0] }
 0x672   :  { %10770 = vmatmul.bf16.vlgmr.msrb.gmra.mxu1 %v20760_v25  ;;  %v17089_v53 = vld [vmem:[#allocation14 + $0xca8] sm:$0xf0]  ;;  %v18973_v0 = vld [vmem:[#allocation14 + $0x9ec] sm:$0xf0]  ;;  %v19116_v40 = vld [vmem:[#allocation14 + $0xe64] sm:$0xf0] }
 0x673   :  { %10818 = vmatpush.bf16.msra.mxu1 %v15976_v29  ;;  %v18749_v29 = vld [vmem:[#allocation14 + $0x2ec] sm:$0xf0]  ;;  %10630 = vmatmul.bf16.vlgmr.msra.gmra.mxu3 %v20772_v31  ;;  %v17092_v45 = vor.u32 %v19056_v50, %v17089_v53  ;;  %v19048_v9 = vld [vmem:[#allocation14 + $0xc4c] sm:$0xf] }
 0x674   :  { %v15848_v32 = vor.u32 %v18749_v29, %v15847_v5  ;;  %10678 = vmatpush.bf16.msrb.mxu3 %v17504_v61  ;;  %v16999_v24 = vld [vmem:[#allocation14 + $0xbd0] sm:$0xf]  ;;  %v17408_v29 = vor.u32 %v19140_v13, %v17407_v20  ;;  %v17375_v61 = vld [vmem:[#allocation14 + $0xec8] sm:$0xf]  ;;  %v17057_v51 = vld [vmem:[#allocation14 + $0xc68] sm:$0xf0] }
 0x675   :  { %10805 = vmatpush.bf16.msra.mxu0 %v15688_v17  ;;  %10727 = vmatpush.bf16.msra.mxu2 %v16004_v58  ;;  %v15815_v17 = vld [vmem:[#allocation14 + $0x290] sm:$0xf]  ;;  %v15560_v58 = vor.u32 %v18677_v33, %v15559_v46  ;;  %v16744_v33 = vor.u32 %v18973_v0, %v16743_v59  ;;  %v19040_v26 = vld [vmem:[#allocation14 + $0xc0c] sm:$0xf] }
 0x676   :  { %v19037_v5 = vld [vmem:[#allocation14 + $0xbec] sm:$0xf0] }
 0x677   :  { %10819 = vmatpush.bf16.msra.mxu1 %v15944_v42  ;;  %v18741_v42 = vld [vmem:[#allocation14 + $0x2ac] sm:$0xf0] }
 0x678   :  { %10728 = vmatmul.bf16.vlgmr.msra.gmra.mxu2 %v20770_v62  ;;  %10679 = vmatpush.bf16.msrb.mxu3 %v17472_v12  ;;  %v18965_v12 = vld [vmem:[#allocation14 + $0x9ac] sm:$0xf0] }
 0x679   :  { %10776 = vmatpush.bf16.msrb.mxu2 %v17252_v3  ;;  %10806 = vmatpush.bf16.msra.mxu0 %v15656_v15  ;;  %v15816_v3 = vor.u32 %v18741_v42, %v15815_v17  ;;  %v15527_v15 = vld [vmem:[#allocation14 + $0x50] sm:$0xf]  ;;  %v17000_v17 = vor.u32 %v19037_v5, %v16999_v24 }
 0x67a   :  { %v16711_v42 = vld [vmem:[#allocation14 + $0x990] sm:$0xf] }
 0x67b   :  { %10820 = vmatpush.bf16.msra.mxu1 %v15912_v63  ;;  %v18669_v63 = vld [vmem:[#allocation14 + $0x6c] sm:$0xf0]  ;;  %v10505_v37 = vpop.f32.mrf.mxu2 }
 0x67c   :  { %v15528_v35 = vor.u32 %v18669_v63, %v15527_v15  ;;  %10680 = vmatpush.bf16.msrb.mxu3 %v17440_v28  ;;  %v20885_v46 = vadd.f32 %v10505_v37, %v20862_v23  ;;  %v17025_v15 = vld [vmem:[#allocation14 + $0xc28] sm:$0xf0]  ;;  %v16712_v23 = vor.u32 %v18965_v12, %v16711_v42  ;;  %v16679_v28 = vld [vmem:[#allocation14 + $0x950] sm:$0xf]  ;;  %v17312_v37 = vor.u32 %v19116_v40, %v17311_v52 }
 0x67d   :  { %10777 = vmatpush.bf16.msrb.mxu2 %v17220_v38  ;;  %10807 = vmatpush.bf16.msra.mxu0 %v15624_v2  ;;  %v15784_v38 = vor.u32 %v18733_v22, %v15783_v41  ;;  %v15751_v2 = vld [vmem:[#allocation14 + $0x210] sm:$0xf] }
 0x67e   :  { %v16231_v41 = vld [vmem:[#allocation14 + $0x5d0] sm:$0xf] }
 0x67f   :  { %10821 = vmatpush.bf16.msra.mxu1 %v15880_v47  ;;  %v18725_v47 = vld [vmem:[#allocation14 + $0x22c] sm:$0xf0] }
 0x680   :  { %10681 = vmatpush.bf16.msrb.mxu3 %v17408_v29  ;;  %v18845_v22 = vld [vmem:[#allocation14 + $0x5ec] sm:$0xf0] }
 0x681   :  { %10778 = vmatpush.bf16.msrb.mxu2 %v17188_v44  ;;  %10808 = vmatpush.bf16.msra.mxu0 %v15592_v27  ;;  %v20882_v44 = vpop.f32.mrf.mxu1  ;;  %v15752_v27 = vor.u32 %v18725_v47, %v15751_v2  ;;  %v16935_v20 = vld [vmem:[#allocation14 + $0xb50] sm:$0xf]  ;;  %v16232_v53 = vor.u32 %v18845_v22, %v16231_v41  ;;  %v18896_v41 = vld [vmem:[#allocation14 + $0x78c] sm:$0xf] }
 0x682   :  { %v19021_v13 = vld [vmem:[#allocation14 + $0xb6c] sm:$0xf0]  ;;  %v16449_v22 = vld [vmem:[#allocation14 + $0x7a8] sm:$0xf0] }
 0x683   :  { %10822 = vmatpush.bf16.msra.mxu1 %v15848_v32  ;;  %v19132_v32 = vld [vmem:[#allocation14 + $0xee4] sm:$0xf0]  ;;  %v16936_v47 = vor.u32 %v19021_v13, %v16935_v20  ;;  %v16199_v59 = vld [vmem:[#allocation14 + $0x590] sm:$0xf] }
 0x684   :  { %v17376_v14 = vor.u32 %v19132_v32, %v17375_v61  ;;  %v18837_v0 = vld [vmem:[#allocation14 + $0x5ac] sm:$0xf0]  ;;  %v17279_v32 = vld [vmem:[#allocation14 + $0xe08] sm:$0xf] }
 0x685   :  { %10779 = vmatpush.bf16.msrb.mxu2 %v17156_v1  ;;  %10809 = vmatpush.bf16.msra.mxu0 %v15560_v58  ;;  %v16967_v1 = vld [vmem:[#allocation14 + $0xb90] sm:$0xf]  ;;  %v17060_v58 = vor.u32 %v19048_v9, %v17057_v51  ;;  %v16200_v9 = vor.u32 %v18837_v0, %v16199_v59  ;;  %v19108_v51 = vld [vmem:[#allocation14 + $0xe24] sm:$0xf0]  ;;  %v16452_v59 = vor.u32 %v18896_v41, %v16449_v22  ;;  %v18713_v41 = vld [vmem:[#allocation14 + $0x1d4] sm:$0xf] }
 0x686   :  { %v16968_v63 = vor.u32 %v19029_v43, %v16967_v1  ;;  %10682 = vmatpush.bf16.msrb.mxu3 %v17376_v14  ;;  %v16647_v24 = vld [vmem:[#allocation14 + $0x910] sm:$0xf]  ;;  %v15721_v22 = vld [vmem:[#allocation14 + $0x1f0] sm:$0xf0] }
 0x687   :  { %10823 = vmatpush.bf16.msra.mxu1 %v15816_v3  ;;  %v17343_v3 = vld [vmem:[#allocation14 + $0xe88] sm:$0xf]  ;;  %v18949_v29 = vld [vmem:[#allocation14 + $0x92c] sm:$0xf0] }
 0x688   :  { %v17344_v50 = vor.u32 %v19124_v10, %v17343_v3  ;;  %v19013_v61 = vld [vmem:[#allocation14 + $0xb2c] sm:$0xf0]  ;;  %v16648_v42 = vor.u32 %v18949_v29, %v16647_v24  ;;  %v18888_v24 = vld [vmem:[#allocation14 + $0x74c] sm:$0xf] }
 0x689   :  { %10780 = vmatpush.bf16.msrb.mxu2 %v17124_v36  ;;  %10810 = vmatpush.bf16.msra.mxu0 %v15528_v35  ;;  %v18957_v36 = vld [vmem:[#allocation14 + $0x96c] sm:$0xf0]  ;;  %v17028_v35 = vor.u32 %v19040_v26, %v17025_v15  ;;  %v20891_v5 = vpop.f32.mrf.mxu1  ;;  %v17280_v26 = vor.u32 %v19108_v51, %v17279_v32  ;;  %v16417_v29 = vld [vmem:[#allocation14 + $0x768] sm:$0xf0] }
 0x68a   :  { %v16680_v2 = vor.u32 %v18957_v36, %v16679_v28  ;;  %10683 = vmatpush.bf16.msrb.mxu3 %v17344_v50  ;;  %v16167_v1 = vld [vmem:[#allocation14 + $0x550] sm:$0xf] }
 0x68b   :  { %10824 = vmatpush.bf16.msra.mxu1 %v15784_v38  ;;  %v20887_v38 = vpop.f32.mrf.mxu0  ;;  %v18829_v43 = vld [vmem:[#allocation14 + $0x56c] sm:$0xf0] }
 0x68c   :  { %v16615_v14 = vld [vmem:[#allocation14 + $0x8d0] sm:$0xf] }
 0x68d   :  { %10781 = vmatpush.bf16.msrb.mxu2 %v17092_v45  ;;  %10811 = vmatpush.bf16.msra.mxu0 %v15496_v57  ;;  %v16903_v45 = vld [vmem:[#allocation14 + $0xb10] sm:$0xf]  ;;  %v20893_v57 = vld [vmem:[#allocation16] sm:$0xff] }
 0x68e   :  { %21335 = vst [vmem:[#allocation75_spill] sm:$0xff] %v20893_v57  ;;  %v16904_v12 = vor.u32 %v19013_v61, %v16903_v45  ;;  %v16871_v3 = vld [vmem:[#allocation14 + $0xad0] sm:$0xf]  ;;  %10684 = vmatpush.bf16.msrb.mxu3 %v17312_v37 }
 0x68f   :  { %10825 = vmatpush.bf16.msra.mxu1 %v15752_v27  ;;  %v21148_v27 = vperm.slane %v20893_v57, 2  ;;  %v19005_v10 = vld [vmem:[#allocation14 + $0xaec] sm:$0xf0] }
 0x690   :  { %10812 = vmatmul.bf16.vlgmr.msra.gmra.mxu0 %v20672_v39  ;;  %v16872_v20 = vor.u32 %v19005_v10, %v16871_v3  ;;  %v16135_v13 = vld [vmem:[#allocation14 + $0x510] sm:$0xf] }
 0x691   :  { %10860 = vmatpush.bf16.msrb.mxu0 %v16744_v33  ;;  %10782 = vmatpush.bf16.msrb.mxu2 %v17060_v58  ;;  %v18904_v33 = vld [vmem:[#allocation14 + $0x7cc] sm:$0xf]  ;;  %v18941_v58 = vld [vmem:[#allocation14 + $0x8ec] sm:$0xf0] }
 0x692   :  { %10826 = vmatmul.bf16.vlgmr.msra.gmra.mxu1 %v20674_v8  ;;  %v16616_v36 = vor.u32 %v18941_v58, %v16615_v14  ;;  %v18821_v50 = vld [vmem:[#allocation14 + $0x52c] sm:$0xf0]  ;;  %10685 = vmatpush.bf16.msrb.mxu3 %v17280_v26 }
 0x693   :  { %10874 = vmatpush.bf16.msrb.mxu1 %v17000_v17  ;;  %v16481_v17 = vld [vmem:[#allocation14 + $0x7e8] sm:$0xf0]  ;;  %v10589_v15 = vpop.f32.mrf.mxu0  ;;  %v18933_v52 = vld [vmem:[#allocation14 + $0x8ac] sm:$0xf0]  ;;  %v16136_v0 = vor.u32 %v18821_v50, %v16135_v13 }
 0x694   :  { %v10590_v28 = vadd.f32 %v10589_v15, %v21148_v27  ;;  %v16839_v40 = vld [vmem:[#allocation14 + $0xa90] sm:$0xf]  ;;  %v18872_v50 = vld [vmem:[#allocation14 + $0x6cc] sm:$0xf]  ;;  %v18961_v27 = vld [vmem:[#allocation14 + $0x994] sm:$0xf] }
 0x695   :  { %10861 = vmatpush.bf16.msrb.mxu0 %v16712_v23  ;;  %10783 = vmatpush.bf16.msrb.mxu2 %v17028_v35  ;;  %v16484_v23 = vor.u32 %v18904_v33, %v16481_v17  ;;  %v16583_v35 = vld [vmem:[#allocation14 + $0x890] sm:$0xf] }
 0x696   :  { %v16584_v45 = vor.u32 %v18933_v52, %v16583_v35  ;;  %v16103_v37 = vld [vmem:[#allocation14 + $0x4d0] sm:$0xf]  ;;  %10686 = vmatmul.bf16.vlgmr.msrb.gmra.mxu3 %v20841_v60  ;;  %v16353_v52 = vld [vmem:[#allocation14 + $0x6e8] sm:$0xf0] }
 0x697   :  { %10875 = vmatpush.bf16.msrb.mxu1 %v16968_v63  ;;  %v16168_v63 = vor.u32 %v18829_v43, %v16167_v1  ;;  %10734 = vmatpush.bf16.msra.mxu3 %v16484_v23  ;;  %v18813_v32 = vld [vmem:[#allocation14 + $0x4ec] sm:$0xf0]  ;;  %v18880_v1 = vld [vmem:[#allocation14 + $0x70c] sm:$0xf] }
 0x698   :  { %10784 = vmatmul.bf16.vlgmr.msrb.gmra.mxu2 %v20780_v54  ;;  %v18925_v51 = vld [vmem:[#allocation14 + $0x86c] sm:$0xf0]  ;;  %v16385_v43 = vld [vmem:[#allocation14 + $0x728] sm:$0xf0] }
 0x699   :  { %10832 = vmatpush.bf16.msra.mxu2 %v16232_v53  ;;  %10862 = vmatpush.bf16.msrb.mxu0 %v16680_v2  ;;  %v10603_v53 = vpop.f32.mrf.mxu1  ;;  %v18997_v2 = vld [vmem:[#allocation14 + $0xaac] sm:$0xf0] }
 0x69a   :  { %v16840_v61 = vor.u32 %v18997_v2, %v16839_v40  ;;  %v16807_v33 = vld [vmem:[#allocation14 + $0xa50] sm:$0xf] }
 0x69b   :  { %10876 = vmatpush.bf16.msrb.mxu1 %v16936_v47  ;;  %v20899_v47 = vadd.f32 %v10603_v53, %v10590_v28  ;;  %v18989_v17 = vld [vmem:[#allocation14 + $0xa6c] sm:$0xf0]  ;;  %10735 = vmatpush.bf16.msra.mxu3 %v16452_v59  ;;  %v18777_v28 = vld [vmem:[#allocation14 + $0x3d4] sm:$0xf]  ;;  %v15724_v59 = vor.u32 %v18713_v41, %v15721_v22  ;;  %v18856_v41 = vld [vmem:[#allocation14 + $0x64c] sm:$0xf] }
 0x69c   :  { %v16071_v14 = vld [vmem:[#allocation14 + $0x490] sm:$0xf]  ;;  %v16808_v3 = vor.u32 %v18989_v17, %v16807_v33  ;;  %v16321_v33 = vld [vmem:[#allocation14 + $0x6a8] sm:$0xf0] }
 0x69d   :  { %10833 = vmatpush.bf16.msra.mxu2 %v16200_v9  ;;  %10863 = vmatpush.bf16.msrb.mxu0 %v16648_v42  ;;  %v16551_v9 = vld [vmem:[#allocation14 + $0x850] sm:$0xf]  ;;  %v16420_v42 = vor.u32 %v18888_v24, %v16417_v29  ;;  %v18705_v24 = vld [vmem:[#allocation14 + $0x194] sm:$0xf]  ;;  %v16289_v22 = vld [vmem:[#allocation14 + $0x668] sm:$0xf0] }
 0x69e   :  { %v16552_v58 = vor.u32 %v18925_v51, %v16551_v9  ;;  %v18805_v10 = vld [vmem:[#allocation14 + $0x4ac] sm:$0xf0]  ;;  %v15689_v29 = vld [vmem:[#allocation14 + $0x1b0] sm:$0xf0]  ;;  %v18864_v51 = vld [vmem:[#allocation14 + $0x68c] sm:$0xf] }
 0x69f   :  { %10877 = vmatpush.bf16.msrb.mxu1 %v16904_v12  ;;  %v16104_v12 = vor.u32 %v18813_v32, %v16103_v37  ;;  %v16519_v26 = vld [vmem:[#allocation14 + $0x810] sm:$0xf]  ;;  %10736 = vmatpush.bf16.msra.mxu3 %v16420_v42  ;;  %v16072_v13 = vor.u32 %v18805_v10, %v16071_v14  ;;  %v20902_v37 = vpop.f32.mrf.mxu2  ;;  %v16356_v32 = vor.u32 %v18872_v50, %v16353_v52  ;;  %v18761_v10 = vld [vmem:[#allocation14 + $0x354] sm:$0xf] }
 0x6a0   :  { %v18917_v15 = vld [vmem:[#allocation14 + $0x82c] sm:$0xf0]  ;;  %v18689_v50 = vld [vmem:[#allocation14 + $0x114] sm:$0xf] }
 0x6a1   :  { %10834 = vmatpush.bf16.msra.mxu2 %v16168_v63  ;;  %10864 = vmatpush.bf16.msrb.mxu0 %v16616_v36  ;;  %v16775_v23 = vld [vmem:[#allocation14 + $0xa10] sm:$0xf]  ;;  %v15977_v36 = vld [vmem:[#allocation14 + $0x3f0] sm:$0xf0]  ;;  %v16520_v35 = vor.u32 %v18917_v15, %v16519_v26  ;;  %v16324_v15 = vor.u32 %v18864_v51, %v16321_v33 }
 0x6a2   :  { %v18981_v63 = vld [vmem:[#allocation14 + $0xa2c] sm:$0xf0]  ;;  %v15913_v26 = vld [vmem:[#allocation14 + $0x370] sm:$0xf0] }
 0x6a3   :  { %10878 = vmatpush.bf16.msrb.mxu1 %v16872_v20  ;;  %v16388_v20 = vor.u32 %v18880_v1, %v16385_v43  ;;  %v16776_v53 = vor.u32 %v18981_v63, %v16775_v23  ;;  %v16039_v40 = vld [vmem:[#allocation14 + $0x450] sm:$0xf]  ;;  %v15881_v52 = vld [vmem:[#allocation14 + $0x330] sm:$0xf0] }
 0x6a4   :  { %v18797_v2 = vld [vmem:[#allocation14 + $0x46c] sm:$0xf0]  ;;  %v18681_v33 = vld [vmem:[#allocation14 + $0xd4] sm:$0xf] }
 0x6a5   :  { %10835 = vmatpush.bf16.msra.mxu2 %v16136_v0  ;;  %10865 = vmatpush.bf16.msrb.mxu0 %v16584_v45  ;;  %v15980_v0 = vor.u32 %v18777_v28, %v15977_v36  ;;  %v18769_v45 = vld [vmem:[#allocation14 + $0x394] sm:$0xf]  ;;  %v16040_v9 = vor.u32 %v18797_v2, %v16039_v40  ;;  %v16007_v17 = vld [vmem:[#allocation14 + $0x410] sm:$0xf]  ;;  %v15916_v36 = vor.u32 %v18761_v10, %v15913_v26 }
 0x6a6   :  { %10737 = vmatpush.bf16.msra.mxu3 %v16388_v20  ;;  %v18789_v42 = vld [vmem:[#allocation14 + $0x42c] sm:$0xf0]  ;;  %v16292_v2 = vor.u32 %v18856_v41, %v16289_v22  ;;  %v15561_v41 = vld [vmem:[#allocation14 + $0xb0] sm:$0xf0] }
 0x6a7   :  { %10879 = vmatpush.bf16.msrb.mxu1 %v16840_v61  ;;  %v15945_v61 = vld [vmem:[#allocation14 + $0x3b0] sm:$0xf0]  ;;  %v17255_v43 = vld [vmem:[#allocation14 + $0xdd0] sm:$0xf]  ;;  %v16008_v23 = vor.u32 %v18789_v42, %v16007_v17  ;;  %v20906_v40 = vpop.f32.mrf.mxu2 }
 0x6a8   :  { %v15948_v1 = vor.u32 %v18769_v45, %v15945_v61  ;;  %v19101_v14 = vld [vmem:[#allocation14 + $0xdec] sm:$0xf0]  ;;  %v17505_v45 = vld [vmem:[#allocation14 + $0xfe8] sm:$0xf0]  ;;  %v15593_v17 = vld [vmem:[#allocation14 + $0xf0] sm:$0xf0] }
 0x6a9   :  { %10836 = vmatpush.bf16.msra.mxu2 %v16104_v12  ;;  %10866 = vmatpush.bf16.msrb.mxu0 %v16552_v58  ;;  %v15692_v12 = vor.u32 %v18705_v24, %v15689_v29  ;;  %v18697_v58 = vld [vmem:[#allocation14 + $0x154] sm:$0xf]  ;;  %v17256_v63 = vor.u32 %v19101_v14, %v17255_v43  ;;  %v17223_v20 = vld [vmem:[#allocation14 + $0xd90] sm:$0xf]  ;;  %v16257_v24 = vld [vmem:[#allocation14 + $0x628] sm:$0xf0]  ;;  %v15596_v10 = vor.u32 %v18681_v33, %v15593_v17 }
 0x6aa   :  { %10738 = vmatpush.bf16.msra.mxu3 %v16356_v32  ;;  %v19160_v29 = vld [vmem:[#allocation14 + $0xfcc] sm:$0xf]  ;;  %v19085_v51 = vld [vmem:[#allocation14 + $0xd6c] sm:$0xf0]  ;;  %v18745_v42 = vld [vmem:[#allocation14 + $0x2d4] sm:$0xf] }
 0x6ab   :  { %10880 = vmatpush.bf16.msrb.mxu1 %v16808_v3  ;;  %v15657_v3 = vld [vmem:[#allocation14 + $0x170] sm:$0xf0]  ;;  %v17508_v43 = vor.u32 %v19160_v29, %v17505_v45  ;;  %v19136_v33 = vld [vmem:[#allocation14 + $0xf0c] sm:$0xf] }
 0x6ac   :  { %v15660_v28 = vor.u32 %v18697_v58, %v15657_v3  ;;  %v19152_v58 = vld [vmem:[#allocation14 + $0xf8c] sm:$0xf]  ;;  %v18737_v22 = vld [vmem:[#allocation14 + $0x294] sm:$0xf] }
 0x6ad   :  { %10837 = vmatpush.bf16.msra.mxu2 %v16072_v13  ;;  %10867 = vmatpush.bf16.msrb.mxu0 %v16520_v35  ;;  %v19093_v13 = vld [vmem:[#allocation14 + $0xdac] sm:$0xf0]  ;;  %v15625_v35 = vld [vmem:[#allocation14 + $0x130] sm:$0xf0]  ;;  %v17473_v3 = vld [vmem:[#allocation14 + $0xfa8] sm:$0xf0] }
 0x6ae   :  { %10739 = vmatpush.bf16.msra.mxu3 %v16324_v15  ;;  %v15628_v61 = vor.u32 %v18689_v50, %v15625_v35  ;;  %v17159_v15 = vld [vmem:[#allocation14 + $0xd10] sm:$0xf]  ;;  %v19144_v35 = vld [vmem:[#allocation14 + $0xf4c] sm:$0xf]  ;;  %v18665_v29 = vld [vmem:[#allocation14 + $0x54] sm:$0xf] }
 0x6af   :  { %10881 = vmatpush.bf16.msrb.mxu1 %v16776_v53  ;;  %v18753_v53 = vld [vmem:[#allocation14 + $0x314] sm:$0xf]  ;;  %v17409_v17 = vld [vmem:[#allocation14 + $0xf28] sm:$0xf0] }
 0x6b0   :  { %10868 = vmatmul.bf16.vlgmr.msrb.gmra.mxu0 %v20758_v4  ;;  %v15884_v32 = vor.u32 %v18753_v53, %v15881_v52  ;;  %v17441_v53 = vld [vmem:[#allocation14 + $0xf68] sm:$0xf0]  ;;  %v20913_v52 = vpop.f32.mrf.mxu2  ;;  %v15529_v45 = vld [vmem:[#allocation14 + $0x70] sm:$0xf0] }
 0x6b1   :  { %10916 = vmatpush.bf16.msra.mxu0 %v15724_v59  ;;  %10838 = vmatpush.bf16.msra.mxu2 %v16040_v9  ;;  %v18848_v59 = vld [vmem:[#allocation14 + $0x60c] sm:$0xf]  ;;  %v17191_v9 = vld [vmem:[#allocation14 + $0xd50] sm:$0xf] }
 0x6b2   :  { %10882 = vmatmul.bf16.vlgmr.msrb.gmra.mxu1 %v20760_v25  ;;  %10740 = vmatpush.bf16.msra.mxu3 %v16292_v2  ;;  %v17192_v14 = vor.u32 %v19085_v51, %v17191_v9  ;;  %v17444_v9 = vor.u32 %v19144_v35, %v17441_v53  ;;  %v19128_v35 = vld [vmem:[#allocation14 + $0xecc] sm:$0xf] }
 0x6b3   :  { %10930 = vmatpush.bf16.msra.mxu1 %v15980_v0  ;;  %v17224_v0 = vor.u32 %v19093_v13, %v17223_v20  ;;  %v20911_v20 = vpop.f32.mrf.mxu1  ;;  %v17476_v13 = vor.u32 %v19152_v58, %v17473_v3  ;;  %v15497_v58 = vld [vmem:[#allocation14 + $0x30] sm:$0xf0]  ;;  %v20916_v3 = vpop.f32.mrf.mxu3 }
 0x6b4   :  { %21337 = vst [vmem:[#allocation77_spill] sm:$0xff] %v20911_v20  ;;  %v15951_v20 = vld [vmem:[#allocation14 + $0x398] sm:$0xf] }
 0x6b5   :  { %10917 = vmatpush.bf16.msra.mxu0 %v15692_v12  ;;  %10839 = vmatpush.bf16.msra.mxu2 %v16008_v23  ;;  %v15849_v12 = vld [vmem:[#allocation14 + $0x2f0] sm:$0xf0]  ;;  %v19077_v23 = vld [vmem:[#allocation14 + $0xd2c] sm:$0xf0] }
 0x6b6   :  { %v15852_v26 = vor.u32 %v18745_v42, %v15849_v12  ;;  %v17160_v50 = vor.u32 %v19077_v23, %v17159_v15  ;;  %v17095_v42 = vld [vmem:[#allocation14 + $0xc90] sm:$0xf]  ;;  %v15532_v12 = vor.u32 %v18665_v29, %v15529_v45  ;;  %v18969_v15 = vld [vmem:[#allocation14 + $0x9d4] sm:$0xf] }
 0x6b7   :  { %10931 = vmatpush.bf16.msra.mxu1 %v15948_v1  ;;  %v16260_v1 = vor.u32 %v18848_v59, %v16257_v24  ;;  %v19069_v24 = vld [vmem:[#allocation14 + $0xcec] sm:$0xf0]  ;;  %v16745_v23 = vld [vmem:[#allocation14 + $0x9f0] sm:$0xf0] }
 0x6b8   :  { %10840 = vmatmul.bf16.vlgmr.msra.gmra.mxu2 %v20770_v62  ;;  %v19053_v29 = vld [vmem:[#allocation14 + $0xc6c] sm:$0xf0] }
 0x6b9   :  { %10888 = vmatpush.bf16.msrb.mxu2 %v17256_v63  ;;  %10918 = vmatpush.bf16.msra.mxu0 %v15660_v28  ;;  %v18673_v63 = vld [vmem:[#allocation14 + $0x94] sm:$0xf] }
 0x6ba   :  { %v15817_v28 = vld [vmem:[#allocation14 + $0x2b0] sm:$0xf0]  ;;  %10741 = vmatpush.bf16.msra.mxu3 %v16260_v1  ;;  %v15564_v2 = vor.u32 %v18673_v63, %v15561_v41 }
 0x6bb   :  { %10932 = vmatpush.bf16.msra.mxu1 %v15916_v36  ;;  %v20909_v36 = vpop.f32.mrf.mxu0  ;;  %v15820_v59 = vor.u32 %v18737_v22, %v15817_v28  ;;  %v19033_v63 = vld [vmem:[#allocation14 + $0xbd4] sm:$0xf]  ;;  %v20920_v28 = vpop.f32.mrf.mxu1 }
 0x6bc   :  { %21336 = vst [vmem:[#allocation76_spill] sm:$0xff] %v20909_v36  ;;  %v17001_v41 = vld [vmem:[#allocation14 + $0xbf0] sm:$0xf0]  ;;  %v10617_v53 = vpop.f32.mrf.mxu2  ;;  %v18774_v36 = vld [vmem:[#allocation14 + $0x3b4] sm:$0xf0] }
 0x6bd   :  { %10889 = vmatpush.bf16.msrb.mxu2 %v17224_v0  ;;  %10919 = vmatpush.bf16.msra.mxu0 %v15628_v61  ;;  %v17127_v0 = vld [vmem:[#allocation14 + $0xcd0] sm:$0xf]  ;;  %v18729_v61 = vld [vmem:[#allocation14 + $0x254] sm:$0xf]  ;;  %21339 = vst [vmem:[#allocation32_spill] sm:$0xff] %v20920_v28  ;;  %v20923_v45 = vadd.f32 %v10617_v53, %v20899_v47  ;;  %v16716_v47 = vor.u32 %v18961_v27, %v16713_v48 }
 0x6be   :  { %10790 = vmatpush.bf16.msrb.mxu3 %v17508_v43  ;;  %v17128_v51 = vor.u32 %v19069_v24, %v17127_v0  ;;  %v19061_v43 = vld [vmem:[#allocation14 + $0xcac] sm:$0xf0]  ;;  %v17377_v0 = vld [vmem:[#allocation14 + $0xee8] sm:$0xf0]  ;;  %v16585_v28 = vld [vmem:[#allocation14 + $0x8b0] sm:$0xf0] }
 0x6bf   :  { %10933 = vmatpush.bf16.msra.mxu1 %v15884_v32  ;;  %10742 = vmatmul.bf16.vlgmr.msra.gmra.mxu3 %v20772_v31  ;;  %v15785_v32 = vld [vmem:[#allocation14 + $0x270] sm:$0xf0]  ;;  %v17063_v24 = vld [vmem:[#allocation14 + $0xc50] sm:$0xf]  ;;  %v19112_v48 = vld [vmem:[#allocation14 + $0xe4c] sm:$0xf] }
 0x6c0   :  { %v15788_v1 = vor.u32 %v18729_v61, %v15785_v32  ;;  %v16748_v61 = vor.u32 %v18969_v15, %v16745_v23  ;;  %v17004_v32 = vor.u32 %v19033_v63, %v17001_v41  ;;  %v18953_v15 = vld [vmem:[#allocation14 + $0x954] sm:$0xf]  ;;  %v17313_v27 = vld [vmem:[#allocation14 + $0xe68] sm:$0xf0] }
 0x6c1   :  { %10890 = vmatpush.bf16.msrb.mxu2 %v17192_v14  ;;  %10920 = vmatpush.bf16.msra.mxu0 %v15596_v10  ;;  %v18657_v14 = vld [vmem:[#allocation14 + $0x14] sm:$0xf] }
 0x6c2   :  { %10791 = vmatpush.bf16.msrb.mxu3 %v17476_v13  ;;  %v18721_v10 = vld [vmem:[#allocation14 + $0x214] sm:$0xf]  ;;  %v17412_v13 = vor.u32 %v19136_v33, %v17409_v17  ;;  %v17380_v33 = vor.u32 %v19128_v35, %v17377_v0  ;;  %v17064_v17 = vor.u32 %v19053_v29, %v17063_v24 }
 0x6c3   :  { %10934 = vmatpush.bf16.msra.mxu1 %v15852_v26  ;;  %v15753_v26 = vld [vmem:[#allocation14 + $0x230] sm:$0xf0]  ;;  %v20918_v22 = vpop.f32.mrf.mxu0 }
 0x6c4   :  { %21338 = vst [vmem:[#allocation38_spill] sm:$0xff] %v20918_v22  ;;  %v16681_v63 = vld [vmem:[#allocation14 + $0x970] sm:$0xf0]  ;;  %v15695_v22 = vld [vmem:[#allocation14 + $0x198] sm:$0xf] }
 0x6c5   :  { %10891 = vmatpush.bf16.msrb.mxu2 %v17160_v50  ;;  %10921 = vmatpush.bf16.msra.mxu0 %v15564_v2  ;;  %v17096_v50 = vor.u32 %v19061_v43, %v17095_v42  ;;  %v15500_v2 = vor.u32 %v18657_v14, %v15497_v58  ;;  %v19120_v42 = vld [vmem:[#allocation14 + $0xe8c] sm:$0xf]  ;;  %v19045_v43 = vld [vmem:[#allocation14 + $0xc2c] sm:$0xf0]  ;;  %v10463_v14 = vpop.f32.mrf.mxu3  ;;  %v19017_v41 = vld [vmem:[#allocation14 + $0xb54] sm:$0xf] }
 0x6c6   :  { %10792 = vmatpush.bf16.msrb.mxu3 %v17444_v9  ;;  %v19025_v9 = vld [vmem:[#allocation14 + $0xb94] sm:$0xf]  ;;  %v20926_v23 = vadd.f32 %v10463_v14, %v20868_v16  ;;  %v16684_v16 = vor.u32 %v18953_v15, %v16681_v63  ;;  %v18909_v14 = vld [vmem:[#allocation14 + $0x7ec] sm:$0xf0] }
 0x6c7   :  { %10935 = vmatpush.bf16.msra.mxu1 %v15820_v59  ;;  %v15756_v59 = vor.u32 %v18721_v10, %v15753_v26  ;;  %v18841_v10 = vld [vmem:[#allocation14 + $0x5d4] sm:$0xf] }
 0x6c8   :  { %v16233_v26 = vld [vmem:[#allocation14 + $0x5f0] sm:$0xf0] }
 0x6c9   :  { %10892 = vmatpush.bf16.msrb.mxu2 %v17128_v51  ;;  %10922 = vmatpush.bf16.msra.mxu0 %v15532_v12  ;;  %v16969_v51 = vld [vmem:[#allocation14 + $0xbb0] sm:$0xf0]  ;;  %v17345_v12 = vld [vmem:[#allocation14 + $0xea8] sm:$0xf0]  ;;  %v16236_v53 = vor.u32 %v18841_v10, %v16233_v26 }
 0x6ca   :  { %10793 = vmatpush.bf16.msrb.mxu3 %v17412_v13  ;;  %v16972_v58 = vor.u32 %v19025_v9, %v16969_v51  ;;  %v16937_v13 = vld [vmem:[#allocation14 + $0xb70] sm:$0xf0] }
 0x6cb   :  { %10936 = vmatpush.bf16.msra.mxu1 %v15788_v1  ;;  %v17031_v1 = vld [vmem:[#allocation14 + $0xc10] sm:$0xf]  ;;  %v16940_v0 = vor.u32 %v19017_v41, %v16937_v13  ;;  %v18833_v24 = vld [vmem:[#allocation14 + $0x594] sm:$0xf] }
 0x6cc   :  { %v17032_v35 = vor.u32 %v19045_v43, %v17031_v1  ;;  %v16201_v29 = vld [vmem:[#allocation14 + $0x5b0] sm:$0xf0]  ;;  %v7783_v1 = vperm.slane %v20893_v57, 3  ;;  %v16487_v43 = vld [vmem:[#allocation14 + $0x7d0] sm:$0xf] }
 0x6cd   :  { %10893 = vmatpush.bf16.msrb.mxu2 %v17096_v50  ;;  %10923 = vmatpush.bf16.msra.mxu0 %v15500_v2  ;;  %v17348_v50 = vor.u32 %v19120_v42, %v17345_v12  ;;  %v20930_v2 = vpop.f32.mrf.mxu0  ;;  %v19009_v9 = vld [vmem:[#allocation14 + $0xb14] sm:$0xf]  ;;  %v17281_v42 = vld [vmem:[#allocation14 + $0xe28] sm:$0xf0]  ;;  %v16204_v12 = vor.u32 %v18833_v24, %v16201_v29  ;;  %v18901_v24 = vld [vmem:[#allocation14 + $0x7ac] sm:$0xf0] }
 0x6ce   :  { %10794 = vmatpush.bf16.msrb.mxu3 %v17380_v33  ;;  %21340 = vst [vmem:[#allocation39_spill] sm:$0xff] %v20930_v2  ;;  %v16905_v51 = vld [vmem:[#allocation14 + $0xb30] sm:$0xf0]  ;;  %v17316_v33 = vor.u32 %v19112_v48, %v17313_v27  ;;  %v16455_v27 = vld [vmem:[#allocation14 + $0x790] sm:$0xf] }
 0x6cf   :  { %10937 = vmatpush.bf16.msra.mxu1 %v15756_v59  ;;  %v20932_v59 = vpop.f32.mrf.mxu1  ;;  %v16908_v10 = vor.u32 %v19009_v9, %v16905_v51  ;;  %v18825_v26 = vld [vmem:[#allocation14 + $0x554] sm:$0xf]  ;;  %v18710_v2 = vld [vmem:[#allocation14 + $0x1b4] sm:$0xf0]  ;;  %v16977_v57 = vld [vmem:[#allocation14 + $0xbb8] sm:$0xf0] }
 0x6d0   :  { %10924 = vmatmul.bf16.vlgmr.msra.gmra.mxu0 %v20672_v39  ;;  %21341 = vst [vmem:[#allocation34_spill] sm:$0xff] %v20932_v59  ;;  %v16169_v15 = vld [vmem:[#allocation14 + $0x570] sm:$0xf0] }
 0x6d1   :  { %10972 = vmatpush.bf16.msrb.mxu0 %v16748_v61  ;;  %10894 = vmatpush.bf16.msrb.mxu2 %v17064_v17  ;;  %v18945_v61 = vld [vmem:[#allocation14 + $0x914] sm:$0xf]  ;;  %v19104_v17 = vld [vmem:[#allocation14 + $0xe0c] sm:$0xf]  ;;  %v16172_v48 = vor.u32 %v18825_v26, %v16169_v15 }
 0x6d2   :  { %10938 = vmatmul.bf16.vlgmr.msra.gmra.mxu1 %v20674_v8  ;;  %10795 = vmatpush.bf16.msrb.mxu3 %v17348_v50  ;;  %v18937_v63 = vld [vmem:[#allocation14 + $0x8d4] sm:$0xf] }
 0x6d3   :  { %10986 = vmatpush.bf16.msrb.mxu1 %v17004_v32  ;;  %v16649_v32 = vld [vmem:[#allocation14 + $0x930] sm:$0xf0] }
 0x6d4   :  { %v16617_v41 = vld [vmem:[#allocation14 + $0x8f0] sm:$0xf0] }
 0x6d5   :  { %10973 = vmatpush.bf16.msrb.mxu0 %v16716_v47  ;;  %10895 = vmatpush.bf16.msrb.mxu2 %v17032_v35  ;;  %v20935_v47 = vpop.f32.mrf.mxu3  ;;  %v19001_v13 = vld [vmem:[#allocation14 + $0xad4] sm:$0xf]  ;;  %v17284_v35 = vor.u32 %v19104_v17, %v17281_v42  ;;  %v10701_v29 = vpop.f32.mrf.mxu0 }
 0x6d6   :  { %v16873_v50 = vld [vmem:[#allocation14 + $0xaf0] sm:$0xf0]  ;;  %10796 = vmatpush.bf16.msrb.mxu3 %v17316_v33  ;;  %v10702_v7 = vadd.f32 %v10701_v29, %v7783_v1  ;;  %v18885_v29 = vld [vmem:[#allocation14 + $0x72c] sm:$0xf0] }
 0x6d7   :  { %10987 = vmatpush.bf16.msrb.mxu1 %v16972_v58  ;;  %v16652_v58 = vor.u32 %v18945_v61, %v16649_v32  ;;  %v16876_v61 = vor.u32 %v19001_v13, %v16873_v50  ;;  %v18817_v32 = vld [vmem:[#allocation14 + $0x514] sm:$0xf] }
 0x6d8   :  { %10896 = vmatmul.bf16.vlgmr.msrb.gmra.mxu2 %v20780_v54  ;;  %v16137_v9 = vld [vmem:[#allocation14 + $0x530] sm:$0xf0] }
 0x6d9   :  { %10944 = vmatpush.bf16.msra.mxu2 %v16236_v53  ;;  %10974 = vmatpush.bf16.msrb.mxu0 %v16684_v16  ;;  %v16488_v53 = vor.u32 %v18909_v14, %v16487_v43  ;;  %v10715_v16 = vpop.f32.mrf.mxu1  ;;  %v18929_v51 = vld [vmem:[#allocation14 + $0x894] sm:$0xf]  ;;  %v16140_v43 = vor.u32 %v18817_v32, %v16137_v9  ;;  %v16423_v14 = vld [vmem:[#allocation14 + $0x750] sm:$0xf] }
 0x6da   :  { %v18993_v33 = vld [vmem:[#allocation14 + $0xa94] sm:$0xf]  ;;  %10797 = vmatpush.bf16.msrb.mxu3 %v17284_v35  ;;  %v20940_v42 = vadd.f32 %v10715_v16, %v10702_v7  ;;  %v16588_v26 = vor.u32 %v18929_v51, %v16585_v28 }
 0x6db   :  { %10988 = vmatpush.bf16.msrb.mxu1 %v16940_v0  ;;  %v16620_v0 = vor.u32 %v18937_v63, %v16617_v41  ;;  %v16841_v17 = vld [vmem:[#allocation14 + $0xab0] sm:$0xf0] }
 0x6dc   :  { %v16844_v15 = vor.u32 %v18993_v33, %v16841_v17  ;;  %v18809_v63 = vld [vmem:[#allocation14 + $0x4d4] sm:$0xf] }
 0x6dd   :  { %10945 = vmatpush.bf16.msra.mxu2 %v16204_v12  ;;  %10975 = vmatpush.bf16.msrb.mxu0 %v16652_v58  ;;  %v16456_v12 = vor.u32 %v18901_v24, %v16455_v27  ;;  %v18893_v58 = vld [vmem:[#allocation14 + $0x76c] sm:$0xf0]  ;;  %v16105_v41 = vld [vmem:[#allocation14 + $0x4f0] sm:$0xf0]  ;;  %v10703_v28 = vpop.f32.mrf.mxu0 }
 0x6de   :  { %10846 = vmatpush.bf16.msra.mxu3 %v16488_v53  ;;  %v18921_v13 = vld [vmem:[#allocation14 + $0x854] sm:$0xf]  ;;  %v16108_v27 = vor.u32 %v18809_v63, %v16105_v41  ;;  %v16391_v24 = vld [vmem:[#allocation14 + $0x710] sm:$0xf]  ;;  %v10704_v51 = vadd.f32 %v10703_v28, %v7783_v1 }
 0x6df   :  { %10989 = vmatpush.bf16.msrb.mxu1 %v16908_v10  ;;  %v10519_v10 = vpop.f32.mrf.mxu3  ;;  %10798 = vmatmul.bf16.vlgmr.msrb.gmra.mxu3 %v20841_v60  ;;  %v16553_v7 = vld [vmem:[#allocation14 + $0x870] sm:$0xf0]  ;;  %v16359_v41 = vld [vmem:[#allocation14 + $0x6d0] sm:$0xf] }
 0x6e0   :  { %v20943_v50 = vadd.f32 %v10519_v10, %v20885_v46  ;;  %v18985_v35 = vld [vmem:[#allocation14 + $0xa54] sm:$0xf]  ;;  %v18782_v10 = vld [vmem:[#allocation14 + $0x3f4] sm:$0xf0] }
 0x6e1   :  { %10946 = vmatpush.bf16.msra.mxu2 %v16172_v48  ;;  %10976 = vmatpush.bf16.msrb.mxu0 %v16620_v0  ;;  %v16809_v53 = vld [vmem:[#allocation14 + $0xa70] sm:$0xf0]  ;;  %v16424_v48 = vor.u32 %v18893_v58, %v16423_v14  ;;  %v16556_v0 = vor.u32 %v18921_v13, %v16553_v7  ;;  %v18718_v14 = vld [vmem:[#allocation14 + $0x1f4] sm:$0xf0] }
 0x6e2   :  { %10847 = vmatpush.bf16.msra.mxu3 %v16456_v12  ;;  %v18801_v16 = vld [vmem:[#allocation14 + $0x494] sm:$0xf]  ;;  %v15727_v12 = vld [vmem:[#allocation14 + $0x1d8] sm:$0xf] }
 0x6e3   :  { %10990 = vmatpush.bf16.msrb.mxu1 %v16876_v61  ;;  %v16812_v61 = vor.u32 %v18985_v35, %v16809_v53  ;;  %v16073_v32 = vld [vmem:[#allocation14 + $0x4b0] sm:$0xf0]  ;;  %v15983_v58 = vld [vmem:[#allocation14 + $0x3d8] sm:$0xf]  ;;  %v18877_v35 = vld [vmem:[#allocation14 + $0x6ec] sm:$0xf0]  ;;  %v15728_v28 = vor.u32 %v18718_v14, %v15727_v12 }
 0x6e4   :  { %v18913_v46 = vld [vmem:[#allocation14 + $0x814] sm:$0xf]  ;;  %v15984_v59 = vor.u32 %v18782_v10, %v15983_v58  ;;  %v15919_v12 = vld [vmem:[#allocation14 + $0x358] sm:$0xf] }
 0x6e5   :  { %10947 = vmatpush.bf16.msra.mxu2 %v16140_v43  ;;  %10977 = vmatpush.bf16.msrb.mxu0 %v16588_v26  ;;  %v16521_v9 = vld [vmem:[#allocation14 + $0x830] sm:$0xf0]  ;;  %v10717_v43 = vpop.f32.mrf.mxu1  ;;  %v16392_v26 = vor.u32 %v18885_v29, %v16391_v24  ;;  %v16327_v24 = vld [vmem:[#allocation14 + $0x690] sm:$0xf] }
 0x6e6   :  { %v18977_v33 = vld [vmem:[#allocation14 + $0xa14] sm:$0xf]  ;;  %v20948_v63 = vadd.f32 %v10717_v43, %v10704_v51  ;;  %10848 = vmatpush.bf16.msra.mxu3 %v16424_v48  ;;  %v16524_v13 = vor.u32 %v18913_v46, %v16521_v9  ;;  %v20950_v51 = vpop.f32.mrf.mxu2  ;;  %v16360_v48 = vor.u32 %v18877_v35, %v16359_v41  ;;  %v18869_v29 = vld [vmem:[#allocation14 + $0x6ac] sm:$0xf0]  ;;  %v18766_v43 = vld [vmem:[#allocation14 + $0x374] sm:$0xf0] }
 0x6e7   :  { %10991 = vmatpush.bf16.msrb.mxu1 %v16844_v15  ;;  %v16777_v17 = vld [vmem:[#allocation14 + $0xa30] sm:$0xf0]  ;;  %v16076_v15 = vor.u32 %v18801_v16, %v16073_v32  ;;  %21342 = vst [vmem:[#allocation36_spill] sm:$0xff] %v20950_v51  ;;  %v15952_v32 = vor.u32 %v18774_v36, %v15951_v20  ;;  %v16328_v14 = vor.u32 %v18869_v29, %v16327_v24  ;;  %v15631_v41 = vld [vmem:[#allocation14 + $0x118] sm:$0xf] }
 0x6e8   :  { %v16780_v7 = vor.u32 %v18977_v33, %v16777_v17  ;;  %v18793_v1 = vld [vmem:[#allocation14 + $0x454] sm:$0xf]  ;;  %v15663_v33 = vld [vmem:[#allocation14 + $0x158] sm:$0xf]  ;;  %v15920_v20 = vor.u32 %v18766_v43, %v15919_v12  ;;  %v17511_v24 = vld [vmem:[#allocation14 + $0xfd0] sm:$0xf] }
 0x6e9   :  { %10948 = vmatpush.bf16.msra.mxu2 %v16108_v27  ;;  %10978 = vmatpush.bf16.msrb.mxu0 %v16556_v0  ;;  %v16041_v53 = vld [vmem:[#allocation14 + $0x470] sm:$0xf0]  ;;  %v18702_v17 = vld [vmem:[#allocation14 + $0x174] sm:$0xf0]  ;;  %v19165_v29 = vld [vmem:[#allocation14 + $0xfec] sm:$0xf0] }
 0x6ea   :  { %10849 = vmatpush.bf16.msra.mxu3 %v16392_v26  ;;  %v16044_v27 = vor.u32 %v18793_v1, %v16041_v53  ;;  %v18785_v16 = vld [vmem:[#allocation14 + $0x414] sm:$0xf]  ;;  %v16295_v26 = vld [vmem:[#allocation14 + $0x650] sm:$0xf]  ;;  %v15664_v36 = vor.u32 %v18702_v17, %v15663_v33  ;;  %v18758_v35 = vld [vmem:[#allocation14 + $0x334] sm:$0xf0]  ;;  %v17512_v43 = vor.u32 %v19165_v29, %v17511_v24 }
 0x6eb   :  { %10992 = vmatpush.bf16.msrb.mxu1 %v16812_v61  ;;  %v16009_v0 = vld [vmem:[#allocation14 + $0x430] sm:$0xf0]  ;;  %v15696_v61 = vor.u32 %v18710_v2, %v15695_v22  ;;  %v15855_v33 = vld [vmem:[#allocation14 + $0x2d8] sm:$0xf]  ;;  %v15953_v51 = vld [vmem:[#allocation14 + $0x3b8] sm:$0xf0] }
 0x6ec   :  { %v19097_v46 = vld [vmem:[#allocation14 + $0xdd4] sm:$0xf]  ;;  %v16012_v58 = vor.u32 %v18785_v16, %v16009_v0  ;;  %v18750_v17 = vld [vmem:[#allocation14 + $0x2f4] sm:$0xf0] }
 0x6ed   :  { %10949 = vmatpush.bf16.msra.mxu2 %v16076_v15  ;;  %10979 = vmatpush.bf16.msrb.mxu0 %v16524_v13  ;;  %v17257_v9 = vld [vmem:[#allocation14 + $0xdf0] sm:$0xf0]  ;;  %v18861_v15 = vld [vmem:[#allocation14 + $0x66c] sm:$0xf0]  ;;  %v18694_v13 = vld [vmem:[#allocation14 + $0x134] sm:$0xf0] }
 0x6ee   :  { %10850 = vmatpush.bf16.msra.mxu3 %v16360_v48  ;;  %v17260_v10 = vor.u32 %v19097_v46, %v17257_v9  ;;  %v19089_v22 = vld [vmem:[#allocation14 + $0xd94] sm:$0xf]  ;;  %v20956_v1 = vpop.f32.mrf.mxu2  ;;  %v16296_v53 = vor.u32 %v18861_v15, %v16295_v26  ;;  %v15632_v16 = vor.u32 %v18694_v13, %v15631_v41  ;;  %v15599_v46 = vld [vmem:[#allocation14 + $0xd8] sm:$0xf]  ;;  %v15856_v15 = vor.u32 %v18750_v17, %v15855_v33 }
 0x6ef   :  { %10993 = vmatpush.bf16.msrb.mxu1 %v16780_v7  ;;  %v17225_v2 = vld [vmem:[#allocation14 + $0xdb0] sm:$0xf0]  ;;  %v15887_v7 = vld [vmem:[#allocation14 + $0x318] sm:$0xf]  ;;  %21343 = vst [vmem:[#allocation35_spill] sm:$0xff] %v20956_v1 }
 0x6f0   :  { %10980 = vmatmul.bf16.vlgmr.msrb.gmra.mxu0 %v20758_v4  ;;  %v17228_v48 = vor.u32 %v19089_v22, %v17225_v2  ;;  %v15888_v0 = vor.u32 %v18758_v35, %v15887_v7  ;;  %v18686_v9 = vld [vmem:[#allocation14 + $0xf4] sm:$0xf0] }
 0x6f1   :  { %11028 = vmatpush.bf16.msra.mxu0 %v15728_v28  ;;  %10950 = vmatpush.bf16.msra.mxu2 %v16044_v27  ;;  %v16263_v28 = vld [vmem:[#allocation14 + $0x610] sm:$0xf]  ;;  %v15600_v26 = vor.u32 %v18686_v9, %v15599_v46  ;;  %v15567_v22 = vld [vmem:[#allocation14 + $0x98] sm:$0xf] }
 0x6f2   :  { %10994 = vmatmul.bf16.vlgmr.msrb.gmra.mxu1 %v20760_v25  ;;  %10851 = vmatpush.bf16.msra.mxu3 %v16328_v14  ;;  %v18853_v27 = vld [vmem:[#allocation14 + $0x62c] sm:$0xf0]  ;;  %v18678_v2 = vld [vmem:[#allocation14 + $0xb4] sm:$0xf0] }
 0x6f3   :  { %11042 = vmatpush.bf16.msra.mxu1 %v15984_v59  ;;  %v20954_v59 = vpop.f32.mrf.mxu3  ;;  %v16264_v12 = vor.u32 %v18853_v27, %v16263_v28  ;;  %v15823_v41 = vld [vmem:[#allocation14 + $0x298] sm:$0xf]  ;;  %v17447_v28 = vld [vmem:[#allocation14 + $0xf50] sm:$0xf]  ;;  %v15568_v24 = vor.u32 %v18678_v2, %v15567_v22 }
 0x6f4   :  { %v18742_v13 = vld [vmem:[#allocation14 + $0x2b4] sm:$0xf0] }
 0x6f5   :  { %11029 = vmatpush.bf16.msra.mxu0 %v15696_v61  ;;  %10951 = vmatpush.bf16.msra.mxu2 %v16012_v58  ;;  %v19081_v61 = vld [vmem:[#allocation14 + $0xd54] sm:$0xf]  ;;  %v17479_v58 = vld [vmem:[#allocation14 + $0xf90] sm:$0xf]  ;;  %v15824_v29 = vor.u32 %v18742_v13, %v15823_v41  ;;  %v15791_v46 = vld [vmem:[#allocation14 + $0x258] sm:$0xf] }
 0x6f6   :  { %10852 = vmatpush.bf16.msra.mxu3 %v16296_v53  ;;  %v20961_v27 = vpop.f32.mrf.mxu2  ;;  %v18734_v9 = vld [vmem:[#allocation14 + $0x274] sm:$0xf0] }
 0x6f7   :  { %11043 = vmatpush.bf16.msra.mxu1 %v15952_v32  ;;  %v17193_v32 = vld [vmem:[#allocation14 + $0xd70] sm:$0xf0]  ;;  %21344 = vst [vmem:[#allocation43_spill] sm:$0xff] %v20961_v27  ;;  %v18726_v22 = vld [vmem:[#allocation14 + $0x234] sm:$0xf0] }
 0x6f8   :  { %10952 = vmatmul.bf16.vlgmr.msra.gmra.mxu2 %v20770_v62  ;;  %v17196_v14 = vor.u32 %v19081_v61, %v17193_v32  ;;  %v15535_v61 = vld [vmem:[#allocation14 + $0x58] sm:$0xf] }
 0x6f9   :  { %11000 = vmatpush.bf16.msrb.mxu2 %v17260_v10  ;;  %11030 = vmatpush.bf16.msra.mxu0 %v15664_v36  ;;  %v19157_v10 = vld [vmem:[#allocation14 + $0xfac] sm:$0xf0]  ;;  %v19073_v36 = vld [vmem:[#allocation14 + $0xd14] sm:$0xf]  ;;  %v18670_v32 = vld [vmem:[#allocation14 + $0x74] sm:$0xf0] }
 0x6fa   :  { %10853 = vmatpush.bf16.msra.mxu3 %v16264_v12  ;;  %v17480_v35 = vor.u32 %v19157_v10, %v17479_v58  ;;  %v17415_v12 = vld [vmem:[#allocation14 + $0xf10] sm:$0xf]  ;;  %v15536_v58 = vor.u32 %v18670_v32, %v15535_v61  ;;  %v15792_v10 = vor.u32 %v18734_v9, %v15791_v46  ;;  %v16751_v2 = vld [vmem:[#allocation14 + $0x9d8] sm:$0xf]  ;;  %v19049_v61 = vld [vmem:[#allocation14 + $0xc54] sm:$0xf] }
 0x6fb   :  { %11044 = vmatpush.bf16.msra.mxu1 %v15920_v20  ;;  %v17161_v20 = vld [vmem:[#allocation14 + $0xd30] sm:$0xf0]  ;;  %v20959_v7 = vpop.f32.mrf.mxu3  ;;  %v18974_v41 = vld [vmem:[#allocation14 + $0x9f4] sm:$0xf0] }
 0x6fc   :  { %v17164_v53 = vor.u32 %v19073_v36, %v17161_v20  ;;  %v18662_v36 = vld [vmem:[#allocation14 + $0x34] sm:$0xf0]  ;;  %v17065_v32 = vld [vmem:[#allocation14 + $0xc70] sm:$0xf0]  ;;  %v16752_v9 = vor.u32 %v18974_v41, %v16751_v2 }
 0x6fd   :  { %11001 = vmatpush.bf16.msrb.mxu2 %v17228_v48  ;;  %11031 = vmatpush.bf16.msra.mxu0 %v15632_v16  ;;  %v19149_v48 = vld [vmem:[#allocation14 + $0xf6c] sm:$0xf0]  ;;  %v19065_v16 = vld [vmem:[#allocation14 + $0xcd4] sm:$0xf]  ;;  %v15759_v20 = vld [vmem:[#allocation14 + $0x218] sm:$0xf] }
 0x6fe   :  { %10902 = vmatpush.bf16.msrb.mxu3 %v17512_v43  ;;  %v17448_v33 = vor.u32 %v19149_v48, %v17447_v28  ;;  %v19141_v43 = vld [vmem:[#allocation14 + $0xf2c] sm:$0xf0]  ;;  %v17007_v13 = vld [vmem:[#allocation14 + $0xbd8] sm:$0xf] }
 0x6ff   :  { %11045 = vmatpush.bf16.msra.mxu1 %v15888_v0  ;;  %v17129_v0 = vld [vmem:[#allocation14 + $0xcf0] sm:$0xf0]  ;;  %10854 = vmatmul.bf16.vlgmr.msra.gmra.mxu3 %v20772_v31  ;;  %v19038_v1 = vld [vmem:[#allocation14 + $0xbf4] sm:$0xf0]  ;;  %v17383_v28 = vld [vmem:[#allocation14 + $0xed0] sm:$0xf] }
 0x700   :  { %v17132_v17 = vor.u32 %v19065_v16, %v17129_v0  ;;  %v15760_v16 = vor.u32 %v18726_v22, %v15759_v20  ;;  %v19133_v0 = vld [vmem:[#allocation14 + $0xeec] sm:$0xf0]  ;;  %v17008_v27 = vor.u32 %v19038_v1, %v17007_v13  ;;  %v16239_v20 = vld [vmem:[#allocation14 + $0x5d8] sm:$0xf] }
 0x701   :  { %11002 = vmatpush.bf16.msrb.mxu2 %v17196_v14  ;;  %11032 = vmatpush.bf16.msra.mxu0 %v15600_v26  ;;  %v19057_v14 = vld [vmem:[#allocation14 + $0xc94] sm:$0xf]  ;;  %v18846_v1 = vld [vmem:[#allocation14 + $0x5f4] sm:$0xf0] }
 0x702   :  { %10903 = vmatpush.bf16.msrb.mxu3 %v17480_v35  ;;  %v17097_v26 = vld [vmem:[#allocation14 + $0xcb0] sm:$0xf0]  ;;  %v17416_v35 = vor.u32 %v19141_v43, %v17415_v12  ;;  %v16975_v12 = vld [vmem:[#allocation14 + $0xb98] sm:$0xf] }
 0x703   :  { %11046 = vmatpush.bf16.msra.mxu1 %v15856_v15  ;;  %v15503_v15 = vld [vmem:[#allocation14 + $0x18] sm:$0xf]  ;;  %v20964_v48 = vpop.f32.mrf.mxu3 }
 0x704   :  { %v19030_v43 = vld [vmem:[#allocation14 + $0xbb4] sm:$0xf0] }
 0x705   :  { %11003 = vmatpush.bf16.msrb.mxu2 %v17164_v53  ;;  %11033 = vmatpush.bf16.msra.mxu0 %v15568_v24  ;;  %v17100_v53 = vor.u32 %v19057_v14, %v17097_v26  ;;  %v10729_v24 = vpop.f32.mrf.mxu2  ;;  %v17384_v14 = vor.u32 %v19133_v0, %v17383_v28  ;;  %v17068_v26 = vor.u32 %v19049_v61, %v17065_v32  ;;  %v16687_v2 = vld [vmem:[#allocation14 + $0x958] sm:$0xf] }
 0x706   :  { %10904 = vmatpush.bf16.msrb.mxu3 %v17448_v33  ;;  %v20967_v46 = vadd.f32 %v10729_v24, %v20940_v42  ;;  %v16719_v33 = vld [vmem:[#allocation14 + $0x998] sm:$0xf]  ;;  %v16976_v22 = vor.u32 %v19030_v43, %v16975_v12 }
 0x707   :  { %11047 = vmatpush.bf16.msra.mxu1 %v15824_v29  ;;  %v15504_v29 = vor.u32 %v18662_v36, %v15503_v15  ;;  %v19041_v15 = vld [vmem:[#allocation14 + $0xc14] sm:$0xf]  ;;  %v18958_v41 = vld [vmem:[#allocation14 + $0x974] sm:$0xf0] }
 0x708   :  { %v17033_v36 = vld [vmem:[#allocation14 + $0xc30] sm:$0xf0]  ;;  %v16943_v13 = vld [vmem:[#allocation14 + $0xb58] sm:$0xf]  ;;  %v16688_v61 = vor.u32 %v18958_v41, %v16687_v2 }
 0x709   :  { %11004 = vmatpush.bf16.msrb.mxu2 %v17132_v17  ;;  %11034 = vmatpush.bf16.msra.mxu0 %v15536_v58  ;;  %v18966_v17 = vld [vmem:[#allocation14 + $0x9b4] sm:$0xf0]  ;;  %v17351_v58 = vld [vmem:[#allocation14 + $0xe90] sm:$0xf] }
 0x70a   :  { %10905 = vmatpush.bf16.msrb.mxu3 %v17416_v35  ;;  %v16720_v42 = vor.u32 %v18966_v17, %v16719_v33  ;;  %v19022_v24 = vld [vmem:[#allocation14 + $0xb74] sm:$0xf0] }
 0x70b   :  { %11048 = vmatpush.bf16.msra.mxu1 %v15792_v10  ;;  %v19125_v10 = vld [vmem:[#allocation14 + $0xeac] sm:$0xf0]  ;;  %v10631_v28 = vpop.f32.mrf.mxu3  ;;  %v16944_v33 = vor.u32 %v19022_v24, %v16943_v13  ;;  %v16207_v17 = vld [vmem:[#allocation14 + $0x598] sm:$0xf] }
 0x70c   :  { %v17352_v35 = vor.u32 %v19125_v10, %v17351_v58  ;;  %v20972_v32 = vadd.f32 %v10631_v28, %v20923_v45  ;;  %v18838_v12 = vld [vmem:[#allocation14 + $0x5b4] sm:$0xf0]  ;;  %v19109_v45 = vld [vmem:[#allocation14 + $0xe2c] sm:$0xf0] }
 0x70d   :  { %11005 = vmatpush.bf16.msrb.mxu2 %v17100_v53  ;;  %11035 = vmatpush.bf16.msra.mxu0 %v15504_v29  ;;  %v17036_v53 = vor.u32 %v19041_v15, %v17033_v36  ;;  %v10731_v0 = vpop.f32.mrf.mxu2  ;;  %v16240_v29 = vor.u32 %v18846_v1, %v16239_v20  ;;  %v16655_v43 = vld [vmem:[#allocation14 + $0x918] sm:$0xf]  ;;  %v17287_v15 = vld [vmem:[#allocation14 + $0xe10] sm:$0xf]  ;;  %v16208_v36 = vor.u32 %v18838_v12, %v16207_v17  ;;  %v18905_v20 = vld [vmem:[#allocation14 + $0x7d4] sm:$0xf] }
 0x70e   :  { %10906 = vmatpush.bf16.msrb.mxu3 %v17384_v14  ;;  %21345 = vst [vmem:[#allocation69_spill] sm:$0xff] %v20972_v32  ;;  %v18950_v14 = vld [vmem:[#allocation14 + $0x934] sm:$0xf0]  ;;  %v16489_v1 = vld [vmem:[#allocation14 + $0x7f0] sm:$0xf0] }
 0x70f   :  { %11049 = vmatpush.bf16.msra.mxu1 %v15760_v16  ;;  %v17319_v16 = vld [vmem:[#allocation14 + $0xe50] sm:$0xf]  ;;  %v19014_v58 = vld [vmem:[#allocation14 + $0xb34] sm:$0xf0]  ;;  %v16492_v28 = vor.u32 %v18905_v20, %v16489_v1  ;;  %v18770_v32 = vld [vmem:[#allocation14 + $0x39c] sm:$0xf] }
 0x710   :  { %11036 = vmatmul.bf16.vlgmr.msra.gmra.mxu0 %v20672_v39  ;;  %v18830_v2 = vld [vmem:[#allocation14 + $0x574] sm:$0xf0] }
 0x711   :  { %11084 = vmatpush.bf16.msrb.mxu0 %v16752_v9  ;;  %11006 = vmatpush.bf16.msrb.mxu2 %v17068_v26  ;;  %v20975_v9 = vadd.f32 %v10731_v0, %v20948_v63  ;;  %v16911_v26 = vld [vmem:[#allocation14 + $0xb18] sm:$0xf]  ;;  %v16656_v63 = vor.u32 %v18950_v14, %v16655_v43 }
 0x712   :  { %11050 = vmatmul.bf16.vlgmr.msra.gmra.mxu1 %v20674_v8  ;;  %10907 = vmatpush.bf16.msrb.mxu3 %v17352_v35  ;;  %v16623_v41 = vld [vmem:[#allocation14 + $0x8d8] sm:$0xf] }
 0x713   :  { %11098 = vmatpush.bf16.msrb.mxu1 %v17008_v27  ;;  %v19117_v27 = vld [vmem:[#allocation14 + $0xe6c] sm:$0xf0]  ;;  %v18942_v13 = vld [vmem:[#allocation14 + $0x8f4] sm:$0xf0] }
 0x714   :  { %v17320_v10 = vor.u32 %v19117_v27, %v17319_v16  ;;  %v16879_v24 = vld [vmem:[#allocation14 + $0xad8] sm:$0xf]  ;;  %v16457_v16 = vld [vmem:[#allocation14 + $0x7b0] sm:$0xf0]  ;;  %v16624_v27 = vor.u32 %v18942_v13, %v16623_v41 }
 0x715   :  { %11085 = vmatpush.bf16.msrb.mxu0 %v16720_v42  ;;  %11007 = vmatpush.bf16.msrb.mxu2 %v17036_v53  ;;  %v16912_v42 = vor.u32 %v19014_v58, %v16911_v26  ;;  %v19006_v35 = vld [vmem:[#allocation14 + $0xaf4] sm:$0xf0]  ;;  %v17288_v53 = vor.u32 %v19109_v45, %v17287_v15  ;;  %v18889_v15 = vld [vmem:[#allocation14 + $0x754] sm:$0xf] }
 0x716   :  { %10908 = vmatpush.bf16.msrb.mxu3 %v17320_v10  ;;  %v18822_v17 = vld [vmem:[#allocation14 + $0x534] sm:$0xf0] }
 0x717   :  { %11099 = vmatpush.bf16.msrb.mxu1 %v16976_v22  ;;  %v16175_v22 = vld [vmem:[#allocation14 + $0x558] sm:$0xf] }
 0x718   :  { %11008 = vmatmul.bf16.vlgmr.msrb.gmra.mxu2 %v20780_v54  ;;  %v16176_v0 = vor.u32 %v18830_v2, %v16175_v22  ;;  %v16591_v12 = vld [vmem:[#allocation14 + $0x898] sm:$0xf] }
 0x719   :  { %11056 = vmatpush.bf16.msra.mxu2 %v16240_v29  ;;  %11086 = vmatpush.bf16.msrb.mxu0 %v16688_v61  ;;  %v18897_v29 = vld [vmem:[#allocation14 + $0x794] sm:$0xf]  ;;  %v16880_v61 = vor.u32 %v19006_v35, %v16879_v24  ;;  %v18934_v43 = vld [vmem:[#allocation14 + $0x8b4] sm:$0xf0] }
 0x71a   :  { %v16847_v14 = vld [vmem:[#allocation14 + $0xa98] sm:$0xf]  ;;  %10909 = vmatpush.bf16.msrb.mxu3 %v17288_v53  ;;  %v16460_v58 = vor.u32 %v18897_v29, %v16457_v16  ;;  %v16592_v45 = vor.u32 %v18934_v43, %v16591_v12  ;;  %v18881_v35 = vld [vmem:[#allocation14 + $0x714] sm:$0xf]  ;;  %v18714_v12 = vld [vmem:[#allocation14 + $0x1dc] sm:$0xf] }
 0x71b   :  { %11100 = vmatpush.bf16.msrb.mxu1 %v16944_v33  ;;  %v16143_v33 = vld [vmem:[#allocation14 + $0x518] sm:$0xf]  ;;  %v16393_v53 = vld [vmem:[#allocation14 + $0x730] sm:$0xf0]  ;;  %v15729_v43 = vld [vmem:[#allocation14 + $0x1f8] sm:$0xf0] }
 0x71c   :  { %v18998_v26 = vld [vmem:[#allocation14 + $0xab4] sm:$0xf0]  ;;  %v16144_v10 = vor.u32 %v18822_v17, %v16143_v33 }
 0x71d   :  { %11057 = vmatpush.bf16.msra.mxu2 %v16208_v36  ;;  %11087 = vmatpush.bf16.msrb.mxu0 %v16656_v63  ;;  %v16425_v36 = vld [vmem:[#allocation14 + $0x770] sm:$0xf0]  ;;  %v16848_v20 = vor.u32 %v18998_v26, %v16847_v14  ;;  %v16111_v1 = vld [vmem:[#allocation14 + $0x4d8] sm:$0xf]  ;;  %v18778_v14 = vld [vmem:[#allocation14 + $0x3dc] sm:$0xf] }
 0x71e   :  { %10958 = vmatpush.bf16.msra.mxu3 %v16492_v28  ;;  %v18814_v63 = vld [vmem:[#allocation14 + $0x4f4] sm:$0xf0]  ;;  %v16428_v13 = vor.u32 %v18889_v15, %v16425_v36  ;;  %v15985_v26 = vld [vmem:[#allocation14 + $0x3f8] sm:$0xf0]  ;;  %v18873_v15 = vld [vmem:[#allocation14 + $0x6d4] sm:$0xf] }
 0x71f   :  { %11101 = vmatpush.bf16.msrb.mxu1 %v16912_v42  ;;  %v16559_v42 = vld [vmem:[#allocation14 + $0x858] sm:$0xf]  ;;  %10910 = vmatmul.bf16.vlgmr.msrb.gmra.mxu3 %v20841_v60  ;;  %v16112_v24 = vor.u32 %v18814_v63, %v16111_v1 }
 0x720   :  { %v18926_v22 = vld [vmem:[#allocation14 + $0x874] sm:$0xf0] }
 0x721   :  { %11058 = vmatpush.bf16.msra.mxu2 %v16176_v0  ;;  %11088 = vmatpush.bf16.msrb.mxu0 %v16624_v27  ;;  %v16815_v2 = vld [vmem:[#allocation14 + $0xa58] sm:$0xf]  ;;  %v16560_v0 = vor.u32 %v18926_v22, %v16559_v42  ;;  %v15732_v42 = vor.u32 %v18714_v12, %v15729_v43  ;;  %v15988_v22 = vor.u32 %v18778_v14, %v15985_v26  ;;  %v18762_v12 = vld [vmem:[#allocation14 + $0x35c] sm:$0xf] }
 0x722   :  { %v18990_v41 = vld [vmem:[#allocation14 + $0xa74] sm:$0xf0]  ;;  %10959 = vmatpush.bf16.msra.mxu3 %v16460_v58  ;;  %v16396_v58 = vor.u32 %v18881_v35, %v16393_v53  ;;  %v18865_v35 = vld [vmem:[#allocation14 + $0x694] sm:$0xf]  ;;  %v15921_v43 = vld [vmem:[#allocation14 + $0x378] sm:$0xf0] }
 0x723   :  { %11102 = vmatpush.bf16.msrb.mxu1 %v16880_v61  ;;  %v16079_v28 = vld [vmem:[#allocation14 + $0x498] sm:$0xf]  ;;  %v16816_v29 = vor.u32 %v18990_v41, %v16815_v2  ;;  %v18706_v2 = vld [vmem:[#allocation14 + $0x19c] sm:$0xf]  ;;  %v16329_v53 = vld [vmem:[#allocation14 + $0x6b0] sm:$0xf0] }
 0x724   :  { %v18806_v16 = vld [vmem:[#allocation14 + $0x4b4] sm:$0xf0]  ;;  %v15697_v41 = vld [vmem:[#allocation14 + $0x1b8] sm:$0xf0]  ;;  %v16332_v14 = vor.u32 %v18865_v35, %v16329_v53  ;;  %v19161_v35 = vld [vmem:[#allocation14 + $0xfd4] sm:$0xf] }
 0x725   :  { %11059 = vmatpush.bf16.msra.mxu2 %v16144_v10  ;;  %11089 = vmatpush.bf16.msrb.mxu0 %v16592_v45  ;;  %v16527_v27 = vld [vmem:[#allocation14 + $0x818] sm:$0xf]  ;;  %v16080_v10 = vor.u32 %v18806_v16, %v16079_v28  ;;  %v15956_v16 = vor.u32 %v18770_v32, %v15953_v51  ;;  %v15924_v32 = vor.u32 %v18762_v12, %v15921_v43  ;;  %v17513_v53 = vld [vmem:[#allocation14 + $0xff0] sm:$0xf0] }
 0x726   :  { %v18918_v61 = vld [vmem:[#allocation14 + $0x834] sm:$0xf0]  ;;  %10960 = vmatpush.bf16.msra.mxu3 %v16428_v13  ;;  %v17516_v43 = vor.u32 %v19161_v35, %v17513_v53 }
 0x727   :  { %11103 = vmatpush.bf16.msrb.mxu1 %v16848_v20  ;;  %v16783_v33 = vld [vmem:[#allocation14 + $0xa18] sm:$0xf]  ;;  %v16528_v36 = vor.u32 %v18918_v61, %v16527_v27  ;;  %v16361_v20 = vld [vmem:[#allocation14 + $0x6f0] sm:$0xf0] }
 0x728   :  { %v18982_v17 = vld [vmem:[#allocation14 + $0xa34] sm:$0xf0]  ;;  %v16364_v13 = vor.u32 %v18873_v15, %v16361_v20  ;;  %v16297_v15 = vld [vmem:[#allocation14 + $0x670] sm:$0xf0]  ;;  %v18690_v20 = vld [vmem:[#allocation14 + $0x11c] sm:$0xf] }
 0x729   :  { %11060 = vmatpush.bf16.msra.mxu2 %v16112_v24  ;;  %11090 = vmatpush.bf16.msrb.mxu0 %v16560_v0  ;;  %v16784_v45 = vor.u32 %v18982_v17, %v16783_v33  ;;  %v16047_v1 = vld [vmem:[#allocation14 + $0x458] sm:$0xf]  ;;  %v18698_v33 = vld [vmem:[#allocation14 + $0x15c] sm:$0xf] }
 0x72a   :  { %v18798_v63 = vld [vmem:[#allocation14 + $0x474] sm:$0xf0]  ;;  %10961 = vmatpush.bf16.msra.mxu3 %v16396_v58  ;;  %v15665_v17 = vld [vmem:[#allocation14 + $0x178] sm:$0xf0] }
 0x72b   :  { %11104 = vmatpush.bf16.msrb.mxu1 %v16816_v29  ;;  %v16048_v24 = vor.u32 %v18798_v63, %v16047_v1  ;;  %v16015_v28 = vld [vmem:[#allocation14 + $0x418] sm:$0xf]  ;;  %v15700_v29 = vor.u32 %v18706_v2, %v15697_v41  ;;  %v15668_v51 = vor.u32 %v18698_v33, %v15665_v17  ;;  %v15633_v1 = vld [vmem:[#allocation14 + $0x138] sm:$0xf0]  ;;  %v18849_v41 = vld [vmem:[#allocation14 + $0x614] sm:$0xf] }
 0x72c   :  { %v18790_v0 = vld [vmem:[#allocation14 + $0x434] sm:$0xf0]  ;;  %v18754_v63 = vld [vmem:[#allocation14 + $0x31c] sm:$0xf] }
 0x72d   :  { %11061 = vmatpush.bf16.msra.mxu2 %v16080_v10  ;;  %11091 = vmatpush.bf16.msrb.mxu0 %v16528_v36  ;;  %v17263_v27 = vld [vmem:[#allocation14 + $0xdd8] sm:$0xf]  ;;  %v16016_v26 = vor.u32 %v18790_v0, %v16015_v28  ;;  %v18857_v10 = vld [vmem:[#allocation14 + $0x654] sm:$0xf]  ;;  %v15636_v28 = vor.u32 %v18690_v20, %v15633_v1  ;;  %v18746_v33 = vld [vmem:[#allocation14 + $0x2dc] sm:$0xf] }
 0x72e   :  { %v19102_v61 = vld [vmem:[#allocation14 + $0xdf4] sm:$0xf0]  ;;  %10962 = vmatpush.bf16.msra.mxu3 %v16364_v13  ;;  %v16300_v2 = vor.u32 %v18857_v10, %v16297_v15  ;;  %v15857_v17 = vld [vmem:[#allocation14 + $0x2f8] sm:$0xf0] }
 0x72f   :  { %11105 = vmatpush.bf16.msrb.mxu1 %v16784_v45  ;;  %v17264_v58 = vor.u32 %v19102_v61, %v17263_v27  ;;  %v17231_v36 = vld [vmem:[#allocation14 + $0xd98] sm:$0xf]  ;;  %v18682_v27 = vld [vmem:[#allocation14 + $0xdc] sm:$0xf]  ;;  %v15860_v15 = vor.u32 %v18746_v33, %v15857_v17  ;;  %v19137_v17 = vld [vmem:[#allocation14 + $0xf14] sm:$0xf] }
 0x730   :  { %11092 = vmatmul.bf16.vlgmr.msrb.gmra.mxu0 %v20758_v4  ;;  %v19094_v45 = vld [vmem:[#allocation14 + $0xdb4] sm:$0xf0]  ;;  %v15601_v61 = vld [vmem:[#allocation14 + $0xf8] sm:$0xf0] }
 0x731   :  { %11140 = vmatpush.bf16.msra.mxu0 %v15732_v42  ;;  %11062 = vmatpush.bf16.msra.mxu2 %v16048_v24  ;;  %v15889_v42 = vld [vmem:[#allocation14 + $0x338] sm:$0xf0]  ;;  %v17232_v13 = vor.u32 %v19094_v45, %v17231_v36  ;;  %v16265_v24 = vld [vmem:[#allocation14 + $0x630] sm:$0xf0]  ;;  %v15604_v10 = vor.u32 %v18682_v27, %v15601_v61  ;;  %v17135_v53 = vld [vmem:[#allocation14 + $0xcd8] sm:$0xf] }
 0x732   :  { %11106 = vmatmul.bf16.vlgmr.msrb.gmra.mxu1 %v20760_v25  ;;  %10963 = vmatpush.bf16.msra.mxu3 %v16332_v14  ;;  %v15892_v0 = vor.u32 %v18754_v63, %v15889_v42  ;;  %v16268_v12 = vor.u32 %v18849_v41, %v16265_v24  ;;  %v18674_v36 = vld [vmem:[#allocation14 + $0x9c] sm:$0xf]  ;;  %v19145_v41 = vld [vmem:[#allocation14 + $0xf54] sm:$0xf] }
 0x733   :  { %11154 = vmatpush.bf16.msra.mxu1 %v15988_v22  ;;  %v20981_v22 = vpop.f32.mrf.mxu3  ;;  %v15569_v45 = vld [vmem:[#allocation14 + $0xb8] sm:$0xf0] }
 0x734   :  { %21346 = vst [vmem:[#allocation37_spill] sm:$0xff] %v20981_v22  ;;  %v18738_v20 = vld [vmem:[#allocation14 + $0x29c] sm:$0xf]  ;;  %v15572_v24 = vor.u32 %v18674_v36, %v15569_v45 }
 0x735   :  { %11141 = vmatpush.bf16.msra.mxu0 %v15700_v29  ;;  %11063 = vmatpush.bf16.msra.mxu2 %v16016_v26  ;;  %v17199_v29 = vld [vmem:[#allocation14 + $0xd58] sm:$0xf]  ;;  %v19153_v26 = vld [vmem:[#allocation14 + $0xf94] sm:$0xf]  ;;  %v15825_v1 = vld [vmem:[#allocation14 + $0x2b8] sm:$0xf0] }
 0x736   :  { %10964 = vmatpush.bf16.msra.mxu3 %v16300_v2  ;;  %v15828_v35 = vor.u32 %v18738_v20, %v15825_v1  ;;  %v15793_v27 = vld [vmem:[#allocation14 + $0x278] sm:$0xf0] }
 0x737   :  { %11155 = vmatpush.bf16.msra.mxu1 %v15956_v16  ;;  %v19086_v16 = vld [vmem:[#allocation14 + $0xd74] sm:$0xf0]  ;;  %v18970_v36 = vld [vmem:[#allocation14 + $0x9dc] sm:$0xf] }
 0x738   :  { %11064 = vmatmul.bf16.vlgmr.msra.gmra.mxu2 %v20770_v62  ;;  %v17200_v14 = vor.u32 %v19086_v16, %v17199_v29  ;;  %v15537_v29 = vld [vmem:[#allocation14 + $0x78] sm:$0xf0] }
 0x739   :  { %11112 = vmatpush.bf16.msrb.mxu2 %v17264_v58  ;;  %11142 = vmatpush.bf16.msra.mxu0 %v15668_v51  ;;  %v17481_v58 = vld [vmem:[#allocation14 + $0xfb0] sm:$0xf0]  ;;  %v17167_v51 = vld [vmem:[#allocation14 + $0xd18] sm:$0xf]  ;;  %v18730_v16 = vld [vmem:[#allocation14 + $0x25c] sm:$0xf] }
 0x73a   :  { %10965 = vmatpush.bf16.msra.mxu3 %v16268_v12  ;;  %v17484_v42 = vor.u32 %v19153_v26, %v17481_v58  ;;  %v17417_v12 = vld [vmem:[#allocation14 + $0xf30] sm:$0xf0]  ;;  %v15796_v26 = vor.u32 %v18730_v16, %v15793_v27  ;;  %v19062_v58 = vld [vmem:[#allocation14 + $0xcb4] sm:$0xf0]  ;;  %v16753_v45 = vld [vmem:[#allocation14 + $0x9f8] sm:$0xf0] }
 0x73b   :  { %11156 = vmatpush.bf16.msra.mxu1 %v15924_v32  ;;  %v19078_v32 = vld [vmem:[#allocation14 + $0xd34] sm:$0xf0]  ;;  %v20984_v63 = vpop.f32.mrf.mxu3  ;;  %v19034_v20 = vld [vmem:[#allocation14 + $0xbdc] sm:$0xf] }
 0x73c   :  { %21347 = vst [vmem:[#allocation56_spill] sm:$0xff] %v20984_v63  ;;  %v17168_v2 = vor.u32 %v19078_v32, %v17167_v51  ;;  %v18722_v51 = vld [vmem:[#allocation14 + $0x21c] sm:$0xf] }
 0x73d   :  { %11113 = vmatpush.bf16.msrb.mxu2 %v17232_v13  ;;  %11143 = vmatpush.bf16.msra.mxu0 %v15636_v28  ;;  %v17449_v13 = vld [vmem:[#allocation14 + $0xf70] sm:$0xf0]  ;;  %v19070_v28 = vld [vmem:[#allocation14 + $0xcf4] sm:$0xf0]  ;;  %v15761_v32 = vld [vmem:[#allocation14 + $0x238] sm:$0xf0] }
 0x73e   :  { %11014 = vmatpush.bf16.msrb.mxu3 %v17516_v43  ;;  %v17452_v61 = vor.u32 %v19145_v41, %v17449_v13  ;;  %v17136_v33 = vor.u32 %v19070_v28, %v17135_v53  ;;  %v17103_v43 = vld [vmem:[#allocation14 + $0xc98] sm:$0xf]  ;;  %v17009_v1 = vld [vmem:[#allocation14 + $0xbf8] sm:$0xf0]  ;;  %v19129_v41 = vld [vmem:[#allocation14 + $0xed4] sm:$0xf] }
 0x73f   :  { %11157 = vmatpush.bf16.msra.mxu1 %v15892_v0  ;;  %v18666_v0 = vld [vmem:[#allocation14 + $0x5c] sm:$0xf]  ;;  %10966 = vmatmul.bf16.vlgmr.msra.gmra.mxu3 %v20772_v31  ;;  %v17385_v53 = vld [vmem:[#allocation14 + $0xef0] sm:$0xf0]  ;;  %v17071_v28 = vld [vmem:[#allocation14 + $0xc58] sm:$0xf]  ;;  %v17012_v16 = vor.u32 %v19034_v20, %v17009_v1 }
 0x740   :  { %v18962_v27 = vld [vmem:[#allocation14 + $0x99c] sm:$0xf] }
 0x741   :  { %11114 = vmatpush.bf16.msrb.mxu2 %v17200_v14  ;;  %11144 = vmatpush.bf16.msra.mxu0 %v15604_v10  ;;  %v15540_v14 = vor.u32 %v18666_v0, %v15537_v29  ;;  %v18658_v10 = vld [vmem:[#allocation14 + $0x1c] sm:$0xf]  ;;  %v19054_v0 = vld [vmem:[#allocation14 + $0xc74] sm:$0xf0]  ;;  %v16756_v29 = vor.u32 %v18970_v36, %v16753_v45 }
 0x742   :  { %11015 = vmatpush.bf16.msrb.mxu3 %v17484_v42  ;;  %v17420_v42 = vor.u32 %v19137_v17, %v17417_v12  ;;  %v16721_v63 = vld [vmem:[#allocation14 + $0x9b8] sm:$0xf0]  ;;  %v19121_v17 = vld [vmem:[#allocation14 + $0xe94] sm:$0xf] }
 0x743   :  { %11158 = vmatpush.bf16.msra.mxu1 %v15860_v15  ;;  %v15505_v15 = vld [vmem:[#allocation14 + $0x38] sm:$0xf0]  ;;  %v20987_v13 = vpop.f32.mrf.mxu3  ;;  %v17353_v12 = vld [vmem:[#allocation14 + $0xeb0] sm:$0xf0] }
 0x744   :  { %v19026_v22 = vld [vmem:[#allocation14 + $0xb9c] sm:$0xf]  ;;  %v17356_v20 = vor.u32 %v19121_v17, %v17353_v12  ;;  %v10785_v17 = vpop.f32.mrf.mxu2 }
 0x745   :  { %11115 = vmatpush.bf16.msrb.mxu2 %v17168_v2  ;;  %11145 = vmatpush.bf16.msra.mxu0 %v15572_v24  ;;  %v17104_v2 = vor.u32 %v19062_v58, %v17103_v43  ;;  %v15508_v24 = vor.u32 %v18658_v10, %v15505_v15  ;;  %v17039_v43 = vld [vmem:[#allocation14 + $0xc18] sm:$0xf]  ;;  %v16980_v58 = vor.u32 %v19026_v22, %v16977_v57  ;;  %v18842_v10 = vld [vmem:[#allocation14 + $0x5dc] sm:$0xf] }
 0x746   :  { %11016 = vmatpush.bf16.msrb.mxu3 %v17452_v61  ;;  %v17388_v61 = vor.u32 %v19129_v41, %v17385_v53  ;;  %v16241_v15 = vld [vmem:[#allocation14 + $0x5f8] sm:$0xf0] }
 0x747   :  { %11159 = vmatpush.bf16.msra.mxu1 %v15828_v35  ;;  %v15764_v35 = vor.u32 %v18722_v51, %v15761_v32  ;;  %v18954_v51 = vld [vmem:[#allocation14 + $0x95c] sm:$0xf]  ;;  %v16244_v41 = vor.u32 %v18842_v10, %v16241_v15 }
 0x748   :  { %v16689_v32 = vld [vmem:[#allocation14 + $0x978] sm:$0xf0] }
 0x749   :  { %11116 = vmatpush.bf16.msrb.mxu2 %v17136_v33  ;;  %11146 = vmatpush.bf16.msra.mxu0 %v15540_v14  ;;  %v17072_v33 = vor.u32 %v19054_v0, %v17071_v28  ;;  %v19046_v14 = vld [vmem:[#allocation14 + $0xc34] sm:$0xf0]  ;;  %v19018_v36 = vld [vmem:[#allocation14 + $0xb5c] sm:$0xf]  ;;  %v16692_v22 = vor.u32 %v18954_v51, %v16689_v32 }
 0x74a   :  { %11017 = vmatpush.bf16.msrb.mxu3 %v17420_v42  ;;  %v16945_v45 = vld [vmem:[#allocation14 + $0xb78] sm:$0xf0]  ;;  %v17040_v1 = vor.u32 %v19046_v14, %v17039_v43  ;;  %v10757_v42 = vpop.f32.mrf.mxu0  ;;  %v16495_v43 = vld [vmem:[#allocation14 + $0x7d8] sm:$0xf] }
 0x74b   :  { %11160 = vmatpush.bf16.msra.mxu1 %v15796_v26  ;;  %v16724_v26 = vor.u32 %v18962_v27, %v16721_v63  ;;  %v17321_v63 = vld [vmem:[#allocation14 + $0xe70] sm:$0xf0]  ;;  %v18834_v53 = vld [vmem:[#allocation14 + $0x59c] sm:$0xf]  ;;  %v18910_v14 = vld [vmem:[#allocation14 + $0x7f4] sm:$0xf0] }
 0x74c   :  { %v16209_v28 = vld [vmem:[#allocation14 + $0x5b8] sm:$0xf0] }
 0x74d   :  { %11117 = vmatpush.bf16.msrb.mxu2 %v17104_v2  ;;  %11147 = vmatpush.bf16.msra.mxu0 %v15508_v24  ;;  %v10743_v2 = vpop.f32.mrf.mxu3  ;;  %v19113_v24 = vld [vmem:[#allocation14 + $0xe54] sm:$0xf]  ;;  %v18946_v0 = vld [vmem:[#allocation14 + $0x91c] sm:$0xf]  ;;  %v16212_v12 = vor.u32 %v18834_v53, %v16209_v28 }
 0x74e   :  { %11018 = vmatpush.bf16.msrb.mxu3 %v17388_v61  ;;  %v10744_v57 = vadd.f32 %v10743_v2, %v20967_v46  ;;  %v19010_v27 = vld [vmem:[#allocation14 + $0xb1c] sm:$0xf]  ;;  %v17289_v46 = vld [vmem:[#allocation14 + $0xe30] sm:$0xf0] }
 0x74f   :  { %11161 = vmatpush.bf16.msra.mxu1 %v15764_v35  ;;  %v16948_v35 = vor.u32 %v19018_v36, %v16945_v45  ;;  %v16913_v61 = vld [vmem:[#allocation14 + $0xb38] sm:$0xf0] }
 0x750   :  { %11148 = vmatmul.bf16.vlgmr.msra.gmra.mxu0 %v20672_v39  ;;  %v17324_v39 = vor.u32 %v19113_v24, %v17321_v63  ;;  %v18826_v10 = vld [vmem:[#allocation14 + $0x55c] sm:$0xf]  ;;  %v16463_v63 = vld [vmem:[#allocation14 + $0x798] sm:$0xf] }
 0x751   :  { %11196 = vmatpush.bf16.msrb.mxu0 %v16756_v29  ;;  %11118 = vmatpush.bf16.msrb.mxu2 %v17072_v33  ;;  %v10771_v29 = vpop.f32.mrf.mxu1  ;;  %v10758_v33 = vadd.f32 %v10757_v42, %v10744_v57  ;;  %v16177_v15 = vld [vmem:[#allocation14 + $0x578] sm:$0xf0]  ;;  %v18902_v57 = vld [vmem:[#allocation14 + $0x7b4] sm:$0xf0] }
 0x752   :  { %11162 = vmatmul.bf16.vlgmr.msra.gmra.mxu1 %v20674_v8  ;;  %11019 = vmatpush.bf16.msrb.mxu3 %v17356_v20  ;;  %v19105_v8 = vld [vmem:[#allocation14 + $0xe14] sm:$0xf]  ;;  %v18938_v51 = vld [vmem:[#allocation14 + $0x8dc] sm:$0xf]  ;;  %v16180_v24 = vor.u32 %v18826_v10, %v16177_v15 }
 0x753   :  { %11210 = vmatpush.bf16.msrb.mxu1 %v17012_v16  ;;  %v16657_v16 = vld [vmem:[#allocation14 + $0x938] sm:$0xf0]  ;;  %v10772_v32 = vadd.f32 %v10771_v29, %v10758_v33 }
 0x754   :  { %v16625_v36 = vld [vmem:[#allocation14 + $0x8f8] sm:$0xf0] }
 0x755   :  { %11197 = vmatpush.bf16.msrb.mxu0 %v16724_v26  ;;  %11119 = vmatpush.bf16.msrb.mxu2 %v17040_v1  ;;  %v16660_v26 = vor.u32 %v18946_v0, %v16657_v16  ;;  %v19002_v45 = vld [vmem:[#allocation14 + $0xadc] sm:$0xf]  ;;  %v17292_v1 = vor.u32 %v19105_v8, %v17289_v46  ;;  %v20993_v42 = vadd.f32 %v10785_v17, %v10772_v32  ;;  %v10745_v2 = vpop.f32.mrf.mxu3  ;;  %v10759_v16 = vpop.f32.mrf.mxu0  ;;  %v16431_v46 = vld [vmem:[#allocation14 + $0x758] sm:$0xf] }
 0x756   :  { %v16881_v20 = vld [vmem:[#allocation14 + $0xaf8] sm:$0xf0]  ;;  %11020 = vmatpush.bf16.msrb.mxu3 %v17324_v39  ;;  %v16464_v17 = vor.u32 %v18902_v57, %v16463_v63 }
 0x757   :  { %11211 = vmatpush.bf16.msrb.mxu1 %v16980_v58  ;;  %v16916_v58 = vor.u32 %v19010_v27, %v16913_v61  ;;  %v16884_v53 = vor.u32 %v19002_v45, %v16881_v20  ;;  %v18818_v28 = vld [vmem:[#allocation14 + $0x51c] sm:$0xf] }
 0x758   :  { %11120 = vmatmul.bf16.vlgmr.msrb.gmra.mxu2 %v20780_v54  ;;  %v16145_v0 = vld [vmem:[#allocation14 + $0x538] sm:$0xf0] }
 0x759   :  { %11168 = vmatpush.bf16.msra.mxu2 %v16244_v41  ;;  %11198 = vmatpush.bf16.msrb.mxu0 %v16692_v22  ;;  %v16496_v41 = vor.u32 %v18910_v14, %v16495_v43  ;;  %v10746_v22 = vadd.f32 %v10745_v2, %v20975_v9  ;;  %v18930_v29 = vld [vmem:[#allocation14 + $0x89c] sm:$0xf]  ;;  %v10773_v8 = vpop.f32.mrf.mxu1  ;;  %v18894_v9 = vld [vmem:[#allocation14 + $0x774] sm:$0xf0] }
 0x75a   :  { %v16593_v27 = vld [vmem:[#allocation14 + $0x8b8] sm:$0xf0]  ;;  %11021 = vmatpush.bf16.msrb.mxu3 %v17292_v1  ;;  %v16432_v1 = vor.u32 %v18894_v9, %v16431_v46 }
 0x75b   :  { %11212 = vmatpush.bf16.msrb.mxu1 %v16948_v35  ;;  %v16628_v35 = vor.u32 %v18938_v51, %v16625_v36  ;;  %v18994_v61 = vld [vmem:[#allocation14 + $0xa9c] sm:$0xf]  ;;  %v10760_v39 = vadd.f32 %v10759_v16, %v10746_v22  ;;  %v16596_v43 = vor.u32 %v18930_v29, %v16593_v27  ;;  %v10787_v51 = vpop.f32.mrf.mxu2 }
 0x75c   :  { %v16849_v33 = vld [vmem:[#allocation14 + $0xab8] sm:$0xf0] }
 0x75d   :  { %11169 = vmatpush.bf16.msra.mxu2 %v16212_v12  ;;  %11199 = vmatpush.bf16.msrb.mxu0 %v16660_v26  ;;  %v16148_v12 = vor.u32 %v18818_v28, %v16145_v0  ;;  %v16852_v14 = vor.u32 %v18994_v61, %v16849_v33  ;;  %v18810_v26 = vld [vmem:[#allocation14 + $0x4dc] sm:$0xf]  ;;  %v10774_v15 = vadd.f32 %v10773_v8, %v10760_v39  ;;  %v16367_v61 = vld [vmem:[#allocation14 + $0x6d8] sm:$0xf]  ;;  %v21348_v33 = vperm.slane %v20821_v19, 0 }
 0x75e   :  { %11070 = vmatpush.bf16.msra.mxu3 %v16496_v41  ;;  %v18922_v10 = vld [vmem:[#allocation14 + $0x85c] sm:$0xf]  ;;  %v16399_v41 = vld [vmem:[#allocation14 + $0x718] sm:$0xf] }
 0x75f   :  { %11213 = vmatpush.bf16.msrb.mxu1 %v16916_v58  ;;  %v16113_v58 = vld [vmem:[#allocation14 + $0x4f8] sm:$0xf0]  ;;  %11022 = vmatmul.bf16.vlgmr.msrb.gmra.mxu3 %v20841_v60  ;;  %v20997_v20 = vadd.f32 %v10787_v51, %v10774_v15  ;;  %v10368_v39 = vadd.f32 %v20843_v21, %v21348_v33  ;;  %v16335_v51 = vld [vmem:[#allocation14 + $0x698] sm:$0xf] }
 0x760   :  { %v16561_v32 = vld [vmem:[#allocation14 + $0x878] sm:$0xf0]  ;;  %v16116_v2 = vor.u32 %v18810_v26, %v16113_v58  ;;  %v19174_v26 = vld [vmem:[#allocation17 + $0x38] sm:$0xff] }
 0x761   :  { %11170 = vmatpush.bf16.msra.mxu2 %v16180_v24  ;;  %11200 = vmatpush.bf16.msrb.mxu0 %v16628_v35  ;;  %v18986_v36 = vld [vmem:[#allocation14 + $0xa5c] sm:$0xf]  ;;  %v18886_v24 = vld [vmem:[#allocation14 + $0x734] sm:$0xf0]  ;;  %v16564_v63 = vor.u32 %v18922_v10, %v16561_v32  ;;  %v19182_v58 = vld [vmem:[#allocation17 + $0x78] sm:$0xff]  ;;  %v10382_v21 = vadd.f32 %v20846_v11, %v10368_v39 }
 0x762   :  { %v16817_v45 = vld [vmem:[#allocation14 + $0xa78] sm:$0xf0]  ;;  %11071 = vmatpush.bf16.msra.mxu3 %v16464_v17  ;;  %v16400_v16 = vor.u32 %v18886_v24, %v16399_v41  ;;  %v18870_v32 = vld [vmem:[#allocation14 + $0x6b4] sm:$0xf0]  ;;  %v19171_v39 = vld [vmem:[#allocation17 + $0x20] sm:$0xff] }
 0x763   :  { %11214 = vmatpush.bf16.msrb.mxu1 %v16884_v53  ;;  %v16820_v57 = vor.u32 %v18986_v36, %v16817_v45  ;;  %v18802_v22 = vld [vmem:[#allocation14 + $0x49c] sm:$0xf]  ;;  %v10396_v24 = vadd.f32 %v20865_v49, %v10382_v21  ;;  %v19180_v49 = vld [vmem:[#allocation17 + $0x68] sm:$0xff] }
 0x764   :  { %v16081_v35 = vld [vmem:[#allocation14 + $0x4b8] sm:$0xf0] }
 0x765   :  { %11171 = vmatpush.bf16.msra.mxu2 %v16148_v12  ;;  %11201 = vmatpush.bf16.msrb.mxu0 %v16596_v43  ;;  %v18914_v53 = vld [vmem:[#allocation14 + $0x81c] sm:$0xf]  ;;  %v16084_v27 = vor.u32 %v18802_v22, %v16081_v35  ;;  %v18878_v12 = vld [vmem:[#allocation14 + $0x6f4] sm:$0xf0]  ;;  %v21349_v43 = vperm.slane %v20821_v19, 1  ;;  %v10799_v22 = vpop.f32.mrf.mxu3 }
 0x766   :  { %v16529_v28 = vld [vmem:[#allocation14 + $0x838] sm:$0xf0]  ;;  %11072 = vmatpush.bf16.msra.mxu3 %v16432_v1  ;;  %v16368_v10 = vor.u32 %v18878_v12, %v16367_v61  ;;  %v18854_v61 = vld [vmem:[#allocation14 + $0x634] sm:$0xf0] }
 0x767   :  { %11215 = vmatpush.bf16.msrb.mxu1 %v16852_v14  ;;  %v18978_v0 = vld [vmem:[#allocation14 + $0xa1c] sm:$0xf]  ;;  %v16532_v8 = vor.u32 %v18914_v53, %v16529_v28  ;;  %v10480_v14 = vadd.f32 %v20873_v18, %v21349_v43  ;;  %v18862_v53 = vld [vmem:[#allocation14 + $0x674] sm:$0xf0]  ;;  %v19172_v28 = vld [vmem:[#allocation17 + $0x28] sm:$0xff] }
 0x768   :  { %v16785_v29 = vld [vmem:[#allocation14 + $0xa38] sm:$0xf0] }
 0x769   :  { %11172 = vmatpush.bf16.msra.mxu2 %v16116_v2  ;;  %11202 = vmatpush.bf16.msrb.mxu0 %v16564_v63  ;;  %v16788_v17 = vor.u32 %v18978_v0, %v16785_v29  ;;  %v18794_v46 = vld [vmem:[#allocation14 + $0x45c] sm:$0xf]  ;;  %v10494_v2 = vadd.f32 %v20875_v55, %v10480_v14  ;;  %v16303_v55 = vld [vmem:[#allocation14 + $0x658] sm:$0xf]  ;;  %v21013_v29 = vadd.f32 %v10799_v22, %v20993_v42  ;;  %v19170_v14 = vld [vmem:[#allocation17 + $0x18] sm:$0xff] }
 0x76a   :  { %v16049_v9 = vld [vmem:[#allocation14 + $0x478] sm:$0xf0]  ;;  %11073 = vmatpush.bf16.msra.mxu3 %v16400_v16 }
 0x76b   :  { %11216 = vmatpush.bf16.msrb.mxu1 %v16820_v57  ;;  %v16052_v15 = vor.u32 %v18794_v46, %v16049_v9  ;;  %v19173_v36 = vld [vmem:[#allocation17 + $0x30] sm:$0xff]  ;;  %v10508_v63 = vadd.f32 %v20902_v37, %v10494_v2  ;;  %v16336_v57 = vor.u32 %v18870_v32, %v16335_v51  ;;  %v11255_v21 = vmul.f32 0.01, %v21013_v29 }
 0x76c   :  { %v18786_v45 = vld [vmem:[#allocation14 + $0x41c] sm:$0xf]  ;;  %v19158_v51 = vld [vmem:[#allocation14 + $0xfb4] sm:$0xf0] }
 0x76d   :  { %11173 = vmatpush.bf16.msra.mxu2 %v16084_v27  ;;  %11203 = vmatpush.bf16.msrb.mxu0 %v16532_v8  ;;  %v16017_v1 = vld [vmem:[#allocation14 + $0x438] sm:$0xf0]  ;;  %v10522_v0 = vadd.f32 %v20954_v59, %v10508_v63  ;;  %v10410_v27 = vadd.f32 %v20916_v3, %v10396_v24  ;;  %v19179_v8 = vld [vmem:[#allocation17 + $0x60] sm:$0xff]  ;;  %v17519_v59 = vld [vmem:[#allocation14 + $0xfd8] sm:$0xf]  ;;  %v10534_v3 = vadd.f32 %v20880_v30, %v20943_v50 }
 0x76e   :  { %v19181_v19 = vld [vmem:[#allocation17 + $0x70] sm:$0xff]  ;;  %11074 = vmatpush.bf16.msra.mxu3 %v16368_v10  ;;  %v16020_v11 = vor.u32 %v18786_v45, %v16017_v1  ;;  %v11271_v24 = vmax.f32 %v21013_v29, %v11255_v21 }
 0x76f   :  { %11217 = vmatpush.bf16.msrb.mxu1 %v16788_v17  ;;  %v19098_v18 = vld [vmem:[#allocation14 + $0xddc] sm:$0xf]  ;;  %v10536_v42 = vadd.f32 %v20887_v38, %v10522_v0  ;;  %v19166_v17 = vld [vmem:[#allocation14 + $0xff4] sm:$0xf0]  ;;  %v10424_v9 = vadd.f32 %v20852_v56, %v10410_v27  ;;  %v19178_v38 = vld [vmem:[#allocation17 + $0x58] sm:$0xff] }
 0x770   :  { %v17265_v41 = vld [vmem:[#allocation14 + $0xdf8] sm:$0xf0]  ;;  %11204 = vmatmul.bf16.vlgmr.msrb.gmra.mxu0 %v20758_v4  ;;  %v16304_v4 = vor.u32 %v18862_v53, %v16303_v55  ;;  %v19176_v0 = vld [vmem:[#allocation17 + $0x48] sm:$0xff]  ;;  %v17423_v29 = vld [vmem:[#allocation14 + $0xf18] sm:$0xf] }
 0x771   :  { %11808 = vmatpush.bf16.msra.mxu0 %v19174_v26  ;;  %11174 = vmatpush.bf16.msra.mxu2 %v16052_v15  ;;  %v17268_v35 = vor.u32 %v19098_v18, %v17265_v41  ;;  %v19090_v37 = vld [vmem:[#allocation14 + $0xd9c] sm:$0xf]  ;;  %v10801_v26 = vpop.f32.mrf.mxu3  ;;  %v17487_v15 = vld [vmem:[#allocation14 + $0xf98] sm:$0xf]  ;;  %v10550_v32 = vadd.f32 %v20891_v5, %v10536_v42  ;;  %v10438_v50 = vadd.f32 %v20856_v34, %v10424_v9  ;;  %v19206_v42 = vld [vmem:[#allocation17 + $0x138] sm:$0xff] }
 0x772   :  { %11218 = vmatmul.bf16.vlgmr.msrb.gmra.mxu1 %v20760_v25  ;;  %v17233_v16 = vld [vmem:[#allocation14 + $0xdb8] sm:$0xf0]  ;;  %11075 = vmatpush.bf16.msra.mxu3 %v16336_v57  ;;  %v16271_v25 = vld [vmem:[#allocation14 + $0x618] sm:$0xf]  ;;  %v10802_v56 = vadd.f32 %v10801_v26, %v20997_v20  ;;  %v17488_v2 = vor.u32 %v19158_v51, %v17487_v15 }
 0x773   :  { %11822 = vmatpush.bf16.msra.mxu1 %v19182_v58  ;;  %v17236_v33 = vor.u32 %v19090_v37, %v17233_v16  ;;  %v19082_v12 = vld [vmem:[#allocation14 + $0xd5c] sm:$0xf]  ;;  %v16272_v43 = vor.u32 %v18854_v61, %v16271_v25  ;;  %v17520_v58 = vor.u32 %v19166_v17, %v17519_v59  ;;  %v10452_v1 = vadd.f32 %v20877_v6, %v10438_v50  ;;  %v17455_v41 = vld [vmem:[#allocation14 + $0xf58] sm:$0xf]  ;;  %v19167_v25 = vld [vmem:[#allocation17] sm:$0xff] }
 0x774   :  { %v17201_v46 = vld [vmem:[#allocation14 + $0xd78] sm:$0xf0]  ;;  %v11263_v45 = vmul.f32 0.01, %v10802_v56  ;;  %v10564_v20 = vadd.f32 %v20913_v52, %v10550_v32  ;;  %v19150_v34 = vld [vmem:[#allocation14 + $0xf74] sm:$0xf0] }
 0x775   :  { %11809 = vmatpush.bf16.msra.mxu0 %v19173_v36  ;;  %11175 = vmatpush.bf16.msra.mxu2 %v16020_v11  ;;  %v17204_v10 = vor.u32 %v19082_v12, %v17201_v46  ;;  %v19074_v30 = vld [vmem:[#allocation14 + $0xd1c] sm:$0xf]  ;;  %v10548_v36 = vadd.f32 %v20882_v44, %v10534_v3  ;;  %v10466_v6 = vadd.f32 %v20935_v47, %v10452_v1  ;;  %v11252_v47 = vmul.f32 0.01, %v20926_v23  ;;  %v19175_v61 = vld [vmem:[#allocation17 + $0x40] sm:$0xff]  ;;  %v21350_v32 = vld [vmem:[#allocation75_spill] sm:$0xff] }
 0x776   :  { %11076 = vmatpush.bf16.msra.mxu3 %v16304_v4  ;;  %v19177_v18 = vld [vmem:[#allocation17 + $0x50] sm:$0xff]  ;;  %v11279_v63 = vmax.f32 %v10802_v56, %v11263_v45  ;;  %v10578_v22 = vadd.f32 %v20964_v48, %v10564_v20  ;;  %v17456_v55 = vor.u32 %v19150_v34, %v17455_v41  ;;  %v21351_v21 = vperm.slane %v21350_v32, 2  ;;  %v19200_v32 = vld [vmem:[#allocation17 + $0x108] sm:$0xff] }
 0x777   :  { %11823 = vmatpush.bf16.msra.mxu1 %v19181_v19  ;;  %v19169_v19 = vld [vmem:[#allocation17 + $0x10] sm:$0xff]  ;;  %v10562_v11 = vadd.f32 %v20906_v40, %v10548_v36  ;;  %v11260_v16 = vmul.f32 0.01, %v10466_v6 }
 0x778   :  { %11176 = vmatmul.bf16.vlgmr.msra.gmra.mxu2 %v20770_v62  ;;  %v17169_v62 = vld [vmem:[#allocation14 + $0xd38] sm:$0xf0]  ;;  %v19142_v40 = vld [vmem:[#allocation14 + $0xf34] sm:$0xf0]  ;;  %v11261_v48 = vmul.f32 0.01, %v10578_v22 }
 0x779   :  { %11224 = vmatpush.bf16.msrb.mxu2 %v17268_v35  ;;  %11810 = vmatpush.bf16.msra.mxu0 %v19172_v28  ;;  %v17172_v5 = vor.u32 %v19074_v30, %v17169_v62  ;;  %v19066_v44 = vld [vmem:[#allocation14 + $0xcdc] sm:$0xf]  ;;  %v21033_v35 = vpack.c.bf16 %v11279_v63, %v11271_v24  ;;  %v10576_v52 = vadd.f32 %v20959_v7, %v10562_v11  ;;  %v19168_v28 = vld [vmem:[#allocation17 + $0x8] sm:$0xff]  ;;  %v17359_v3 = vld [vmem:[#allocation14 + $0xe98] sm:$0xf]  ;;  %v10813_v62 = vpop.f32.mrf.mxu0 }
 0x77a   :  { %11077 = vmatpush.bf16.msra.mxu3 %v16272_v43  ;;  %v17137_v57 = vld [vmem:[#allocation14 + $0xcf8] sm:$0xf0]  ;;  %v17424_v7 = vor.u32 %v19142_v40, %v17423_v29  ;;  %v11276_v17 = vmax.f32 %v10466_v6, %v11260_v16  ;;  %v11277_v12 = vmax.f32 %v10578_v22, %v11261_v48  ;;  %v11268_v43 = vmax.f32 %v20926_v23, %v11252_v47  ;;  %v19126_v26 = vld [vmem:[#allocation14 + $0xeb4] sm:$0xf0]  ;;  %v19190_v23 = vld [vmem:[#allocation17 + $0xb8] sm:$0xff] }
 0x77b   :  { %11824 = vmatpush.bf16.msra.mxu1 %v19180_v49  ;;  %v17140_v53 = vor.u32 %v19066_v44, %v17137_v57  ;;  %v19058_v49 = vld [vmem:[#allocation14 + $0xc9c] sm:$0xf]  ;;  %v11253_v27 = vmul.f32 0.01, %v10576_v52  ;;  %v17360_v50 = vor.u32 %v19126_v26, %v17359_v3  ;;  %v17327_v45 = vld [vmem:[#allocation14 + $0xe58] sm:$0xf] }
 0x77c   :  { %v17105_v37 = vld [vmem:[#allocation14 + $0xcb8] sm:$0xf0]  ;;  %v11284_v15 = vpack.c.bf16 %v11276_v17, %v11268_v43  ;;  %v19118_v1 = vld [vmem:[#allocation14 + $0xe74] sm:$0xf0]  ;;  %v19203_v6 = vld [vmem:[#allocation17 + $0x120] sm:$0xff] }
 0x77d   :  { %11225 = vmatpush.bf16.msrb.mxu2 %v17236_v33  ;;  %11811 = vmatpush.bf16.msra.mxu0 %v19171_v39  ;;  %v17108_v4 = vor.u32 %v19058_v49, %v17105_v37  ;;  %v17391_v33 = vld [vmem:[#allocation14 + $0xed8] sm:$0xf]  ;;  %v17073_v59 = vld [vmem:[#allocation14 + $0xc78] sm:$0xf0]  ;;  %v17328_v41 = vor.u32 %v19118_v1, %v17327_v45  ;;  %v21355_v22 = vld [vmem:[#allocation37_spill] sm:$0xff] }
 0x77e   :  { %11126 = vmatpush.bf16.msrb.mxu3 %v17520_v58  ;;  %v19134_v39 = vld [vmem:[#allocation14 + $0xef4] sm:$0xf0]  ;;  %v19042_v58 = vld [vmem:[#allocation14 + $0xc1c] sm:$0xf]  ;;  %v19188_v40 = vld [vmem:[#allocation17 + $0xa8] sm:$0xff] }
 0x77f   :  { %11825 = vmatpush.bf16.msra.mxu1 %v19179_v8  ;;  %11078 = vmatmul.bf16.vlgmr.msra.gmra.mxu3 %v20772_v31  ;;  %v19050_v8 = vld [vmem:[#allocation14 + $0xc5c] sm:$0xf]  ;;  %v17392_v46 = vor.u32 %v19134_v39, %v17391_v33  ;;  %v17295_v24 = vld [vmem:[#allocation14 + $0xe18] sm:$0xf]  ;;  %v19202_v16 = vld [vmem:[#allocation17 + $0x118] sm:$0xff] }
 0x780   :  { %v17076_v9 = vor.u32 %v19050_v8, %v17073_v59  ;;  %v21352_v56 = vld [vmem:[#allocation76_spill] sm:$0xff]  ;;  %v21356_v48 = vld [vmem:[#allocation39_spill] sm:$0xff]  ;;  %v21358_v33 = vld [vmem:[#allocation38_spill] sm:$0xff] }
 0x781   :  { %11226 = vmatpush.bf16.msrb.mxu2 %v17204_v10  ;;  %11812 = vmatpush.bf16.msra.mxu0 %v19170_v14  ;;  %v11269_v14 = vmax.f32 %v10576_v52, %v11253_v27  ;;  %v17041_v10 = vld [vmem:[#allocation14 + $0xc38] sm:$0xf0]  ;;  %v10592_v30 = vadd.f32 %v21352_v56, %v21351_v21  ;;  %v19110_v63 = vld [vmem:[#allocation14 + $0xe34] sm:$0xf0]  ;;  %v10815_v49 = vpop.f32.mrf.mxu0 }
 0x782   :  { %11127 = vmatpush.bf16.msrb.mxu3 %v17488_v2  ;;  %v17044_v36 = vor.u32 %v19042_v58, %v17041_v10  ;;  %v19204_v2 = vld [vmem:[#allocation17 + $0x128] sm:$0xff]  ;;  %v19189_v20 = vld [vmem:[#allocation17 + $0xb0] sm:$0xff] }
 0x783   :  { %11826 = vmatpush.bf16.msra.mxu1 %v19178_v38  ;;  %v19205_v38 = vld [vmem:[#allocation17 + $0x130] sm:$0xff]  ;;  %v11285_v51 = vpack.c.bf16 %v11277_v12, %v11269_v14  ;;  %v21359_v12 = vld [vmem:[#allocation34_spill] sm:$0xff]  ;;  %v19186_v14 = vld [vmem:[#allocation17 + $0x98] sm:$0xff] }
 0x784   :  { %v21354_v34 = vld [vmem:[#allocation36_spill] sm:$0xff]  ;;  %v21361_v56 = vld [vmem:[#allocation43_spill] sm:$0xff] }
 0x785   :  { %11227 = vmatpush.bf16.msrb.mxu2 %v17172_v5  ;;  %11813 = vmatpush.bf16.msra.mxu0 %v19169_v19  ;;  %v21353_v5 = vld [vmem:[#allocation77_spill] sm:$0xff]  ;;  %v18906_v57 = vld [vmem:[#allocation14 + $0x7dc] sm:$0xf]  ;;  %v21362_v45 = vld [vmem:[#allocation35_spill] sm:$0xff] }
 0x786   :  { %11128 = vmatpush.bf16.msrb.mxu3 %v17456_v55  ;;  %v10606_v19 = vadd.f32 %v21353_v5, %v10592_v30  ;;  %v16497_v11 = vld [vmem:[#allocation14 + $0x7f8] sm:$0xf0]  ;;  %v10841_v55 = vpop.f32.mrf.mxu2 }
 0x787   :  { %11827 = vmatpush.bf16.msra.mxu1 %v19177_v18  ;;  %v10827_v18 = vpop.f32.mrf.mxu1  ;;  %v16500_v29 = vor.u32 %v18906_v57, %v16497_v11  ;;  %v18898_v37 = vld [vmem:[#allocation14 + $0x79c] sm:$0xf] }
 0x788   :  { %v10620_v44 = vadd.f32 %v21354_v34, %v10606_v19  ;;  %v16465_v47 = vld [vmem:[#allocation14 + $0x7b8] sm:$0xf0] }
 0x789   :  { %11228 = vmatpush.bf16.msrb.mxu2 %v17140_v53  ;;  %11814 = vmatpush.bf16.msra.mxu0 %v19168_v28  ;;  %v17296_v53 = vor.u32 %v19110_v63, %v17295_v24  ;;  %v21045_v28 = vld [vmem:[#allocation16] sm:$0xff]  ;;  %v18890_v59 = vld [vmem:[#allocation14 + $0x75c] sm:$0xf]  ;;  %v10869_v10 = vpop.f32.mrf.mxu0 }
 0x78a   :  { %11129 = vmatpush.bf16.msrb.mxu3 %v17424_v7  ;;  %v10634_v52 = vadd.f32 %v21355_v22, %v10620_v44  ;;  %v19201_v17 = vld [vmem:[#allocation17 + $0x110] sm:$0xff] }
 0x78b   :  { %11828 = vmatpush.bf16.msra.mxu1 %v19176_v0  ;;  %v7784_v0 = vperm.slane %v21045_v28, 4  ;;  %v21360_v26 = vld [vmem:[#allocation32_spill] sm:$0xff] }
 0x78c   :  { %v10648_v27 = vadd.f32 %v21356_v48, %v10634_v52  ;;  %v21363_v63 = vld [vmem:[#allocation56_spill] sm:$0xff] }
 0x78d   :  { %11229 = vmatpush.bf16.msrb.mxu2 %v17108_v4  ;;  %11815 = vmatpush.bf16.msra.mxu0 %v19167_v25  ;;  %v10814_v7 = vadd.f32 %v10813_v62, %v7784_v0  ;;  %v16468_v4 = vor.u32 %v18898_v37, %v16465_v47  ;;  %v19187_v25 = vld [vmem:[#allocation17 + $0xa0] sm:$0xff]  ;;  %v10816_v3 = vadd.f32 %v10815_v49, %v7784_v0  ;;  %v18858_v48 = vld [vmem:[#allocation14 + $0x65c] sm:$0xf] }
 0x78e   :  { %11130 = vmatpush.bf16.msrb.mxu3 %v17392_v46  ;;  %v10662_v46 = vadd.f32 %v21359_v12, %v10648_v27  ;;  %v19183_v37 = vld [vmem:[#allocation17 + $0x80] sm:$0xff]  ;;  %v16305_v27 = vld [vmem:[#allocation14 + $0x678] sm:$0xf0] }
 0x78f   :  { %11829 = vmatpush.bf16.msra.mxu1 %v19175_v61  ;;  %v21357_v61 = vld [vmem:[#allocation69_spill] sm:$0xff]  ;;  %v10829_v8 = vpop.f32.mrf.mxu1 }
 0x790   :  { %11816 = vmatmul.bf16.vlgmr.msra.gmra.mxu0 %v11284_v15  ;;  %v10646_v39 = vadd.f32 %v21358_v33, %v21357_v61  ;;  %v18882_v15 = vld [vmem:[#allocation14 + $0x71c] sm:$0xf]  ;;  %v10676_v30 = vadd.f32 %v21361_v56, %v10662_v46  ;;  %v10830_v62 = vadd.f32 %v10829_v8, %v10816_v3 }
 0x791   :  { %11864 = vmatpush.bf16.msrb.mxu0 %v19206_v42  ;;  %11230 = vmatpush.bf16.msrb.mxu2 %v17076_v9  ;;  %v16433_v42 = vld [vmem:[#allocation14 + $0x778] sm:$0xf0]  ;;  %v10828_v9 = vadd.f32 %v10827_v18, %v10814_v7  ;;  %v10871_v0 = vpop.f32.mrf.mxu0 }
 0x792   :  { %11830 = vmatmul.bf16.vlgmr.msra.gmra.mxu1 %v11285_v51  ;;  %11131 = vmatpush.bf16.msrb.mxu3 %v17360_v50  ;;  %v16436_v43 = vor.u32 %v18890_v59, %v16433_v42  ;;  %v10660_v58 = vadd.f32 %v21360_v26, %v10646_v39  ;;  %v16401_v51 = vld [vmem:[#allocation14 + $0x738] sm:$0xf0] }
 0x793   :  { %v10842_v21 = vadd.f32 %v10841_v55, %v10828_v9  ;;  %v18874_v18 = vld [vmem:[#allocation14 + $0x6dc] sm:$0xf] }
 0x794   :  { %v10674_v1 = vadd.f32 %v21362_v45, %v10660_v58  ;;  %v18866_v55 = vld [vmem:[#allocation14 + $0x69c] sm:$0xf] }
 0x795   :  { %11865 = vmatpush.bf16.msrb.mxu0 %v19205_v38  ;;  %11231 = vmatpush.bf16.msrb.mxu2 %v17044_v36  ;;  %v10843_v38 = vpop.f32.mrf.mxu2  ;;  %v16404_v36 = vor.u32 %v18882_v15, %v16401_v51  ;;  %v18850_v39 = vld [vmem:[#allocation14 + $0x61c] sm:$0xf] }
 0x796   :  { %11132 = vmatpush.bf16.msrb.mxu3 %v17328_v41  ;;  %v16369_v41 = vld [vmem:[#allocation14 + $0x6f8] sm:$0xf0]  ;;  %v10844_v24 = vadd.f32 %v10843_v38, %v10830_v62  ;;  %v10688_v34 = vadd.f32 %v21363_v63, %v10674_v1  ;;  %v19214_v38 = vld [vmem:[#allocation17 + $0x178] sm:$0xff]  ;;  %v19212_v1 = vld [vmem:[#allocation17 + $0x168] sm:$0xff] }
 0x797   :  { %v10883_v5 = vpop.f32.mrf.mxu1  ;;  %v16372_v11 = vor.u32 %v18874_v18, %v16369_v41  ;;  %v16273_v8 = vld [vmem:[#allocation14 + $0x638] sm:$0xf0]  ;;  %11878 = vmatpush.bf16.msrb.mxu1 %v19214_v38  ;;  %v19211_v18 = vld [vmem:[#allocation17 + $0x160] sm:$0xff] }
 0x798   :  { %11232 = vmatmul.bf16.vlgmr.msrb.gmra.mxu2 %v20780_v54  ;;  %v10855_v54 = vpop.f32.mrf.mxu3  ;;  %v19162_v42 = vld [vmem:[#allocation14 + $0xfdc] sm:$0xf]  ;;  %v16276_v9 = vor.u32 %v18850_v39, %v16273_v8 }
 0x799   :  { %11836 = vmatpush.bf16.msra.mxu2 %v19190_v23  ;;  %11866 = vmatpush.bf16.msrb.mxu0 %v19204_v2  ;;  %v10856_v50 = vadd.f32 %v10855_v54, %v10842_v21  ;;  %v19185_v23 = vld [vmem:[#allocation17 + $0x90] sm:$0xff]  ;;  %v10690_v2 = vadd.f32 %v20987_v13, %v10676_v30  ;;  %v11254_v13 = vmul.f32 0.01, %v10688_v34  ;;  %v10925_v63 = vpop.f32.mrf.mxu0 }
 0x79a   :  { %11133 = vmatpush.bf16.msrb.mxu3 %v17296_v53  ;;  %v16337_v53 = vld [vmem:[#allocation14 + $0x6b8] sm:$0xf0] }
 0x79b   :  { %v10870_v44 = vadd.f32 %v10869_v10, %v10856_v50  ;;  %v11262_v22 = vmul.f32 0.01, %v10690_v2  ;;  %v16340_v49 = vor.u32 %v18866_v55, %v16337_v53  ;;  %v11270_v54 = vmax.f32 %v10688_v34, %v11254_v13  ;;  %v19154_v58 = vld [vmem:[#allocation14 + $0xf9c] sm:$0xf]  ;;  %v19208_v53 = vld [vmem:[#allocation17 + $0x148] sm:$0xff] }
 0x79c   :  { %v17489_v10 = vld [vmem:[#allocation14 + $0xfb8] sm:$0xf0] }
 0x79d   :  { %11837 = vmatpush.bf16.msra.mxu2 %v19189_v20  ;;  %11867 = vmatpush.bf16.msrb.mxu0 %v19203_v6  ;;  %v19199_v20 = vld [vmem:[#allocation17 + $0x100] sm:$0xff]  ;;  %v19184_v6 = vld [vmem:[#allocation17 + $0x88] sm:$0xff]  ;;  %v10897_v52 = vpop.f32.mrf.mxu2  ;;  %v11278_v47 = vmax.f32 %v10690_v2, %v11262_v22  ;;  %v17492_v51 = vor.u32 %v19154_v58, %v17489_v10  ;;  %v19146_v56 = vld [vmem:[#allocation14 + $0xf5c] sm:$0xf] }
 0x79e   :  { %11182 = vmatpush.bf16.msra.mxu3 %v16500_v29  ;;  %v17457_v30 = vld [vmem:[#allocation14 + $0xf78] sm:$0xf0] }
 0x79f   :  { %11134 = vmatmul.bf16.vlgmr.msrb.gmra.mxu3 %v20841_v60  ;;  %v10885_v7 = vpop.f32.mrf.mxu1  ;;  %v11286_v33 = vpack.c.bf16 %v11278_v47, %v11270_v54  ;;  %v19213_v62 = vld [vmem:[#allocation17 + $0x170] sm:$0xff] }
 0x7a0   :  { %v10857_v19 = vpop.f32.mrf.mxu3  ;;  %11879 = vmatpush.bf16.msrb.mxu1 %v19213_v62  ;;  %v17425_v45 = vld [vmem:[#allocation14 + $0xf38] sm:$0xf0]  ;;  %v19191_v62 = vld [vmem:[#allocation17 + $0xc0] sm:$0xff] }
 0x7a1   :  { %11838 = vmatpush.bf16.msra.mxu2 %v19188_v40  ;;  %11868 = vmatpush.bf16.msrb.mxu0 %v19202_v16  ;;  %v10858_v57 = vadd.f32 %v10857_v19, %v10844_v24  ;;  %v10884_v40 = vadd.f32 %v10883_v5, %v10870_v44  ;;  %v19130_v5 = vld [vmem:[#allocation14 + $0xedc] sm:$0xf]  ;;  %v19210_v24 = vld [vmem:[#allocation17 + $0x158] sm:$0xff] }
 0x7a2   :  { %11183 = vmatpush.bf16.msra.mxu3 %v16468_v4  ;;  %v17393_v19 = vld [vmem:[#allocation14 + $0xef8] sm:$0xf0] }
 0x7a3   :  { %v10872_v29 = vadd.f32 %v10871_v0, %v10858_v57  ;;  %v10898_v4 = vadd.f32 %v10897_v52, %v10884_v40  ;;  %v17396_v41 = vor.u32 %v19130_v5, %v17393_v19  ;;  %v19114_v44 = vld [vmem:[#allocation14 + $0xe5c] sm:$0xf]  ;;  %v19198_v40 = vld [vmem:[#allocation17 + $0xf8] sm:$0xff] }
 0x7a4   :  { %11880 = vmatpush.bf16.msrb.mxu1 %v19212_v1  ;;  %v17329_v57 = vld [vmem:[#allocation14 + $0xe78] sm:$0xf0] }
 0x7a5   :  { %11839 = vmatpush.bf16.msra.mxu2 %v19187_v25  ;;  %11869 = vmatpush.bf16.msrb.mxu0 %v19201_v17  ;;  %v16308_v25 = vor.u32 %v18858_v48, %v16305_v27  ;;  %v10886_v61 = vadd.f32 %v10885_v7, %v10872_v29  ;;  %v17521_v17 = vld [vmem:[#allocation14 + $0xff8] sm:$0xf0]  ;;  %v10899_v12 = vpop.f32.mrf.mxu2  ;;  %v17332_v22 = vor.u32 %v19114_v44, %v17329_v57  ;;  %v7785_v29 = vperm.slane %v21045_v28, 5  ;;  %v19216_v44 = vld [vmem:[#allocation17 + $0x188] sm:$0xff] }
 0x7a6   :  { %11184 = vmatpush.bf16.msra.mxu3 %v16436_v43  ;;  %v17524_v43 = vor.u32 %v19162_v42, %v17521_v17  ;;  %v19106_v52 = vld [vmem:[#allocation14 + $0xe1c] sm:$0xf] }
 0x7a7   :  { %v10900_v46 = vadd.f32 %v10899_v12, %v10886_v61  ;;  %v17297_v55 = vld [vmem:[#allocation14 + $0xe38] sm:$0xf0] }
 0x7a8   :  { %v10911_v16 = vpop.f32.mrf.mxu3  ;;  %11881 = vmatpush.bf16.msrb.mxu1 %v19211_v18  ;;  %v17300_v0 = vor.u32 %v19106_v52, %v17297_v55  ;;  %v19197_v48 = vld [vmem:[#allocation17 + $0xf0] sm:$0xff] }
 0x7a9   :  { %11840 = vmatpush.bf16.msra.mxu2 %v19186_v14  ;;  %11870 = vmatpush.bf16.msrb.mxu0 %v19200_v32  ;;  %v10912_v59 = vadd.f32 %v10911_v16, %v10898_v4  ;;  %v10926_v16 = vadd.f32 %v10925_v63, %v7785_v29  ;;  %v19196_v4 = vld [vmem:[#allocation17 + $0xe8] sm:$0xff]  ;;  %v19193_v58 = vld [vmem:[#allocation17 + $0xd0] sm:$0xff] }
 0x7aa   :  { %11185 = vmatpush.bf16.msra.mxu3 %v16404_v36  ;;  %v17460_v36 = vor.u32 %v19146_v56, %v17457_v30  ;;  %v19221_v19 = vld [vmem:[#allocation17 + $0x1b0] sm:$0xff] }
 0x7ab   :  { %v11256_v14 = vmul.f32 0.01, %v10912_v59  ;;  %v19217_v63 = vld [vmem:[#allocation17 + $0x190] sm:$0xff] }
 0x7ac   :  { %11882 = vmatpush.bf16.msrb.mxu1 %v19210_v24 }
 0x7ad   :  { %11841 = vmatpush.bf16.msra.mxu2 %v19185_v23  ;;  %11871 = vmatpush.bf16.msrb.mxu0 %v19199_v20  ;;  %v11272_v32 = vmax.f32 %v10912_v59, %v11256_v14  ;;  %v19138_v23 = vld [vmem:[#allocation14 + $0xf1c] sm:$0xf]  ;;  %v10953_v13 = vpop.f32.mrf.mxu2  ;;  %v19195_v59 = vld [vmem:[#allocation17 + $0xe0] sm:$0xff] }
 0x7ae   :  { %11186 = vmatpush.bf16.msra.mxu3 %v16372_v11  ;;  %v17428_v2 = vor.u32 %v19138_v23, %v17425_v45  ;;  %v19122_v20 = vld [vmem:[#allocation14 + $0xe9c] sm:$0xf]  ;;  %v19222_v45 = vld [vmem:[#allocation17 + $0x1b8] sm:$0xff] }
 0x7af   :  { %v19209_v11 = vld [vmem:[#allocation17 + $0x150] sm:$0xff] }
 0x7b0   :  { %v10913_v3 = vpop.f32.mrf.mxu3  ;;  %11883 = vmatpush.bf16.msrb.mxu1 %v19209_v11  ;;  %v7786_v11 = vperm.slane %v21045_v28, 6 }
 0x7b1   :  { %11842 = vmatpush.bf16.msra.mxu2 %v19184_v6  ;;  %v10914_v26 = vadd.f32 %v10913_v3, %v10900_v46  ;;  %v10939_v6 = vpop.f32.mrf.mxu1  ;;  %v19194_v3 = vld [vmem:[#allocation17 + $0xd8] sm:$0xff] }
 0x7b2   :  { %11187 = vmatpush.bf16.msra.mxu3 %v16340_v49  ;;  %v10927_v49 = vpop.f32.mrf.mxu0  ;;  %v10940_v54 = vadd.f32 %v10939_v6, %v10926_v16  ;;  %v19215_v6 = vld [vmem:[#allocation17 + $0x180] sm:$0xff] }
 0x7b3   :  { %v11264_v15 = vmul.f32 0.01, %v10914_v26  ;;  %v10928_v7 = vadd.f32 %v10927_v49, %v7785_v29 }
 0x7b4   :  { %11884 = vmatpush.bf16.msrb.mxu1 %v19208_v53 }
 0x7b5   :  { %11843 = vmatpush.bf16.msra.mxu2 %v19183_v37  ;;  %v11280_v21 = vmax.f32 %v10914_v26, %v11264_v15  ;;  %v19207_v37 = vld [vmem:[#allocation17 + $0x140] sm:$0xff]  ;;  %v10955_v61 = vpop.f32.mrf.mxu2 }
 0x7b6   :  { %11188 = vmatpush.bf16.msra.mxu3 %v16308_v25 }
 0x7b7   :  { %v11288_v50 = vpack.c.bf16 %v11280_v21, %v11272_v32 }
 0x7b8   :  { %11844 = vmatmul.bf16.vlgmr.msra.gmra.mxu2 %v11286_v33  ;;  %11885 = vmatpush.bf16.msrb.mxu1 %v19207_v37  ;;  %v10954_v33 = vadd.f32 %v10953_v13, %v10940_v54 }
 0x7b9   :  { %11872 = vmatmul.bf16.vlgmr.msrb.gmra.mxu0 %v11288_v50  ;;  %v10941_v27 = vpop.f32.mrf.mxu1  ;;  %11892 = vmatpush.bf16.msrb.mxu2 %v19222_v45 }
 0x7ba   :  { %11189 = vmatpush.bf16.msra.mxu3 %v16276_v9  ;;  %v10981_v25 = vpop.f32.mrf.mxu0  ;;  %v10942_v39 = vadd.f32 %v10941_v27, %v10928_v7 }
 0x7bc   :  { %v10956_v12 = vadd.f32 %v10955_v61, %v10942_v39 }
 0x7bd   :  { %11190 = vmatmul.bf16.vlgmr.msra.gmra.mxu3 %v20772_v31  ;;  %v17361_v31 = vld [vmem:[#allocation14 + $0xeb8] sm:$0xf0]  ;;  %11893 = vmatpush.bf16.msrb.mxu2 %v19221_v19 }
 0x7be   :  { %11238 = vmatpush.bf16.msrb.mxu3 %v17524_v43  ;;  %v17364_v34 = vor.u32 %v19122_v20, %v17361_v31  ;;  %v11009_v43 = vpop.f32.mrf.mxu2  ;;  %v19219_v20 = vld [vmem:[#allocation17 + $0x1a0] sm:$0xff]  ;;  %v19218_v31 = vld [vmem:[#allocation17 + $0x198] sm:$0xff] }
 0x7c1   :  { %v10995_v42 = vpop.f32.mrf.mxu1 }
 0x7c2   :  { %11239 = vmatpush.bf16.msrb.mxu3 %v17492_v51  ;;  %v10967_v47 = vpop.f32.mrf.mxu3  ;;  %v19192_v51 = vld [vmem:[#allocation17 + $0xc8] sm:$0xff] }
 0x7c3   :  { %v10968_v8 = vadd.f32 %v10967_v47, %v10954_v33 }
 0x7c5   :  { %v10982_v46 = vadd.f32 %v10981_v25, %v10968_v8 }
 0x7c6   :  { %11240 = vmatpush.bf16.msrb.mxu3 %v17460_v36  ;;  %v11011_v56 = vpop.f32.mrf.mxu2 }
 0x7c7   :  { %v10996_v26 = vadd.f32 %v10995_v42, %v10982_v46 }
 0x7c9   :  { %v10997_v38 = vpop.f32.mrf.mxu1  ;;  %v11010_v15 = vadd.f32 %v11009_v43, %v10996_v26 }
 0x7ca   :  { %11241 = vmatpush.bf16.msrb.mxu3 %v17428_v2  ;;  %v10969_v17 = vpop.f32.mrf.mxu3 }
 0x7cb   :  { %v10970_v9 = vadd.f32 %v10969_v17, %v10956_v12 }
 0x7ce   :  { %11242 = vmatpush.bf16.msrb.mxu3 %v17396_v41  ;;  %v19220_v41 = vld [vmem:[#allocation17 + $0x1a8] sm:$0xff]  ;;  %v11065_v57 = vpop.f32.mrf.mxu2 }
 0x7cf   :  { %11894 = vmatpush.bf16.msrb.mxu2 %v19220_v41 }
 0x7d2   :  { %11243 = vmatpush.bf16.msrb.mxu3 %v17364_v34  ;;  %v11051_v34 = vpop.f32.mrf.mxu1 }
 0x7d3   :  { %11895 = vmatpush.bf16.msrb.mxu2 %v19219_v20 }
 0x7d6   :  { %11244 = vmatpush.bf16.msrb.mxu3 %v17332_v22  ;;  %v11067_v29 = vpop.f32.mrf.mxu2 }
 0x7d7   :  { %11896 = vmatpush.bf16.msrb.mxu2 %v19218_v31 }
 0x7da   :  { %11245 = vmatpush.bf16.msrb.mxu3 %v17300_v0  ;;  %v11053_v55 = vpop.f32.mrf.mxu1 }
 0x7db   :  { %11897 = vmatpush.bf16.msrb.mxu2 %v19217_v63 }
 0x7dd   :  { %11246 = vmatmul.bf16.vlgmr.msrb.gmra.mxu3 %v20841_v60  ;;  %v10983_v60 = vpop.f32.mrf.mxu0 }
 0x7de   :  { %11850 = vmatpush.bf16.msra.mxu3 %v19198_v40  ;;  %v10984_v14 = vadd.f32 %v10983_v60, %v10970_v9  ;;  %v11121_v7 = vpop.f32.mrf.mxu2  ;;  %v19230_v9 = vld [vmem:[#allocation17 + $0x1f8] sm:$0xff]  ;;  %v19229_v60 = vld [vmem:[#allocation17 + $0x1f0] sm:$0xff] }
 0x7df   :  { %11898 = vmatpush.bf16.msrb.mxu2 %v19216_v44 }
 0x7e0   :  { %v10998_v32 = vadd.f32 %v10997_v38, %v10984_v14 }
 0x7e2   :  { %11851 = vmatpush.bf16.msra.mxu3 %v19197_v48  ;;  %v11023_v10 = vpop.f32.mrf.mxu3  ;;  %v11012_v30 = vadd.f32 %v11011_v56, %v10998_v32  ;;  %v11107_v47 = vpop.f32.mrf.mxu1 }
 0x7e3   :  { %v11024_v21 = vadd.f32 %v11023_v10, %v11010_v15  ;;  %11899 = vmatpush.bf16.msrb.mxu2 %v19215_v6  ;;  %v19228_v10 = vld [vmem:[#allocation17 + $0x1e8] sm:$0xff]  ;;  %v19227_v15 = vld [vmem:[#allocation17 + $0x1e0] sm:$0xff] }
 0x7e5   :  { %v11257_v36 = vmul.f32 0.01, %v11024_v21  ;;  %v11037_v24 = vpop.f32.mrf.mxu0 }
 0x7e6   :  { %11852 = vmatpush.bf16.msra.mxu3 %v19196_v4  ;;  %v11038_v52 = vadd.f32 %v11037_v24, %v7786_v11  ;;  %v11123_v17 = vpop.f32.mrf.mxu2 }
 0x7e7   :  { %v11273_v2 = vmax.f32 %v11024_v21, %v11257_v36  ;;  %v19225_v21 = vld [vmem:[#allocation17 + $0x1d0] sm:$0xff] }
 0x7e8   :  { %v11052_v53 = vadd.f32 %v11051_v34, %v11038_v52 }
 0x7ea   :  { %11853 = vmatpush.bf16.msra.mxu3 %v19195_v59  ;;  %v11025_v50 = vpop.f32.mrf.mxu3  ;;  %v11066_v40 = vadd.f32 %v11065_v57, %v11052_v53  ;;  %v11109_v39 = vpop.f32.mrf.mxu1 }
 0x7eb   :  { %v11026_v23 = vadd.f32 %v11025_v50, %v11012_v30  ;;  %v19224_v30 = vld [vmem:[#allocation17 + $0x1c8] sm:$0xff]  ;;  %v7787_v50 = vperm.slane %v21045_v28, 7 }
 0x7ed   :  { %v11265_v1 = vmul.f32 0.01, %v11026_v23 }
 0x7ee   :  { %11854 = vmatpush.bf16.msra.mxu3 %v19194_v3 }
 0x7ef   :  { %v11281_v5 = vmax.f32 %v11026_v23, %v11265_v1  ;;  %v19223_v23 = vld [vmem:[#allocation17 + $0x1c0] sm:$0xff] }
 0x7f1   :  { %v11289_v18 = vpack.c.bf16 %v11281_v5, %v11273_v2 }
 0x7f2   :  { %11855 = vmatpush.bf16.msra.mxu3 %v19193_v58  ;;  %v11163_v56 = vpop.f32.mrf.mxu1 }
 0x7f3   :  { %11886 = vmatmul.bf16.vlgmr.msrb.gmra.mxu1 %v11289_v18 }
 0x7f6   :  { %11856 = vmatpush.bf16.msra.mxu3 %v19192_v51  ;;  %v19226_v51 = vld [vmem:[#allocation17 + $0x1d8] sm:$0xff] }
 0x7fa   :  { %11857 = vmatpush.bf16.msra.mxu3 %v19191_v62  ;;  %v11165_v2 = vpop.f32.mrf.mxu1 }
 0x7fb   :  { %v11177_v62 = vpop.f32.mrf.mxu2 }
 0x7fd   :  { %11858 = vmatmul.bf16.vlgmr.msra.gmra.mxu3 %v21033_v35  ;;  %v11039_v35 = vpop.f32.mrf.mxu0 }
 0x7fe   :  { %v11040_v13 = vadd.f32 %v11039_v35, %v7786_v11  ;;  %11906 = vmatpush.bf16.msrb.mxu3 %v19230_v9 }
 0x800   :  { %v11054_v49 = vadd.f32 %v11053_v55, %v11040_v13 }
 0x802   :  { %v11079_v22 = vpop.f32.mrf.mxu3  ;;  %v11068_v48 = vadd.f32 %v11067_v29, %v11054_v49  ;;  %11907 = vmatpush.bf16.msrb.mxu3 %v19229_v60  ;;  %v11219_v63 = vpop.f32.mrf.mxu1 }
 0x803   :  { %v11080_v37 = vadd.f32 %v11079_v22, %v11066_v40  ;;  %v11179_v41 = vpop.f32.mrf.mxu2 }
 0x805   :  { %v11093_v0 = vpop.f32.mrf.mxu0 }
 0x806   :  { %v11094_v27 = vadd.f32 %v11093_v0, %v11080_v37  ;;  %11908 = vmatpush.bf16.msrb.mxu3 %v19228_v10 }
 0x808   :  { %v11108_v61 = vadd.f32 %v11107_v47, %v11094_v27 }
 0x80a   :  { %v11081_v16 = vpop.f32.mrf.mxu3  ;;  %v11122_v8 = vadd.f32 %v11121_v7, %v11108_v61  ;;  %11909 = vmatpush.bf16.msrb.mxu3 %v19227_v15  ;;  %v11221_v55 = vpop.f32.mrf.mxu1  ;;  %v19255_v61 = vld [vmem:[#allocation19] ss:$0 sm:$0xff] }
 0x80b   :  { %v11082_v54 = vadd.f32 %v11081_v16, %v11068_v48 }
 0x80d   :  { %v11095_v4 = vpop.f32.mrf.mxu0 }
 0x80e   :  { %v11096_v25 = vadd.f32 %v11095_v4, %v11082_v54  ;;  %11910 = vmatpush.bf16.msrb.mxu3 %v19226_v51 }
 0x810   :  { %v11110_v59 = vadd.f32 %v11109_v39, %v11096_v25 }
 0x812   :  { %v11124_v12 = vadd.f32 %v11123_v17, %v11110_v59  ;;  %11911 = vmatpush.bf16.msrb.mxu3 %v19225_v21  ;;  %v11831_v4 = vpop.f32.mrf.mxu1 }
 0x815   :  { %v11149_v32 = vpop.f32.mrf.mxu0 }
 0x816   :  { %11912 = vmatpush.bf16.msrb.mxu3 %v19224_v30  ;;  %v11150_v1 = vadd.f32 %v11149_v32, %v7787_v50 }
 0x818   :  { %v11164_v5 = vadd.f32 %v11163_v56, %v11150_v1 }
 0x81a   :  { %11913 = vmatpush.bf16.msrb.mxu3 %v19223_v23  ;;  %v11178_v20 = vadd.f32 %v11177_v62, %v11164_v5 }
 0x81b   :  { %v11233_v35 = vpop.f32.mrf.mxu2 }
 0x81d   :  { %v11151_v36 = vpop.f32.mrf.mxu0 }
 0x81e   :  { %v11152_v19 = vadd.f32 %v11151_v36, %v7787_v50 }
 0x820   :  { %v11166_v31 = vadd.f32 %v11165_v2, %v11152_v19 }
 0x822   :  { %v11135_v33 = vpop.f32.mrf.mxu3  ;;  %v11180_v44 = vadd.f32 %v11179_v41, %v11166_v31 }
 0x823   :  { %v11136_v42 = vadd.f32 %v11135_v33, %v11122_v8  ;;  %v11235_v29 = vpop.f32.mrf.mxu2 }
 0x825   :  { %v11258_v3 = vmul.f32 0.01, %v11136_v42  ;;  %v11205_v18 = vpop.f32.mrf.mxu0 }
 0x827   :  { %v11274_v26 = vmax.f32 %v11136_v42, %v11258_v3  ;;  %v11833_v42 = vpop.f32.mrf.mxu1 }
 0x82a   :  { %v11137_v46 = vpop.f32.mrf.mxu3 }
 0x82b   :  { %v11138_v43 = vadd.f32 %v11137_v46, %v11124_v12 }
 0x82d   :  { %v11266_v14 = vmul.f32 0.01, %v11138_v43  ;;  %v11207_v28 = vpop.f32.mrf.mxu0 }
 0x82f   :  { %v11282_v58 = vmax.f32 %v11138_v43, %v11266_v14 }
 0x831   :  { %v11290_v38 = vpack.c.bf16 %v11282_v58, %v11274_v26 }
 0x833   :  { %11900 = vmatmul.bf16.vlgmr.msrb.gmra.mxu2 %v11290_v38 }
 0x835   :  { %v11817_v7 = vpop.f32.mrf.mxu0 }
 0x836   :  { %v11818_v33 = vadd.f32 %v19255_v61, %v11817_v7 }
 0x838   :  { %v11832_v59 = vadd.f32 %v11831_v4, %v11818_v33 }
 0x83b   :  { %v11845_v25 = vpop.f32.mrf.mxu2 }
 0x83c   :  { %v11846_v12 = vadd.f32 %v11845_v25, %v11832_v59 }
 0x83d   :  { %v11819_v39 = vpop.f32.mrf.mxu0 }
 0x83e   :  { %v11820_v46 = vadd.f32 %v19255_v61, %v11819_v39 }
 0x840   :  { %v11191_v45 = vpop.f32.mrf.mxu3  ;;  %v11834_v60 = vadd.f32 %v11833_v42, %v11820_v46 }
 0x841   :  { %v11192_v24 = vadd.f32 %v11191_v45, %v11178_v20 }
 0x843   :  { %v11206_v57 = vadd.f32 %v11205_v18, %v11192_v24  ;;  %v11847_v17 = vpop.f32.mrf.mxu2 }
 0x844   :  { %v11848_v10 = vadd.f32 %v11847_v17, %v11834_v60 }
 0x845   :  { %v11220_v22 = vadd.f32 %v11219_v63, %v11206_v57  ;;  %v11873_v3 = vpop.f32.mrf.mxu0 }
 0x847   :  { %v11234_v53 = vadd.f32 %v11233_v35, %v11220_v22 }
 0x848   :  { %v11193_v34 = vpop.f32.mrf.mxu3 }
 0x849   :  { %v11194_v11 = vadd.f32 %v11193_v34, %v11180_v44 }
 0x84b   :  { %v11208_v6 = vadd.f32 %v11207_v28, %v11194_v11 }
 0x84d   :  { %v11222_v13 = vadd.f32 %v11221_v55, %v11208_v6  ;;  %v11875_v32 = vpop.f32.mrf.mxu0 }
 0x84f   :  { %v11236_v40 = vadd.f32 %v11235_v29, %v11222_v13 }
 0x860   :  { %v11247_v52 = vpop.f32.mrf.mxu3 }
 0x861   :  { %v11248_v0 = vadd.f32 %v11247_v52, %v11234_v53 }
 0x863   :  { %v11259_v37 = vmul.f32 0.01, %v11248_v0 }
 0x865   :  { %v11275_v48 = vmax.f32 %v11248_v0, %v11259_v37 }
 0x868   :  { %v11249_v49 = vpop.f32.mrf.mxu3 }
 0x869   :  { %v11250_v47 = vadd.f32 %v11249_v49, %v11236_v40 }
 0x86b   :  { %v11267_v16 = vmul.f32 0.01, %v11250_v47 }
 0x86d   :  { %v11283_v27 = vmax.f32 %v11250_v47, %v11267_v16 }
 0x86f   :  { %v11291_v54 = vpack.c.bf16 %v11283_v27, %v11275_v48 }
 0x870   :  { %v11887_v26 = vpop.f32.mrf.mxu1 }
 0x871   :  { %11914 = vmatmul.bf16.vlgmr.msrb.gmra.mxu3 %v11291_v54 }
 0x878   :  { %v11889_v62 = vpop.f32.mrf.mxu1 }
 0x880   :  { %v11859_v8 = vpop.f32.mrf.mxu3 }
 0x881   :  { %v11860_v9 = vadd.f32 %v11859_v8, %v11846_v12 }
 0x883   :  { %v11874_v14 = vadd.f32 %v11873_v3, %v11860_v9 }
 0x885   :  { %v11888_v15 = vadd.f32 %v11887_v26, %v11874_v14 }
 0x888   :  { %v11861_v43 = vpop.f32.mrf.mxu3 }
 0x889   :  { %v11862_v38 = vadd.f32 %v11861_v43, %v11848_v10 }
 0x88b   :  { %v11876_v56 = vadd.f32 %v11875_v32, %v11862_v38 }
 0x88d   :  { %v11890_v36 = vadd.f32 %v11889_v62, %v11876_v56 }
 0x8b6   :  { %v11901_v58 = vpop.f32.mrf.mxu2 }
 0x8b7   :  { %v11902_v51 = vadd.f32 %v11901_v58, %v11888_v15 }
 0x8be   :  { %v11903_v50 = vpop.f32.mrf.mxu2 }
 0x8bf   :  { %v11904_v23 = vadd.f32 %v11903_v50, %v11890_v36 }
 0x8f4   :  { %v11915_v21 = vpop.f32.mrf.mxu3 }
 0x8f5   :  { %v11916_v30 = vadd.f32 %v11915_v21, %v11902_v51 }
 0x8f7   :  { %11920 = vst [vmem:[#allocation23] sm:$0xff] %v11916_v30 }
 0x8fc   :  { %v11917_v45 = vpop.f32.mrf.mxu3 }
 0x8fd   :  { %v11918_v1 = vadd.f32 %v11917_v45, %v11904_v23 }
 0x8ff   :  { %11921 = vst [vmem:[#allocation23 + $0x8] sm:$0xff] %v11918_v1 }
 0x900   :  { %11960 = dma.vmem_to_hbm [thread:$0]  %s11953_s12, 256, %s11955_s2, [#allocation22], %s19636_s19, %s19636_s19, %s19637_s20  }
 0x901   :  { %19610 = dma.done.wait [#allocation4], 1024  }
 0x902   :  { %19611 = vsyncadd [#allocation4], 4294966272 }
 0x903   :  { %19612 = dma.done.wait [#allocation22], 1280  }
 0x904   :  { %19613 = vsyncadd [#allocation22], 4294966016 }
 0x905   :  { %11973 = vsyncpa [#allocation3], 1 }
 0x906   :  { %11974 = vsyncpa [#allocation6], 1 }
 0x907   :  { %11975 = vsyncpa [#allocation9], 1 }
 0x908   :  { %11976 = vsyncpa [#allocation12], 1 }
 0x909   :  { %11977 = vsyncpa [#allocation15], 1 }
 0x90a   :  { %11978 = vsyncpa [#allocation18], 1 }
 0x90b   :  { %11979 = vsyncpa [#allocation4], 1 }
 0x90c   :  { %11980 = vsyncpa [#allocation22], 1 }

</bundles_post_ra>
